<compile_context>
chip_gen: v7x
topology: tpu7x:2x2x1
jax: 0.10.0
libtpu: 0.0.40
codegen_flags: <defaults>
</compile_context>

<pallas_src>
import numpy as np
import jax
import jax.numpy as jnp
from jax import lax
from jax.experimental import pallas as pl
from jax.experimental.pallas import tpu as pltpu

MIN_STAR = 0.01
BN_EPS = 1e-5
LEAKY_SLOPE = 0.01
H_STAR = 32                               # hidden width of the star MLPs


def _round_up(x, m):
    return ((x + m - 1) // m) * m


def _vmem_limit_bytes():
    """Per-chip scoped-VMEM limit: ~60% of physical capacity (review item)."""
    try:
        cap = int(pltpu.get_tpu_info().vmem_capacity_bytes)
    except Exception:
        cap = 128 * 1024 * 1024           # v5e/v6e physical VMEM fallback
    return max(int(cap * 0.6), 32 * 1024 * 1024)


VMEM_LIMIT = _vmem_limit_bytes()


def _resident_spec():
    """Whole array resident in VMEM: single copy, no pipelining / double buffers."""
    return pl.BlockSpec(memory_space=pltpu.MemorySpace.VMEM)


# ----------------------------- Pallas kernels ------------------------------

def _mlp5_bn(x, w_ref, v_ref):
    """4x (Linear -> BatchNorm1d(train) -> LeakyReLU) + final Linear, packed params.

    x: (N, H) zero-padded input features.  w_ref: (5, H, H).  v_ref: (16, H)
    rows 0..4 = biases, 5..8 = BN gammas, 9..12 = BN betas.
    BatchNorm uses batch statistics over ALL N rows, so the full (unpadded) row
    batch must live in a single block -- the row dim must NOT be tiled over a
    grid (would silently turn into per-tile stats).
    """
    V = v_ref[...]
    h = x
    for l in range(4):
        h = jnp.dot(h, w_ref[l], preferred_element_type=jnp.float32) + V[l:l + 1, :]
        mean = jnp.mean(h, axis=0, keepdims=True)
        var = jnp.mean((h - mean) * (h - mean), axis=0, keepdims=True)
        h = (h - mean) * lax.rsqrt(var + BN_EPS) * V[5 + l:6 + l, :] + V[9 + l:10 + l, :]
        h = jnp.where(h >= 0.0, h, LEAKY_SLOPE * h)
    return jnp.dot(h, w_ref[4], preferred_element_type=jnp.float32) + V[4:5, :]


def make_star0_kernel(sum_rows, rows_per_mesh):
    """Triangle MLP (once, at grid step 0) fused with the per-mesh gather_star0."""
    def kernel(toff_ref, x_ref, w_ref, v_ref, atl_ref, out_ref, s0_ref):
        b = pl.program_id(0)

        @pl.when(b == 0)
        def _():
            # shared across grid steps via VMEM scratch; zero the padded tail so
            # per-mesh windows never read stale VMEM garbage.
            s0_ref[...] = jnp.zeros_like(s0_ref)
            s0t = _mlp5_bn(x_ref[...], w_ref, v_ref)             # (sumT, H)
            s0_ref[0:sum_rows, :] = s0t[:, 0:1]

        # mesh b's window of the shared MLP output; rows past this mesh's own
        # triangles are multiplied by all-zero slab rows -> contribute nothing.
        sl = s0_ref[pl.ds(toff_ref[b], rows_per_mesh), :]        # (Tmax, 1)
        slab = atl_ref[0]                                        # (Tmax, Vp) local A^T
        # broadcast-multiply + sublane reduce (<= a few vregs of VALU/XLU work at
        # these row counts); the pure-MXU formulation (1,Tmax)@(Tmax,Vp) would
        # need a minor-dim-1 transpose of `sl`, which costs more than it saves.
        g = jnp.sum(sl * slab, axis=0, keepdims=True)            # (1, Vp) lane-dense
        out_ref[0] = g * g + MIN_STAR
    return kernel


def make_star1_laplacian_kernel(sum_rows, rows_per_mesh):
    """Edge MLP (once) fused with star1^2+min_star and L_b = d01^T diag(star1) d01."""
    def kernel(eoff_ref, x_ref, w_ref, v_ref, dl_ref, out_ref, s1_ref):
        b = pl.program_id(0)

        @pl.when(b == 0)
        def _():
            s1_ref[...] = jnp.zeros_like(s1_ref)
            s1 = _mlp5_bn(x_ref[...], w_ref, v_ref)[:, 0:1]      # (sumE, 1)
            s1_ref[0:sum_rows, :] = s1 * s1 + MIN_STAR

        sl = s1_ref[pl.ds(eoff_ref[b], rows_per_mesh), :]        # (Emax, 1)
        d = dl_ref[0]                                            # (Emax, Vp) local d01
        sd = sl * d                                              # diag(star1) @ d01
        # d01^T formed in-register (one small XLU transpose per mesh) instead of
        # DMA-ing a host-precomputed transposed copy from HBM.
        out_ref[0] = jnp.dot(d.T, sd, preferred_element_type=jnp.float32)  # (Vp, Vp)
        # TODO(synk): for meshes whose (E, Vp) slab exceeds VMEM, add an inner
        # "arbitrary" E-tile grid axis accumulating into a (Vp, Vp) scratch
        # (E tiles in multiples of 256 on v6e/v7x, 128 on v5e) and switch BN to
        # a two-pass formulation.
    return kernel


def make_feature_kernel(K):
    """Eigenvalue MLP (once, into scratch) fused with the per-vertex feature stage:
    out[v, f] = sum_k U[v, k]^2 * P[k, f]  (num_vector_dimensions == 1)."""
    def kernel(ev_ref, wev_ref, vev_ref, u_ref, out_ref, p_ref):
        b = pl.program_id(0)

        @pl.when(b == 0)
        def _():
            p_ref[...] = _mlp5_bn(ev_ref[...], wev_ref, vev_ref)  # (nb*K, F)

        start = pl.multiple_of(b * K, K)
        P = p_ref[pl.ds(start, K), :]                             # (K, F)
        u = u_ref[0]                                              # (Vp, K)
        out_ref[0] = jnp.dot(u * u, P, preferred_element_type=jnp.float32)
    return kernel


# ------------------------------- parameters --------------------------------

def init_mlp_packed(key, in_dim, hidden, out_dim):
    """Pack (Linear->BN->LeakyReLU)x4 + Linear into W:(5,H,H), V:(16,H).

    Zero padding makes layer-0 input rows >= in_dim and layer-4 output cols >=
    out_dim inert; init matches nn.Linear's uniform(-1/sqrt(fan_in)).
    """
    H = hidden
    dims = [in_dim, H, H, H, H, out_dim]
    Wp = np.zeros((5, H, H), np.float32)
    Vp_ = np.zeros((16, H), np.float32)
    keys = jax.random.split(key, 5)
    for l, (k, din, dout) in enumerate(zip(keys, dims[:-1], dims[1:])):
        kw, kb = jax.random.split(k)
        bound = 1.0 / float(np.sqrt(din))
        Wl = jax.random.uniform(kw, (din, dout), jnp.float32, -bound, bound)
        bl = jax.random.uniform(kb, (dout,), jnp.float32, -bound, bound)
        Wp[l, :din, :dout] = np.asarray(Wl)
        Vp_[l, :dout] = np.asarray(bl)
    Vp_[5:9, :] = 1.0                     # BN gammas (betas rows 9..12 stay zero)
    return jnp.asarray(Wp), jnp.asarray(Vp_)


# ----------------------------- mesh construction ----------------------------

def make_grid_mesh(nx, ny, key, num_edge_features, num_triangle_features):
    nvx, nvy = nx + 1, ny + 1
    V = nvx * nvy
    tris = []
    for i in range(nx):
        for j in range(ny):
            v00 = i * nvy + j
            v01 = v00 + 1
            v10 = v00 + nvy
            v11 = v10 + 1
            tris.append((v00, v10, v11))
            tris.append((v00, v11, v01))
    edge_set = set()
    for (a, b, c) in tris:
        for p, q in ((a, b), (b, c), (c, a)):
            edge_set.add((min(p, q), max(p, q)))
    edges = sorted(edge_set)
    E, T = len(edges), len(tris)
    d01 = np.zeros((E, V), np.float32)            # signed edge->vertex incidence
    for e, (p, q) in enumerate(edges):
        d01[e, p] = -1.0
        d01[e, q] = 1.0
    A = np.zeros((V, T), np.float32)              # the 3 index_add_ as a matrix
    for t, (a, b, c) in enumerate(tris):
        A[a, t] += 1.0
        A[b, t] += 1.0
        A[c, t] += 1.0
    k1, k2, k3 = jax.random.split(key, 3)
    return dict(
        vertices=jax.random.normal(k1, (V, 3), jnp.float32),
        triangles=np.array(tris, np.int32),
        d01=d01, A=A,
        int_edge_features=jax.random.normal(k2, (E, num_edge_features), jnp.float32),
        triangle_features=jax.random.normal(k3, (T, num_triangle_features), jnp.float32),
    )


def prepare_batch(batch, num_eigenvectors, feat_pad=H_STAR):
    """Stack / pad the batch into lane-friendly arrays consumed by the kernels."""
    nb = len(batch)
    V_list = [int(m['d01'].shape[1]) for m in batch]
    E_list = [int(m['d01'].shape[0]) for m in batch]
    T_list = [int(m['A'].shape[1]) for m in batch]
    # correctness guard (review): padded eigenpairs (eigenvalue == Gershgorin
    # shift) would leak into the top-K slice if any mesh had V_b < K.
    for V in V_list:
        assert V >= num_eigenvectors, "mesh has fewer vertices than num_eigenvectors"

    Vp = _round_up(max(V_list), 128)      # lane-dense stores on every stage
    Tmax_pad = _round_up(max(T_list), 8)
    Emax_pad = _round_up(max(E_list), 8)
    sumT, sumE = sum(T_list), sum(E_list)

    # concatenated feature rows (exact rows -> BN statistics stay exact),
    # zero-padded on the feature axis to the MLP width.
    tri_feats = jnp.concatenate([m['triangle_features'] for m in batch], axis=0)
    edge_feats = jnp.concatenate([m['int_edge_features'] for m in batch], axis=0)
    tri_feats = jnp.pad(tri_feats, ((0, 0), (0, feat_pad - tri_feats.shape[1])))
    edge_feats = jnp.pad(edge_feats, ((0, 0), (0, feat_pad - edge_feats.shape[1])))

    # mesh-LOCAL operators: one slab per mesh, stacked on a leading mesh axis and
    # streamed one mesh per grid step (no nb-fold zero redundancy).  Rows past a
    # mesh's own triangles/edges and columns past its own vertices are EXACTLY
    # zero -- the eigensystem padding trick and the shared-MLP-scratch window
    # slicing both rely on it.
    ATl = np.zeros((nb, Tmax_pad, Vp), np.float32)
    D01l = np.zeros((nb, Emax_pad, Vp), np.float32)
    t_off = np.zeros((nb,), np.int32)
    e_off = np.zeros((nb,), np.int32)
    to = eo = 0
    for b, m in enumerate(batch):
        T, E, V = T_list[b], E_list[b], V_list[b]
        ATl[b, :T, :V] = m['A'].T
        D01l[b, :E, :V] = m['d01']
        t_off[b], e_off[b] = to, eo
        to += T
        eo += E

    pad_mask = np.zeros((nb, Vp), np.float32)
    for b, V in enumerate(V_list):
        pad_mask[b, V:] = 1.0

    return dict(tri_feats=tri_feats, edge_feats=edge_feats,
                ATl=jnp.asarray(ATl), D01l=jnp.asarray(D01l),
                t_off=jnp.asarray(t_off), e_off=jnp.asarray(e_off),
                pad_mask=jnp.asarray(pad_mask),
                V_list=V_list, T_list=T_list, E_list=E_list,
                Vp=Vp, Tmax_pad=Tmax_pad, Emax_pad=Emax_pad,
                sumT=sumT, sumE=sumE, nb=nb)


# -------------------------------- forward ----------------------------------

def build_forward(prep, num_eigenvectors, num_output_features):
    nb, Vp = prep['nb'], prep['Vp']
    V_list = prep['V_list']
    sumT, sumE = prep['sumT'], prep['sumE']
    Tmax_pad, Emax_pad = prep['Tmax_pad'], prep['Emax_pad']
    K, F = num_eigenvectors, num_output_features
    # scratch row counts: window [off_b, off_b + max_pad) must stay in bounds.
    s0_rows = _round_up(sumT + Tmax_pad, 8)
    s1_rows = _round_up(sumE + Emax_pad, 8)

    # stage 1: triangle MLP + fused per-mesh gather -> star0 (nb, 1, Vp)
    star0_call = pl.pallas_call(
        make_star0_kernel(sumT, Tmax_pad),
        out_shape=jax.ShapeDtypeStruct((nb, 1, Vp), jnp.float32),
        grid_spec=pltpu.PrefetchScalarGridSpec(
            num_scalar_prefetch=1,                       # t_off -> SMEM
            grid=(nb,),
            in_specs=[_resident_spec(),                  # tri_feats (sumT, H)
                      _resident_spec(),                  # W0 (5, H, H)
                      _resident_spec(),                  # V0 (16, H)
                      pl.BlockSpec((1, Tmax_pad, Vp), lambda b, toff: (b, 0, 0))],
            out_specs=pl.BlockSpec((1, 1, Vp), lambda b, toff: (b, 0, 0)),
            scratch_shapes=[pltpu.VMEM((s0_rows, 1), jnp.float32)]),
        compiler_params=pltpu.CompilerParams(
            dimension_semantics=("arbitrary",),          # shares step-0 MLP scratch
            vmem_limit_bytes=VMEM_LIMIT))

    # stage 2: edge MLP + fused per-mesh Laplacian build -> L (nb, Vp, Vp)
    lap_call = pl.pallas_call(
        make_star1_laplacian_kernel(sumE, Emax_pad),
        out_shape=jax.ShapeDtypeStruct((nb, Vp, Vp), jnp.float32),
        grid_spec=pltpu.PrefetchScalarGridSpec(
            num_scalar_prefetch=1,                       # e_off -> SMEM
            grid=(nb,),
            in_specs=[_resident_spec(),                  # edge_feats (sumE, H)
                      _resident_spec(),                  # W1
                      _resident_spec(),                  # V1
                      pl.BlockSpec((1, Emax_pad, Vp), lambda b, eoff: (b, 0, 0))],
            out_specs=pl.BlockSpec((1, Vp, Vp), lambda b, eoff: (b, 0, 0)),
            scratch_shapes=[pltpu.VMEM((s1_rows, 1), jnp.float32)]),
        compiler_params=pltpu.CompilerParams(
            dimension_semantics=("arbitrary",),
            vmem_limit_bytes=VMEM_LIMIT))

    # stages 4+5 fused: eigenvalue MLP (step 0, into scratch) + per-vertex features
    feat_call = pl.pallas_call(
        make_feature_kernel(K),
        out_shape=jax.ShapeDtypeStruct((nb, Vp, F), jnp.float32),
        grid=(nb,),
        in_specs=[_resident_spec(),                      # ev_in (nb*K, F)
                  _resident_spec(),                      # Wev
                  _resident_spec(),                      # Vev
                  pl.BlockSpec((1, Vp, K), lambda b: (b, 0, 0))],
        out_specs=pl.BlockSpec((1, Vp, F), lambda b: (b, 0, 0)),
        scratch_shapes=[pltpu.VMEM((nb * K, F), jnp.float32)],
        compiler_params=pltpu.CompilerParams(
            dimension_semantics=("arbitrary",),
            vmem_limit_bytes=VMEM_LIMIT))

    def forward(t_off, e_off, tri_feats, edge_feats, ATl, D01l, pad_mask, params):
        W0, V0 = params['to_star0_tri']
        star0 = star0_call(t_off, tri_feats, W0, V0, ATl)[:, 0, :]   # (nb, Vp)

        W1, V1 = params['to_star1']
        L = lap_call(e_off, edge_feats, W1, V1, D01l)                # (nb, Vp, Vp)

        # stage 3: batched generalized eigensystem (plain JAX).
        # TODO(synk): the original HodgeEigensystem wraps scipy.sparse.linalg.eigsh
        # (sparse Lanczos + custom backward); here the small dense generalized
        # problem L x = lam * diag(star0) x is solved via symmetric whitening +
        # ONE batched jnp.linalg.eigh over the padded batch.  For non-toy Vp this
        # O(Vp^3) eigh dominates: switch to subspace iteration / LOBPCG
        # ((Vp,Vp)@(Vp,K+q) MXU matvecs), keeping the Gershgorin-shift padding.
        inv_sqrt = lax.rsqrt(star0)                                  # (nb, Vp)
        Lt = L * inv_sqrt[:, :, None] * inv_sqrt[:, None, :]
        Lt = 0.5 * (Lt + jnp.swapaxes(Lt, 1, 2))
        bound = jnp.max(jnp.sum(jnp.abs(Lt), axis=-1), axis=-1)      # Gershgorin
        shift = 2.0 * bound + 1.0
        Lt = Lt + (pad_mask * shift[:, None])[:, :, None] * \
            jnp.eye(Vp, dtype=jnp.float32)[None]
        evals, evecs = jnp.linalg.eigh(Lt)                           # ascending
        evals_k = evals[:, :K]                                       # (nb, K)
        U = evecs[:, :, :K] * inv_sqrt[:, :, None]                   # (nb, Vp, K)

        # stages 4+5 fused
        Wev, Vev = params['eigenvalue_to_matrix']
        ev_in = jnp.pad(evals_k.reshape(nb * K, 1), ((0, 0), (0, F - 1)))
        out = feat_call(ev_in, Wev, Vev, U)                          # (nb, Vp, F)

        # drop padded vertices and concatenate per-mesh results
        return jnp.concatenate([out[b, :V_list[b]] for b in range(nb)], axis=0)

    return jax.jit(forward)


# ---------------------------------- main ------------------------------------

if __name__ == "__main__":
    num_edge_features = 6
    num_triangle_features = 8
    num_output_features = 32
    num_eigenvectors = 8
    num_extra_eigenvectors = 4  # only affects sparse-solver accuracy in the original

    key = jax.random.PRNGKey(0)
    k_mesh1, k_mesh2, k_p1, k_p2, k_p3 = jax.random.split(key, 5)

    batch = [
        make_grid_mesh(3, 3, k_mesh1, num_edge_features, num_triangle_features),  # V=16
        make_grid_mesh(4, 3, k_mesh2, num_edge_features, num_triangle_features),  # V=20
    ]

    params = {
        'to_star0_tri': init_mlp_packed(k_p1, num_triangle_features, H_STAR, 1),
        'to_star1': init_mlp_packed(k_p2, num_edge_features, H_STAR, 1),
        'eigenvalue_to_matrix': init_mlp_packed(k_p3, 1, num_output_features,
                                                num_output_features),
    }

    prep = prepare_batch(batch, num_eigenvectors, feat_pad=H_STAR)
    fwd = build_forward(prep, num_eigenvectors, num_output_features)
    out = fwd(prep['t_off'], prep['e_off'], prep['tri_feats'], prep['edge_feats'],
              prep['ATl'], prep['D01l'], prep['pad_mask'], params)
    out = jax.block_until_ready(out)

    total_vertices = sum(prep['V_list'])
    assert out.shape == (total_vertices, num_output_features), out.shape
    assert bool(jnp.all(jnp.isfinite(out)))
    print("KERNEL_OK")
</pallas_src>

<mosaic_0001>
module attributes {stable_mosaic.version = 11 : i64} {
  func.func @kernel(%arg0: i32, %arg1: memref<2xi32, #tpu.memory_space<smem>>, %arg2: memref<42x32xf32, #tpu.memory_space<vmem>>, %arg3: memref<5x32x32xf32, #tpu.memory_space<vmem>>, %arg4: memref<16x32xf32, #tpu.memory_space<vmem>>, %arg5: memref<1x24x128xf32, #tpu.memory_space<vmem>>, %arg6: memref<1x1x128xf32, #tpu.memory_space<vmem>>, %arg7: memref<72x1xf32, #tpu.memory_space<vmem>>) attributes {dimension_semantics = [#tpu.dimension_semantics<arbitrary>], iteration_bounds = array<i64: 2>, scalar_prefetch = 1 : i64, scratch_operands = 1 : i64, tpu.core_type = #tpu.core_type<tc>, window_params = [{pipeline_mode = #tpu.pipeline_mode<synchronous>, transform_indices = @transform_0, window_bounds = array<i64: 42, 32>}, {pipeline_mode = #tpu.pipeline_mode<synchronous>, transform_indices = @transform_1, window_bounds = array<i64: 5, 32, 32>}, {pipeline_mode = #tpu.pipeline_mode<synchronous>, transform_indices = @transform_2, window_bounds = array<i64: 16, 32>}, {transform_indices = @transform_3, window_bounds = array<i64: 1, 24, 128>}, {transform_indices = @transform_4, window_bounds = array<i64: 1, 1, 128>}]} {
    %c0_i32 = arith.constant 0 : i32
    %0 = arith.cmpi eq, %arg0, %c0_i32 : i32
    %1 = arith.extui %0 : i1 to i32
    %c0_i32_0 = arith.constant 0 : i32
    %2 = arith.cmpi ne, %1, %c0_i32_0 : i32
    scf.if %2 {
      %cst_8 = arith.constant 0.000000e+00 : f32
      %19 = vector.broadcast %cst_8 : f32 to vector<72x1xf32>
      %c0_9 = arith.constant 0 : index
      %c0_10 = arith.constant 0 : index
      %20 = vector.load %arg7[%c0_9, %c0_10] : memref<72x1xf32, #tpu.memory_space<vmem>>, vector<72x1xf32>
      tpu.vector_store %arg7[%c0_9, %c0_10], %19 {strides = array<i32>} : memref<72x1xf32, #tpu.memory_space<vmem>>, vector<72x1xf32>,
      %c0_11 = arith.constant 0 : index
      %c0_12 = arith.constant 0 : index
      %21 = vector.load %arg2[%c0_11, %c0_12] : memref<42x32xf32, #tpu.memory_space<vmem>>, vector<42x32xf32>
      %c0_13 = arith.constant 0 : index
      %c0_14 = arith.constant 0 : index
      %22 = vector.load %arg4[%c0_13, %c0_14] : memref<16x32xf32, #tpu.memory_space<vmem>>, vector<16x32xf32>
      %c0_15 = arith.constant 0 : index
      %c0_16 = arith.constant 0 : index
      %c0_17 = arith.constant 0 : index
      %23 = vector.load %arg3[%c0_15, %c0_16, %c0_17] : memref<5x32x32xf32, #tpu.memory_space<vmem>>, vector<1x32x32xf32>
      %24 = vector.shape_cast %23 : vector<1x32x32xf32> to vector<32x32xf32>
      %cst_18 = arith.constant dense<0.000000e+00> : vector<42x32xf32>
      %25 = tpu.matmul %21, %24, %cst_18 {dimension_numbers = #tpu.dot_dimension_numbers<[1], [0], [0], [1], [0, 0, 1, 1], [], []>} : vector<42x32xf32>, vector<32x32xf32>, vector<42x32xf32> -> vector<42x32xf32>
      %26 = vector.extract_strided_slice %22 {offsets = [0, 0], sizes = [1, 32], strides = [1, 1]} : vector<16x32xf32> to vector<1x32xf32>
      %27 = vector.broadcast %26 : vector<1x32xf32> to vector<42x32xf32>
      %28 = arith.addf %25, %27 : vector<42x32xf32>
      %cst_19 = arith.constant dense<0.000000e+00> : vector<32xf32>
      %29 = vector.multi_reduction <add>, %28, %cst_19 [0] : vector<42x32xf32> to vector<32xf32>
      %30 = vector.shape_cast %29 : vector<32xf32> to vector<1x32xf32>
      %cst_20 = arith.constant 4.200000e+01 : f32
      %31 = vector.broadcast %cst_20 : f32 to vector<1x32xf32>
      %32 = arith.divf %30, %31 : vector<1x32xf32>
      %33 = vector.broadcast %32 : vector<1x32xf32> to vector<42x32xf32>
      %34 = arith.subf %28, %33 : vector<42x32xf32>
      %35 = vector.broadcast %32 : vector<1x32xf32> to vector<42x32xf32>
      %36 = arith.subf %28, %35 : vector<42x32xf32>
      %37 = arith.mulf %34, %36 : vector<42x32xf32>
      %cst_21 = arith.constant dense<0.000000e+00> : vector<32xf32>
      %38 = vector.multi_reduction <add>, %37, %cst_21 [0] : vector<42x32xf32> to vector<32xf32>
      %39 = vector.shape_cast %38 : vector<32xf32> to vector<1x32xf32>
      %cst_22 = arith.constant 4.200000e+01 : f32
      %40 = vector.broadcast %cst_22 : f32 to vector<1x32xf32>
      %41 = arith.divf %39, %40 : vector<1x32xf32>
      %42 = vector.broadcast %32 : vector<1x32xf32> to vector<42x32xf32>
      %43 = arith.subf %28, %42 : vector<42x32xf32>
      %cst_23 = arith.constant 9.99999974E-6 : f32
      %44 = vector.broadcast %cst_23 : f32 to vector<1x32xf32>
      %45 = arith.addf %41, %44 : vector<1x32xf32>
      %46 = math.rsqrt %45 : vector<1x32xf32>
      %47 = vector.broadcast %46 : vector<1x32xf32> to vector<42x32xf32>
      %48 = arith.mulf %43, %47 : vector<42x32xf32>
      %49 = vector.extract_strided_slice %22 {offsets = [5, 0], sizes = [1, 32], strides = [1, 1]} : vector<16x32xf32> to vector<1x32xf32>
      %50 = vector.broadcast %49 : vector<1x32xf32> to vector<42x32xf32>
      %51 = arith.mulf %48, %50 : vector<42x32xf32>
      %52 = vector.extract_strided_slice %22 {offsets = [9, 0], sizes = [1, 32], strides = [1, 1]} : vector<16x32xf32> to vector<1x32xf32>
      %53 = vector.broadcast %52 : vector<1x32xf32> to vector<42x32xf32>
      %54 = arith.addf %51, %53 : vector<42x32xf32>
      %cst_24 = arith.constant 0.000000e+00 : f32
      %55 = vector.broadcast %cst_24 : f32 to vector<42x32xf32>
      %56 = arith.cmpf oge, %54, %55 : vector<42x32xf32>
      %cst_25 = arith.constant 0.00999999977 : f32
      %57 = vector.broadcast %cst_25 : f32 to vector<42x32xf32>
      %58 = arith.mulf %57, %54 : vector<42x32xf32>
      %59 = arith.select %56, %54, %58 : vector<42x32xi1>, vector<42x32xf32>
      %c1 = arith.constant 1 : index
      %c0_26 = arith.constant 0 : index
      %c0_27 = arith.constant 0 : index
      %60 = vector.load %arg3[%c1, %c0_26, %c0_27] : memref<5x32x32xf32, #tpu.memory_space<vmem>>, vector<1x32x32xf32>
      %61 = vector.shape_cast %60 : vector<1x32x32xf32> to vector<32x32xf32>
      %cst_28 = arith.constant dense<0.000000e+00> : vector<42x32xf32>
      %62 = tpu.matmul %59, %61, %cst_28 {dimension_numbers = #tpu.dot_dimension_numbers<[1], [0], [0], [1], [0, 0, 1, 1], [], []>} : vector<42x32xf32>, vector<32x32xf32>, vector<42x32xf32> -> vector<42x32xf32>
      %63 = vector.extract_strided_slice %22 {offsets = [1, 0], sizes = [1, 32], strides = [1, 1]} : vector<16x32xf32> to vector<1x32xf32>
      %64 = vector.broadcast %63 : vector<1x32xf32> to vector<42x32xf32>
      %65 = arith.addf %62, %64 : vector<42x32xf32>
      %cst_29 = arith.constant dense<0.000000e+00> : vector<32xf32>
      %66 = vector.multi_reduction <add>, %65, %cst_29 [0] : vector<42x32xf32> to vector<32xf32>
      %67 = vector.shape_cast %66 : vector<32xf32> to vector<1x32xf32>
      %cst_30 = arith.constant 4.200000e+01 : f32
      %68 = vector.broadcast %cst_30 : f32 to vector<1x32xf32>
      %69 = arith.divf %67, %68 : vector<1x32xf32>
      %70 = vector.broadcast %69 : vector<1x32xf32> to vector<42x32xf32>
      %71 = arith.subf %65, %70 : vector<42x32xf32>
      %72 = vector.broadcast %69 : vector<1x32xf32> to vector<42x32xf32>
      %73 = arith.subf %65, %72 : vector<42x32xf32>
      %74 = arith.mulf %71, %73 : vector<42x32xf32>
      %cst_31 = arith.constant dense<0.000000e+00> : vector<32xf32>
      %75 = vector.multi_reduction <add>, %74, %cst_31 [0] : vector<42x32xf32> to vector<32xf32>
      %76 = vector.shape_cast %75 : vector<32xf32> to vector<1x32xf32>
      %cst_32 = arith.constant 4.200000e+01 : f32
      %77 = vector.broadcast %cst_32 : f32 to vector<1x32xf32>
      %78 = arith.divf %76, %77 : vector<1x32xf32>
      %79 = vector.broadcast %69 : vector<1x32xf32> to vector<42x32xf32>
      %80 = arith.subf %65, %79 : vector<42x32xf32>
      %cst_33 = arith.constant 9.99999974E-6 : f32
      %81 = vector.broadcast %cst_33 : f32 to vector<1x32xf32>
      %82 = arith.addf %78, %81 : vector<1x32xf32>
      %83 = math.rsqrt %82 : vector<1x32xf32>
      %84 = vector.broadcast %83 : vector<1x32xf32> to vector<42x32xf32>
      %85 = arith.mulf %80, %84 : vector<42x32xf32>
      %86 = vector.extract_strided_slice %22 {offsets = [6, 0], sizes = [1, 32], strides = [1, 1]} : vector<16x32xf32> to vector<1x32xf32>
      %87 = vector.broadcast %86 : vector<1x32xf32> to vector<42x32xf32>
      %88 = arith.mulf %85, %87 : vector<42x32xf32>
      %89 = vector.extract_strided_slice %22 {offsets = [10, 0], sizes = [1, 32], strides = [1, 1]} : vector<16x32xf32> to vector<1x32xf32>
      %90 = vector.broadcast %89 : vector<1x32xf32> to vector<42x32xf32>
      %91 = arith.addf %88, %90 : vector<42x32xf32>
      %cst_34 = arith.constant 0.000000e+00 : f32
      %92 = vector.broadcast %cst_34 : f32 to vector<42x32xf32>
      %93 = arith.cmpf oge, %91, %92 : vector<42x32xf32>
      %cst_35 = arith.constant 0.00999999977 : f32
      %94 = vector.broadcast %cst_35 : f32 to vector<42x32xf32>
      %95 = arith.mulf %94, %91 : vector<42x32xf32>
      %96 = arith.select %93, %91, %95 : vector<42x32xi1>, vector<42x32xf32>
      %c2 = arith.constant 2 : index
      %c0_36 = arith.constant 0 : index
      %c0_37 = arith.constant 0 : index
      %97 = vector.load %arg3[%c2, %c0_36, %c0_37] : memref<5x32x32xf32, #tpu.memory_space<vmem>>, vector<1x32x32xf32>
      %98 = vector.shape_cast %97 : vector<1x32x32xf32> to vector<32x32xf32>
      %cst_38 = arith.constant dense<0.000000e+00> : vector<42x32xf32>
      %99 = tpu.matmul %96, %98, %cst_38 {dimension_numbers = #tpu.dot_dimension_numbers<[1], [0], [0], [1], [0, 0, 1, 1], [], []>} : vector<42x32xf32>, vector<32x32xf32>, vector<42x32xf32> -> vector<42x32xf32>
      %100 = vector.extract_strided_slice %22 {offsets = [2, 0], sizes = [1, 32], strides = [1, 1]} : vector<16x32xf32> to vector<1x32xf32>
      %101 = vector.broadcast %100 : vector<1x32xf32> to vector<42x32xf32>
      %102 = arith.addf %99, %101 : vector<42x32xf32>
      %cst_39 = arith.constant dense<0.000000e+00> : vector<32xf32>
      %103 = vector.multi_reduction <add>, %102, %cst_39 [0] : vector<42x32xf32> to vector<32xf32>
      %104 = vector.shape_cast %103 : vector<32xf32> to vector<1x32xf32>
      %cst_40 = arith.constant 4.200000e+01 : f32
      %105 = vector.broadcast %cst_40 : f32 to vector<1x32xf32>
      %106 = arith.divf %104, %105 : vector<1x32xf32>
      %107 = vector.broadcast %106 : vector<1x32xf32> to vector<42x32xf32>
      %108 = arith.subf %102, %107 : vector<42x32xf32>
      %109 = vector.broadcast %106 : vector<1x32xf32> to vector<42x32xf32>
      %110 = arith.subf %102, %109 : vector<42x32xf32>
      %111 = arith.mulf %108, %110 : vector<42x32xf32>
      %cst_41 = arith.constant dense<0.000000e+00> : vector<32xf32>
      %112 = vector.multi_reduction <add>, %111, %cst_41 [0] : vector<42x32xf32> to vector<32xf32>
      %113 = vector.shape_cast %112 : vector<32xf32> to vector<1x32xf32>
      %cst_42 = arith.constant 4.200000e+01 : f32
      %114 = vector.broadcast %cst_42 : f32 to vector<1x32xf32>
      %115 = arith.divf %113, %114 : vector<1x32xf32>
      %116 = vector.broadcast %106 : vector<1x32xf32> to vector<42x32xf32>
      %117 = arith.subf %102, %116 : vector<42x32xf32>
      %cst_43 = arith.constant 9.99999974E-6 : f32
      %118 = vector.broadcast %cst_43 : f32 to vector<1x32xf32>
      %119 = arith.addf %115, %118 : vector<1x32xf32>
      %120 = math.rsqrt %119 : vector<1x32xf32>
      %121 = vector.broadcast %120 : vector<1x32xf32> to vector<42x32xf32>
      %122 = arith.mulf %117, %121 : vector<42x32xf32>
      %123 = vector.extract_strided_slice %22 {offsets = [7, 0], sizes = [1, 32], strides = [1, 1]} : vector<16x32xf32> to vector<1x32xf32>
      %124 = vector.broadcast %123 : vector<1x32xf32> to vector<42x32xf32>
      %125 = arith.mulf %122, %124 : vector<42x32xf32>
      %126 = vector.extract_strided_slice %22 {offsets = [11, 0], sizes = [1, 32], strides = [1, 1]} : vector<16x32xf32> to vector<1x32xf32>
      %127 = vector.broadcast %126 : vector<1x32xf32> to vector<42x32xf32>
      %128 = arith.addf %125, %127 : vector<42x32xf32>
      %cst_44 = arith.constant 0.000000e+00 : f32
      %129 = vector.broadcast %cst_44 : f32 to vector<42x32xf32>
      %130 = arith.cmpf oge, %128, %129 : vector<42x32xf32>
      %cst_45 = arith.constant 0.00999999977 : f32
      %131 = vector.broadcast %cst_45 : f32 to vector<42x32xf32>
      %132 = arith.mulf %131, %128 : vector<42x32xf32>
      %133 = arith.select %130, %128, %132 : vector<42x32xi1>, vector<42x32xf32>
      %c3 = arith.constant 3 : index
      %c0_46 = arith.constant 0 : index
      %c0_47 = arith.constant 0 : index
      %134 = vector.load %arg3[%c3, %c0_46, %c0_47] : memref<5x32x32xf32, #tpu.memory_space<vmem>>, vector<1x32x32xf32>
      %135 = vector.shape_cast %134 : vector<1x32x32xf32> to vector<32x32xf32>
      %cst_48 = arith.constant dense<0.000000e+00> : vector<42x32xf32>
      %136 = tpu.matmul %133, %135, %cst_48 {dimension_numbers = #tpu.dot_dimension_numbers<[1], [0], [0], [1], [0, 0, 1, 1], [], []>} : vector<42x32xf32>, vector<32x32xf32>, vector<42x32xf32> -> vector<42x32xf32>
      %137 = vector.extract_strided_slice %22 {offsets = [3, 0], sizes = [1, 32], strides = [1, 1]} : vector<16x32xf32> to vector<1x32xf32>
      %138 = vector.broadcast %137 : vector<1x32xf32> to vector<42x32xf32>
      %139 = arith.addf %136, %138 : vector<42x32xf32>
      %cst_49 = arith.constant dense<0.000000e+00> : vector<32xf32>
      %140 = vector.multi_reduction <add>, %139, %cst_49 [0] : vector<42x32xf32> to vector<32xf32>
      %141 = vector.shape_cast %140 : vector<32xf32> to vector<1x32xf32>
      %cst_50 = arith.constant 4.200000e+01 : f32
      %142 = vector.broadcast %cst_50 : f32 to vector<1x32xf32>
      %143 = arith.divf %141, %142 : vector<1x32xf32>
      %144 = vector.broadcast %143 : vector<1x32xf32> to vector<42x32xf32>
      %145 = arith.subf %139, %144 : vector<42x32xf32>
      %146 = vector.broadcast %143 : vector<1x32xf32> to vector<42x32xf32>
      %147 = arith.subf %139, %146 : vector<42x32xf32>
      %148 = arith.mulf %145, %147 : vector<42x32xf32>
      %cst_51 = arith.constant dense<0.000000e+00> : vector<32xf32>
      %149 = vector.multi_reduction <add>, %148, %cst_51 [0] : vector<42x32xf32> to vector<32xf32>
      %150 = vector.shape_cast %149 : vector<32xf32> to vector<1x32xf32>
      %cst_52 = arith.constant 4.200000e+01 : f32
      %151 = vector.broadcast %cst_52 : f32 to vector<1x32xf32>
      %152 = arith.divf %150, %151 : vector<1x32xf32>
      %153 = vector.broadcast %143 : vector<1x32xf32> to vector<42x32xf32>
      %154 = arith.subf %139, %153 : vector<42x32xf32>
      %cst_53 = arith.constant 9.99999974E-6 : f32
      %155 = vector.broadcast %cst_53 : f32 to vector<1x32xf32>
      %156 = arith.addf %152, %155 : vector<1x32xf32>
      %157 = math.rsqrt %156 : vector<1x32xf32>
      %158 = vector.broadcast %157 : vector<1x32xf32> to vector<42x32xf32>
      %159 = arith.mulf %154, %158 : vector<42x32xf32>
      %160 = vector.extract_strided_slice %22 {offsets = [8, 0], sizes = [1, 32], strides = [1, 1]} : vector<16x32xf32> to vector<1x32xf32>
      %161 = vector.broadcast %160 : vector<1x32xf32> to vector<42x32xf32>
      %162 = arith.mulf %159, %161 : vector<42x32xf32>
      %163 = vector.extract_strided_slice %22 {offsets = [12, 0], sizes = [1, 32], strides = [1, 1]} : vector<16x32xf32> to vector<1x32xf32>
      %164 = vector.broadcast %163 : vector<1x32xf32> to vector<42x32xf32>
      %165 = arith.addf %162, %164 : vector<42x32xf32>
      %cst_54 = arith.constant 0.000000e+00 : f32
      %166 = vector.broadcast %cst_54 : f32 to vector<42x32xf32>
      %167 = arith.cmpf oge, %165, %166 : vector<42x32xf32>
      %cst_55 = arith.constant 0.00999999977 : f32
      %168 = vector.broadcast %cst_55 : f32 to vector<42x32xf32>
      %169 = arith.mulf %168, %165 : vector<42x32xf32>
      %170 = arith.select %167, %165, %169 : vector<42x32xi1>, vector<42x32xf32>
      %c4 = arith.constant 4 : index
      %c0_56 = arith.constant 0 : index
      %c0_57 = arith.constant 0 : index
      %171 = vector.load %arg3[%c4, %c0_56, %c0_57] : memref<5x32x32xf32, #tpu.memory_space<vmem>>, vector<1x32x32xf32>
      %172 = vector.shape_cast %171 : vector<1x32x32xf32> to vector<32x32xf32>
      %cst_58 = arith.constant dense<0.000000e+00> : vector<42x32xf32>
      %173 = tpu.matmul %170, %172, %cst_58 {dimension_numbers = #tpu.dot_dimension_numbers<[1], [0], [0], [1], [0, 0, 1, 1], [], []>} : vector<42x32xf32>, vector<32x32xf32>, vector<42x32xf32> -> vector<42x32xf32>
      %174 = vector.extract_strided_slice %22 {offsets = [4, 0], sizes = [1, 32], strides = [1, 1]} : vector<16x32xf32> to vector<1x32xf32>
      %175 = vector.broadcast %174 : vector<1x32xf32> to vector<42x32xf32>
      %176 = arith.addf %173, %175 : vector<42x32xf32>
      %177 = vector.extract_strided_slice %176 {offsets = [0, 0], sizes = [42, 1], strides = [1, 1]} : vector<42x32xf32> to vector<42x1xf32>
      %c0_59 = arith.constant 0 : index
      %c0_60 = arith.constant 0 : index
      %178 = vector.load %arg7[%c0_59, %c0_60] : memref<72x1xf32, #tpu.memory_space<vmem>>, vector<42x1xf32>
      tpu.vector_store %arg7[%c0_59, %c0_60], %177 {strides = array<i32>} : memref<72x1xf32, #tpu.memory_space<vmem>>, vector<42x1xf32>,
    } else {
    }
    %3 = arith.index_cast %arg0 : i32 to index
    %4 = memref.load %arg1[%3] : memref<2xi32, #tpu.memory_space<smem>>
    %5 = arith.index_cast %4 : i32 to index
    %c0 = arith.constant 0 : index
    %6 = vector.load %arg7[%5, %c0] : memref<72x1xf32, #tpu.memory_space<vmem>>, vector<24x1xf32>
    %c0_1 = arith.constant 0 : index
    %c0_2 = arith.constant 0 : index
    %c0_3 = arith.constant 0 : index
    %7 = vector.load %arg5[%c0_1, %c0_2, %c0_3] : memref<1x24x128xf32, #tpu.memory_space<vmem>>, vector<1x24x128xf32>
    %8 = vector.shape_cast %7 : vector<1x24x128xf32> to vector<24x128xf32>
    %9 = vector.broadcast %6 : vector<24x1xf32> to vector<24x128xf32>
    %10 = arith.mulf %9, %8 : vector<24x128xf32>
    %cst = arith.constant dense<0.000000e+00> : vector<128xf32>
    %11 = vector.multi_reduction <add>, %10, %cst [0] : vector<24x128xf32> to vector<128xf32>
    %12 = vector.shape_cast %11 : vector<128xf32> to vector<1x128xf32>
    %13 = arith.mulf %12, %12 : vector<1x128xf32>
    %cst_4 = arith.constant 0.00999999977 : f32
    %14 = vector.broadcast %cst_4 : f32 to vector<1x128xf32>
    %15 = arith.addf %13, %14 : vector<1x128xf32>
    %c0_5 = arith.constant 0 : index
    %c0_6 = arith.constant 0 : index
    %c0_7 = arith.constant 0 : index
    %16 = vector.load %arg6[%c0_5, %c0_6, %c0_7] : memref<1x1x128xf32, #tpu.memory_space<vmem>>, vector<1x1x128xf32>
    %17 = vector.shape_cast %16 : vector<1x1x128xf32> to vector<1x128xf32>
    %18 = vector.shape_cast %15 : vector<1x128xf32> to vector<1x1x128xf32>
    tpu.vector_store %arg6[%c0_5, %c0_6, %c0_7], %18 {strides = array<i32>} : memref<1x1x128xf32, #tpu.memory_space<vmem>>, vector<1x1x128xf32>,
    return
  }
  func.func @transform_0(%arg0: i32, %arg1: memref<2xi32, #tpu.memory_space<smem>>) -> (i32, i32) {
    %c0_i32 = arith.constant 0 : i32
    %c0_i32_0 = arith.constant 0 : i32
    %c0_i32_1 = arith.constant 0 : i32
    return %c0_i32, %c0_i32_0 : i32, i32
  }
  func.func @transform_1(%arg0: i32, %arg1: memref<2xi32, #tpu.memory_space<smem>>) -> (i32, i32, i32) {
    %c0_i32 = arith.constant 0 : i32
    %c0_i32_0 = arith.constant 0 : i32
    %c0_i32_1 = arith.constant 0 : i32
    %c0_i32_2 = arith.constant 0 : i32
    return %c0_i32, %c0_i32_0, %c0_i32_1 : i32, i32, i32
  }
  func.func @transform_2(%arg0: i32, %arg1: memref<2xi32, #tpu.memory_space<smem>>) -> (i32, i32) {
    %c0_i32 = arith.constant 0 : i32
    %c0_i32_0 = arith.constant 0 : i32
    %c0_i32_1 = arith.constant 0 : i32
    return %c0_i32, %c0_i32_0 : i32, i32
  }
  func.func @transform_3(%arg0: i32, %arg1: memref<2xi32, #tpu.memory_space<smem>>) -> (i32, i32, i32) {
    %c0_i32 = arith.constant 0 : i32
    %c0_i32_0 = arith.constant 0 : i32
    %c0_i32_1 = arith.constant 0 : i32
    return %arg0, %c0_i32, %c0_i32_0 : i32, i32, i32
  }
  func.func @transform_4(%arg0: i32, %arg1: memref<2xi32, #tpu.memory_space<smem>>) -> (i32, i32, i32) {
    %c0_i32 = arith.constant 0 : i32
    %c0_i32_0 = arith.constant 0 : i32
    %c0_i32_1 = arith.constant 0 : i32
    return %arg0, %c0_i32, %c0_i32_0 : i32, i32, i32
  }
}

module attributes {stable_mosaic.version = 11 : i64} {
  func.func @kernel(%arg0: i32, %arg1: memref<2xi32, #tpu.memory_space<smem>>, %arg2: memref<76x32xf32, #tpu.memory_space<vmem>>, %arg3: memref<5x32x32xf32, #tpu.memory_space<vmem>>, %arg4: memref<16x32xf32, #tpu.memory_space<vmem>>, %arg5: memref<1x48x128xf32, #tpu.memory_space<vmem>>, %arg6: memref<1x128x128xf32, #tpu.memory_space<vmem>>, %arg7: memref<128x1xf32, #tpu.memory_space<vmem>>) attributes {dimension_semantics = [#tpu.dimension_semantics<arbitrary>], iteration_bounds = array<i64: 2>, scalar_prefetch = 1 : i64, scratch_operands = 1 : i64, tpu.core_type = #tpu.core_type<tc>, window_params = [{pipeline_mode = #tpu.pipeline_mode<synchronous>, transform_indices = @transform_0, window_bounds = array<i64: 76, 32>}, {pipeline_mode = #tpu.pipeline_mode<synchronous>, transform_indices = @transform_1, window_bounds = array<i64: 5, 32, 32>}, {pipeline_mode = #tpu.pipeline_mode<synchronous>, transform_indices = @transform_2, window_bounds = array<i64: 16, 32>}, {transform_indices = @transform_3, window_bounds = array<i64: 1, 48, 128>}, {transform_indices = @transform_4, window_bounds = array<i64: 1, 128, 128>}]} {
    %c0_i32 = arith.constant 0 : i32
    %0 = arith.cmpi eq, %arg0, %c0_i32 : i32
    %1 = arith.extui %0 : i1 to i32
    %c0_i32_0 = arith.constant 0 : i32
    %2 = arith.cmpi ne, %1, %c0_i32_0 : i32
    scf.if %2 {
      %cst_7 = arith.constant 0.000000e+00 : f32
      %16 = vector.broadcast %cst_7 : f32 to vector<128x1xf32>
      %c0_8 = arith.constant 0 : index
      %c0_9 = arith.constant 0 : index
      %17 = vector.load %arg7[%c0_8, %c0_9] : memref<128x1xf32, #tpu.memory_space<vmem>>, vector<128x1xf32>
      tpu.vector_store %arg7[%c0_8, %c0_9], %16 {strides = array<i32>} : memref<128x1xf32, #tpu.memory_space<vmem>>, vector<128x1xf32>,
      %c0_10 = arith.constant 0 : index
      %c0_11 = arith.constant 0 : index
      %18 = vector.load %arg2[%c0_10, %c0_11] : memref<76x32xf32, #tpu.memory_space<vmem>>, vector<76x32xf32>
      %c0_12 = arith.constant 0 : index
      %c0_13 = arith.constant 0 : index
      %19 = vector.load %arg4[%c0_12, %c0_13] : memref<16x32xf32, #tpu.memory_space<vmem>>, vector<16x32xf32>
      %c0_14 = arith.constant 0 : index
      %c0_15 = arith.constant 0 : index
      %c0_16 = arith.constant 0 : index
      %20 = vector.load %arg3[%c0_14, %c0_15, %c0_16] : memref<5x32x32xf32, #tpu.memory_space<vmem>>, vector<1x32x32xf32>
      %21 = vector.shape_cast %20 : vector<1x32x32xf32> to vector<32x32xf32>
      %cst_17 = arith.constant dense<0.000000e+00> : vector<76x32xf32>
      %22 = tpu.matmul %18, %21, %cst_17 {dimension_numbers = #tpu.dot_dimension_numbers<[1], [0], [0], [1], [0, 0, 1, 1], [], []>} : vector<76x32xf32>, vector<32x32xf32>, vector<76x32xf32> -> vector<76x32xf32>
      %23 = vector.extract_strided_slice %19 {offsets = [0, 0], sizes = [1, 32], strides = [1, 1]} : vector<16x32xf32> to vector<1x32xf32>
      %24 = vector.broadcast %23 : vector<1x32xf32> to vector<76x32xf32>
      %25 = arith.addf %22, %24 : vector<76x32xf32>
      %cst_18 = arith.constant dense<0.000000e+00> : vector<32xf32>
      %26 = vector.multi_reduction <add>, %25, %cst_18 [0] : vector<76x32xf32> to vector<32xf32>
      %27 = vector.shape_cast %26 : vector<32xf32> to vector<1x32xf32>
      %cst_19 = arith.constant 7.600000e+01 : f32
      %28 = vector.broadcast %cst_19 : f32 to vector<1x32xf32>
      %29 = arith.divf %27, %28 : vector<1x32xf32>
      %30 = vector.broadcast %29 : vector<1x32xf32> to vector<76x32xf32>
      %31 = arith.subf %25, %30 : vector<76x32xf32>
      %32 = vector.broadcast %29 : vector<1x32xf32> to vector<76x32xf32>
      %33 = arith.subf %25, %32 : vector<76x32xf32>
      %34 = arith.mulf %31, %33 : vector<76x32xf32>
      %cst_20 = arith.constant dense<0.000000e+00> : vector<32xf32>
      %35 = vector.multi_reduction <add>, %34, %cst_20 [0] : vector<76x32xf32> to vector<32xf32>
      %36 = vector.shape_cast %35 : vector<32xf32> to vector<1x32xf32>
      %cst_21 = arith.constant 7.600000e+01 : f32
      %37 = vector.broadcast %cst_21 : f32 to vector<1x32xf32>
      %38 = arith.divf %36, %37 : vector<1x32xf32>
      %39 = vector.broadcast %29 : vector<1x32xf32> to vector<76x32xf32>
      %40 = arith.subf %25, %39 : vector<76x32xf32>
      %cst_22 = arith.constant 9.99999974E-6 : f32
      %41 = vector.broadcast %cst_22 : f32 to vector<1x32xf32>
      %42 = arith.addf %38, %41 : vector<1x32xf32>
      %43 = math.rsqrt %42 : vector<1x32xf32>
      %44 = vector.broadcast %43 : vector<1x32xf32> to vector<76x32xf32>
      %45 = arith.mulf %40, %44 : vector<76x32xf32>
      %46 = vector.extract_strided_slice %19 {offsets = [5, 0], sizes = [1, 32], strides = [1, 1]} : vector<16x32xf32> to vector<1x32xf32>
      %47 = vector.broadcast %46 : vector<1x32xf32> to vector<76x32xf32>
      %48 = arith.mulf %45, %47 : vector<76x32xf32>
      %49 = vector.extract_strided_slice %19 {offsets = [9, 0], sizes = [1, 32], strides = [1, 1]} : vector<16x32xf32> to vector<1x32xf32>
      %50 = vector.broadcast %49 : vector<1x32xf32> to vector<76x32xf32>
      %51 = arith.addf %48, %50 : vector<76x32xf32>
      %cst_23 = arith.constant 0.000000e+00 : f32
      %52 = vector.broadcast %cst_23 : f32 to vector<76x32xf32>
      %53 = arith.cmpf oge, %51, %52 : vector<76x32xf32>
      %cst_24 = arith.constant 0.00999999977 : f32
      %54 = vector.broadcast %cst_24 : f32 to vector<76x32xf32>
      %55 = arith.mulf %54, %51 : vector<76x32xf32>
      %56 = arith.select %53, %51, %55 : vector<76x32xi1>, vector<76x32xf32>
      %c1 = arith.constant 1 : index
      %c0_25 = arith.constant 0 : index
      %c0_26 = arith.constant 0 : index
      %57 = vector.load %arg3[%c1, %c0_25, %c0_26] : memref<5x32x32xf32, #tpu.memory_space<vmem>>, vector<1x32x32xf32>
      %58 = vector.shape_cast %57 : vector<1x32x32xf32> to vector<32x32xf32>
      %cst_27 = arith.constant dense<0.000000e+00> : vector<76x32xf32>
      %59 = tpu.matmul %56, %58, %cst_27 {dimension_numbers = #tpu.dot_dimension_numbers<[1], [0], [0], [1], [0, 0, 1, 1], [], []>} : vector<76x32xf32>, vector<32x32xf32>, vector<76x32xf32> -> vector<76x32xf32>
      %60 = vector.extract_strided_slice %19 {offsets = [1, 0], sizes = [1, 32], strides = [1, 1]} : vector<16x32xf32> to vector<1x32xf32>
      %61 = vector.broadcast %60 : vector<1x32xf32> to vector<76x32xf32>
      %62 = arith.addf %59, %61 : vector<76x32xf32>
      %cst_28 = arith.constant dense<0.000000e+00> : vector<32xf32>
      %63 = vector.multi_reduction <add>, %62, %cst_28 [0] : vector<76x32xf32> to vector<32xf32>
      %64 = vector.shape_cast %63 : vector<32xf32> to vector<1x32xf32>
      %cst_29 = arith.constant 7.600000e+01 : f32
      %65 = vector.broadcast %cst_29 : f32 to vector<1x32xf32>
      %66 = arith.divf %64, %65 : vector<1x32xf32>
      %67 = vector.broadcast %66 : vector<1x32xf32> to vector<76x32xf32>
      %68 = arith.subf %62, %67 : vector<76x32xf32>
      %69 = vector.broadcast %66 : vector<1x32xf32> to vector<76x32xf32>
      %70 = arith.subf %62, %69 : vector<76x32xf32>
      %71 = arith.mulf %68, %70 : vector<76x32xf32>
      %cst_30 = arith.constant dense<0.000000e+00> : vector<32xf32>
      %72 = vector.multi_reduction <add>, %71, %cst_30 [0] : vector<76x32xf32> to vector<32xf32>
      %73 = vector.shape_cast %72 : vector<32xf32> to vector<1x32xf32>
      %cst_31 = arith.constant 7.600000e+01 : f32
      %74 = vector.broadcast %cst_31 : f32 to vector<1x32xf32>
      %75 = arith.divf %73, %74 : vector<1x32xf32>
      %76 = vector.broadcast %66 : vector<1x32xf32> to vector<76x32xf32>
      %77 = arith.subf %62, %76 : vector<76x32xf32>
      %cst_32 = arith.constant 9.99999974E-6 : f32
      %78 = vector.broadcast %cst_32 : f32 to vector<1x32xf32>
      %79 = arith.addf %75, %78 : vector<1x32xf32>
      %80 = math.rsqrt %79 : vector<1x32xf32>
      %81 = vector.broadcast %80 : vector<1x32xf32> to vector<76x32xf32>
      %82 = arith.mulf %77, %81 : vector<76x32xf32>
      %83 = vector.extract_strided_slice %19 {offsets = [6, 0], sizes = [1, 32], strides = [1, 1]} : vector<16x32xf32> to vector<1x32xf32>
      %84 = vector.broadcast %83 : vector<1x32xf32> to vector<76x32xf32>
      %85 = arith.mulf %82, %84 : vector<76x32xf32>
      %86 = vector.extract_strided_slice %19 {offsets = [10, 0], sizes = [1, 32], strides = [1, 1]} : vector<16x32xf32> to vector<1x32xf32>
      %87 = vector.broadcast %86 : vector<1x32xf32> to vector<76x32xf32>
      %88 = arith.addf %85, %87 : vector<76x32xf32>
      %cst_33 = arith.constant 0.000000e+00 : f32
      %89 = vector.broadcast %cst_33 : f32 to vector<76x32xf32>
      %90 = arith.cmpf oge, %88, %89 : vector<76x32xf32>
      %cst_34 = arith.constant 0.00999999977 : f32
      %91 = vector.broadcast %cst_34 : f32 to vector<76x32xf32>
      %92 = arith.mulf %91, %88 : vector<76x32xf32>
      %93 = arith.select %90, %88, %92 : vector<76x32xi1>, vector<76x32xf32>
      %c2 = arith.constant 2 : index
      %c0_35 = arith.constant 0 : index
      %c0_36 = arith.constant 0 : index
      %94 = vector.load %arg3[%c2, %c0_35, %c0_36] : memref<5x32x32xf32, #tpu.memory_space<vmem>>, vector<1x32x32xf32>
      %95 = vector.shape_cast %94 : vector<1x32x32xf32> to vector<32x32xf32>
      %cst_37 = arith.constant dense<0.000000e+00> : vector<76x32xf32>
      %96 = tpu.matmul %93, %95, %cst_37 {dimension_numbers = #tpu.dot_dimension_numbers<[1], [0], [0], [1], [0, 0, 1, 1], [], []>} : vector<76x32xf32>, vector<32x32xf32>, vector<76x32xf32> -> vector<76x32xf32>
      %97 = vector.extract_strided_slice %19 {offsets = [2, 0], sizes = [1, 32], strides = [1, 1]} : vector<16x32xf32> to vector<1x32xf32>
      %98 = vector.broadcast %97 : vector<1x32xf32> to vector<76x32xf32>
      %99 = arith.addf %96, %98 : vector<76x32xf32>
      %cst_38 = arith.constant dense<0.000000e+00> : vector<32xf32>
      %100 = vector.multi_reduction <add>, %99, %cst_38 [0] : vector<76x32xf32> to vector<32xf32>
      %101 = vector.shape_cast %100 : vector<32xf32> to vector<1x32xf32>
      %cst_39 = arith.constant 7.600000e+01 : f32
      %102 = vector.broadcast %cst_39 : f32 to vector<1x32xf32>
      %103 = arith.divf %101, %102 : vector<1x32xf32>
      %104 = vector.broadcast %103 : vector<1x32xf32> to vector<76x32xf32>
      %105 = arith.subf %99, %104 : vector<76x32xf32>
      %106 = vector.broadcast %103 : vector<1x32xf32> to vector<76x32xf32>
      %107 = arith.subf %99, %106 : vector<76x32xf32>
      %108 = arith.mulf %105, %107 : vector<76x32xf32>
      %cst_40 = arith.constant dense<0.000000e+00> : vector<32xf32>
      %109 = vector.multi_reduction <add>, %108, %cst_40 [0] : vector<76x32xf32> to vector<32xf32>
      %110 = vector.shape_cast %109 : vector<32xf32> to vector<1x32xf32>
      %cst_41 = arith.constant 7.600000e+01 : f32
      %111 = vector.broadcast %cst_41 : f32 to vector<1x32xf32>
      %112 = arith.divf %110, %111 : vector<1x32xf32>
      %113 = vector.broadcast %103 : vector<1x32xf32> to vector<76x32xf32>
      %114 = arith.subf %99, %113 : vector<76x32xf32>
      %cst_42 = arith.constant 9.99999974E-6 : f32
      %115 = vector.broadcast %cst_42 : f32 to vector<1x32xf32>
      %116 = arith.addf %112, %115 : vector<1x32xf32>
      %117 = math.rsqrt %116 : vector<1x32xf32>
      %118 = vector.broadcast %117 : vector<1x32xf32> to vector<76x32xf32>
      %119 = arith.mulf %114, %118 : vector<76x32xf32>
      %120 = vector.extract_strided_slice %19 {offsets = [7, 0], sizes = [1, 32], strides = [1, 1]} : vector<16x32xf32> to vector<1x32xf32>
      %121 = vector.broadcast %120 : vector<1x32xf32> to vector<76x32xf32>
      %122 = arith.mulf %119, %121 : vector<76x32xf32>
      %123 = vector.extract_strided_slice %19 {offsets = [11, 0], sizes = [1, 32], strides = [1, 1]} : vector<16x32xf32> to vector<1x32xf32>
      %124 = vector.broadcast %123 : vector<1x32xf32> to vector<76x32xf32>
      %125 = arith.addf %122, %124 : vector<76x32xf32>
      %cst_43 = arith.constant 0.000000e+00 : f32
      %126 = vector.broadcast %cst_43 : f32 to vector<76x32xf32>
      %127 = arith.cmpf oge, %125, %126 : vector<76x32xf32>
      %cst_44 = arith.constant 0.00999999977 : f32
      %128 = vector.broadcast %cst_44 : f32 to vector<76x32xf32>
      %129 = arith.mulf %128, %125 : vector<76x32xf32>
      %130 = arith.select %127, %125, %129 : vector<76x32xi1>, vector<76x32xf32>
      %c3 = arith.constant 3 : index
      %c0_45 = arith.constant 0 : index
      %c0_46 = arith.constant 0 : index
      %131 = vector.load %arg3[%c3, %c0_45, %c0_46] : memref<5x32x32xf32, #tpu.memory_space<vmem>>, vector<1x32x32xf32>
      %132 = vector.shape_cast %131 : vector<1x32x32xf32> to vector<32x32xf32>
      %cst_47 = arith.constant dense<0.000000e+00> : vector<76x32xf32>
      %133 = tpu.matmul %130, %132, %cst_47 {dimension_numbers = #tpu.dot_dimension_numbers<[1], [0], [0], [1], [0, 0, 1, 1], [], []>} : vector<76x32xf32>, vector<32x32xf32>, vector<76x32xf32> -> vector<76x32xf32>
      %134 = vector.extract_strided_slice %19 {offsets = [3, 0], sizes = [1, 32], strides = [1, 1]} : vector<16x32xf32> to vector<1x32xf32>
      %135 = vector.broadcast %134 : vector<1x32xf32> to vector<76x32xf32>
      %136 = arith.addf %133, %135 : vector<76x32xf32>
      %cst_48 = arith.constant dense<0.000000e+00> : vector<32xf32>
      %137 = vector.multi_reduction <add>, %136, %cst_48 [0] : vector<76x32xf32> to vector<32xf32>
      %138 = vector.shape_cast %137 : vector<32xf32> to vector<1x32xf32>
      %cst_49 = arith.constant 7.600000e+01 : f32
      %139 = vector.broadcast %cst_49 : f32 to vector<1x32xf32>
      %140 = arith.divf %138, %139 : vector<1x32xf32>
      %141 = vector.broadcast %140 : vector<1x32xf32> to vector<76x32xf32>
      %142 = arith.subf %136, %141 : vector<76x32xf32>
      %143 = vector.broadcast %140 : vector<1x32xf32> to vector<76x32xf32>
      %144 = arith.subf %136, %143 : vector<76x32xf32>
      %145 = arith.mulf %142, %144 : vector<76x32xf32>
      %cst_50 = arith.constant dense<0.000000e+00> : vector<32xf32>
      %146 = vector.multi_reduction <add>, %145, %cst_50 [0] : vector<76x32xf32> to vector<32xf32>
      %147 = vector.shape_cast %146 : vector<32xf32> to vector<1x32xf32>
      %cst_51 = arith.constant 7.600000e+01 : f32
      %148 = vector.broadcast %cst_51 : f32 to vector<1x32xf32>
      %149 = arith.divf %147, %148 : vector<1x32xf32>
      %150 = vector.broadcast %140 : vector<1x32xf32> to vector<76x32xf32>
      %151 = arith.subf %136, %150 : vector<76x32xf32>
      %cst_52 = arith.constant 9.99999974E-6 : f32
      %152 = vector.broadcast %cst_52 : f32 to vector<1x32xf32>
      %153 = arith.addf %149, %152 : vector<1x32xf32>
      %154 = math.rsqrt %153 : vector<1x32xf32>
      %155 = vector.broadcast %154 : vector<1x32xf32> to vector<76x32xf32>
      %156 = arith.mulf %151, %155 : vector<76x32xf32>
      %157 = vector.extract_strided_slice %19 {offsets = [8, 0], sizes = [1, 32], strides = [1, 1]} : vector<16x32xf32> to vector<1x32xf32>
      %158 = vector.broadcast %157 : vector<1x32xf32> to vector<76x32xf32>
      %159 = arith.mulf %156, %158 : vector<76x32xf32>
      %160 = vector.extract_strided_slice %19 {offsets = [12, 0], sizes = [1, 32], strides = [1, 1]} : vector<16x32xf32> to vector<1x32xf32>
      %161 = vector.broadcast %160 : vector<1x32xf32> to vector<76x32xf32>
      %162 = arith.addf %159, %161 : vector<76x32xf32>
      %cst_53 = arith.constant 0.000000e+00 : f32
      %163 = vector.broadcast %cst_53 : f32 to vector<76x32xf32>
      %164 = arith.cmpf oge, %162, %163 : vector<76x32xf32>
      %cst_54 = arith.constant 0.00999999977 : f32
      %165 = vector.broadcast %cst_54 : f32 to vector<76x32xf32>
      %166 = arith.mulf %165, %162 : vector<76x32xf32>
      %167 = arith.select %164, %162, %166 : vector<76x32xi1>, vector<76x32xf32>
      %c4 = arith.constant 4 : index
      %c0_55 = arith.constant 0 : index
      %c0_56 = arith.constant 0 : index
      %168 = vector.load %arg3[%c4, %c0_55, %c0_56] : memref<5x32x32xf32, #tpu.memory_space<vmem>>, vector<1x32x32xf32>
      %169 = vector.shape_cast %168 : vector<1x32x32xf32> to vector<32x32xf32>
      %cst_57 = arith.constant dense<0.000000e+00> : vector<76x32xf32>
      %170 = tpu.matmul %167, %169, %cst_57 {dimension_numbers = #tpu.dot_dimension_numbers<[1], [0], [0], [1], [0, 0, 1, 1], [], []>} : vector<76x32xf32>, vector<32x32xf32>, vector<76x32xf32> -> vector<76x32xf32>
      %171 = vector.extract_strided_slice %19 {offsets = [4, 0], sizes = [1, 32], strides = [1, 1]} : vector<16x32xf32> to vector<1x32xf32>
      %172 = vector.broadcast %171 : vector<1x32xf32> to vector<76x32xf32>
      %173 = arith.addf %170, %172 : vector<76x32xf32>
      %174 = vector.extract_strided_slice %173 {offsets = [0, 0], sizes = [76, 1], strides = [1, 1]} : vector<76x32xf32> to vector<76x1xf32>
      %175 = arith.mulf %174, %174 : vector<76x1xf32>
      %cst_58 = arith.constant 0.00999999977 : f32
      %176 = vector.broadcast %cst_58 : f32 to vector<76x1xf32>
      %177 = arith.addf %175, %176 : vector<76x1xf32>
      %c0_59 = arith.constant 0 : index
      %c0_60 = arith.constant 0 : index
      %178 = vector.load %arg7[%c0_59, %c0_60] : memref<128x1xf32, #tpu.memory_space<vmem>>, vector<76x1xf32>
      tpu.vector_store %arg7[%c0_59, %c0_60], %177 {strides = array<i32>} : memref<128x1xf32, #tpu.memory_space<vmem>>, vector<76x1xf32>,
    } else {
    }
    %3 = arith.index_cast %arg0 : i32 to index
    %4 = memref.load %arg1[%3] : memref<2xi32, #tpu.memory_space<smem>>
    %5 = arith.index_cast %4 : i32 to index
    %c0 = arith.constant 0 : index
    %6 = vector.load %arg7[%5, %c0] : memref<128x1xf32, #tpu.memory_space<vmem>>, vector<48x1xf32>
    %c0_1 = arith.constant 0 : index
    %c0_2 = arith.constant 0 : index
    %c0_3 = arith.constant 0 : index
    %7 = vector.load %arg5[%c0_1, %c0_2, %c0_3] : memref<1x48x128xf32, #tpu.memory_space<vmem>>, vector<1x48x128xf32>
    %8 = vector.shape_cast %7 : vector<1x48x128xf32> to vector<48x128xf32>
    %9 = vector.broadcast %6 : vector<48x1xf32> to vector<48x128xf32>
    %10 = arith.mulf %9, %8 : vector<48x128xf32>
    %11 = tpu.transpose %8, [1, 0] : vector<48x128xf32> -> vector<128x48xf32>
    %cst = arith.constant dense<0.000000e+00> : vector<128x128xf32>
    %12 = tpu.matmul %11, %10, %cst {dimension_numbers = #tpu.dot_dimension_numbers<[1], [0], [0], [1], [0, 0, 1, 1], [], []>} : vector<128x48xf32>, vector<48x128xf32>, vector<128x128xf32> -> vector<128x128xf32>
    %c0_4 = arith.constant 0 : index
    %c0_5 = arith.constant 0 : index
    %c0_6 = arith.constant 0 : index
    %13 = vector.load %arg6[%c0_4, %c0_5, %c0_6] : memref<1x128x128xf32, #tpu.memory_space<vmem>>, vector<1x128x128xf32>
    %14 = vector.shape_cast %13 : vector<1x128x128xf32> to vector<128x128xf32>
    %15 = vector.shape_cast %12 : vector<128x128xf32> to vector<1x128x128xf32>
    tpu.vector_store %arg6[%c0_4, %c0_5, %c0_6], %15 {strides = array<i32>} : memref<1x128x128xf32, #tpu.memory_space<vmem>>, vector<1x128x128xf32>,
    return
  }
  func.func @transform_0(%arg0: i32, %arg1: memref<2xi32, #tpu.memory_space<smem>>) -> (i32, i32) {
    %c0_i32 = arith.constant 0 : i32
    %c0_i32_0 = arith.constant 0 : i32
    %c0_i32_1 = arith.constant 0 : i32
    return %c0_i32, %c0_i32_0 : i32, i32
  }
  func.func @transform_1(%arg0: i32, %arg1: memref<2xi32, #tpu.memory_space<smem>>) -> (i32, i32, i32) {
    %c0_i32 = arith.constant 0 : i32
    %c0_i32_0 = arith.constant 0 : i32
    %c0_i32_1 = arith.constant 0 : i32
    %c0_i32_2 = arith.constant 0 : i32
    return %c0_i32, %c0_i32_0, %c0_i32_1 : i32, i32, i32
  }
  func.func @transform_2(%arg0: i32, %arg1: memref<2xi32, #tpu.memory_space<smem>>) -> (i32, i32) {
    %c0_i32 = arith.constant 0 : i32
    %c0_i32_0 = arith.constant 0 : i32
    %c0_i32_1 = arith.constant 0 : i32
    return %c0_i32, %c0_i32_0 : i32, i32
  }
  func.func @transform_3(%arg0: i32, %arg1: memref<2xi32, #tpu.memory_space<smem>>) -> (i32, i32, i32) {
    %c0_i32 = arith.constant 0 : i32
    %c0_i32_0 = arith.constant 0 : i32
    %c0_i32_1 = arith.constant 0 : i32
    return %arg0, %c0_i32, %c0_i32_0 : i32, i32, i32
  }
  func.func @transform_4(%arg0: i32, %arg1: memref<2xi32, #tpu.memory_space<smem>>) -> (i32, i32, i32) {
    %c0_i32 = arith.constant 0 : i32
    %c0_i32_0 = arith.constant 0 : i32
    %c0_i32_1 = arith.constant 0 : i32
    return %arg0, %c0_i32, %c0_i32_0 : i32, i32, i32
  }
}

module attributes {stable_mosaic.version = 11 : i64} {
  func.func @kernel(%arg0: i32, %arg1: memref<16x32xf32, #tpu.memory_space<vmem>>, %arg2: memref<5x32x32xf32, #tpu.memory_space<vmem>>, %arg3: memref<16x32xf32, #tpu.memory_space<vmem>>, %arg4: memref<1x128x8xf32, #tpu.memory_space<vmem>>, %arg5: memref<1x128x32xf32, #tpu.memory_space<vmem>>, %arg6: memref<16x32xf32, #tpu.memory_space<vmem>>) attributes {dimension_semantics = [#tpu.dimension_semantics<arbitrary>], iteration_bounds = array<i64: 2>, scalar_prefetch = 0 : i64, scratch_operands = 1 : i64, tpu.core_type = #tpu.core_type<tc>, window_params = [{pipeline_mode = #tpu.pipeline_mode<synchronous>, transform_indices = @transform_0, window_bounds = array<i64: 16, 32>}, {pipeline_mode = #tpu.pipeline_mode<synchronous>, transform_indices = @transform_1, window_bounds = array<i64: 5, 32, 32>}, {pipeline_mode = #tpu.pipeline_mode<synchronous>, transform_indices = @transform_2, window_bounds = array<i64: 16, 32>}, {transform_indices = @transform_3, window_bounds = array<i64: 1, 128, 8>}, {transform_indices = @transform_4, window_bounds = array<i64: 1, 128, 32>}]} {
    %c0_i32 = arith.constant 0 : i32
    %0 = arith.cmpi eq, %arg0, %c0_i32 : i32
    %1 = arith.extui %0 : i1 to i32
    %c0_i32_0 = arith.constant 0 : i32
    %2 = arith.cmpi ne, %1, %c0_i32_0 : i32
    scf.if %2 {
      %c0_7 = arith.constant 0 : index
      %c0_8 = arith.constant 0 : index
      %14 = vector.load %arg1[%c0_7, %c0_8] : memref<16x32xf32, #tpu.memory_space<vmem>>, vector<16x32xf32>
      %c0_9 = arith.constant 0 : index
      %c0_10 = arith.constant 0 : index
      %15 = vector.load %arg3[%c0_9, %c0_10] : memref<16x32xf32, #tpu.memory_space<vmem>>, vector<16x32xf32>
      %c0_11 = arith.constant 0 : index
      %c0_12 = arith.constant 0 : index
      %c0_13 = arith.constant 0 : index
      %16 = vector.load %arg2[%c0_11, %c0_12, %c0_13] : memref<5x32x32xf32, #tpu.memory_space<vmem>>, vector<1x32x32xf32>
      %17 = vector.shape_cast %16 : vector<1x32x32xf32> to vector<32x32xf32>
      %cst_14 = arith.constant dense<0.000000e+00> : vector<16x32xf32>
      %18 = tpu.matmul %14, %17, %cst_14 {dimension_numbers = #tpu.dot_dimension_numbers<[1], [0], [0], [1], [0, 0, 1, 1], [], []>} : vector<16x32xf32>, vector<32x32xf32>, vector<16x32xf32> -> vector<16x32xf32>
      %19 = vector.extract_strided_slice %15 {offsets = [0, 0], sizes = [1, 32], strides = [1, 1]} : vector<16x32xf32> to vector<1x32xf32>
      %20 = vector.broadcast %19 : vector<1x32xf32> to vector<16x32xf32>
      %21 = arith.addf %18, %20 : vector<16x32xf32>
      %cst_15 = arith.constant dense<0.000000e+00> : vector<32xf32>
      %22 = vector.multi_reduction <add>, %21, %cst_15 [0] : vector<16x32xf32> to vector<32xf32>
      %23 = vector.shape_cast %22 : vector<32xf32> to vector<1x32xf32>
      %cst_16 = arith.constant 1.600000e+01 : f32
      %24 = vector.broadcast %cst_16 : f32 to vector<1x32xf32>
      %25 = arith.divf %23, %24 : vector<1x32xf32>
      %26 = vector.broadcast %25 : vector<1x32xf32> to vector<16x32xf32>
      %27 = arith.subf %21, %26 : vector<16x32xf32>
      %28 = vector.broadcast %25 : vector<1x32xf32> to vector<16x32xf32>
      %29 = arith.subf %21, %28 : vector<16x32xf32>
      %30 = arith.mulf %27, %29 : vector<16x32xf32>
      %cst_17 = arith.constant dense<0.000000e+00> : vector<32xf32>
      %31 = vector.multi_reduction <add>, %30, %cst_17 [0] : vector<16x32xf32> to vector<32xf32>
      %32 = vector.shape_cast %31 : vector<32xf32> to vector<1x32xf32>
      %cst_18 = arith.constant 1.600000e+01 : f32
      %33 = vector.broadcast %cst_18 : f32 to vector<1x32xf32>
      %34 = arith.divf %32, %33 : vector<1x32xf32>
      %35 = vector.broadcast %25 : vector<1x32xf32> to vector<16x32xf32>
      %36 = arith.subf %21, %35 : vector<16x32xf32>
      %cst_19 = arith.constant 9.99999974E-6 : f32
      %37 = vector.broadcast %cst_19 : f32 to vector<1x32xf32>
      %38 = arith.addf %34, %37 : vector<1x32xf32>
      %39 = math.rsqrt %38 : vector<1x32xf32>
      %40 = vector.broadcast %39 : vector<1x32xf32> to vector<16x32xf32>
      %41 = arith.mulf %36, %40 : vector<16x32xf32>
      %42 = vector.extract_strided_slice %15 {offsets = [5, 0], sizes = [1, 32], strides = [1, 1]} : vector<16x32xf32> to vector<1x32xf32>
      %43 = vector.broadcast %42 : vector<1x32xf32> to vector<16x32xf32>
      %44 = arith.mulf %41, %43 : vector<16x32xf32>
      %45 = vector.extract_strided_slice %15 {offsets = [9, 0], sizes = [1, 32], strides = [1, 1]} : vector<16x32xf32> to vector<1x32xf32>
      %46 = vector.broadcast %45 : vector<1x32xf32> to vector<16x32xf32>
      %47 = arith.addf %44, %46 : vector<16x32xf32>
      %cst_20 = arith.constant 0.000000e+00 : f32
      %48 = vector.broadcast %cst_20 : f32 to vector<16x32xf32>
      %49 = arith.cmpf oge, %47, %48 : vector<16x32xf32>
      %cst_21 = arith.constant 0.00999999977 : f32
      %50 = vector.broadcast %cst_21 : f32 to vector<16x32xf32>
      %51 = arith.mulf %50, %47 : vector<16x32xf32>
      %52 = arith.select %49, %47, %51 : vector<16x32xi1>, vector<16x32xf32>
      %c1 = arith.constant 1 : index
      %c0_22 = arith.constant 0 : index
      %c0_23 = arith.constant 0 : index
      %53 = vector.load %arg2[%c1, %c0_22, %c0_23] : memref<5x32x32xf32, #tpu.memory_space<vmem>>, vector<1x32x32xf32>
      %54 = vector.shape_cast %53 : vector<1x32x32xf32> to vector<32x32xf32>
      %cst_24 = arith.constant dense<0.000000e+00> : vector<16x32xf32>
      %55 = tpu.matmul %52, %54, %cst_24 {dimension_numbers = #tpu.dot_dimension_numbers<[1], [0], [0], [1], [0, 0, 1, 1], [], []>} : vector<16x32xf32>, vector<32x32xf32>, vector<16x32xf32> -> vector<16x32xf32>
      %56 = vector.extract_strided_slice %15 {offsets = [1, 0], sizes = [1, 32], strides = [1, 1]} : vector<16x32xf32> to vector<1x32xf32>
      %57 = vector.broadcast %56 : vector<1x32xf32> to vector<16x32xf32>
      %58 = arith.addf %55, %57 : vector<16x32xf32>
      %cst_25 = arith.constant dense<0.000000e+00> : vector<32xf32>
      %59 = vector.multi_reduction <add>, %58, %cst_25 [0] : vector<16x32xf32> to vector<32xf32>
      %60 = vector.shape_cast %59 : vector<32xf32> to vector<1x32xf32>
      %cst_26 = arith.constant 1.600000e+01 : f32
      %61 = vector.broadcast %cst_26 : f32 to vector<1x32xf32>
      %62 = arith.divf %60, %61 : vector<1x32xf32>
      %63 = vector.broadcast %62 : vector<1x32xf32> to vector<16x32xf32>
      %64 = arith.subf %58, %63 : vector<16x32xf32>
      %65 = vector.broadcast %62 : vector<1x32xf32> to vector<16x32xf32>
      %66 = arith.subf %58, %65 : vector<16x32xf32>
      %67 = arith.mulf %64, %66 : vector<16x32xf32>
      %cst_27 = arith.constant dense<0.000000e+00> : vector<32xf32>
      %68 = vector.multi_reduction <add>, %67, %cst_27 [0] : vector<16x32xf32> to vector<32xf32>
      %69 = vector.shape_cast %68 : vector<32xf32> to vector<1x32xf32>
      %cst_28 = arith.constant 1.600000e+01 : f32
      %70 = vector.broadcast %cst_28 : f32 to vector<1x32xf32>
      %71 = arith.divf %69, %70 : vector<1x32xf32>
      %72 = vector.broadcast %62 : vector<1x32xf32> to vector<16x32xf32>
      %73 = arith.subf %58, %72 : vector<16x32xf32>
      %cst_29 = arith.constant 9.99999974E-6 : f32
      %74 = vector.broadcast %cst_29 : f32 to vector<1x32xf32>
      %75 = arith.addf %71, %74 : vector<1x32xf32>
      %76 = math.rsqrt %75 : vector<1x32xf32>
      %77 = vector.broadcast %76 : vector<1x32xf32> to vector<16x32xf32>
      %78 = arith.mulf %73, %77 : vector<16x32xf32>
      %79 = vector.extract_strided_slice %15 {offsets = [6, 0], sizes = [1, 32], strides = [1, 1]} : vector<16x32xf32> to vector<1x32xf32>
      %80 = vector.broadcast %79 : vector<1x32xf32> to vector<16x32xf32>
      %81 = arith.mulf %78, %80 : vector<16x32xf32>
      %82 = vector.extract_strided_slice %15 {offsets = [10, 0], sizes = [1, 32], strides = [1, 1]} : vector<16x32xf32> to vector<1x32xf32>
      %83 = vector.broadcast %82 : vector<1x32xf32> to vector<16x32xf32>
      %84 = arith.addf %81, %83 : vector<16x32xf32>
      %cst_30 = arith.constant 0.000000e+00 : f32
      %85 = vector.broadcast %cst_30 : f32 to vector<16x32xf32>
      %86 = arith.cmpf oge, %84, %85 : vector<16x32xf32>
      %cst_31 = arith.constant 0.00999999977 : f32
      %87 = vector.broadcast %cst_31 : f32 to vector<16x32xf32>
      %88 = arith.mulf %87, %84 : vector<16x32xf32>
      %89 = arith.select %86, %84, %88 : vector<16x32xi1>, vector<16x32xf32>
      %c2 = arith.constant 2 : index
      %c0_32 = arith.constant 0 : index
      %c0_33 = arith.constant 0 : index
      %90 = vector.load %arg2[%c2, %c0_32, %c0_33] : memref<5x32x32xf32, #tpu.memory_space<vmem>>, vector<1x32x32xf32>
      %91 = vector.shape_cast %90 : vector<1x32x32xf32> to vector<32x32xf32>
      %cst_34 = arith.constant dense<0.000000e+00> : vector<16x32xf32>
      %92 = tpu.matmul %89, %91, %cst_34 {dimension_numbers = #tpu.dot_dimension_numbers<[1], [0], [0], [1], [0, 0, 1, 1], [], []>} : vector<16x32xf32>, vector<32x32xf32>, vector<16x32xf32> -> vector<16x32xf32>
      %93 = vector.extract_strided_slice %15 {offsets = [2, 0], sizes = [1, 32], strides = [1, 1]} : vector<16x32xf32> to vector<1x32xf32>
      %94 = vector.broadcast %93 : vector<1x32xf32> to vector<16x32xf32>
      %95 = arith.addf %92, %94 : vector<16x32xf32>
      %cst_35 = arith.constant dense<0.000000e+00> : vector<32xf32>
      %96 = vector.multi_reduction <add>, %95, %cst_35 [0] : vector<16x32xf32> to vector<32xf32>
      %97 = vector.shape_cast %96 : vector<32xf32> to vector<1x32xf32>
      %cst_36 = arith.constant 1.600000e+01 : f32
      %98 = vector.broadcast %cst_36 : f32 to vector<1x32xf32>
      %99 = arith.divf %97, %98 : vector<1x32xf32>
      %100 = vector.broadcast %99 : vector<1x32xf32> to vector<16x32xf32>
      %101 = arith.subf %95, %100 : vector<16x32xf32>
      %102 = vector.broadcast %99 : vector<1x32xf32> to vector<16x32xf32>
      %103 = arith.subf %95, %102 : vector<16x32xf32>
      %104 = arith.mulf %101, %103 : vector<16x32xf32>
      %cst_37 = arith.constant dense<0.000000e+00> : vector<32xf32>
      %105 = vector.multi_reduction <add>, %104, %cst_37 [0] : vector<16x32xf32> to vector<32xf32>
      %106 = vector.shape_cast %105 : vector<32xf32> to vector<1x32xf32>
      %cst_38 = arith.constant 1.600000e+01 : f32
      %107 = vector.broadcast %cst_38 : f32 to vector<1x32xf32>
      %108 = arith.divf %106, %107 : vector<1x32xf32>
      %109 = vector.broadcast %99 : vector<1x32xf32> to vector<16x32xf32>
      %110 = arith.subf %95, %109 : vector<16x32xf32>
      %cst_39 = arith.constant 9.99999974E-6 : f32
      %111 = vector.broadcast %cst_39 : f32 to vector<1x32xf32>
      %112 = arith.addf %108, %111 : vector<1x32xf32>
      %113 = math.rsqrt %112 : vector<1x32xf32>
      %114 = vector.broadcast %113 : vector<1x32xf32> to vector<16x32xf32>
      %115 = arith.mulf %110, %114 : vector<16x32xf32>
      %116 = vector.extract_strided_slice %15 {offsets = [7, 0], sizes = [1, 32], strides = [1, 1]} : vector<16x32xf32> to vector<1x32xf32>
      %117 = vector.broadcast %116 : vector<1x32xf32> to vector<16x32xf32>
      %118 = arith.mulf %115, %117 : vector<16x32xf32>
      %119 = vector.extract_strided_slice %15 {offsets = [11, 0], sizes = [1, 32], strides = [1, 1]} : vector<16x32xf32> to vector<1x32xf32>
      %120 = vector.broadcast %119 : vector<1x32xf32> to vector<16x32xf32>
      %121 = arith.addf %118, %120 : vector<16x32xf32>
      %cst_40 = arith.constant 0.000000e+00 : f32
      %122 = vector.broadcast %cst_40 : f32 to vector<16x32xf32>
      %123 = arith.cmpf oge, %121, %122 : vector<16x32xf32>
      %cst_41 = arith.constant 0.00999999977 : f32
      %124 = vector.broadcast %cst_41 : f32 to vector<16x32xf32>
      %125 = arith.mulf %124, %121 : vector<16x32xf32>
      %126 = arith.select %123, %121, %125 : vector<16x32xi1>, vector<16x32xf32>
      %c3 = arith.constant 3 : index
      %c0_42 = arith.constant 0 : index
      %c0_43 = arith.constant 0 : index
      %127 = vector.load %arg2[%c3, %c0_42, %c0_43] : memref<5x32x32xf32, #tpu.memory_space<vmem>>, vector<1x32x32xf32>
      %128 = vector.shape_cast %127 : vector<1x32x32xf32> to vector<32x32xf32>
      %cst_44 = arith.constant dense<0.000000e+00> : vector<16x32xf32>
      %129 = tpu.matmul %126, %128, %cst_44 {dimension_numbers = #tpu.dot_dimension_numbers<[1], [0], [0], [1], [0, 0, 1, 1], [], []>} : vector<16x32xf32>, vector<32x32xf32>, vector<16x32xf32> -> vector<16x32xf32>
      %130 = vector.extract_strided_slice %15 {offsets = [3, 0], sizes = [1, 32], strides = [1, 1]} : vector<16x32xf32> to vector<1x32xf32>
      %131 = vector.broadcast %130 : vector<1x32xf32> to vector<16x32xf32>
      %132 = arith.addf %129, %131 : vector<16x32xf32>
      %cst_45 = arith.constant dense<0.000000e+00> : vector<32xf32>
      %133 = vector.multi_reduction <add>, %132, %cst_45 [0] : vector<16x32xf32> to vector<32xf32>
      %134 = vector.shape_cast %133 : vector<32xf32> to vector<1x32xf32>
      %cst_46 = arith.constant 1.600000e+01 : f32
      %135 = vector.broadcast %cst_46 : f32 to vector<1x32xf32>
      %136 = arith.divf %134, %135 : vector<1x32xf32>
      %137 = vector.broadcast %136 : vector<1x32xf32> to vector<16x32xf32>
      %138 = arith.subf %132, %137 : vector<16x32xf32>
      %139 = vector.broadcast %136 : vector<1x32xf32> to vector<16x32xf32>
      %140 = arith.subf %132, %139 : vector<16x32xf32>
      %141 = arith.mulf %138, %140 : vector<16x32xf32>
      %cst_47 = arith.constant dense<0.000000e+00> : vector<32xf32>
      %142 = vector.multi_reduction <add>, %141, %cst_47 [0] : vector<16x32xf32> to vector<32xf32>
      %143 = vector.shape_cast %142 : vector<32xf32> to vector<1x32xf32>
      %cst_48 = arith.constant 1.600000e+01 : f32
      %144 = vector.broadcast %cst_48 : f32 to vector<1x32xf32>
      %145 = arith.divf %143, %144 : vector<1x32xf32>
      %146 = vector.broadcast %136 : vector<1x32xf32> to vector<16x32xf32>
      %147 = arith.subf %132, %146 : vector<16x32xf32>
      %cst_49 = arith.constant 9.99999974E-6 : f32
      %148 = vector.broadcast %cst_49 : f32 to vector<1x32xf32>
      %149 = arith.addf %145, %148 : vector<1x32xf32>
      %150 = math.rsqrt %149 : vector<1x32xf32>
      %151 = vector.broadcast %150 : vector<1x32xf32> to vector<16x32xf32>
      %152 = arith.mulf %147, %151 : vector<16x32xf32>
      %153 = vector.extract_strided_slice %15 {offsets = [8, 0], sizes = [1, 32], strides = [1, 1]} : vector<16x32xf32> to vector<1x32xf32>
      %154 = vector.broadcast %153 : vector<1x32xf32> to vector<16x32xf32>
      %155 = arith.mulf %152, %154 : vector<16x32xf32>
      %156 = vector.extract_strided_slice %15 {offsets = [12, 0], sizes = [1, 32], strides = [1, 1]} : vector<16x32xf32> to vector<1x32xf32>
      %157 = vector.broadcast %156 : vector<1x32xf32> to vector<16x32xf32>
      %158 = arith.addf %155, %157 : vector<16x32xf32>
      %cst_50 = arith.constant 0.000000e+00 : f32
      %159 = vector.broadcast %cst_50 : f32 to vector<16x32xf32>
      %160 = arith.cmpf oge, %158, %159 : vector<16x32xf32>
      %cst_51 = arith.constant 0.00999999977 : f32
      %161 = vector.broadcast %cst_51 : f32 to vector<16x32xf32>
      %162 = arith.mulf %161, %158 : vector<16x32xf32>
      %163 = arith.select %160, %158, %162 : vector<16x32xi1>, vector<16x32xf32>
      %c4 = arith.constant 4 : index
      %c0_52 = arith.constant 0 : index
      %c0_53 = arith.constant 0 : index
      %164 = vector.load %arg2[%c4, %c0_52, %c0_53] : memref<5x32x32xf32, #tpu.memory_space<vmem>>, vector<1x32x32xf32>
      %165 = vector.shape_cast %164 : vector<1x32x32xf32> to vector<32x32xf32>
      %cst_54 = arith.constant dense<0.000000e+00> : vector<16x32xf32>
      %166 = tpu.matmul %163, %165, %cst_54 {dimension_numbers = #tpu.dot_dimension_numbers<[1], [0], [0], [1], [0, 0, 1, 1], [], []>} : vector<16x32xf32>, vector<32x32xf32>, vector<16x32xf32> -> vector<16x32xf32>
      %167 = vector.extract_strided_slice %15 {offsets = [4, 0], sizes = [1, 32], strides = [1, 1]} : vector<16x32xf32> to vector<1x32xf32>
      %168 = vector.broadcast %167 : vector<1x32xf32> to vector<16x32xf32>
      %169 = arith.addf %166, %168 : vector<16x32xf32>
      %c0_55 = arith.constant 0 : index
      %c0_56 = arith.constant 0 : index
      %170 = vector.load %arg6[%c0_55, %c0_56] : memref<16x32xf32, #tpu.memory_space<vmem>>, vector<16x32xf32>
      tpu.vector_store %arg6[%c0_55, %c0_56], %169 {strides = array<i32>} : memref<16x32xf32, #tpu.memory_space<vmem>>, vector<16x32xf32>,
    } else {
    }
    %c8_i32 = arith.constant 8 : i32
    %3 = arith.muli %arg0, %c8_i32 : i32
    %4 = tpu.assume_multiple %3, 8 : i32
    %5 = arith.index_cast %4 : i32 to index
    %c0 = arith.constant 0 : index
    %6 = vector.load %arg6[%5, %c0] : memref<16x32xf32, #tpu.memory_space<vmem>>, vector<8x32xf32>
    %c0_1 = arith.constant 0 : index
    %c0_2 = arith.constant 0 : index
    %c0_3 = arith.constant 0 : index
    %7 = vector.load %arg4[%c0_1, %c0_2, %c0_3] : memref<1x128x8xf32, #tpu.memory_space<vmem>>, vector<1x128x8xf32>
    %8 = vector.shape_cast %7 : vector<1x128x8xf32> to vector<128x8xf32>
    %9 = arith.mulf %8, %8 : vector<128x8xf32>
    %cst = arith.constant dense<0.000000e+00> : vector<128x32xf32>
    %10 = tpu.matmul %9, %6, %cst {dimension_numbers = #tpu.dot_dimension_numbers<[1], [0], [0], [1], [0, 0, 1, 1], [], []>} : vector<128x8xf32>, vector<8x32xf32>, vector<128x32xf32> -> vector<128x32xf32>
    %c0_4 = arith.constant 0 : index
    %c0_5 = arith.constant 0 : index
    %c0_6 = arith.constant 0 : index
    %11 = vector.load %arg5[%c0_4, %c0_5, %c0_6] : memref<1x128x32xf32, #tpu.memory_space<vmem>>, vector<1x128x32xf32>
    %12 = vector.shape_cast %11 : vector<1x128x32xf32> to vector<128x32xf32>
    %13 = vector.shape_cast %10 : vector<128x32xf32> to vector<1x128x32xf32>
    tpu.vector_store %arg5[%c0_4, %c0_5, %c0_6], %13 {strides = array<i32>} : memref<1x128x32xf32, #tpu.memory_space<vmem>>, vector<1x128x32xf32>,
    return
  }
  func.func @transform_0(%arg0: i32) -> (i32, i32) {
    %c0_i32 = arith.constant 0 : i32
    %c0_i32_0 = arith.constant 0 : i32
    %c0_i32_1 = arith.constant 0 : i32
    return %c0_i32, %c0_i32_0 : i32, i32
  }
  func.func @transform_1(%arg0: i32) -> (i32, i32, i32) {
    %c0_i32 = arith.constant 0 : i32
    %c0_i32_0 = arith.constant 0 : i32
    %c0_i32_1 = arith.constant 0 : i32
    %c0_i32_2 = arith.constant 0 : i32
    return %c0_i32, %c0_i32_0, %c0_i32_1 : i32, i32, i32
  }
  func.func @transform_2(%arg0: i32) -> (i32, i32) {
    %c0_i32 = arith.constant 0 : i32
    %c0_i32_0 = arith.constant 0 : i32
    %c0_i32_1 = arith.constant 0 : i32
    return %c0_i32, %c0_i32_0 : i32, i32
  }
  func.func @transform_3(%arg0: i32) -> (i32, i32, i32) {
    %c0_i32 = arith.constant 0 : i32
    %c0_i32_0 = arith.constant 0 : i32
    %c0_i32_1 = arith.constant 0 : i32
    return %arg0, %c0_i32, %c0_i32_0 : i32, i32, i32
  }
  func.func @transform_4(%arg0: i32) -> (i32, i32, i32) {
    %c0_i32 = arith.constant 0 : i32
    %c0_i32_0 = arith.constant 0 : i32
    %c0_i32_1 = arith.constant 0 : i32
    return %arg0, %c0_i32, %c0_i32_0 : i32, i32, i32
  }
}

</mosaic_0001>

<bundles_post_ra>
// kernel: custom-call.2
= control target key start
LH: loop header
LB: loop body
LE: loop exit
PB: predicated region body
PF: predicated region fallthrough
CT: control target
= control target key end

     0   :  { %s7863_s0 = inlined_call_operand.vmem [shape: f32[2,64,64], index: 0, kind: input, shape index: {}]   ;;  %s7864_s1 = inlined_call_operand.vmem [shape: f32[2,64,64], index: 1, kind: input, shape index: {}]   ;;  %s7865_s2 = inlined_call_operand.vmem [shape: f32[2,64,64], index: 2, kind: input, shape index: {}]   ;;  %s7866_s3 = inlined_call_operand.vmem [shape: f32[2,64,64], index: 3, kind: input, shape index: {}]   ;;  %s7867_s4 = inlined_call_operand.vmem [shape: f32[2,64], index: 4, kind: output, shape index: {0}]   ;;  %s7868_s5 = inlined_call_operand.vmem [shape: f32[2,64], index: 5, kind: output, shape index: {1}]   ;;  %s7869_s6 = inlined_call_operand.vmem [shape: f32[2,64,64], index: 6, kind: output, shape index: {2}]   ;;  %s7870_s7 = inlined_call_operand.vmem [shape: f32[2,64,64], index: 7, kind: output, shape index: {3}]   ;;  %s7871_s8 = inlined_call_operand.vmem [shape: f32[2,64,64], index: 8, kind: output, shape index: {4}]   ;;  %s7872_s9 = inlined_call_operand.vmem [shape: f32[2,64,64], index: 9, kind: output, shape index: {5}]  }
   0x1   :  { %7901 = sst [smem:[#allocation40_spill]] %s7863_s0 }
   0x2   :  { %7902 = sst [smem:[#allocation41_spill]] %s7864_s1 }
   0x3   :  { %7903 = sst [smem:[#allocation42_spill]] %s7865_s2 }
   0x4   :  { %7904 = sst [smem:[#allocation43_spill]] %s7866_s3 }
   0x5   :  { %7905 = sst [smem:[#allocation44_spill]] %s7867_s4 }
   0x6   :  { %7906 = sst [smem:[#allocation45_spill]] %s7868_s5 }
   0x7   :  { %7907 = sst [smem:[#allocation46_spill]] %s7869_s6 }
   0x8   :  { %7908 = sst [smem:[#allocation47_spill]] %s7870_s7 }
   0x9   :  { %7909 = sst [smem:[#allocation48_spill]] %s7871_s8 }
   0xa   :  { %7910 = sst [smem:[#allocation49_spill]] %s7872_s9 }
   0xb   :  { %s5521_s30 = smov 0   ;;  %s5523_s10 = smov 0  }
   0xc   :  { %s5525_s11 = smov 0  }
   0xd LB: > { %7911 = sst [smem:[#allocation25_spill]] %s5454_s10  ;;  %s5537_s12 = sadd.s32 4294967295, %s5458_s11   ;;  %s5458_s11 = sphi %s5525_s11, %s8053_s11   ;;  %s5454_s10 = sphi %s5523_s10, %s8055_s10   ;;  %s5450_s30 = sphi %s5521_s30, %s8054_s30  }
   0xe   : > { %7912 = sst [smem:[#allocation26_spill]] %s5537_s12  ;;  %s5540_s13 = sadd.s32 1, %s5458_s11  }
   0xf   : > { %7913 = sst [smem:[#allocation27_spill]] %s5540_s13  ;;  %s20_s14 = sshrl.u32 %s5458_s11, 3 }
  0x10   : > { %s21_s15 = sshrl.u32 %s5540_s13, 3  ;;  %s25_s17 = sadd.s32 1, %s5454_s10 }
  0x11   : > { %s22_s16 = ssub.s32 %s20_s14, %s21_s15  ;;  %p35_p1 = scmp.ne.s32.totalorder %s5454_s10, %s5450_s30 }
  0x12   : > { %p23_p0 = scmp.eq.s32.totalorder %s22_s16, 0  ;;  %p36_p2 = scmp.eq.s32.totalorder %s5537_s12, 1 }
  0x13   : > { %p4598_p4 = scmp.ge.s32.totalorder %s5458_s11, 2 }
  0x14   : > { %s5549_s18 = scalar_select %p23_p0, %s5454_s10, %s25_s17  }
  0x15   : > { %p5551_p3 = por %p36_p2, %p35_p1  ;;  %86 = sbr.rel (%p4598_p4) target bundleno = 49 (0x31), region = 16 }
  0x16   : > { %7914 = sst [smem:[#allocation28_spill]] %s5549_s18  ;;  %s88_s20 = sand.u32 (!%p4598_p4), 1, %s5458_s11  }
  0x17   : > { %s7915_s19 = scalar_select %p5551_p3, 1, 0 }
  0x18   : > { %s5558_s21 = sshll.u32 (!%p4598_p4), %s5458_s11, 6  ;;  %s5560_s22 = sshll.u32 (!%p4598_p4), %s88_s20, 6 }
  0x19   : > { %7916 = sst [smem:[#allocation29_spill]] %s7915_s19  ;;  %s7917_s0 = sld [smem:[#allocation40_spill]] (!%p4598_p4) }
  0x1a   : > { %s90_s26 = scalar_lea.vmem (!%p4598_p4), [#allocation0], %s5560_s22  ;;  %s7918_s1 = sld [smem:[#allocation41_spill]] (!%p4598_p4) }
  0x1b   : > { %s7919_s2 = sld [smem:[#allocation42_spill]] (!%p4598_p4)  ;;  %s127_s17 = scalar_lea.vmem (!%p4598_p4), [#allocation1], %s5560_s22 }
  0x1c   : > { %s7920_s3 = sld [smem:[#allocation43_spill]] }
  0x1f   : > { %s92_s25 = scalar_lea.vmem %s7917_s0, %s5558_s21 }
  0x20   : > { %v105_v0 = vld [vmem:[%s92_s25] sm:$0xff]  ;;  %v107_v1 = vld [vmem:[%s92_s25 + $0x8] sm:$0xff]  ;;  %v109_v2 = vld [vmem:[%s92_s25 + $0x10] sm:$0xff]  ;;  %s129_s29 = scalar_lea.vmem %s7918_s1, %s5558_s21 }
  0x21   : > { %106 = vst [vmem:[%s90_s26] sm:$0xff] %v105_v0  ;;  %108 = vst [vmem:[%s90_s26 + $0x8] sm:$0xff] %v107_v1  ;;  %v111_v3 = vld [vmem:[%s92_s25 + $0x18] sm:$0xff]  ;;  %v113_v4 = vld [vmem:[%s92_s25 + $0x20] sm:$0xff]  ;;  %s5575_s16 = scalar_lea.vmem %s7919_s2, %s5558_s21 }
  0x22   : > { %110 = vst [vmem:[%s90_s26 + $0x10] sm:$0xff] %v109_v2  ;;  %v115_v5 = vld [vmem:[%s92_s25 + $0x28] sm:$0xff]  ;;  %112 = vst [vmem:[%s90_s26 + $0x18] sm:$0xff] %v111_v3  ;;  %v117_v6 = vld [vmem:[%s92_s25 + $0x30] sm:$0xff]  ;;  %s5584_s24 = scalar_lea.vmem %s7920_s3, %s5558_s21  ;;  %s201_s21 = scalar_lea.vmem [#allocation3], %s5560_s22 }
  0x23   : > { %114 = vst [vmem:[%s90_s26 + $0x20] sm:$0xff] %v113_v4  ;;  %116 = vst [vmem:[%s90_s26 + $0x28] sm:$0xff] %v115_v5  ;;  %v119_v7 = vld [vmem:[%s92_s25 + $0x38] sm:$0xff]  ;;  %v142_v8 = vld [vmem:[%s129_s29] sm:$0xff]  ;;  %s164_s25 = scalar_lea.vmem [#allocation2], %s5560_s22 }
  0x24   : > { %118 = vst [vmem:[%s90_s26 + $0x30] sm:$0xff] %v117_v6  ;;  %120 = vst [vmem:[%s90_s26 + $0x38] sm:$0xff] %v119_v7  ;;  %v144_v9 = vld [vmem:[%s129_s29 + $0x8] sm:$0xff]  ;;  %v146_v10 = vld [vmem:[%s129_s29 + $0x10] sm:$0xff] }
  0x25   : > { %143 = vst [vmem:[%s127_s17] sm:$0xff] %v142_v8  ;;  %v148_v11 = vld [vmem:[%s129_s29 + $0x18] sm:$0xff]  ;;  %145 = vst [vmem:[%s127_s17 + $0x8] sm:$0xff] %v144_v9  ;;  %v150_v12 = vld [vmem:[%s129_s29 + $0x20] sm:$0xff] }
  0x26   : > { %147 = vst [vmem:[%s127_s17 + $0x10] sm:$0xff] %v146_v10  ;;  %149 = vst [vmem:[%s127_s17 + $0x18] sm:$0xff] %v148_v11  ;;  %v152_v13 = vld [vmem:[%s129_s29 + $0x28] sm:$0xff]  ;;  %v154_v14 = vld [vmem:[%s129_s29 + $0x30] sm:$0xff] }
  0x27   : > { %151 = vst [vmem:[%s127_s17 + $0x20] sm:$0xff] %v150_v12  ;;  %153 = vst [vmem:[%s127_s17 + $0x28] sm:$0xff] %v152_v13  ;;  %v156_v15 = vld [vmem:[%s129_s29 + $0x38] sm:$0xff]  ;;  %v179_v16 = vld [vmem:[%s5575_s16] sm:$0xff] }
  0x28   : > { %155 = vst [vmem:[%s127_s17 + $0x30] sm:$0xff] %v154_v14  ;;  %v181_v17 = vld [vmem:[%s5575_s16 + $0x8] sm:$0xff]  ;;  %157 = vst [vmem:[%s127_s17 + $0x38] sm:$0xff] %v156_v15  ;;  %v183_v18 = vld [vmem:[%s5575_s16 + $0x10] sm:$0xff] }
  0x29   : > { %180 = vst [vmem:[%s164_s25] sm:$0xff] %v179_v16  ;;  %182 = vst [vmem:[%s164_s25 + $0x8] sm:$0xff] %v181_v17  ;;  %v185_v19 = vld [vmem:[%s5575_s16 + $0x18] sm:$0xff]  ;;  %v187_v20 = vld [vmem:[%s5575_s16 + $0x20] sm:$0xff] }
  0x2a   : > { %184 = vst [vmem:[%s164_s25 + $0x10] sm:$0xff] %v183_v18  ;;  %186 = vst [vmem:[%s164_s25 + $0x18] sm:$0xff] %v185_v19  ;;  %v189_v21 = vld [vmem:[%s5575_s16 + $0x28] sm:$0xff]  ;;  %v191_v22 = vld [vmem:[%s5575_s16 + $0x30] sm:$0xff] }
  0x2b   : > { %188 = vst [vmem:[%s164_s25 + $0x20] sm:$0xff] %v187_v20  ;;  %v193_v23 = vld [vmem:[%s5575_s16 + $0x38] sm:$0xff]  ;;  %190 = vst [vmem:[%s164_s25 + $0x28] sm:$0xff] %v189_v21  ;;  %v216_v24 = vld [vmem:[%s5584_s24] sm:$0xff] }
  0x2c   : > { %192 = vst [vmem:[%s164_s25 + $0x30] sm:$0xff] %v191_v22  ;;  %194 = vst [vmem:[%s164_s25 + $0x38] sm:$0xff] %v193_v23  ;;  %v218_v25 = vld [vmem:[%s5584_s24 + $0x8] sm:$0xff]  ;;  %v220_v26 = vld [vmem:[%s5584_s24 + $0x10] sm:$0xff] }
  0x2d   : > { %217 = vst [vmem:[%s201_s21] sm:$0xff] %v216_v24  ;;  %219 = vst [vmem:[%s201_s21 + $0x8] sm:$0xff] %v218_v25  ;;  %v222_v27 = vld [vmem:[%s5584_s24 + $0x18] sm:$0xff]  ;;  %v224_v28 = vld [vmem:[%s5584_s24 + $0x20] sm:$0xff] }
  0x2e   : > { %221 = vst [vmem:[%s201_s21 + $0x10] sm:$0xff] %v220_v26  ;;  %v226_v29 = vld [vmem:[%s5584_s24 + $0x28] sm:$0xff]  ;;  %223 = vst [vmem:[%s201_s21 + $0x18] sm:$0xff] %v222_v27  ;;  %v228_v30 = vld [vmem:[%s5584_s24 + $0x30] sm:$0xff] }
  0x2f   : > { %225 = vst [vmem:[%s201_s21 + $0x20] sm:$0xff] %v224_v28  ;;  %227 = vst [vmem:[%s201_s21 + $0x28] sm:$0xff] %v226_v29  ;;  %v230_v31 = vld [vmem:[%s5584_s24 + $0x38] sm:$0xff] }
  0x30   : > { %229 = vst [vmem:[%s201_s21 + $0x30] sm:$0xff] %v228_v30  ;;  %231 = vst [vmem:[%s201_s21 + $0x38] sm:$0xff] %v230_v31 }
  0x31 PF: > { %p4607_p5 = scmp.ge.s32.totalorder %s5458_s11, 1  ;;  %p236_p6 = scmp.lt.s32.totalorder %s5458_s11, 3 }
  0x33   : > { %p237_p7 = pnand %p4607_p5, %p236_p6 }
  0x35   : > { %240 = sbr.rel (%p237_p7) target bundleno = 1517 (0x5ed), region = 96 }
  0x3c   : > { %s243_s22 = sand.u32 1, %s5537_s12   ;;  %s277_s26 = sand.u32 1, %s5450_s30   ;;  %v489_v32 = vlaneseq  ;;  %v5468_v48 = vmov 0.0  }
  0x3d   : > { %s5606_s27 = sshll.u32 %s243_s22, 6  ;;  %s5608_s28 = sshll.u32 %s277_s26, 1 }
  0x3e   : > { %7921 = sst [smem:[#allocation30_spill]] %s5608_s28  ;;  %v5610_v33 = vand.u32 127, %v489_v32  ;;  %v5612_v34 = vshrl.u32 %v489_v32, 7  ;;  %s245_s29 = scalar_lea.vmem [#allocation0], %s5606_s27 }
  0x3f   : > { %v305_v35 = vld [vmem:[%s245_s29] sm:$0xff]  ;;  %v4618_v36 = vld [vmem:[%s245_s29 + $0x8] sm:$0xff]  ;;  %v4620_v37 = vld [vmem:[%s245_s29 + $0x10] sm:$0xff]  ;;  %s5619_s30 = scalar_lea.vmem [#allocation1], %s5606_s27  ;;  %s5632_s11 = scalar_lea.vmem [#allocation8], %s5606_s27 }
  0x40   : > { %v4622_v38 = vld [vmem:[%s245_s29 + $0x18] sm:$0xff]  ;;  %v4624_v39 = vld [vmem:[%s245_s29 + $0x20] sm:$0xff]  ;;  %v4626_v40 = vld [vmem:[%s245_s29 + $0x28] sm:$0xff]  ;;  %v5616_v34 = vmov %v5612_v34  ;;  %v5623_v33 = vmov %v5610_v33  ;;  %7922 = sst [smem:[#allocation31_spill]] %s5632_s11  ;;  %428 = vst [vmem:[%s5632_s11] sm:$0xff] %v5468_v48  ;;  %s5643_s14 = scalar_lea.vmem [#allocation9], %s5606_s27 }
  0x41   : > { %v4628_v41 = vld [vmem:[%s245_s29 + $0x30] sm:$0xff]  ;;  %v4630_v42 = vld [vmem:[%s245_s29 + $0x38] sm:$0xff]  ;;  %v336_v43 = vld [vmem:[%s5619_s30] sm:$0xff]  ;;  %v5626_v44 = vadd.s32 8, %v5616_v34  ;;  %4674 = vst [vmem:[%s5632_s11 + $0x8] sm:$0xff] %v5468_v48  ;;  %7923 = sst [smem:[#allocation32_spill]] %s5643_s14  ;;  %v5657_v33 = vmov %v5610_v33  ;;  %vm498_vm0 = vcmp.eq.s32.totalorder %v5616_v34, %v5623_v33 }
  0x42   : > { %v4632_v45 = vld [vmem:[%s5619_s30 + $0x8] sm:$0xff]  ;;  %v4634_v46 = vld [vmem:[%s5619_s30 + $0x10] sm:$0xff]  ;;  %v4636_v47 = vld [vmem:[%s5619_s30 + $0x18] sm:$0xff]  ;;  %4675 = vst [vmem:[%s5632_s11 + $0x10] sm:$0xff] %v5468_v48  ;;  %v5654_v49 = vadd.s32 16, %v5616_v34  ;;  %s5659_s15 = smov [#allocation12] }
  0x43   : > { %4676 = vst [vmem:[%s5632_s11 + $0x18] sm:$0xff] %v5468_v48  ;;  %4677 = vst [vmem:[%s5632_s11 + $0x20] sm:$0xff] %v5468_v48  ;;  %s5661_s16 = smov [#allocation13]  ;;  %v4638_v50 = vld [vmem:[%s5619_s30 + $0x20] sm:$0xff]  ;;  %v4640_v51 = vld [vmem:[%s5619_s30 + $0x28] sm:$0xff]  ;;  %s5667_s17 = scalar_lea.vmem [#allocation10], %s5606_s27  ;;  %vm505_vm2 = vcmp.eq.s32.totalorder %v5626_v44, %v5623_v33 }
  0x44   : > { %4678 = vst [vmem:[%s5632_s11 + $0x28] sm:$0xff] %v5468_v48  ;;  %4679 = vst [vmem:[%s5632_s11 + $0x30] sm:$0xff] %v5468_v48  ;;  %v4642_v52 = vld [vmem:[%s5619_s30 + $0x30] sm:$0xff]  ;;  %7924 = sst [smem:[#allocation33_spill]] %s5667_s17  ;;  %s5678_s20 = scalar_lea.vmem [#allocation11], %s5606_s27  ;;  %v5689_v53 = vadd.s32 24, %v5616_v34  ;;  %v5692_v34 = vmov %v5612_v34  ;;  %vm512_vm3 = vcmp.eq.s32.totalorder %v5654_v49, %v5623_v33 }
  0x45   : > { %4680 = vst [vmem:[%s5632_s11 + $0x38] sm:$0xff] %v5468_v48  ;;  %443 = vst [vmem:[%s5643_s14] sm:$0xff] %v5468_v48  ;;  %7925 = sst [smem:[#allocation34_spill]] %s5678_s20  ;;  %v4644_v54 = vld [vmem:[%s5619_s30 + $0x38] sm:$0xff]  ;;  %s366_s23 = smov [#allocation14]  ;;  %v5716_v57 = vadd.s32 32, %v5616_v34  ;;  %v5720_v61 = vadd.s32 40, %v5616_v34  ;;  %vm560_vm1 = vcmp.eq.s32.totalorder %v5692_v34, %v5657_v33 }
  0x46   : > { %4681 = vst [vmem:[%s5643_s14 + $0x8] sm:$0xff] %v5468_v48  ;;  %4682 = vst [vmem:[%s5643_s14 + $0x10] sm:$0xff] %v5468_v48  ;;  %s253_s24 = scalar_lea.vmem [#allocation2], %s5606_s27  ;;  %s5711_s25 = smov [#allocation15]  ;;  %v5723_v62 = vadd.s32 48, %v5616_v34  ;;  %v5726_v63 = vadd.s32 56, %v5616_v34  ;;  %vm519_vm4 = vcmp.eq.s32.totalorder %v5689_v53, %v5623_v33 }
  0x47   : > { %4683 = vst [vmem:[%s5643_s14 + $0x18] sm:$0xff] %v5468_v48  ;;  %4684 = vst [vmem:[%s5643_s14 + $0x20] sm:$0xff] %v5468_v48  ;;  %v367_v55 = vld [vmem:[%s253_s24] sm:$0xff]  ;;  %v4646_v56 = vld [vmem:[%s253_s24 + $0x8] sm:$0xff]  ;;  %s5731_s11 = smov %s5632_s11  ;;  %v5736_v3 = vadd.s32 8, %v5692_v34  ;;  %v5739_v4 = vadd.s32 16, %v5692_v34  ;;  %vm526_vm5 = vcmp.eq.s32.totalorder %v5716_v57, %v5623_v33  ;;  %vm533_vm6 = vcmp.eq.s32.totalorder %v5720_v61, %v5623_v33 }
  0x48   : > { %4685 = vst [vmem:[%s5643_s14 + $0x28] sm:$0xff] %v5468_v48  ;;  %4686 = vst [vmem:[%s5643_s14 + $0x30] sm:$0xff] %v5468_v48  ;;  %v4648_v58 = vld [vmem:[%s253_s24 + $0x10] sm:$0xff]  ;;  %v4650_v59 = vld [vmem:[%s253_s24 + $0x18] sm:$0xff]  ;;  %v5742_v5 = vadd.s32 24, %v5692_v34  ;;  %s257_s21 = scalar_lea.vmem [#allocation3], %s5606_s27  ;;  %vm540_vm7 = vcmp.eq.s32.totalorder %v5723_v62, %v5623_v33  ;;  %vm547_vm8 = vcmp.eq.s32.totalorder %v5726_v63, %v5623_v33 }
  0x49   : > { %4687 = vst [vmem:[%s5643_s14 + $0x38] sm:$0xff] %v5468_v48  ;;  %458 = vst [vmem:[%s5667_s17] sm:$0xff] %v5468_v48  ;;  %v4652_v60 = vld [vmem:[%s253_s24 + $0x20] sm:$0xff]  ;;  %v4654_v0 = vld [vmem:[%s253_s24 + $0x28] sm:$0xff]  ;;  %v5752_v9 = vadd.s32 32, %v5692_v34  ;;  %v594_v13 = vadd.s32 40, %v5692_v34  ;;  %vm567_vm9 = vcmp.eq.s32.totalorder %v5736_v3, %v5657_v33  ;;  %vm574_vm10 = vcmp.eq.s32.totalorder %v5739_v4, %v5657_v33  ;;  %s4273_s27 = smov [#allocation12] }
  0x4a   : > { %4688 = vst [vmem:[%s5667_s17 + $0x8] sm:$0xff] %v5468_v48  ;;  %4689 = vst [vmem:[%s5667_s17 + $0x10] sm:$0xff] %v5468_v48  ;;  %v4656_v1 = vld [vmem:[%s253_s24 + $0x30] sm:$0xff]  ;;  %v4658_v2 = vld [vmem:[%s253_s24 + $0x38] sm:$0xff]  ;;  %v601_v17 = vadd.s32 48, %v5692_v34  ;;  %v608_v18 = vadd.s32 56, %v5692_v34  ;;  %vm581_vm11 = vcmp.eq.s32.totalorder %v5742_v5, %v5657_v33  ;;  %v4272_v34 = vmov %v5612_v34 }
  0x4b   : > { %4690 = vst [vmem:[%s5667_s17 + $0x18] sm:$0xff] %v5468_v48  ;;  %4691 = vst [vmem:[%s5667_s17 + $0x20] sm:$0xff] %v5468_v48  ;;  %v398_v6 = vld [vmem:[%s257_s21] sm:$0xff]  ;;  %v4660_v7 = vld [vmem:[%s257_s21 + $0x8] sm:$0xff]  ;;  %vm588_vm12 = vcmp.eq.s32.totalorder %v5752_v9, %v5657_v33  ;;  %vm595_vm13 = vcmp.eq.s32.totalorder %v594_v13, %v5657_v33  ;;  %s5878_s29 = smov [#allocation13]  ;;  %s5930_s30 = smov [#allocation14] }
  0x4c   : > { %4692 = vst [vmem:[%s5667_s17 + $0x28] sm:$0xff] %v5468_v48  ;;  %4693 = vst [vmem:[%s5667_s17 + $0x30] sm:$0xff] %v5468_v48  ;;  %v4662_v8 = vld [vmem:[%s257_s21 + $0x10] sm:$0xff]  ;;  %v4664_v10 = vld [vmem:[%s257_s21 + $0x18] sm:$0xff]  ;;  %vm602_vm14 = vcmp.eq.s32.totalorder %v601_v17, %v5657_v33  ;;  %vm609_vm15 = vcmp.eq.s32.totalorder %v608_v18, %v5657_v33 }
  0x4d   : > { %4694 = vst [vmem:[%s5667_s17 + $0x38] sm:$0xff] %v5468_v48  ;;  %473 = vst [vmem:[%s5678_s20] sm:$0xff] %v5468_v48  ;;  %v4666_v11 = vld [vmem:[%s257_s21 + $0x20] sm:$0xff]  ;;  %v4668_v12 = vld [vmem:[%s257_s21 + $0x28] sm:$0xff] }
  0x4e   : > { %4695 = vst [vmem:[%s5678_s20 + $0x8] sm:$0xff] %v5468_v48  ;;  %4696 = vst [vmem:[%s5678_s20 + $0x10] sm:$0xff] %v5468_v48  ;;  %v4670_v14 = vld [vmem:[%s257_s21 + $0x30] sm:$0xff]  ;;  %v4672_v15 = vld [vmem:[%s257_s21 + $0x38] sm:$0xff] }
  0x4f   : > { %4697 = vst [vmem:[%s5678_s20 + $0x18] sm:$0xff] %v5468_v48  ;;  %4698 = vst [vmem:[%s5678_s20 + $0x20] sm:$0xff] %v5468_v48  ;;  %v495_v16 = vld [vmem:[%s5731_s11] sm:$0xff]  ;;  %v4702_v20 = vld [vmem:[%s5731_s11 + $0x8] sm:$0xff] }
  0x50   : > { %4699 = vst [vmem:[%s5678_s20 + $0x28] sm:$0xff] %v5468_v48  ;;  %4700 = vst [vmem:[%s5678_s20 + $0x30] sm:$0xff] %v5468_v48  ;;  %v499_v19 = vsel %vm498_vm0, 1.0, %v495_v16  ;;  %v4704_v21 = vld [vmem:[%s5731_s11 + $0x10] sm:$0xff]  ;;  %v4706_v22 = vld [vmem:[%s5731_s11 + $0x18] sm:$0xff]  ;;  %v506_v23 = vsel %vm505_vm2, 1.0, %v4702_v20 }
  0x51   : > { %4701 = vst [vmem:[%s5678_s20 + $0x38] sm:$0xff] %v5468_v48  ;;  %306 = vst [vmem:[%s5659_s15] sm:$0xff] %v305_v35  ;;  %s5769_s20 = smov %s5678_s20  ;;  %v513_v24 = vsel %vm512_vm3, 1.0, %v4704_v21  ;;  %v520_v25 = vsel %vm519_vm4, 1.0, %v4706_v22  ;;  %v4708_v26 = vld [vmem:[%s5731_s11 + $0x20] sm:$0xff]  ;;  %v4710_v27 = vld [vmem:[%s5731_s11 + $0x28] sm:$0xff]  ;;  %vm7875_vm0 = vcmp.lt.s32.totalorder %v5610_v33, 64  ;;  %v4349_v33 = vmov %v5610_v33 }
  0x52   : > { %4619 = vst [vmem:[%s5659_s15 + $0x8] sm:$0xff] %v4618_v36  ;;  %4621 = vst [vmem:[%s5659_s15 + $0x10] sm:$0xff] %v4620_v37  ;;  %v4712_v28 = vld [vmem:[%s5731_s11 + $0x30] sm:$0xff]  ;;  %v527_v29 = vsel %vm526_vm5, 1.0, %v4708_v26  ;;  %v534_v30 = vsel %vm533_vm6, 1.0, %v4710_v27  ;;  %v4714_v32 = vld [vmem:[%s5731_s11 + $0x38] sm:$0xff]  ;;  %v5902_v33 = vmov %v5610_v33 }
  0x53   : > { %4623 = vst [vmem:[%s5659_s15 + $0x18] sm:$0xff] %v4622_v38  ;;  %4625 = vst [vmem:[%s5659_s15 + $0x20] sm:$0xff] %v4624_v39  ;;  %v541_v31 = vsel %vm540_vm7, 1.0, %v4712_v28  ;;  %v548_v37 = vsel %vm547_vm8, 1.0, %v4714_v32 }
  0x54   : > { %4627 = vst [vmem:[%s5659_s15 + $0x28] sm:$0xff] %v4626_v40  ;;  %4629 = vst [vmem:[%s5659_s15 + $0x30] sm:$0xff] %v4628_v41 }
  0x55   : > { %4631 = vst [vmem:[%s5659_s15 + $0x38] sm:$0xff] %v4630_v42  ;;  %337 = vst [vmem:[%s5661_s16] sm:$0xff] %v336_v43  ;;  %s5975_s15 = smov [#allocation15] }
  0x56   : > { %4633 = vst [vmem:[%s5661_s16 + $0x8] sm:$0xff] %v4632_v45  ;;  %4635 = vst [vmem:[%s5661_s16 + $0x10] sm:$0xff] %v4634_v46 }
  0x57   : > { %4637 = vst [vmem:[%s5661_s16 + $0x18] sm:$0xff] %v4636_v47  ;;  %4639 = vst [vmem:[%s5661_s16 + $0x20] sm:$0xff] %v4638_v50 }
  0x58   : > { %4641 = vst [vmem:[%s5661_s16 + $0x28] sm:$0xff] %v4640_v51  ;;  %4643 = vst [vmem:[%s5661_s16 + $0x30] sm:$0xff] %v4642_v52  ;;  %v557_v35 = vld [vmem:[%s5769_s20] sm:$0xff]  ;;  %v4716_v36 = vld [vmem:[%s5769_s20 + $0x8] sm:$0xff] }
  0x59   : > { %4645 = vst [vmem:[%s5661_s16 + $0x38] sm:$0xff] %v4644_v54  ;;  %368 = vst [vmem:[%s366_s23] sm:$0xff] %v367_v55  ;;  %v561_v38 = vsel %vm560_vm1, 1.0, %v557_v35  ;;  %v568_v39 = vsel %vm567_vm9, 1.0, %v4716_v36  ;;  %v4718_v40 = vld [vmem:[%s5769_s20 + $0x10] sm:$0xff]  ;;  %v4720_v41 = vld [vmem:[%s5769_s20 + $0x18] sm:$0xff]  ;;  %vm4282_vm1 = vcmp.eq.s32.totalorder %v4272_v34, %v5902_v33 }
  0x5a   : > { %4647 = vst [vmem:[%s366_s23 + $0x8] sm:$0xff] %v4646_v56  ;;  %4649 = vst [vmem:[%s366_s23 + $0x10] sm:$0xff] %v4648_v58  ;;  %v4722_v42 = vld [vmem:[%s5769_s20 + $0x20] sm:$0xff]  ;;  %v575_v43 = vsel %vm574_vm10, 1.0, %v4718_v40  ;;  %v582_v44 = vsel %vm581_vm11, 1.0, %v4720_v41  ;;  %v4724_v46 = vld [vmem:[%s5769_s20 + $0x28] sm:$0xff] }
  0x5b   : > { %4651 = vst [vmem:[%s366_s23 + $0x18] sm:$0xff] %v4650_v59  ;;  %4653 = vst [vmem:[%s366_s23 + $0x20] sm:$0xff] %v4652_v60  ;;  %v589_v45 = vsel %vm588_vm12, 1.0, %v4722_v42  ;;  %v4726_v47 = vld [vmem:[%s5769_s20 + $0x30] sm:$0xff]  ;;  %v4728_v48 = vld [vmem:[%s5769_s20 + $0x38] sm:$0xff]  ;;  %v596_v49 = vsel %vm595_vm13, 1.0, %v4724_v46 }
  0x5c   : > { %4655 = vst [vmem:[%s366_s23 + $0x28] sm:$0xff] %v4654_v0  ;;  %4657 = vst [vmem:[%s366_s23 + $0x30] sm:$0xff] %v4656_v1  ;;  %v603_v50 = vsel %vm602_vm14, 1.0, %v4726_v47  ;;  %v610_v51 = vsel %vm609_vm15, 1.0, %v4728_v48  ;;  %v4279_v52 = vld [vmem:[%s4273_s27] sm:$0xff]  ;;  %v4730_v53 = vld [vmem:[%s4273_s27 + $0x8] sm:$0xff] }
  0x5d   : > { %4659 = vst [vmem:[%s366_s23 + $0x38] sm:$0xff] %v4658_v2  ;;  %399 = vst [vmem:[%s5711_s25] sm:$0xff] %v398_v6  ;;  %v4731_v54 = vld [vmem:[%s4273_s27 + $0x10] sm:$0xff]  ;;  %v4280_v55 = vsel %vm7875_vm0, %v4279_v52, 0.0  ;;  %v4286_v56 = vsel %vm7875_vm0, %v4730_v53, 0.0  ;;  %v4732_v58 = vld [vmem:[%s4273_s27 + $0x18] sm:$0xff]  ;;  %v4297_v41 = vadd.s32 16, %v4272_v34 }
  0x5e   : > { %4661 = vst [vmem:[%s5711_s25 + $0x8] sm:$0xff] %v4660_v7  ;;  %4663 = vst [vmem:[%s5711_s25 + $0x10] sm:$0xff] %v4662_v8  ;;  %v4295_v57 = vsel %vm7875_vm0, %v4731_v54, 0.0  ;;  %v4733_v59 = vld [vmem:[%s4273_s27 + $0x20] sm:$0xff]  ;;  %v4281_v60 = vmul.f32 %v4280_v55, %v4280_v55  ;;  %v4287_v61 = vmul.f32 %v4286_v56, %v4286_v56  ;;  %v4304_v63 = vsel %vm7875_vm0, %v4732_v58, 0.0  ;;  %v4734_v0 = vld [vmem:[%s4273_s27 + $0x28] sm:$0xff] }
  0x5f   : > { %4665 = vst [vmem:[%s5711_s25 + $0x18] sm:$0xff] %v4664_v10  ;;  %4667 = vst [vmem:[%s5711_s25 + $0x20] sm:$0xff] %v4666_v11  ;;  %v4296_v62 = vmul.f32 %v4295_v57, %v4295_v57  ;;  %v4313_v1 = vsel %vm7875_vm0, %v4733_v59, 0.0  ;;  %v4305_v3 = vmul.f32 %v4304_v63, %v4304_v63  ;;  %v4735_v4 = vld [vmem:[%s4273_s27 + $0x30] sm:$0xff]  ;;  %v4322_v5 = vsel %vm7875_vm0, %v4734_v0, 0.0  ;;  %v4736_v8 = vld [vmem:[%s4273_s27 + $0x38] sm:$0xff] }
  0x60   : > { %4669 = vst [vmem:[%s5711_s25 + $0x28] sm:$0xff] %v4668_v12  ;;  %4671 = vst [vmem:[%s5711_s25 + $0x30] sm:$0xff] %v4670_v14  ;;  %v4292_v2 = vadd.f32 %v4287_v61, %v4281_v60  ;;  %v4314_v7 = vmul.f32 %v4313_v1, %v4313_v1  ;;  %v4331_v9 = vsel %vm7875_vm0, %v4735_v4, 0.0  ;;  %v5882_v11 = vmul.f32 %v4322_v5, %v4322_v5  ;;  %v4359_v12 = vld [vmem:[%s5878_s29] sm:$0xff]  ;;  %v4737_v16 = vld [vmem:[%s5878_s29 + $0x8] sm:$0xff] }
  0x61   : > { %4673 = vst [vmem:[%s5711_s25 + $0x38] sm:$0xff] %v4672_v15  ;;  %500 = vst [vmem:[%s5731_s11] sm:$0xff] %v499_v19  ;;  %v4340_v13 = vsel %vm7875_vm0, %v4736_v8, 0.0  ;;  %v5887_v15 = vmul.f32 %v4331_v9, %v4331_v9  ;;  %v4360_v17 = vsel %vm7875_vm0, %v4359_v12, 0.0  ;;  %v4738_v20 = vld [vmem:[%s5878_s29 + $0x10] sm:$0xff]  ;;  %v4739_v21 = vld [vmem:[%s5878_s29 + $0x18] sm:$0xff]  ;;  %v4366_v22 = vsel %vm7875_vm0, %v4737_v16, 0.0 }
  0x62   : > { %4703 = vst [vmem:[%s5731_s11 + $0x8] sm:$0xff] %v506_v23  ;;  %4705 = vst [vmem:[%s5731_s11 + $0x10] sm:$0xff] %v513_v24  ;;  %v4301_v6 = vadd.f32 %v4296_v62, %v4292_v2  ;;  %v5893_v19 = vmul.f32 %v4340_v13, %v4340_v13  ;;  %v4740_v23 = vld [vmem:[%s5878_s29 + $0x20] sm:$0xff]  ;;  %v4372_v26 = vsel %vm7875_vm0, %v4738_v20, 0.0  ;;  %v4378_v27 = vsel %vm7875_vm0, %v4739_v21, 0.0  ;;  %v4741_v28 = vld [vmem:[%s5878_s29 + $0x28] sm:$0xff] }
  0x63   : > { %4707 = vst [vmem:[%s5731_s11 + $0x18] sm:$0xff] %v520_v25  ;;  %4709 = vst [vmem:[%s5731_s11 + $0x20] sm:$0xff] %v527_v29  ;;  %v5905_v25 = vmul.f32 %v4360_v17, %v4360_v17  ;;  %v4288_v29 = vadd.s32 8, %v4272_v34  ;;  %v4384_v32 = vsel %vm7875_vm0, %v4740_v23, 0.0  ;;  %v5919_v36 = vmul.f32 %v4372_v26, %v4372_v26 }
  0x64   : > { %4711 = vst [vmem:[%s5731_s11 + $0x28] sm:$0xff] %v534_v30  ;;  %4713 = vst [vmem:[%s5731_s11 + $0x30] sm:$0xff] %v541_v31  ;;  %v4310_v10 = vadd.f32 %v4305_v3, %v4301_v6  ;;  %v5913_v31 = vmul.f32 %v4366_v22, %v4366_v22  ;;  %v4283_v40 = vsel %vm4282_vm1, 0.0, %v4281_v60  ;;  %v4315_v46 = vadd.s32 32, %v4272_v34  ;;  %v4418_v58 = vld [vmem:[%s5930_s30] sm:$0xff]  ;;  %v4744_v1 = vld [vmem:[%s5930_s30 + $0x8] sm:$0xff] }
  0x65   : > { %4715 = vst [vmem:[%s5731_s11 + $0x38] sm:$0xff] %v548_v37  ;;  %562 = vst [vmem:[%s5769_s20] sm:$0xff] %v561_v38  ;;  %v5921_v37 = vmul.f32 %v4378_v27, %v4378_v27  ;;  %v4390_v38 = vsel %vm7875_vm0, %v4741_v28, 0.0  ;;  %vm4289_vm2 = vcmp.eq.s32.totalorder %v4288_v29, %v5902_v33  ;;  %vm4298_vm3 = vcmp.eq.s32.totalorder %v4297_v41, %v5902_v33  ;;  %v4746_v13 = vld [vmem:[%s5930_s30 + $0x18] sm:$0xff]  ;;  %v4747_v20 = vld [vmem:[%s5930_s30 + $0x20] sm:$0xff] }
  0x66   : > { %4717 = vst [vmem:[%s5769_s20 + $0x8] sm:$0xff] %v568_v39  ;;  %4719 = vst [vmem:[%s5769_s20 + $0x10] sm:$0xff] %v575_v43  ;;  %v4319_v14 = vadd.f32 %v4314_v7, %v4310_v10  ;;  %v5925_v39 = vmul.f32 %v4384_v32, %v4384_v32  ;;  %v4742_v43 = vld [vmem:[%s5878_s29 + $0x30] sm:$0xff]  ;;  %v4324_v48 = vadd.s32 40, %v4272_v34  ;;  %v4299_v52 = vsel %vm4298_vm3, 0.0, %v4296_v62  ;;  %v4750_v41 = vld [vmem:[%s5930_s30 + $0x38] sm:$0xff] }
  0x67   : > { %4721 = vst [vmem:[%s5769_s20 + $0x18] sm:$0xff] %v582_v44  ;;  %4723 = vst [vmem:[%s5769_s20 + $0x20] sm:$0xff] %v589_v45  ;;  %v4290_v44 = vsel %vm4289_vm2, 0.0, %v4287_v61  ;;  %v4306_v45 = vadd.s32 24, %v4272_v34  ;;  %vm4316_vm5 = vcmp.eq.s32.totalorder %v4315_v46, %v5902_v33  ;;  %v4396_v53 = vsel %vm7875_vm0, %v4742_v43, 0.0 }
  0x68   : > { %4725 = vst [vmem:[%s5769_s20 + $0x28] sm:$0xff] %v596_v49  ;;  %4727 = vst [vmem:[%s5769_s20 + $0x30] sm:$0xff] %v603_v50  ;;  %v4328_v18 = vadd.f32 %v5882_v11, %v4319_v14  ;;  %v4291_v47 = vadd.f32 %v4290_v44, %v4283_v40  ;;  %v4333_v49 = vadd.s32 48, %v4272_v34  ;;  %vm4325_vm6 = vcmp.eq.s32.totalorder %v4324_v48, %v5902_v33 }
  0x69   : > { %4729 = vst [vmem:[%s5769_s20 + $0x38] sm:$0xff] %v610_v51  ;;  %v4743_v51 = vld [vmem:[%s5878_s29 + $0x38] sm:$0xff]  ;;  %vm4307_vm4 = vcmp.eq.s32.totalorder %v4306_v45, %v5902_v33  ;;  %v5941_v57 = vmul.f32 %v4390_v38, %v4390_v38  ;;  %v4317_v59 = vsel %vm4316_vm5, 0.0, %v4314_v7  ;;  %v4342_v60 = vadd.s32 56, %v4272_v34  ;;  %v4745_v7 = vld [vmem:[%s5930_s30 + $0x10] sm:$0xff]  ;;  %v4477_v45 = vld [vmem:[%s5975_s15] sm:$0xff] }
  0x6a   : > { %v4337_v24 = vadd.f32 %v5887_v15, %v4328_v18  ;;  %v4300_v54 = vadd.f32 %v4299_v52, %v4291_v47  ;;  %v4308_v55 = vsel %vm4307_vm4, 0.0, %v4305_v3  ;;  %v4402_v61 = vsel %vm7875_vm0, %v4743_v51, 0.0 }
  0x6b   : > { %vm4334_vm7 = vcmp.eq.s32.totalorder %v4333_v49, %v5902_v33  ;;  %v4397_v0 = vmul.f32 %v4396_v53, %v4396_v53  ;;  %v4326_v2 = vsel %vm4325_vm6, 0.0, %v5882_v11  ;;  %v4419_v3 = vsel %vm7875_vm0, %v4418_v58, 0.0  ;;  %v4751_v49 = vld [vmem:[%s5975_s15 + $0x8] sm:$0xff]  ;;  %v4752_v53 = vld [vmem:[%s5975_s15 + $0x10] sm:$0xff]  ;;  %v4753_v58 = vld [vmem:[%s5975_s15 + $0x18] sm:$0xff] }
  0x6c   : > { %v4346_v30 = vadd.f32 %v5893_v19, %v4337_v24  ;;  %v4309_v62 = vadd.f32 %v4308_v55, %v4300_v54  ;;  %vm4343_vm8 = vcmp.eq.s32.totalorder %v4342_v60, %v5902_v33  ;;  %v4403_v6 = vmul.f32 %v4402_v61, %v4402_v61  ;;  %v4748_v24 = vld [vmem:[%s5930_s30 + $0x28] sm:$0xff] }
  0x6d   : > { %v4335_v8 = vsel %vm4334_vm7, 0.0, %v5887_v15  ;;  %v4425_v9 = vsel %vm7875_vm0, %v4744_v1, 0.0  ;;  %v4420_v11 = vmul.f32 %v4419_v3, %v4419_v3  ;;  %v4344_v14 = vsel %vm4343_vm8, 0.0, %v5893_v19 }
  0x6e   : > { %v4363_v35 = vadd.f32 %v5905_v25, %v4346_v30  ;;  %v4318_v4 = vadd.f32 %v4317_v59, %v4309_v62  ;;  %v4431_v16 = vsel %vm7875_vm0, %v4745_v7, 0.0  ;;  %v4352_v34 = vmov %v5612_v34  ;;  %v4749_v30 = vld [vmem:[%s5930_s30 + $0x30] sm:$0xff] }
  0x6f   : > { %v4408_v33 = vmov %v5610_v33  ;;  %v4426_v18 = vmul.f32 %v4425_v9, %v4425_v9  ;;  %v4411_v34 = vmov %v5612_v34  ;;  %v4437_v21 = vsel %vm7875_vm0, %v4746_v13, 0.0  ;;  %v4756_v9 = vld [vmem:[%s5975_s15 + $0x30] sm:$0xff] }
  0x70   : > { %v4369_v42 = vadd.f32 %v5913_v31, %v4363_v35  ;;  %v4327_v10 = vadd.f32 %v4326_v2, %v4318_v4  ;;  %v4432_v23 = vmul.f32 %v4431_v16, %v4431_v16  ;;  %v4443_v26 = vsel %vm7875_vm0, %v4747_v20, 0.0  ;;  %v4755_v4 = vld [vmem:[%s5975_s15 + $0x28] sm:$0xff] }
  0x71   : > { %v4438_v29 = vmul.f32 %v4437_v21, %v4437_v21  ;;  %v4449_v32 = vsel %vm7875_vm0, %v4748_v24, 0.0  ;;  %v4444_v40 = vmul.f32 %v4443_v26, %v4443_v26  ;;  %v4461_v46 = vsel %vm7875_vm0, %v4750_v41, 0.0 }
  0x72   : > { %v4375_v50 = vadd.f32 %v5919_v36, %v4369_v42  ;;  %v4336_v17 = vadd.f32 %v4335_v8, %v4327_v10  ;;  %v4455_v42 = vsel %vm7875_vm0, %v4749_v30, 0.0  ;;  %v4450_v44 = vmul.f32 %v4449_v32, %v4449_v32 }
  0x73   : > { %v4486_v54 = vsel %vm7875_vm0, %v4751_v49, 0.0  ;;  %v4495_v59 = vsel %vm7875_vm0, %v4752_v53, 0.0  ;;  %v4470_v34 = vmov %v5612_v34  ;;  %v4467_v33 = vmov %v5610_v33 }
  0x74   : > { %v4381_v56 = vadd.f32 %v5921_v37, %v4375_v50  ;;  %v4345_v22 = vadd.f32 %v4344_v14, %v4336_v17  ;;  %v4478_v50 = vsel %vm7875_vm0, %v4477_v45, 0.0  ;;  %v4487_v62 = vmul.f32 %v4486_v54, %v4486_v54  ;;  %v4757_v14 = vld [vmem:[%s5975_s15 + $0x38] sm:$0xff] }
  0x75   : > { %v4496_v3 = vmul.f32 %v4495_v59, %v4495_v59  ;;  %vm4480_vm9 = vcmp.eq.s32.totalorder %v4470_v34, %v4467_v33  ;;  %v4506_v32 = vadd.s32 24, %v4470_v34 }
  0x76   : > { %v4387_v63 = vadd.f32 %v5925_v39, %v4381_v56  ;;  %v4362_v27 = vadd.f32 %v5905_v25, %v4345_v22 }
  0x77   : > { %vm4507_vm12 = vcmp.eq.s32.totalorder %v4506_v32, %v4467_v33 }
  0x78   : > { %v4393_v5 = vadd.f32 %v5941_v57, %v4387_v63  ;;  %v4368_v35 = vadd.f32 %v5913_v31, %v4362_v27  ;;  %v4456_v31 = vmul.f32 %v4455_v42, %v4455_v42  ;;  %v4504_v63 = vsel %vm7875_vm0, %v4753_v58, 0.0 }
  0x79   : > { %v4505_v8 = vmul.f32 %v4504_v63, %v4504_v63 }
  0x7a   : > { %v4399_v12 = vadd.f32 %v4397_v0, %v4393_v5  ;;  %v4374_v25 = vadd.f32 %v5919_v36, %v4368_v35  ;;  %v4462_v36 = vmul.f32 %v4461_v46, %v4461_v46 }
  0x7b   : > { %v4508_v46 = vsel %vm4507_vm12, 0.0, %v4505_v8 }
  0x7c   : > { %v4405_v15 = vadd.f32 %v4403_v6, %v4399_v12  ;;  %v4380_v47 = vadd.f32 %v5921_v37, %v4374_v25  ;;  %v4479_v37 = vmul.f32 %v4478_v50, %v4478_v50 }
  0x7e   : > { %v4422_v19 = vadd.f32 %v4420_v11, %v4405_v15  ;;  %v4386_v51 = vadd.f32 %v5925_v39, %v4380_v47  ;;  %v4754_v39 = vld [vmem:[%s5975_s15 + $0x20] sm:$0xff] }
  0x80   : > { %v4428_v28 = vadd.f32 %v4426_v18, %v4422_v19  ;;  %v4392_v55 = vadd.f32 %v5941_v57, %v4386_v51  ;;  %v4513_v57 = vsel %vm7875_vm0, %v4754_v39, 0.0  ;;  %v4488_v19 = vadd.s32 8, %v4470_v34 }
  0x81   : > { %v4514_v13 = vmul.f32 %v4513_v57, %v4513_v57 }
  0x82   : > { %v4434_v38 = vadd.f32 %v4432_v23, %v4428_v28  ;;  %v4398_v60 = vadd.f32 %v4397_v0, %v4392_v55  ;;  %v4522_v0 = vsel %vm7875_vm0, %v4755_v4, 0.0  ;;  %v4497_v28 = vadd.s32 16, %v4470_v34 }
  0x83   : > { %v4523_v15 = vmul.f32 %v4522_v0, %v4522_v0  ;;  %vm4489_vm10 = vcmp.eq.s32.totalorder %v4488_v19, %v4467_v33 }
  0x84   : > { %v4440_v43 = vadd.f32 %v4438_v29, %v4434_v38  ;;  %v4404_v1 = vadd.f32 %v4403_v6, %v4398_v60  ;;  %v4531_v6 = vsel %vm7875_vm0, %v4756_v9, 0.0  ;;  %v4481_v38 = vsel %vm4480_vm9, 0.0, %v4479_v37 }
  0x85   : > { %v4532_v22 = vmul.f32 %v4531_v6, %v4531_v6  ;;  %vm4498_vm11 = vcmp.eq.s32.totalorder %v4497_v28, %v4467_v33  ;;  %v4490_v42 = vsel %vm4489_vm10, 0.0, %v4487_v62 }
  0x86   : > { %v4446_v48 = vadd.f32 %v4444_v40, %v4440_v43  ;;  %v4421_v5 = vadd.f32 %v4420_v11, %v4404_v1  ;;  %v4540_v11 = vsel %vm7875_vm0, %v4757_v14, 0.0  ;;  %v4499_v43 = vsel %vm4498_vm11, 0.0, %v4496_v3 }
  0x87   : > { %v4541_v26 = vmul.f32 %v4540_v11, %v4540_v11 }
  0x88   : > { %v4452_v52 = vadd.f32 %v4450_v44, %v4446_v48  ;;  %v4427_v10 = vadd.f32 %v4426_v18, %v4421_v5  ;;  %v4542_v48 = vadd.s32 56, %v4470_v34 }
  0x8a   : > { %v4458_v56 = vadd.f32 %v4456_v31, %v4452_v52  ;;  %v4433_v16 = vadd.f32 %v4432_v23, %v4427_v10  ;;  %vm4543_vm1 = vcmp.eq.s32.totalorder %v4542_v48, %v4467_v33 }
  0x8b   : > { %v4544_v53 = vsel %vm4543_vm1, 0.0, %v4541_v26 }
  0x8c   : > { %v4464_v61 = vadd.f32 %v4462_v36, %v4458_v56  ;;  %v4439_v20 = vadd.f32 %v4438_v29, %v4433_v16  ;;  %v4515_v29 = vadd.s32 32, %v4470_v34 }
  0x8e   : > { %v4483_v2 = vadd.f32 %v4479_v37, %v4464_v61  ;;  %v4445_v18 = vadd.f32 %v4444_v40, %v4439_v20  ;;  %v4524_v40 = vadd.s32 40, %v4470_v34  ;;  %vm4516_vm13 = vcmp.eq.s32.totalorder %v4515_v29, %v4467_v33 }
  0x90   : > { %v4492_v7 = vadd.f32 %v4487_v62, %v4483_v2  ;;  %v4451_v27 = vadd.f32 %v4450_v44, %v4445_v18  ;;  %v4533_v44 = vadd.s32 48, %v4470_v34  ;;  %vm4525_vm14 = vcmp.eq.s32.totalorder %v4524_v40, %v4467_v33 }
  0x91   : > { %v4526_v50 = vsel %vm4525_vm14, 0.0, %v4523_v15 }
  0x92   : > { %v4501_v12 = vadd.f32 %v4496_v3, %v4492_v7  ;;  %v4457_v30 = vadd.f32 %v4456_v31, %v4451_v27  ;;  %v4517_v31 = vsel %vm4516_vm13, 0.0, %v4514_v13  ;;  %vm4534_vm15 = vcmp.eq.s32.totalorder %v4533_v44, %v4467_v33 }
  0x93   : > { %v4535_v52 = vsel %vm4534_vm15, 0.0, %v4532_v22 }
  0x94   : > { %v4510_v17 = vadd.f32 %v4505_v8, %v4501_v12  ;;  %v4463_v41 = vadd.f32 %v4462_v36, %v4457_v30 }
  0x96   : > { %v4519_v21 = vadd.f32 %v4514_v13, %v4510_v17  ;;  %v4482_v25 = vadd.f32 %v4481_v38, %v4463_v41 }
  0x98   : > { %v4528_v24 = vadd.f32 %v4523_v15, %v4519_v21  ;;  %v4491_v45 = vadd.f32 %v4490_v42, %v4482_v25 }
  0x9a   : > { %v4537_v23 = vadd.f32 %v4532_v22, %v4528_v24  ;;  %v4500_v47 = vadd.f32 %v4499_v43, %v4491_v45 }
  0x9c   : > { %v4546_v35 = vadd.f32 %v4541_v26, %v4537_v23  ;;  %v4509_v49 = vadd.f32 %v4508_v46, %v4500_v47 }
  0x9e   : > { %4547 = vadd.xlane.f32.xlu0 %v4546_v35  ;;  %v4518_v51 = vadd.f32 %v4517_v31, %v4509_v49 }
  0xa0   : > { %v4527_v36 = vadd.f32 %v4526_v50, %v4518_v51 }
  0xa2   : > { %v4536_v54 = vadd.f32 %v4535_v52, %v4527_v36 }
  0xa4   : > { %v4545_v55 = vadd.f32 %v4544_v53, %v4536_v54 }
  0xa6   : > { %4555 = vadd.xlane.f32.xlu0 %v4545_v55 }
 0x12b   : > { %v4548_v56 = vpop.xlane.xlu0 %4547 }
 0x12c   : > { %v4549_v37 = vrot.slane %v4548_v56, 4 }
 0x12e   : > { %v4550_v58 = vadd.f32 %v4549_v37, %v4548_v56 }
 0x130   : > { %v4551_v59 = vrot.slane %v4550_v58, 2 }
 0x132   : > { %v4552_v39 = vadd.f32 %v4551_v59, %v4550_v58 }
 0x133   : > { %v4556_v60 = vpop.xlane.xlu0 %4555 }
 0x134   : > { %v4557_v61 = vrot.slane %v4556_v60, 4  ;;  %v4553_v2 = vrot.slane %v4552_v39, 1 }
 0x136   : > { %v4558_v62 = vadd.f32 %v4557_v61, %v4556_v60  ;;  %v4554_v57 = vadd.f32 %v4553_v2, %v4552_v39 }
 0x138   : > { %v4559_v63 = vrot.slane %v4558_v62, 2 }
 0x13a   : > { %v4560_v1 = vadd.f32 %v4559_v63, %v4558_v62 }
 0x13c   : > { %v4561_v3 = vrot.slane %v4560_v1, 1 }
 0x13e   : > { %v4562_v4 = vadd.f32 %v4561_v3, %v4560_v1 }
 0x140   : > { %5369 = vpush %v4562_v4 }
 0x141   : > { %5371 = vpush %v4554_v57 }
 0x171   : > { %s5370_s16 = spop %5369 }
 0x172   : > { %s5372_s23 = spop %5371 }
 0x173   : > { %s4565_s24 = smul.f32 1e-10, %s5372_s23 }
 0x175   : > { %p4566_p8 = scmp.le.f32.partialorder %s5370_s16, %s4565_s24 }
 0x176   : > { %s6013_s25 = smov (!%p4566_p8), 0  }
 0x177   : > { %4569 = sbr.rel (%p4566_p8) target bundleno = 1443 (0x5a3), region = 862 }
 0x17e LB: >> { %7926 = sst [smem:[#allocation35_spill]] %s5462_s25  ;;  %s6018_s21 = smov 0   ;;  %s5462_s25 = sphi %s6013_s25, %s8029_s25  }
 0x17f LB: >>> { %s7927_s11 = sld [smem:[#allocation31_spill]]  ;;  %s7928_s14 = sld [smem:[#allocation32_spill]]  ;;  %s5466_s21 = sphi %s6018_s21, %s939_s21  }
 0x180   : >>> { %s7929_s17 = sld [smem:[#allocation33_spill]]  ;;  %s7930_s20 = sld [smem:[#allocation34_spill]] }
 0x181   : >>> { %7931 = sst [smem:[#allocation36_spill]] %s5466_s21 }
 0x182   : >>> { %s6023_s27 = smov [#allocation12]  ;;  %v944_v33 = vmov %v5610_v33  ;;  %v947_v34 = vmov %v5612_v34  ;;  %s6036_s29 = smov [#allocation13] }
 0x183   : >>> { %v6028_v33 = vmov %v5610_v33  ;;  %v1009_v34 = vmov %v5612_v34  ;;  %v948_v5 = vld [vmem:[%s6023_s27] sm:$0xff]  ;;  %vm951_vm2 = vcmp.eq.s32.totalorder %v947_v34, %v944_v33  ;;  %v4758_v7 = vld [vmem:[%s6023_s27 + $0x8] sm:$0xff]  ;;  %v956_v8 = vadd.s32 8, %v947_v34  ;;  %v4759_v12 = vld [vmem:[%s6023_s27 + $0x10] sm:$0xff]  ;;  %s6050_s30 = smov [#allocation15]  ;;  %s941_s15 = smov [#allocation16] }
 0x184   : >>> { %v962_v9 = vadd.s32 16, %v947_v34  ;;  %v968_v0 = vadd.s32 24, %v947_v34  ;;  %v952_v10 = vsel %vm951_vm2, %v948_v5, 0.0  ;;  %v974_v13 = vadd.s32 32, %v947_v34  ;;  %v4760_v6 = vld [vmem:[%s6023_s27 + $0x18] sm:$0xff]  ;;  %v4761_v15 = vld [vmem:[%s6023_s27 + $0x20] sm:$0xff] }
 0x185   : >>> { %v980_v14 = vadd.s32 40, %v947_v34  ;;  %vm1013_vm3 = vcmp.eq.s32.totalorder %v1009_v34, %v6028_v33  ;;  %vm957_vm4 = vcmp.eq.s32.totalorder %v956_v8, %v944_v33  ;;  %v986_v16 = vadd.s32 48, %v947_v34  ;;  %v1010_v20 = vld [vmem:[%s6036_s29] sm:$0xff]  ;;  %v4762_v22 = vld [vmem:[%s6023_s27 + $0x28] sm:$0xff]  ;;  %v4763_v27 = vld [vmem:[%s6023_s27 + $0x30] sm:$0xff]  ;;  %s1003_s16 = smov [#allocation17]  ;;  %s6119_s11 = smov %s7927_s11 }
 0x186   : >>> { %vm963_vm5 = vcmp.eq.s32.totalorder %v962_v9, %v944_v33  ;;  %vm969_vm6 = vcmp.eq.s32.totalorder %v968_v0, %v944_v33  ;;  %v958_v17 = vsel %vm957_vm4, %v4758_v7, %v952_v10  ;;  %vm975_vm7 = vcmp.eq.s32.totalorder %v974_v13, %v944_v33  ;;  %v4765_v19 = vld [vmem:[%s6036_s29 + $0x8] sm:$0xff]  ;;  %v4766_v28 = vld [vmem:[%s6036_s29 + $0x10] sm:$0xff]  ;;  %v4764_v35 = vld [vmem:[%s6023_s27 + $0x38] sm:$0xff]  ;;  %s1130_s23 = smov [#allocation17]  ;;  %s1065_s24 = smov [#allocation18] }
 0x187   : >>> { %vm981_vm8 = vcmp.eq.s32.totalorder %v980_v14, %v944_v33  ;;  %v992_v11 = vadd.s32 56, %v947_v34  ;;  %v964_v21 = vsel %vm963_vm5, %v4759_v12, %v958_v17  ;;  %vm987_vm9 = vcmp.eq.s32.totalorder %v986_v16, %v944_v33  ;;  %v4767_v38 = vld [vmem:[%s6036_s29 + $0x18] sm:$0xff]  ;;  %v4768_v40 = vld [vmem:[%s6036_s29 + $0x20] sm:$0xff]  ;;  %v4769_v44 = vld [vmem:[%s6036_s29 + $0x28] sm:$0xff]  ;;  %s1128_s27 = smov [#allocation16]  ;;  %s1330_s26 = smov [#allocation24] }
 0x188   : >>> { %v1014_v18 = vsel %vm1013_vm3, %v1010_v20, 0.0  ;;  %v1018_v24 = vadd.s32 8, %v1009_v34  ;;  %v970_v26 = vsel %vm969_vm6, %v4760_v6, %v964_v21  ;;  %v1024_v23 = vadd.s32 16, %v1009_v34  ;;  %v4770_v48 = vld [vmem:[%s6036_s29 + $0x30] sm:$0xff]  ;;  %v1072_v50 = vld [vmem:[%s6050_s30] sm:$0xff]  ;;  %v4771_v36 = vld [vmem:[%s6036_s29 + $0x38] sm:$0xff]  ;;  %s6122_s14 = smov %s7928_s14  ;;  %s6127_s17 = smov %s7929_s17 }
 0x189   : >>> { %vm993_vm10 = vcmp.eq.s32.totalorder %v992_v11, %v944_v33  ;;  %v1030_v30 = vadd.s32 24, %v1009_v34  ;;  %v976_v32 = vsel %vm975_vm7, %v4761_v15, %v970_v26  ;;  %v1036_v41 = vadd.s32 32, %v1009_v34  ;;  %v4772_v37 = vld [vmem:[%s6050_s30 + $0x8] sm:$0xff]  ;;  %v4773_v60 = vld [vmem:[%s6050_s30 + $0x10] sm:$0xff]  ;;  %v4774_v2 = vld [vmem:[%s6050_s30 + $0x18] sm:$0xff]  ;;  %s1132_s29 = smov [#allocation18]  ;;  %s6130_s20 = smov %s7930_s20 }
 0x18a   : >>> { %vm1019_vm11 = vcmp.eq.s32.totalorder %v1018_v24, %v6028_v33  ;;  %v1042_v29 = vadd.s32 40, %v1009_v34  ;;  %v982_v42 = vsel %vm981_vm8, %v4762_v22, %v976_v32  ;;  %vm1025_vm12 = vcmp.eq.s32.totalorder %v1024_v23, %v6028_v33  ;;  %v4775_v57 = vld [vmem:[%s6050_s30 + $0x20] sm:$0xff]  ;;  %v4776_v9 = vld [vmem:[%s6050_s30 + $0x28] sm:$0xff]  ;;  %v4777_v10 = vld [vmem:[%s6050_s30 + $0x30] sm:$0xff]  ;;  %s1283_s22 = smov [#allocation23]  ;;  %s1394_s0 = smov [#allocation24] }
 0x18b   : >>> { %v1020_v25 = vsel %vm1019_vm11, %v4765_v19, %v1014_v18  ;;  %vm1031_vm13 = vcmp.eq.s32.totalorder %v1030_v30, %v6028_v33  ;;  %v988_v43 = vsel %vm987_vm9, %v4763_v27, %v982_v42  ;;  %vm1037_vm14 = vcmp.eq.s32.totalorder %v1036_v41, %v6028_v33  ;;  %v4778_v17 = vld [vmem:[%s6050_s30 + $0x38] sm:$0xff]  ;;  %s1167_s30 = smov [#allocation19]  ;;  %s7073_s1 = smov [#allocation13] }
 0x18c   : >>> { %v1026_v45 = vsel %vm1025_vm12, %v4766_v28, %v1020_v25  ;;  %vm1043_vm15 = vcmp.eq.s32.totalorder %v1042_v29, %v6028_v33  ;;  %v994_v46 = vsel %vm993_vm10, %v4764_v35, %v988_v43  ;;  %v1048_v31 = vadd.s32 48, %v1009_v34  ;;  %s7941_s2 = smov 127   ;;  %s7083_s3 = smov [#allocation14] }
 0x18d   : >>> { %v1032_v47 = vsel %vm1031_vm13, %v4767_v38, %v1026_v45  ;;  %v1054_v49 = vadd.s32 56, %v1009_v34  ;;  %v995_v51 = vrot.slane %v994_v46, 4  ;;  %v1068_v33 = vmov %v5610_v33  ;;  %s7089_s18 = smov [#allocation12]  ;;  %s7093_s10 = smov [#allocation15] }
 0x18e   : >>> { %v1038_v52 = vsel %vm1037_vm14, %v4768_v40, %v1032_v47  ;;  %v1071_v34 = vmov %v5612_v34  ;;  %vm1049_vm1 = vcmp.eq.s32.totalorder %v1048_v31, %v6028_v33  ;;  %s7102_s13 = smov [#allocation14]  ;;  %s7108_s9 = smov [#allocation12] }
 0x18f   : >>> { %v1044_v53 = vsel %vm1043_vm15, %v4769_v44, %v1038_v52  ;;  %vm1055_vm2 = vcmp.eq.s32.totalorder %v1054_v49, %v6028_v33  ;;  %vm1075_vm3 = vcmp.eq.s32.totalorder %v1071_v34, %v1068_v33  ;;  %v996_v54 = vadd.f32 %v995_v51, %v994_v46  ;;  %s7120_s8 = smov [#allocation15]  ;;  %s7132_s7 = smov [#allocation12] }
 0x190   : >>> { %v1050_v55 = vsel %vm1049_vm1, %v4770_v48, %v1044_v53  ;;  %v1076_v56 = vsel %vm1075_vm3, %v1072_v50, 0.0  ;;  %v1080_v58 = vadd.s32 8, %v1071_v34  ;;  %v1086_v61 = vadd.s32 16, %v1071_v34  ;;  %s7136_s6 = smov [#allocation13]  ;;  %s7156_s5 = smov [#allocation12] }
 0x191   : >>> { %v1056_v59 = vsel %vm1055_vm2, %v4771_v36, %v1050_v55  ;;  %v1092_v62 = vadd.s32 24, %v1071_v34  ;;  %v1098_v39 = vadd.s32 32, %v1071_v34  ;;  %v997_v63 = vrot.slane %v996_v54, 2  ;;  %s7160_s4 = smov [#allocation13]  ;;  %s7168_s19 = smov [#allocation15] }
 0x192   : >>> { %v1057_v1 = vrot.slane %v1056_v59, 4  ;;  %vm1081_vm4 = vcmp.eq.s32.totalorder %v1080_v58, %v1068_v33  ;;  %v1104_v3 = vadd.s32 40, %v1071_v34  ;;  %vm1087_vm5 = vcmp.eq.s32.totalorder %v1086_v61, %v1068_v33  ;;  %7942 = sst [smem:[#allocation37_spill]] %s7160_s4  ;;  %s7174_s28 = smov [#allocation14] }
 0x193   : >>> { %v1082_v4 = vsel %vm1081_vm4, %v4772_v37, %v1076_v56  ;;  %vm1093_vm6 = vcmp.eq.s32.totalorder %v1092_v62, %v1068_v33  ;;  %vm1099_vm7 = vcmp.eq.s32.totalorder %v1098_v39, %v1068_v33  ;;  %v998_v5 = vadd.f32 %v997_v63, %v996_v54  ;;  %7943 = sst [smem:[#allocation38_spill]] %s7174_s28  ;;  %s7180_s12 = smov [#allocation12] }
 0x194   : >>> { %v1058_v7 = vadd.f32 %v1057_v1, %v1056_v59  ;;  %v1088_v8 = vsel %vm1087_vm5, %v4773_v60, %v1082_v4  ;;  %vm1105_vm8 = vcmp.eq.s32.totalorder %v1104_v3, %v1068_v33  ;;  %v1110_v12 = vadd.s32 48, %v1071_v34  ;;  %s7184_s25 = smov [#allocation13]  ;;  %s7192_s21 = smov [#allocation15] }
 0x195   : >>> { %v1094_v0 = vsel %vm1093_vm6, %v4774_v2, %v1088_v8  ;;  %v1116_v13 = vadd.s32 56, %v1071_v34  ;;  %v999_v14 = vrot.slane %v998_v5, 1  ;;  %v1197_v34 = vmov %v5612_v34  ;;  %7944 = sst [smem:[#allocation39_spill]] %s7184_s25 }
 0x196   : >>> { %v1059_v6 = vrot.slane %v1058_v7, 2  ;;  %v1100_v16 = vsel %vm1099_vm7, %v4775_v57, %v1094_v0  ;;  %vm1111_vm9 = vcmp.eq.s32.totalorder %v1110_v12, %v1068_v33  ;;  %v1213_v34 = vmov %v5612_v34 }
 0x197   : >>> { %v1106_v15 = vsel %vm1105_vm8, %v4776_v9, %v1100_v16  ;;  %vm1117_vm10 = vcmp.eq.s32.totalorder %v1116_v13, %v1068_v33  ;;  %v1000_v11 = vadd.f32 %v999_v14, %v998_v5  ;;  %v1324_v34 = vmov %v5612_v34 }
 0x198   : >>> { %v1060_v20 = vadd.f32 %v1059_v6, %v1058_v7  ;;  %v1112_v21 = vsel %vm1111_vm9, %v4777_v10, %v1106_v15  ;;  %v1198_v63 = vadd.s32 8, %v1197_v34  ;;  %v1194_v33 = vmov %v5610_v33 }
 0x199   : >>> { %v1118_v22 = vsel %vm1117_vm10, %v4778_v17, %v1112_v21  ;;  %1001 = vst [vmem:[%s941_s15] sm:$0x1] %v1000_v11  ;;  %s1169_s15 = smov [#allocation20]  ;;  %v1179_v33 = vmov %v5610_v33  ;;  %v1182_v34 = vmov %v5612_v34  ;;  %v1214_v1 = vadd.s32 16, %v1213_v34 }
 0x19a   : >>> { %v1061_v18 = vrot.slane %v1060_v20, 1  ;;  %v1119_v19 = vrot.slane %v1118_v22, 4  ;;  %v1210_v33 = vmov %v5610_v33  ;;  %v1325_v2 = vadd.s32 8, %v1324_v34 }
 0x19b   : >>> { %v1321_v33 = vmov %v5610_v33  ;;  %v1229_v34 = vmov %v5612_v34  ;;  %vm1199_vm15 = vcmp.eq.s32.totalorder %v1198_v63, %v1194_v33  ;;  %vm1184_vm1 = vcmp.eq.s32.totalorder %v1182_v34, %v1179_v33 }
 0x19c   : >>> { %v1062_v24 = vadd.f32 %v1061_v18, %v1060_v20  ;;  %v1120_v26 = vadd.f32 %v1119_v19, %v1118_v22  ;;  %v1340_v34 = vmov %v5612_v34  ;;  %vm1215_vm2 = vcmp.eq.s32.totalorder %v1214_v1, %v1210_v33 }
 0x19d   : >>> { %v1226_v33 = vmov %v5610_v33  ;;  %vm1326_vm3 = vcmp.eq.s32.totalorder %v1325_v2, %v1321_v33  ;;  %v1230_v57 = vadd.s32 24, %v1229_v34  ;;  %v1341_v5 = vadd.s32 16, %v1340_v34 }
 0x19e   : >>> { %1063 = vst [vmem:[%s1003_s16] sm:$0x1] %v1062_v24  ;;  %v1121_v27 = vrot.slane %v1120_v26, 2  ;;  %s1126_s16 = smov [#allocation21]  ;;  %v1337_v33 = vmov %v5610_v33  ;;  %v1245_v34 = vmov %v5612_v34 }
 0x19f   : >>> { %s1171_s16 = smov %s1126_s16  ;;  %v1356_v34 = vmov %v5612_v34  ;;  %vm1231_vm4 = vcmp.eq.s32.totalorder %v1230_v57, %v1226_v33  ;;  %vm1342_vm5 = vcmp.eq.s32.totalorder %v1341_v5, %v1337_v33  ;;  %v1246_v6 = vadd.s32 32, %v1245_v34  ;;  %v3061_v57 = vld [vmem:[%s6119_s11] sm:$0xff] }
 0x1a0   : >>> { %v1122_v28 = vadd.f32 %v1121_v27, %v1120_v26  ;;  %v1129_v38 = vld [vmem:[%s1128_s27] sm:$0xff]  ;;  %s1175_s27 = smov [#allocation21]  ;;  %v1357_v16 = vadd.s32 24, %v1356_v34  ;;  %v1242_v33 = vmov %v5610_v33  ;;  %v1261_v34 = vmov %v5612_v34 }
 0x1a1   : >>> { %v1152_v49 = vand.u32 2147483647, %v1129_v38  ;;  %v1353_v33 = vmov %v5610_v33  ;;  %v1372_v34 = vmov %v5612_v34  ;;  %vm1247_vm6 = vcmp.eq.s32.totalorder %v1246_v6, %v1242_v33  ;;  %v3062_v5 = vld [vmem:[%s6122_s14] sm:$0xff] }
 0x1a2   : >>> { %v1123_v23 = vrot.slane %v1122_v28, 1  ;;  %vm1358_vm7 = vcmp.eq.s32.totalorder %v1357_v16, %v1353_v33  ;;  %v1262_v21 = vadd.s32 40, %v1261_v34  ;;  %v1373_v22 = vadd.s32 32, %v1372_v34 }
 0x1a3   : >>> { %v1258_v33 = vmov %v5610_v33  ;;  %v1388_v34 = vmov %v5612_v34 }
 0x1a4   : >>> { %v1124_v30 = vadd.f32 %v1123_v23, %v1122_v28  ;;  %v1369_v33 = vmov %v5610_v33  ;;  %vm1263_vm8 = vcmp.eq.s32.totalorder %v1262_v21, %v1258_v33  ;;  %v1389_v27 = vadd.s32 40, %v1388_v34 }
 0x1a5   : >>> { %v1131_v32 = vld [vmem:[%s1130_s23] sm:$0xff]  ;;  %s1127_s23 = smov [#allocation22]  ;;  %vm1374_vm9 = vcmp.eq.s32.totalorder %v1373_v22, %v1369_v33  ;;  %v1385_v33 = vmov %v5610_v33  ;;  %v1309_v34 = vmov %v5612_v34 }
 0x1a6   : >>> { %1125 = vst [vmem:[%s1065_s24] sm:$0x1] %v1124_v30  ;;  %v1135_v35 = vmul.f32 2.0, %v1131_v32  ;;  %v1153_v53 = vand.u32 2147483647, %v1131_v32  ;;  %s1173_s23 = smov %s1127_s23  ;;  %s1190_s24 = smov [#allocation21]  ;;  %v1306_v33 = vmov %v5610_v33  ;;  %v1404_v34 = vmov %v5612_v34 }
 0x1a7   : >>> { %v1277_v34 = vmov %v5612_v34  ;;  %vm1390_vm10 = vcmp.eq.s32.totalorder %v1389_v27, %v1385_v33 }
 0x1a8   : >>> { %5420 = vrcp.f32 %v1135_v35  ;;  %v1405_v35 = vadd.s32 48, %v1404_v34 }
 0x1ad   : >>> { %v1133_v41 = vld [vmem:[%s1132_s29] sm:$0xff]  ;;  %s1206_s29 = smov [#allocation21] }
 0x1ae   : >>> { %v1134_v29 = vsub.f32 %v1133_v41, %v1129_v38  ;;  %v1154_v50 = vand.u32 2147483647, %v1133_v41 }
 0x1b0   : >>> { %v1155_v36 = vmin.f32 %v1152_v49, %v1154_v50 }
 0x1b2   : >>> { %v5421_v42 = vpop.eup %5420  ;;  %v1156_v54 = vmul.f32 1.1920929e-08, %v1155_v36 }
 0x1b3   : >>> { %v1137_v25 = vmul.f32 %v5421_v42, %v1134_v29 }
 0x1b4   : >>> { %vm1157_vm14 = vcmp.le.f32.partialorder %v1153_v53, %v1156_v54 }
 0x1b5   : >>> { %v1139_v40 = vmul.f32 %v1137_v25, %v1137_v25  ;;  %vm1138_vm13 = vcmp.ge.f32.partialorder %v1137_v25, 0.0 }
 0x1b7   : >>> { %v1140_v43 = vadd.f32 1.0, %v1139_v40 }
 0x1b9   : >>> { %5422 = vrsqrt.f32 %v1140_v43  ;;  %vm1143_vm11 = vcmp.eq.f32.partialorder %v1140_v43, inf  ;;  %v1146_v44 = vand.u32 2147483648, %v1140_v43  ;;  %vm1145_vm12 = vcmp.eq.f32.partialorder %v1140_v43, 0.0 }
 0x1c3   : >>> { %v5423_v45 = vpop.eup %5422 }
 0x1c4   : >>> { %v1142_v46 = vmul.f32 %v5423_v45, %v1140_v43 }
 0x1c6   : >>> { %v1144_v47 = vsel %vm1143_vm11, %v1140_v43, %v1142_v46  ;;  %vm1311_vm11 = vcmp.eq.s32.totalorder %v1309_v34, %v1306_v33  ;;  %v1401_v33 = vmov %v5610_v33 }
 0x1c7   : >>> { %v1147_v48 = vsel %vm1145_vm12, %v1146_v44, %v1144_v47  ;;  %v1274_v33 = vmov %v5610_v33  ;;  %vm1406_vm12 = vcmp.eq.s32.totalorder %v1405_v35, %v1401_v33 }
 0x1c8   : >>> { %v1148_v31 = vxor.u32 2147483648, %v1147_v48 }
 0x1ca   : >>> { %v1149_v51 = vsel %vm1138_vm13, %v1147_v48, %v1148_v31 }
 0x1cb   : >>> { %v1150_v52 = vadd.f32 %v1149_v51, %v1137_v25 }
 0x1cd   : >>> { %5424 = vrcp.f32 %v1150_v52 }
 0x1d7   : >>> { %v5425_v55 = vpop.eup %5424 }
 0x1d8   : >>> { %v1158_v56 = vsel %vm1157_vm14, 0.0, %v5425_v55 }
 0x1d9   : >>> { %v1159_v37 = vmul.f32 %v1158_v56, %v1158_v56  ;;  %v1163_v58 = vmul.f32 %v1158_v56, %v1131_v32 }
 0x1db   : >>> { %v1160_v59 = vadd.f32 1.0, %v1159_v37  ;;  %v1164_v60 = vsub.f32 %v1129_v38, %v1163_v58  ;;  %v1166_v61 = vadd.f32 %v1163_v58, %v1133_v41  ;;  %v1278_v38 = vadd.s32 48, %v1277_v34 }
 0x1dc   : >>> { %v1420_v34 = vmov %v5612_v34 }
 0x1dd   : >>> { %5426 = vrsqrt.f32 %v1160_v59  ;;  %1168 = vst [vmem:[%s1167_s30] sm:$0xff] %v1164_v60  ;;  %1170 = vst [vmem:[%s1169_s15] sm:$0xff] %v1166_v61  ;;  %s1317_s30 = smov [#allocation22]  ;;  %s1222_s15 = smov [#allocation21]  ;;  %v1293_v34 = vmov %v5612_v34  ;;  %vm1279_vm13 = vcmp.eq.s32.totalorder %v1278_v38, %v1274_v33  ;;  %v1421_v40 = vadd.s32 56, %v1420_v34 }
 0x1de   : >>> { %v1294_v43 = vadd.s32 56, %v1293_v34  ;;  %v1417_v33 = vmov %v5610_v33 }
 0x1df   : >>> { %v1290_v33 = vmov %v5610_v33  ;;  %vm1422_vm14 = vcmp.eq.s32.totalorder %v1421_v40, %v1417_v33 }
 0x1e7   : >>> { %v5427_v62 = vpop.eup %5426 }
 0x1e8   : >>> { %1172 = vst [vmem:[%s1171_s16] sm:$0xff] %v5427_v62  ;;  %v1162_v39 = vmul.f32 %v5427_v62, %v1158_v56  ;;  %s1333_s16 = smov [#allocation22] }
 0x1ea   : >>> { %1174 = vst [vmem:[%s1173_s23] sm:$0xff] %v1162_v39  ;;  %s1238_s23 = smov [#allocation21] }
 0x1ef   : >>> { %v1191_v3 = vld [vmem:[%s1190_s24] ss:$0 sm:$0xff]  ;;  %s1349_s24 = smov [#allocation22] }
 0x1f0   : >>> { %v1176_v4 = vld [vmem:[%s1175_s27] ss:$0 sm:$0xff]  ;;  %v1200_v7 = vsel %vm1199_vm15, %v1191_v3, 0.0  ;;  %s1254_s27 = smov [#allocation21]  ;;  %vm1295_vm15 = vcmp.eq.s32.totalorder %v1294_v43, %v1290_v33  ;;  %v6674_v33 = vmov %v5610_v33 }
 0x1f1   : >>> { %v1185_v8 = vsel %vm1184_vm1, %v1176_v4, 0.0  ;;  %v1207_v9 = vld [vmem:[%s1206_s29] ss:$0 sm:$0xff]  ;;  %1201 = vadd.xlane.f32.xlu1 %v1200_v7  ;;  %s1365_s29 = smov [#allocation22]  ;;  %vm7874_vm1 = vcmp.eq.s32.totalorder %v5612_v34, 0  ;;  %v6677_v33 = vmov %v5610_v33 }
 0x1f2   : >>> { %1186 = vadd.xlane.f32.xlu0 %v1185_v8  ;;  %v1318_v0 = vld [vmem:[%s1317_s30] ss:$0 sm:$0xff]  ;;  %v1216_v10 = vsel %vm1215_vm2, %v1207_v9, 0.0  ;;  %s1381_s30 = smov [#allocation22]  ;;  %vm7873_vm2 = vcmp.eq.s32.totalorder %v5612_v34, 7  ;;  %v6667_v34 = vmov %v5612_v34 }
 0x1f3   : >>> { %v1327_v12 = vsel %vm1326_vm3, %v1318_v0, 0.0  ;;  %v1223_v13 = vld [vmem:[%s1222_s15] ss:$0 sm:$0xff]  ;;  %s1302_s15 = smov [#allocation22]  ;;  %vm1931_vm3 = vcmp.eq.s32.totalorder %v6667_v34, %v6674_v33 }
 0x1f4   : >>> { %v1334_v14 = vld [vmem:[%s1333_s16] ss:$0 sm:$0xff]  ;;  %v1232_v17 = vsel %vm1231_vm4, %v1223_v13, 0.0  ;;  %s1397_s16 = smov [#allocation22] }
 0x1f5   : >>> { %1328 = vadd.xlane.f32.xlu1 %v1327_v12  ;;  %v1343_v15 = vsel %vm1342_vm5, %v1334_v14, 0.0  ;;  %v1239_v11 = vld [vmem:[%s1238_s23] ss:$0 sm:$0xff]  ;;  %s1270_s23 = smov [#allocation21] }
 0x1f6   : >>> { %1217 = vadd.xlane.f32.xlu0 %v1216_v10  ;;  %v1350_v20 = vld [vmem:[%s1349_s24] ss:$0 sm:$0xff]  ;;  %v1248_v18 = vsel %vm1247_vm6, %v1239_v11, 0.0  ;;  %s1413_s24 = smov [#allocation22] }
 0x1f7   : >>> { %v1359_v19 = vsel %vm1358_vm7, %v1350_v20, 0.0  ;;  %v1255_v24 = vld [vmem:[%s1254_s27] ss:$0 sm:$0xff]  ;;  %s1286_s27 = smov [#allocation21] }
 0x1f8   : >>> { %v1366_v26 = vld [vmem:[%s1365_s29] ss:$0 sm:$0xff]  ;;  %v1264_v28 = vsel %vm1263_vm8, %v1255_v24, 0.0  ;;  %s1188_s29 = smov [#allocation23] }
 0x1f9   : >>> { %1344 = vadd.xlane.f32.xlu1 %v1343_v15  ;;  %v1375_v23 = vsel %vm1374_vm9, %v1366_v26, 0.0  ;;  %v1382_v30 = vld [vmem:[%s1381_s30] ss:$0 sm:$0xff]  ;;  %s1203_s30 = smov [#allocation23] }
 0x1fa   : >>> { %1233 = vadd.xlane.f32.xlu0 %v1232_v17  ;;  %v1303_v32 = vld [vmem:[%s1302_s15] ss:$0 sm:$0xff]  ;;  %v1391_v41 = vsel %vm1390_vm10, %v1382_v30, 0.0  ;;  %s1219_s15 = smov [#allocation23] }
 0x1fb   : >>> { %v1312_v29 = vsel %vm1311_vm11, %v1303_v32, 0.0  ;;  %v1398_v42 = vld [vmem:[%s1397_s16] ss:$0 sm:$0xff]  ;;  %s1235_s16 = smov [#allocation23] }
 0x1fc   : >>> { %v1271_v25 = vld [vmem:[%s1270_s23] ss:$0 sm:$0xff]  ;;  %v1407_v45 = vsel %vm1406_vm12, %v1398_v42, 0.0  ;;  %s1251_s23 = smov [#allocation23] }
 0x1fd   : >>> { %1360 = vadd.xlane.f32.xlu1 %v1359_v19  ;;  %v1280_v44 = vsel %vm1279_vm13, %v1271_v25, 0.0  ;;  %v1414_v46 = vld [vmem:[%s1413_s24] ss:$0 sm:$0xff]  ;;  %s1267_s24 = smov [#allocation23] }
 0x1fe   : >>> { %1249 = vadd.xlane.f32.xlu0 %v1248_v18  ;;  %v1287_v47 = vld [vmem:[%s1286_s27] ss:$0 sm:$0xff]  ;;  %v1423_v48 = vsel %vm1422_vm14, %v1414_v46, 0.0  ;;  %s1315_s27 = smov [#allocation24] }
 0x1ff   : >>> { %v1296_v31 = vsel %vm1295_vm15, %v1287_v47, 0.0  ;;  %v3063_v7 = vld [vmem:[%s6127_s17] sm:$0xff] }
 0x200   : >>> { %v3064_v8 = vld [vmem:[%s6130_s20] sm:$0xff] }
 0x201   : >>> { %1376 = vadd.xlane.f32.xlu1 %v1375_v23 }
 0x202   : >>> { %1265 = vadd.xlane.f32.xlu0 %v1264_v28 }
 0x205   : >>> { %1392 = vadd.xlane.f32.xlu1 %v1391_v41 }
 0x206   : >>> { %1313 = vadd.xlane.f32.xlu0 %v1312_v29 }
 0x209   : >>> { %1408 = vadd.xlane.f32.xlu1 %v1407_v45 }
 0x20a   : >>> { %1281 = vadd.xlane.f32.xlu0 %v1280_v44 }
 0x20d   : >>> { %1424 = vadd.xlane.f32.xlu1 %v1423_v48 }
 0x20e   : >>> { %1297 = vadd.xlane.f32.xlu0 %v1296_v31 }
 0x27e   : >>> { %v1202_v49 = vpop.xlane.xlu1 %1201 }
 0x27f   : >>> { %v1187_v50 = vpop.xlane.xlu0 %1186 }
 0x280   : >>> { %1189 = vst [vmem:[%s1188_s29] sm:$0xff] %v1187_v50  ;;  %s1346_s29 = smov [#allocation24] }
 0x281   : >>> { %4779 = vst [vmem:[%s1203_s30 + $0x8] sm:$0xff] %v1202_v49  ;;  %s1362_s30 = smov [#allocation24] }
 0x282   : >>> { %v1329_v52 = vpop.xlane.xlu1 %1328 }
 0x283   : >>> { %v1218_v51 = vpop.xlane.xlu0 %1217 }
 0x284   : >>> { %4780 = vst [vmem:[%s1219_s15 + $0x10] sm:$0xff] %v1218_v51  ;;  %s1378_s15 = smov [#allocation24] }
 0x286   : >>> { %v1345_v53 = vpop.xlane.xlu1 %1344 }
 0x287   : >>> { %v1234_v36 = vpop.xlane.xlu0 %1233 }
 0x288   : >>> { %4781 = vst [vmem:[%s1235_s16 + $0x18] sm:$0xff] %v1234_v36  ;;  %s1410_s16 = smov [#allocation24] }
 0x28a   : >>> { %v1361_v55 = vpop.xlane.xlu1 %1360 }
 0x28b   : >>> { %v1250_v54 = vpop.xlane.xlu0 %1249 }
 0x28c   : >>> { %4782 = vst [vmem:[%s1251_s23 + $0x20] sm:$0xff] %v1250_v54  ;;  %s1426_s23 = smov [#allocation24] }
 0x28e   : >>> { %v1377_v37 = vpop.xlane.xlu1 %1376 }
 0x28f   : >>> { %v1266_v56 = vpop.xlane.xlu0 %1265 }
 0x290   : >>> { %4783 = vst [vmem:[%s1267_s24 + $0x28] sm:$0xff] %v1266_v56  ;;  %s1299_s24 = smov [#allocation23] }
 0x292   : >>> { %v1393_v58 = vpop.xlane.xlu1 %1392 }
 0x293   : >>> { %v1314_v59 = vpop.xlane.xlu0 %1313 }
 0x294   : >>> { %1316 = vst [vmem:[%s1315_s27] sm:$0xff] %v1314_v59  ;;  %s6108_s27 = smov [#allocation12] }
 0x295   : >>> { %4786 = vst [vmem:[%s1330_s26 + $0x8] sm:$0xff] %v1329_v52  ;;  %s1431_s26 = smov [#allocation24]  ;;  %v1437_v63 = vld [vmem:[%s6108_s27] sm:$0xff] }
 0x296   : >>> { %4787 = vst [vmem:[%s1346_s29 + $0x10] sm:$0xff] %v1345_v53  ;;  %v1409_v60 = vpop.xlane.xlu1 %1408  ;;  %s6110_s29 = smov [#allocation13] }
 0x297   : >>> { %4788 = vst [vmem:[%s1362_s30 + $0x18] sm:$0xff] %v1361_v55  ;;  %v1282_v61 = vpop.xlane.xlu0 %1281  ;;  %s3055_s30 = smov [#allocation24]  ;;  %v1438_v1 = vld [vmem:[%s6110_s29] sm:$0xff] }
 0x298   : >>> { %4789 = vst [vmem:[%s1378_s15 + $0x20] sm:$0xff] %v1377_v37  ;;  %4784 = vst [vmem:[%s1283_s22 + $0x30] sm:$0xff] %v1282_v61  ;;  %s6112_s22 = smov [#allocation14]  ;;  %s1429_s15 = smov [#allocation23] }
 0x299   : >>> { %4790 = vst [vmem:[%s1394_s0 + $0x28] sm:$0xff] %v1393_v58  ;;  %s6114_s0 = smov [#allocation15]  ;;  %v1439_v2 = vld [vmem:[%s6112_s22] sm:$0xff] }
 0x29a   : >>> { %4791 = vst [vmem:[%s1410_s16 + $0x30] sm:$0xff] %v1409_v60  ;;  %v1425_v62 = vpop.xlane.xlu1 %1424  ;;  %v1440_v3 = vld [vmem:[%s6114_s0] sm:$0xff]  ;;  %s3053_s16 = smov [#allocation23] }
 0x29b   : >>> { %v1298_v39 = vpop.xlane.xlu0 %1297  ;;  %4792 = vst [vmem:[%s1426_s23 + $0x38] sm:$0xff] %v1425_v62  ;;  %s1460_s23 = smov [#allocation24] }
 0x29c   : >>> { %4785 = vst [vmem:[%s1299_s24 + $0x38] sm:$0xff] %v1298_v39  ;;  %s6140_s24 = smov [#allocation12] }
 0x2a2   : >>> { %v1432_v4 = vld [vmem:[%s1431_s26] sm:$0xff]  ;;  %s1457_s26 = smov [#allocation23]  ;;  %v4794_v42 = vld [vmem:[%s1460_s23 + $0x8] sm:$0xff]  ;;  %s6178_s23 = smov [#allocation13] }
 0x2a3   : >>> { %v1442_v9 = vmul.f32 %v1439_v2, %v1432_v4  ;;  %v1445_v0 = vmul.f32 %v1440_v3, %v1432_v4  ;;  %v1447_v10 = vmul.f32 %v1437_v63, %v1432_v4  ;;  %v1450_v12 = vmul.f32 %v1438_v1, %v1432_v4  ;;  %v3056_v13 = vld [vmem:[%s3055_s30] sm:$0xff]  ;;  %v4793_v25 = vld [vmem:[%s1457_s26 + $0x8] sm:$0xff]  ;;  %s3084_s30 = smov [#allocation24]  ;;  %s6182_s26 = smov [#allocation14] }
 0x2a4   : >>> { %v1430_v14 = vld [vmem:[%s1429_s15] sm:$0xff]  ;;  %v3066_v11 = vmul.f32 %v3063_v7, %v3056_v13  ;;  %v3069_v20 = vmul.f32 %v3064_v8, %v3056_v13  ;;  %v3071_v21 = vmul.f32 %v3061_v57, %v3056_v13  ;;  %v3074_v22 = vmul.f32 %v3062_v5, %v3056_v13  ;;  %v5152_v37 = vld [vmem:[%s3084_s30 + $0x8] sm:$0xff]  ;;  %s1494_s15 = smov [#allocation24]  ;;  %s6212_s30 = smov [#allocation12] }
 0x2a5   : >>> { %v1441_v6 = vmul.f32 %v1437_v63, %v1430_v14  ;;  %v1444_v16 = vmul.f32 %v1438_v1, %v1430_v14  ;;  %v1448_v17 = vmul.f32 %v1439_v2, %v1430_v14  ;;  %v1451_v15 = vmul.f32 %v1440_v3, %v1430_v14  ;;  %v3054_v27 = vld [vmem:[%s3053_s16] sm:$0xff]  ;;  %s6176_s16 = smov [#allocation12] }
 0x2a6   : >>> { %v3065_v28 = vmul.f32 %v3061_v57, %v3054_v27  ;;  %v3068_v23 = vmul.f32 %v3062_v5, %v3054_v27  ;;  %v3072_v30 = vmul.f32 %v3063_v7, %v3054_v27  ;;  %v3075_v32 = vmul.f32 %v3064_v8, %v3054_v27 }
 0x2a7   : >>> { %v1443_v18 = vsub.f32 %v1441_v6, %v1442_v9  ;;  %v1446_v19 = vsub.f32 %v1444_v16, %v1445_v0  ;;  %v1449_v24 = vadd.f32 %v1448_v17, %v1447_v10  ;;  %v1452_v26 = vadd.f32 %v1451_v15, %v1450_v12  ;;  %v4804_v0 = vld [vmem:[%s1494_s15 + $0x10] sm:$0xff]  ;;  %s1525_s15 = smov [#allocation23] }
 0x2a8   : >>> { %v3067_v35 = vsub.f32 %v3065_v28, %v3066_v11  ;;  %v3070_v38 = vsub.f32 %v3068_v23, %v3069_v20  ;;  %v3073_v41 = vadd.f32 %v3072_v30, %v3071_v21  ;;  %v3076_v29 = vadd.f32 %v3075_v32, %v3074_v22 }
 0x2a9   : >>> { %1453 = vst [vmem:[%s6108_s27] sm:$0xff] %v1443_v18  ;;  %1454 = vst [vmem:[%s6110_s29] sm:$0xff] %v1446_v19  ;;  %s6146_s27 = smov [#allocation13]  ;;  %s6148_s29 = smov [#allocation14] }
 0x2aa   : >>> { %1455 = vst [vmem:[%s6112_s22] sm:$0xff] %v1449_v24  ;;  %1456 = vst [vmem:[%s6114_s0] sm:$0xff] %v1452_v26  ;;  %s6150_s22 = smov [#allocation15]  ;;  %s3081_s0 = smov [#allocation23] }
 0x2ab   : >>> { %3077 = vst [vmem:[%s6119_s11] sm:$0xff] %v3067_v35  ;;  %3078 = vst [vmem:[%s6122_s14] sm:$0xff] %v3070_v38  ;;  %s6153_s11 = smov %s7927_s11  ;;  %s6156_s14 = smov %s7928_s14  ;;  %v5151_v36 = vld [vmem:[%s3081_s0 + $0x8] sm:$0xff] }
 0x2ac   : >>> { %3079 = vst [vmem:[%s6127_s17] sm:$0xff] %v3073_v41  ;;  %3080 = vst [vmem:[%s6130_s20] sm:$0xff] %v3076_v29  ;;  %s6159_s17 = smov %s7929_s17  ;;  %s6165_s20 = smov %s7930_s20 }
 0x2ad   : >>> { %s1528_s0 = smov [#allocation24] }
 0x2b0   : >>> { %v4795_v40 = vld [vmem:[%s6140_s24 + $0x8] sm:$0xff] }
 0x2b1   : >>> { %v4796_v43 = vld [vmem:[%s6146_s27 + $0x8] sm:$0xff]  ;;  %v1475_v46 = vmul.f32 %v4795_v40, %v4793_v25  ;;  %v1481_v31 = vmul.f32 %v4795_v40, %v4794_v42 }
 0x2b2   : >>> { %v4797_v45 = vld [vmem:[%s6148_s29 + $0x8] sm:$0xff]  ;;  %v1478_v48 = vmul.f32 %v4796_v43, %v4793_v25  ;;  %v1484_v51 = vmul.f32 %v4796_v43, %v4794_v42 }
 0x2b3   : >>> { %v4798_v44 = vld [vmem:[%s6150_s22 + $0x8] sm:$0xff]  ;;  %v1476_v47 = vmul.f32 %v4797_v45, %v4794_v42  ;;  %v1482_v50 = vmul.f32 %v4797_v45, %v4793_v25 }
 0x2b4   : >>> { %v1479_v49 = vmul.f32 %v4798_v44, %v4794_v42  ;;  %v1485_v52 = vmul.f32 %v4798_v44, %v4793_v25  ;;  %v5153_v54 = vld [vmem:[%s6153_s11 + $0x8] sm:$0xff] }
 0x2b5   : >>> { %v1477_v53 = vsub.f32 %v1475_v46, %v1476_v47  ;;  %v5154_v55 = vld [vmem:[%s6156_s14 + $0x8] sm:$0xff]  ;;  %v1483_v59 = vadd.f32 %v1482_v50, %v1481_v31  ;;  %v3099_v62 = vmul.f32 %v5153_v54, %v5151_v36  ;;  %v3105_v2 = vmul.f32 %v5153_v54, %v5152_v37  ;;  %v4813_v50 = vld [vmem:[%s1525_s15 + $0x18] sm:$0xff]  ;;  %s6253_s15 = smov [#allocation14] }
 0x2b6   : >>> { %v5155_v56 = vld [vmem:[%s6159_s17 + $0x8] sm:$0xff]  ;;  %v1480_v58 = vsub.f32 %v1478_v48, %v1479_v49  ;;  %v1486_v60 = vadd.f32 %v1485_v52, %v1484_v51  ;;  %v3102_v63 = vmul.f32 %v5154_v55, %v5151_v36  ;;  %v3108_v4 = vmul.f32 %v5154_v55, %v5152_v37  ;;  %v4814_v49 = vld [vmem:[%s1528_s0 + $0x18] sm:$0xff]  ;;  %s6250_s0 = smov [#allocation13] }
 0x2b7   : >>> { %v5156_v61 = vld [vmem:[%s6165_s20 + $0x8] sm:$0xff]  ;;  %4799 = vst [vmem:[%s6140_s24 + $0x8] sm:$0xff] %v1477_v53  ;;  %v3100_v39 = vmul.f32 %v5155_v56, %v5152_v37  ;;  %4801 = vst [vmem:[%s6148_s29 + $0x8] sm:$0xff] %v1483_v59  ;;  %v3106_v3 = vmul.f32 %v5155_v56, %v5151_v36  ;;  %s1491_s24 = smov [#allocation23]  ;;  %s3118_s29 = smov [#allocation24] }
 0x2b8   : >>> { %v3103_v1 = vmul.f32 %v5156_v61, %v5152_v37  ;;  %4800 = vst [vmem:[%s6146_s27 + $0x8] sm:$0xff] %v1480_v58  ;;  %4802 = vst [vmem:[%s6150_s22 + $0x8] sm:$0xff] %v1486_v60  ;;  %v3109_v57 = vmul.f32 %v5156_v61, %v5151_v36  ;;  %s6184_s27 = smov [#allocation15]  ;;  %s3115_s22 = smov [#allocation23]  ;;  %v4803_v10 = vld [vmem:[%s1491_s24 + $0x10] sm:$0xff] }
 0x2b9   : >>> { %v3101_v5 = vsub.f32 %v3099_v62, %v3100_v39  ;;  %v3107_v8 = vadd.f32 %v3106_v3, %v3105_v2  ;;  %v5162_v22 = vld [vmem:[%s3118_s29 + $0x10] sm:$0xff]  ;;  %s6221_s24 = smov [#allocation15]  ;;  %s1562_s29 = smov [#allocation24] }
 0x2ba   : >>> { %v3104_v7 = vsub.f32 %v3102_v63, %v3103_v1  ;;  %v3110_v9 = vadd.f32 %v3109_v57, %v3108_v4  ;;  %v5161_v28 = vld [vmem:[%s3115_s22 + $0x10] sm:$0xff]  ;;  %s6248_s22 = smov [#allocation12] }
 0x2bb   : >>> { %5157 = vst [vmem:[%s6153_s11 + $0x8] sm:$0xff] %v3101_v5  ;;  %5159 = vst [vmem:[%s6159_s17 + $0x8] sm:$0xff] %v3107_v8  ;;  %s6190_s11 = smov %s7927_s11  ;;  %s6199_s17 = smov %s7929_s17 }
 0x2bc   : >>> { %5158 = vst [vmem:[%s6156_s14 + $0x8] sm:$0xff] %v3104_v7  ;;  %5160 = vst [vmem:[%s6165_s20 + $0x8] sm:$0xff] %v3110_v9  ;;  %s6193_s14 = smov %s7928_s14  ;;  %s6202_s20 = smov %s7930_s20 }
 0x2be   : >>> { %v4805_v12 = vld [vmem:[%s6176_s16 + $0x10] sm:$0xff] }
 0x2bf   : >>> { %v4806_v13 = vld [vmem:[%s6178_s23 + $0x10] sm:$0xff]  ;;  %v1509_v16 = vmul.f32 %v4805_v12, %v4803_v10  ;;  %v1515_v17 = vmul.f32 %v4805_v12, %v4804_v0 }
 0x2c0   : >>> { %v4807_v14 = vld [vmem:[%s6182_s26 + $0x10] sm:$0xff]  ;;  %v1512_v11 = vmul.f32 %v4806_v13, %v4803_v10  ;;  %v1518_v18 = vmul.f32 %v4806_v13, %v4804_v0 }
 0x2c1   : >>> { %v4808_v6 = vld [vmem:[%s6184_s27 + $0x10] sm:$0xff]  ;;  %v1510_v15 = vmul.f32 %v4807_v14, %v4804_v0  ;;  %v1516_v21 = vmul.f32 %v4807_v14, %v4803_v10 }
 0x2c2   : >>> { %v1513_v20 = vmul.f32 %v4808_v6, %v4804_v0  ;;  %v1519_v19 = vmul.f32 %v4808_v6, %v4803_v10  ;;  %v5163_v23 = vld [vmem:[%s6190_s11 + $0x10] sm:$0xff] }
 0x2c3   : >>> { %v1511_v24 = vsub.f32 %v1509_v16, %v1510_v15  ;;  %v1517_v27 = vadd.f32 %v1516_v21, %v1515_v17  ;;  %v5164_v30 = vld [vmem:[%s6193_s14 + $0x10] sm:$0xff]  ;;  %v3133_v41 = vmul.f32 %v5163_v23, %v5161_v28  ;;  %v3139_v42 = vmul.f32 %v5163_v23, %v5162_v22 }
 0x2c4   : >>> { %v1514_v26 = vsub.f32 %v1512_v11, %v1513_v20  ;;  %v1520_v32 = vadd.f32 %v1519_v19, %v1518_v18  ;;  %v5165_v35 = vld [vmem:[%s6199_s17 + $0x10] sm:$0xff]  ;;  %v3136_v29 = vmul.f32 %v5164_v30, %v5161_v28  ;;  %v3142_v45 = vmul.f32 %v5164_v30, %v5162_v22  ;;  %v4824_v20 = vld [vmem:[%s1562_s29 + $0x20] sm:$0xff]  ;;  %s1593_s29 = smov [#allocation23] }
 0x2c5   : >>> { %v5166_v38 = vld [vmem:[%s6202_s20 + $0x10] sm:$0xff]  ;;  %4809 = vst [vmem:[%s6176_s16 + $0x10] sm:$0xff] %v1511_v24  ;;  %4811 = vst [vmem:[%s6182_s26 + $0x10] sm:$0xff] %v1517_v27  ;;  %v3134_v25 = vmul.f32 %v5165_v35, %v5162_v22  ;;  %v3140_v43 = vmul.f32 %v5165_v35, %v5161_v28  ;;  %s6214_s16 = smov [#allocation13]  ;;  %s3152_s26 = smov [#allocation24] }
 0x2c6   : >>> { %4810 = vst [vmem:[%s6178_s23 + $0x10] sm:$0xff] %v1514_v26  ;;  %v3137_v40 = vmul.f32 %v5166_v38, %v5162_v22  ;;  %4812 = vst [vmem:[%s6184_s27 + $0x10] sm:$0xff] %v1520_v32  ;;  %v3143_v44 = vmul.f32 %v5166_v38, %v5161_v28  ;;  %s6216_s23 = smov [#allocation14]  ;;  %s3149_s27 = smov [#allocation23]  ;;  %v5172_v62 = vld [vmem:[%s3152_s26 + $0x18] sm:$0xff] }
 0x2c7   : >>> { %v3135_v46 = vsub.f32 %v3133_v41, %v3134_v25  ;;  %v3141_v48 = vadd.f32 %v3140_v43, %v3139_v42  ;;  %v5171_v63 = vld [vmem:[%s3149_s27 + $0x18] sm:$0xff]  ;;  %s1596_s26 = smov [#allocation24]  ;;  %s6284_s27 = smov [#allocation12] }
 0x2c8   : >>> { %v3138_v47 = vsub.f32 %v3136_v29, %v3137_v40  ;;  %v3144_v31 = vadd.f32 %v3143_v44, %v3142_v45 }
 0x2c9   : >>> { %5167 = vst [vmem:[%s6190_s11 + $0x10] sm:$0xff] %v3135_v46  ;;  %5169 = vst [vmem:[%s6199_s17 + $0x10] sm:$0xff] %v3141_v48  ;;  %s6225_s11 = smov %s7927_s11  ;;  %s6234_s17 = smov %s7929_s17 }
 0x2ca   : >>> { %5168 = vst [vmem:[%s6193_s14 + $0x10] sm:$0xff] %v3138_v47  ;;  %5170 = vst [vmem:[%s6202_s20 + $0x10] sm:$0xff] %v3144_v31  ;;  %s6231_s14 = smov %s7928_s14  ;;  %s6238_s20 = smov %s7930_s20 }
 0x2cc   : >>> { %v4815_v51 = vld [vmem:[%s6212_s30 + $0x18] sm:$0xff] }
 0x2cd   : >>> { %v4816_v52 = vld [vmem:[%s6214_s16 + $0x18] sm:$0xff]  ;;  %v1543_v54 = vmul.f32 %v4815_v51, %v4813_v50  ;;  %v1549_v37 = vmul.f32 %v4815_v51, %v4814_v49 }
 0x2ce   : >>> { %v4817_v36 = vld [vmem:[%s6216_s23 + $0x18] sm:$0xff]  ;;  %v1546_v56 = vmul.f32 %v4816_v52, %v4813_v50  ;;  %v1552_v60 = vmul.f32 %v4816_v52, %v4814_v49 }
 0x2cf   : >>> { %v4818_v53 = vld [vmem:[%s6221_s24 + $0x18] sm:$0xff]  ;;  %v1544_v55 = vmul.f32 %v4817_v36, %v4814_v49  ;;  %v1550_v59 = vmul.f32 %v4817_v36, %v4813_v50 }
 0x2d0   : >>> { %v1547_v58 = vmul.f32 %v4818_v53, %v4814_v49  ;;  %v1553_v61 = vmul.f32 %v4818_v53, %v4813_v50  ;;  %v5173_v4 = vld [vmem:[%s6225_s11 + $0x18] sm:$0xff] }
 0x2d1   : >>> { %v1545_v39 = vsub.f32 %v1543_v54, %v1544_v55  ;;  %v1551_v2 = vadd.f32 %v1550_v59, %v1549_v37  ;;  %v5174_v57 = vld [vmem:[%s6231_s14 + $0x18] sm:$0xff]  ;;  %v3167_v8 = vmul.f32 %v5173_v4, %v5171_v63  ;;  %v3173_v10 = vmul.f32 %v5173_v4, %v5172_v62  ;;  %v4833_v59 = vld [vmem:[%s1593_s29 + $0x28] sm:$0xff]  ;;  %s6325_s29 = smov [#allocation14] }
 0x2d2   : >>> { %v1548_v1 = vsub.f32 %v1546_v56, %v1547_v58  ;;  %v1554_v3 = vadd.f32 %v1553_v61, %v1552_v60  ;;  %v5175_v5 = vld [vmem:[%s6234_s17 + $0x18] sm:$0xff]  ;;  %v3170_v0 = vmul.f32 %v5174_v57, %v5171_v63  ;;  %v3176_v14 = vmul.f32 %v5174_v57, %v5172_v62  ;;  %v4834_v58 = vld [vmem:[%s1596_s26 + $0x28] sm:$0xff]  ;;  %s6322_s26 = smov [#allocation13] }
 0x2d3   : >>> { %4819 = vst [vmem:[%s6212_s30 + $0x18] sm:$0xff] %v1545_v39  ;;  %v5176_v7 = vld [vmem:[%s6238_s20 + $0x18] sm:$0xff]  ;;  %v3168_v9 = vmul.f32 %v5175_v5, %v5172_v62  ;;  %4821 = vst [vmem:[%s6216_s23 + $0x18] sm:$0xff] %v1551_v2  ;;  %v3174_v13 = vmul.f32 %v5175_v5, %v5171_v63  ;;  %s1559_s30 = smov [#allocation23]  ;;  %s3186_s23 = smov [#allocation24] }
 0x2d4   : >>> { %4820 = vst [vmem:[%s6214_s16 + $0x18] sm:$0xff] %v1548_v1  ;;  %4822 = vst [vmem:[%s6221_s24 + $0x18] sm:$0xff] %v1554_v3  ;;  %v3171_v12 = vmul.f32 %v5176_v7, %v5172_v62  ;;  %v3177_v6 = vmul.f32 %v5176_v7, %v5171_v63  ;;  %s6255_s16 = smov [#allocation15]  ;;  %s3183_s24 = smov [#allocation23]  ;;  %v4823_v21 = vld [vmem:[%s1559_s30 + $0x20] sm:$0xff] }
 0x2d5   : >>> { %v3169_v16 = vsub.f32 %v3167_v8, %v3168_v9  ;;  %v3175_v15 = vadd.f32 %v3174_v13, %v3173_v10  ;;  %v5182_v41 = vld [vmem:[%s3186_s23 + $0x20] sm:$0xff]  ;;  %s6293_s30 = smov [#allocation15]  ;;  %s1630_s23 = smov [#allocation24] }
 0x2d6   : >>> { %v3172_v17 = vsub.f32 %v3170_v0, %v3171_v12  ;;  %v3178_v11 = vadd.f32 %v3177_v6, %v3176_v14  ;;  %v5181_v40 = vld [vmem:[%s3183_s24 + $0x20] sm:$0xff]  ;;  %s6320_s24 = smov [#allocation12] }
 0x2d7   : >>> { %5177 = vst [vmem:[%s6225_s11 + $0x18] sm:$0xff] %v3169_v16  ;;  %5179 = vst [vmem:[%s6234_s17 + $0x18] sm:$0xff] %v3175_v15  ;;  %s6262_s11 = smov %s7927_s11  ;;  %s6271_s17 = smov %s7929_s17 }
 0x2d8   : >>> { %5178 = vst [vmem:[%s6231_s14 + $0x18] sm:$0xff] %v3172_v17  ;;  %5180 = vst [vmem:[%s6238_s20 + $0x18] sm:$0xff] %v3178_v11  ;;  %s6265_s14 = smov %s7928_s14  ;;  %s6274_s20 = smov %s7930_s20 }
 0x2da   : >>> { %v4825_v22 = vld [vmem:[%s6248_s22 + $0x20] sm:$0xff] }
 0x2db   : >>> { %v4826_v18 = vld [vmem:[%s6250_s0 + $0x20] sm:$0xff]  ;;  %v1577_v26 = vmul.f32 %v4825_v22, %v4823_v21  ;;  %v1583_v27 = vmul.f32 %v4825_v22, %v4824_v20 }
 0x2dc   : >>> { %v4827_v19 = vld [vmem:[%s6253_s15 + $0x20] sm:$0xff]  ;;  %v1580_v23 = vmul.f32 %v4826_v18, %v4823_v21  ;;  %v1586_v35 = vmul.f32 %v4826_v18, %v4824_v20 }
 0x2dd   : >>> { %v4828_v24 = vld [vmem:[%s6255_s16 + $0x20] sm:$0xff]  ;;  %v1578_v28 = vmul.f32 %v4827_v19, %v4824_v20  ;;  %v1584_v32 = vmul.f32 %v4827_v19, %v4823_v21 }
 0x2de   : >>> { %v1581_v30 = vmul.f32 %v4828_v24, %v4824_v20  ;;  %v1587_v38 = vmul.f32 %v4828_v24, %v4823_v21  ;;  %v5183_v43 = vld [vmem:[%s6262_s11 + $0x20] sm:$0xff] }
 0x2df   : >>> { %v1579_v29 = vsub.f32 %v1577_v26, %v1578_v28  ;;  %v1585_v25 = vadd.f32 %v1584_v32, %v1583_v27  ;;  %v5184_v44 = vld [vmem:[%s6265_s14 + $0x20] sm:$0xff]  ;;  %v3201_v48 = vmul.f32 %v5183_v43, %v5181_v40  ;;  %v3207_v31 = vmul.f32 %v5183_v43, %v5182_v41 }
 0x2e0   : >>> { %v1582_v42 = vsub.f32 %v1580_v23, %v1581_v30  ;;  %v1588_v45 = vadd.f32 %v1587_v38, %v1586_v35  ;;  %v5185_v46 = vld [vmem:[%s6271_s17 + $0x20] sm:$0xff]  ;;  %v3204_v50 = vmul.f32 %v5184_v44, %v5181_v40  ;;  %v3210_v36 = vmul.f32 %v5184_v44, %v5182_v41  ;;  %v4844_v30 = vld [vmem:[%s1630_s23 + $0x30] sm:$0xff]  ;;  %s1661_s23 = smov [#allocation23] }
 0x2e1   : >>> { %v5186_v47 = vld [vmem:[%s6274_s20 + $0x20] sm:$0xff]  ;;  %4829 = vst [vmem:[%s6248_s22 + $0x20] sm:$0xff] %v1579_v29  ;;  %4831 = vst [vmem:[%s6253_s15 + $0x20] sm:$0xff] %v1585_v25  ;;  %v3202_v49 = vmul.f32 %v5185_v46, %v5182_v41  ;;  %v3208_v52 = vmul.f32 %v5185_v46, %v5181_v40  ;;  %s6286_s22 = smov [#allocation13]  ;;  %s3220_s15 = smov [#allocation24] }
 0x2e2   : >>> { %4830 = vst [vmem:[%s6250_s0 + $0x20] sm:$0xff] %v1582_v42  ;;  %v3205_v51 = vmul.f32 %v5186_v47, %v5182_v41  ;;  %4832 = vst [vmem:[%s6255_s16 + $0x20] sm:$0xff] %v1588_v45  ;;  %v3211_v53 = vmul.f32 %v5186_v47, %v5181_v40  ;;  %s6288_s0 = smov [#allocation14]  ;;  %s3217_s16 = smov [#allocation23]  ;;  %v5192_v8 = vld [vmem:[%s3220_s15 + $0x28] sm:$0xff] }
 0x2e3   : >>> { %v3203_v54 = vsub.f32 %v3201_v48, %v3202_v49  ;;  %v3209_v56 = vadd.f32 %v3208_v52, %v3207_v31  ;;  %v5191_v0 = vld [vmem:[%s3217_s16 + $0x28] sm:$0xff]  ;;  %s1664_s15 = smov [#allocation24]  ;;  %s6356_s16 = smov [#allocation12] }
 0x2e4   : >>> { %v3206_v55 = vsub.f32 %v3204_v50, %v3205_v51  ;;  %v3212_v37 = vadd.f32 %v3211_v53, %v3210_v36 }
 0x2e5   : >>> { %5187 = vst [vmem:[%s6262_s11 + $0x20] sm:$0xff] %v3203_v54  ;;  %5189 = vst [vmem:[%s6271_s17 + $0x20] sm:$0xff] %v3209_v56  ;;  %s6297_s11 = smov %s7927_s11  ;;  %s6306_s17 = smov %s7929_s17 }
 0x2e6   : >>> { %5188 = vst [vmem:[%s6265_s14 + $0x20] sm:$0xff] %v3206_v55  ;;  %5190 = vst [vmem:[%s6274_s20 + $0x20] sm:$0xff] %v3212_v37  ;;  %s6303_s14 = smov %s7928_s14  ;;  %s6310_s20 = smov %s7930_s20 }
 0x2e8   : >>> { %v4835_v60 = vld [vmem:[%s6284_s27 + $0x28] sm:$0xff] }
 0x2e9   : >>> { %v4836_v61 = vld [vmem:[%s6286_s22 + $0x28] sm:$0xff]  ;;  %v1611_v63 = vmul.f32 %v4835_v60, %v4833_v59  ;;  %v1617_v3 = vmul.f32 %v4835_v60, %v4834_v58 }
 0x2ea   : >>> { %v4837_v62 = vld [vmem:[%s6288_s0 + $0x28] sm:$0xff]  ;;  %v1614_v2 = vmul.f32 %v4836_v61, %v4833_v59  ;;  %v1620_v5 = vmul.f32 %v4836_v61, %v4834_v58 }
 0x2eb   : >>> { %v4838_v39 = vld [vmem:[%s6293_s30 + $0x28] sm:$0xff]  ;;  %v1612_v1 = vmul.f32 %v4837_v62, %v4834_v58  ;;  %v1618_v57 = vmul.f32 %v4837_v62, %v4833_v59 }
 0x2ec   : >>> { %v1615_v4 = vmul.f32 %v4838_v39, %v4834_v58  ;;  %v1621_v7 = vmul.f32 %v4838_v39, %v4833_v59  ;;  %v5193_v14 = vld [vmem:[%s6297_s11 + $0x28] sm:$0xff] }
 0x2ed   : >>> { %v1613_v9 = vsub.f32 %v1611_v63, %v1612_v1  ;;  %v1619_v12 = vadd.f32 %v1618_v57, %v1617_v3  ;;  %v5194_v6 = vld [vmem:[%s6303_s14 + $0x28] sm:$0xff]  ;;  %v3235_v15 = vmul.f32 %v5193_v14, %v5191_v0  ;;  %v3241_v21 = vmul.f32 %v5193_v14, %v5192_v8  ;;  %v4853_v57 = vld [vmem:[%s1661_s23 + $0x38] sm:$0xff]  ;;  %s6404_s23 = smov [#allocation14] }
 0x2ee   : >>> { %v1616_v10 = vsub.f32 %v1614_v2, %v1615_v4  ;;  %v1622_v13 = vadd.f32 %v1621_v7, %v1620_v5  ;;  %v5195_v16 = vld [vmem:[%s6306_s17 + $0x28] sm:$0xff]  ;;  %v3238_v20 = vmul.f32 %v5194_v6, %v5191_v0  ;;  %v3244_v19 = vmul.f32 %v5194_v6, %v5192_v8  ;;  %v4854_v4 = vld [vmem:[%s1664_s15 + $0x38] sm:$0xff]  ;;  %s6393_s15 = smov [#allocation12] }
 0x2ef   : >>> { %4839 = vst [vmem:[%s6284_s27 + $0x28] sm:$0xff] %v1613_v9  ;;  %v5196_v17 = vld [vmem:[%s6310_s20 + $0x28] sm:$0xff]  ;;  %v3236_v11 = vmul.f32 %v5195_v16, %v5192_v8  ;;  %4841 = vst [vmem:[%s6288_s0 + $0x28] sm:$0xff] %v1619_v12  ;;  %v3242_v18 = vmul.f32 %v5195_v16, %v5191_v0  ;;  %s1627_s27 = smov [#allocation23]  ;;  %s3254_s0 = smov [#allocation24] }
 0x2f0   : >>> { %4840 = vst [vmem:[%s6286_s22 + $0x28] sm:$0xff] %v1616_v10  ;;  %4842 = vst [vmem:[%s6293_s30 + $0x28] sm:$0xff] %v1622_v13  ;;  %v3239_v22 = vmul.f32 %v5196_v17, %v5192_v8  ;;  %v3245_v24 = vmul.f32 %v5196_v17, %v5191_v0  ;;  %s6327_s22 = smov [#allocation15]  ;;  %s3251_s30 = smov [#allocation23]  ;;  %v4843_v32 = vld [vmem:[%s1627_s27 + $0x30] sm:$0xff] }
 0x2f1   : >>> { %v3237_v26 = vsub.f32 %v3235_v15, %v3236_v11  ;;  %v3243_v28 = vadd.f32 %v3242_v18, %v3241_v21  ;;  %v5202_v48 = vld [vmem:[%s3254_s0 + $0x30] sm:$0xff]  ;;  %s6365_s27 = smov [#allocation15]  ;;  %s1695_s0 = smov [#allocation21] }
 0x2f2   : >>> { %v3240_v27 = vsub.f32 %v3238_v20, %v3239_v22  ;;  %v3246_v23 = vadd.f32 %v3245_v24, %v3244_v19  ;;  %v5201_v51 = vld [vmem:[%s3251_s30 + $0x30] sm:$0xff]  ;;  %s1697_s30 = smov [#allocation22] }
 0x2f3   : >>> { %5197 = vst [vmem:[%s6297_s11 + $0x28] sm:$0xff] %v3237_v26  ;;  %5199 = vst [vmem:[%s6306_s17 + $0x28] sm:$0xff] %v3243_v28  ;;  %s6334_s11 = smov %s7927_s11  ;;  %s6343_s17 = smov %s7929_s17 }
 0x2f4   : >>> { %5198 = vst [vmem:[%s6303_s14 + $0x28] sm:$0xff] %v3240_v27  ;;  %5200 = vst [vmem:[%s6310_s20 + $0x28] sm:$0xff] %v3246_v23  ;;  %s6337_s14 = smov %s7928_s14  ;;  %s6346_s20 = smov %s7930_s20 }
 0x2f6   : >>> { %v4845_v35 = vld [vmem:[%s6320_s24 + $0x30] sm:$0xff] }
 0x2f7   : >>> { %v4846_v38 = vld [vmem:[%s6322_s26 + $0x30] sm:$0xff]  ;;  %v1645_v42 = vmul.f32 %v4845_v35, %v4843_v32  ;;  %v1651_v25 = vmul.f32 %v4845_v35, %v4844_v30 }
 0x2f8   : >>> { %v4847_v41 = vld [vmem:[%s6325_s29 + $0x30] sm:$0xff]  ;;  %v1648_v43 = vmul.f32 %v4846_v38, %v4843_v32  ;;  %v1654_v46 = vmul.f32 %v4846_v38, %v4844_v30 }
 0x2f9   : >>> { %v4848_v29 = vld [vmem:[%s6327_s22 + $0x30] sm:$0xff]  ;;  %v1646_v40 = vmul.f32 %v4847_v41, %v4844_v30  ;;  %v1652_v44 = vmul.f32 %v4847_v41, %v4843_v32 }
 0x2fa   : >>> { %v1649_v45 = vmul.f32 %v4848_v29, %v4844_v30  ;;  %v1655_v47 = vmul.f32 %v4848_v29, %v4843_v32  ;;  %v5203_v52 = vld [vmem:[%s6334_s11 + $0x30] sm:$0xff] }
 0x2fb   : >>> { %v1647_v31 = vsub.f32 %v1645_v42, %v1646_v40  ;;  %v1653_v50 = vadd.f32 %v1652_v44, %v1651_v25  ;;  %v5204_v53 = vld [vmem:[%s6337_s14 + $0x30] sm:$0xff]  ;;  %v3269_v56 = vmul.f32 %v5203_v52, %v5201_v51  ;;  %v3275_v37 = vmul.f32 %v5203_v52, %v5202_v48  ;;  %v6399_v44 = vld [vmem:[%s1697_s30] ss:$0 sm:$0xff]  ;;  %s1753_s30 = smov [#allocation13] }
 0x2fc   : >>> { %v1650_v49 = vsub.f32 %v1648_v43, %v1649_v45  ;;  %v1656_v36 = vadd.f32 %v1655_v47, %v1654_v46  ;;  %v5205_v54 = vld [vmem:[%s6343_s17 + $0x30] sm:$0xff]  ;;  %v3272_v59 = vmul.f32 %v5204_v53, %v5201_v51  ;;  %v3278_v62 = vmul.f32 %v5204_v53, %v5202_v48  ;;  %v6397_v45 = vld [vmem:[%s1695_s0] ss:$0 sm:$0xff]  ;;  %s1751_s0 = smov [#allocation12] }
 0x2fd   : >>> { %v5206_v55 = vld [vmem:[%s6346_s20 + $0x30] sm:$0xff]  ;;  %4849 = vst [vmem:[%s6320_s24 + $0x30] sm:$0xff] %v1647_v31  ;;  %4851 = vst [vmem:[%s6325_s29 + $0x30] sm:$0xff] %v1653_v50  ;;  %v3270_v58 = vmul.f32 %v5205_v54, %v5202_v48  ;;  %v3276_v61 = vmul.f32 %v5205_v54, %v5201_v51  ;;  %s6358_s24 = smov [#allocation13]  ;;  %s3288_s29 = smov [#allocation24] }
 0x2fe   : >>> { %4850 = vst [vmem:[%s6322_s26 + $0x30] sm:$0xff] %v1650_v49  ;;  %v3273_v60 = vmul.f32 %v5206_v55, %v5202_v48  ;;  %4852 = vst [vmem:[%s6327_s22 + $0x30] sm:$0xff] %v1656_v36  ;;  %v3279_v39 = vmul.f32 %v5206_v55, %v5201_v51  ;;  %s6360_s26 = smov [#allocation14]  ;;  %s3285_s22 = smov [#allocation23]  ;;  %v5212_v15 = vld [vmem:[%s3288_s29 + $0x38] sm:$0xff] }
 0x2ff   : >>> { %v3271_v63 = vsub.f32 %v3269_v56, %v3270_v58  ;;  %v3277_v2 = vadd.f32 %v3276_v61, %v3275_v37  ;;  %v5211_v20 = vld [vmem:[%s3285_s22 + $0x38] sm:$0xff]  ;;  %s6429_s29 = smov [#allocation14]  ;;  %s6431_s22 = smov [#allocation15] }
 0x300   : >>> { %v3274_v1 = vsub.f32 %v3272_v59, %v3273_v60  ;;  %v3280_v3 = vadd.f32 %v3279_v39, %v3278_v62 }
 0x301   : >>> { %5207 = vst [vmem:[%s6334_s11 + $0x30] sm:$0xff] %v3271_v63  ;;  %5209 = vst [vmem:[%s6343_s17 + $0x30] sm:$0xff] %v3277_v2  ;;  %s6369_s11 = smov %s7927_s11  ;;  %s6378_s17 = smov %s7929_s17 }
 0x302   : >>> { %5208 = vst [vmem:[%s6337_s14 + $0x30] sm:$0xff] %v3274_v1  ;;  %5210 = vst [vmem:[%s6346_s20 + $0x30] sm:$0xff] %v3280_v3  ;;  %s6375_s14 = smov %s7928_s14  ;;  %s6382_s20 = smov %s7930_s20 }
 0x304   : >>> { %v4855_v5 = vld [vmem:[%s6356_s16 + $0x38] sm:$0xff] }
 0x305   : >>> { %v4856_v7 = vld [vmem:[%s6358_s24 + $0x38] sm:$0xff]  ;;  %v1679_v0 = vmul.f32 %v4855_v5, %v4853_v57  ;;  %v1685_v13 = vmul.f32 %v4855_v5, %v4854_v4 }
 0x306   : >>> { %v4857_v8 = vld [vmem:[%s6360_s26 + $0x38] sm:$0xff]  ;;  %v1682_v12 = vmul.f32 %v4856_v7, %v4853_v57  ;;  %v1688_v16 = vmul.f32 %v4856_v7, %v4854_v4 }
 0x307   : >>> { %v4858_v9 = vld [vmem:[%s6365_s27 + $0x38] sm:$0xff]  ;;  %v1680_v10 = vmul.f32 %v4857_v8, %v4854_v4  ;;  %v1686_v6 = vmul.f32 %v4857_v8, %v4853_v57 }
 0x308   : >>> { %v1683_v14 = vmul.f32 %v4858_v9, %v4854_v4  ;;  %v1689_v17 = vmul.f32 %v4858_v9, %v4853_v57  ;;  %v5213_v19 = vld [vmem:[%s6369_s11 + $0x38] sm:$0xff] }
 0x309   : >>> { %v1681_v11 = vsub.f32 %v1679_v0, %v1680_v10  ;;  %v1687_v22 = vadd.f32 %v1686_v6, %v1685_v13  ;;  %v5214_v24 = vld [vmem:[%s6375_s14 + $0x38] sm:$0xff]  ;;  %v3303_v28 = vmul.f32 %v5213_v19, %v5211_v20  ;;  %v3309_v32 = vmul.f32 %v5213_v19, %v5212_v15 }
 0x30a   : >>> { %v1684_v21 = vsub.f32 %v1682_v12, %v1683_v14  ;;  %v1690_v18 = vadd.f32 %v1689_v17, %v1688_v16  ;;  %v5215_v26 = vld [vmem:[%s6378_s17 + $0x38] sm:$0xff]  ;;  %v3306_v30 = vmul.f32 %v5214_v24, %v5211_v20  ;;  %v3312_v41 = vmul.f32 %v5214_v24, %v5212_v15 }
 0x30b   : >>> { %v5216_v27 = vld [vmem:[%s6382_s20 + $0x38] sm:$0xff]  ;;  %v3304_v23 = vmul.f32 %v5215_v26, %v5212_v15  ;;  %4859 = vst [vmem:[%s6356_s16 + $0x38] sm:$0xff] %v1681_v11  ;;  %v3310_v38 = vmul.f32 %v5215_v26, %v5211_v20  ;;  %4861 = vst [vmem:[%s6360_s26 + $0x38] sm:$0xff] %v1687_v22  ;;  %s6395_s16 = smov [#allocation13]  ;;  %s6420_s26 = smov [#allocation12] }
 0x30c   : >>> { %v3307_v35 = vmul.f32 %v5216_v27, %v5212_v15  ;;  %v3313_v29 = vmul.f32 %v5216_v27, %v5211_v20  ;;  %4860 = vst [vmem:[%s6358_s24 + $0x38] sm:$0xff] %v1684_v21  ;;  %4862 = vst [vmem:[%s6365_s27 + $0x38] sm:$0xff] %v1690_v18  ;;  %s6406_s24 = smov [#allocation15]  ;;  %s6422_s27 = smov [#allocation13] }
 0x30d   : >>> { %v3305_v42 = vsub.f32 %v3303_v28, %v3304_v23  ;;  %v3311_v40 = vadd.f32 %v3310_v38, %v3309_v32 }
 0x30e   : >>> { %v3308_v25 = vsub.f32 %v3306_v30, %v3307_v35  ;;  %v3314_v43 = vadd.f32 %v3313_v29, %v3312_v41 }
 0x30f   : >>> { %5217 = vst [vmem:[%s6369_s11 + $0x38] sm:$0xff] %v3305_v42  ;;  %5219 = vst [vmem:[%s6378_s17 + $0x38] sm:$0xff] %v3311_v40  ;;  %s6411_s11 = smov %s7927_s11  ;;  %s6442_s17 = smov %s7929_s17 }
 0x310   : >>> { %5218 = vst [vmem:[%s6375_s14 + $0x38] sm:$0xff] %v3308_v25  ;;  %5220 = vst [vmem:[%s6382_s20 + $0x38] sm:$0xff] %v3314_v43  ;;  %s6494_s14 = smov %s7928_s14  ;;  %s6534_s20 = smov %s7930_s20 }
 0x312   : >>> { %v1703_v46 = vld [vmem:[%s6393_s15] sm:$0xff] }
 0x313   : >>> { %v1704_v47 = vld [vmem:[%s6395_s16] sm:$0xff]  ;;  %v1707_v48 = vmul.f32 %v1703_v46, %v6397_v45  ;;  %v1710_v31 = vmul.f32 %v1703_v46, %v6399_v44 }
 0x314   : >>> { %v1705_v49 = vld [vmem:[%s6404_s23] sm:$0xff]  ;;  %v1708_v51 = vmul.f32 %v1704_v47, %v6399_v44  ;;  %v1711_v52 = vmul.f32 %v1704_v47, %v6397_v45 }
 0x315   : >>> { %v1706_v50 = vld [vmem:[%s6406_s24] sm:$0xff]  ;;  %v1713_v36 = vmul.f32 %v1705_v49, %v6397_v45  ;;  %v1716_v54 = vmul.f32 %v1705_v49, %v6399_v44 }
 0x316   : >>> { %v1714_v53 = vmul.f32 %v1706_v50, %v6399_v44  ;;  %v1717_v55 = vmul.f32 %v1706_v50, %v6397_v45  ;;  %v3321_v56 = vld [vmem:[%s6411_s11] ss:$0 sm:$0xff]  ;;  %v5222_v58 = vld [vmem:[%s6411_s11 + $0x7] ss:$0 sm:$0xff]  ;;  %v1709_v59 = vsub.f32 %v1707_v48, %v1708_v51  ;;  %v1712_v60 = vadd.f32 %v1711_v52, %v1710_v31  ;;  %v5223_v39 = vld [vmem:[%s6411_s11 + $0x7] sm:$0xfe] }
 0x317   : >>> { %v5221_v37 = vld [vmem:[%s6411_s11 - $0x1] sm:$0xfe]  ;;  %v5224_v63 = vld [vmem:[%s6411_s11 + $0xf] ss:$0 sm:$0xff]  ;;  %v5226_v1 = vld [vmem:[%s6411_s11 + $0xf] sm:$0xfe]  ;;  %v3339_v3 = vsel %vm7874_vm1, %v5222_v58, %v5223_v39 }
 0x318   : >>> { %v1715_v61 = vsub.f32 %v1713_v36, %v1714_v53  ;;  %v3328_v62 = vsel %vm7874_vm1, %v3321_v56, %v5221_v37  ;;  %v1718_v2 = vadd.f32 %v1717_v55, %v1716_v54  ;;  %v3350_v4 = vsel %vm7874_vm1, %v5224_v63, %v5226_v1  ;;  %v5227_v57 = vld [vmem:[%s6411_s11 + $0x17] ss:$0 sm:$0xff]  ;;  %v5229_v5 = vld [vmem:[%s6411_s11 + $0x17] sm:$0xfe]  ;;  %v5230_v7 = vld [vmem:[%s6411_s11 + $0x1f] ss:$0 sm:$0xff]  ;;  %1719 = vst [vmem:[%s6393_s15] sm:$0xff] %v1709_v59 }
 0x319   : >>> { %3331 = vst [vmem:[%s6411_s11] sm:$0xff] %v3328_v62  ;;  %1720 = vst [vmem:[%s6395_s16] sm:$0xff] %v1712_v60  ;;  %v3361_v8 = vsel %vm7874_vm1, %v5227_v57, %v5229_v5  ;;  %v5232_v9 = vld [vmem:[%s6411_s11 + $0x1f] sm:$0xfe]  ;;  %v5233_v0 = vld [vmem:[%s6411_s11 + $0x27] ss:$0 sm:$0xff]  ;;  %s1755_s15 = smov [#allocation14]  ;;  %s1757_s16 = smov [#allocation15] }
 0x31a   : >>> { %1721 = vst [vmem:[%s6404_s23] sm:$0xff] %v1715_v61  ;;  %5225 = vst [vmem:[%s6411_s11 + $0x8] sm:$0xff] %v3339_v3  ;;  %v5235_v10 = vld [vmem:[%s6411_s11 + $0x27] sm:$0xfe]  ;;  %v3372_v12 = vsel %vm7874_vm1, %v5230_v7, %v5232_v9  ;;  %v5236_v14 = vld [vmem:[%s6411_s11 + $0x2f] ss:$0 sm:$0xff]  ;;  %s1779_s23 = smov [#allocation12] }
 0x31b   : >>> { %5228 = vst [vmem:[%s6411_s11 + $0x10] sm:$0xff] %v3350_v4  ;;  %1722 = vst [vmem:[%s6406_s24] sm:$0xff] %v1718_v2  ;;  %v3383_v13 = vsel %vm7874_vm1, %v5233_v0, %v5235_v10  ;;  %v5238_v6 = vld [vmem:[%s6411_s11 + $0x2f] sm:$0xfe]  ;;  %v5239_v16 = vld [vmem:[%s6411_s11 + $0x37] ss:$0 sm:$0xff]  ;;  %s1781_s24 = smov [#allocation13] }
 0x31c   : >>> { %5231 = vst [vmem:[%s6411_s11 + $0x18] sm:$0xff] %v3361_v8  ;;  %5234 = vst [vmem:[%s6411_s11 + $0x20] sm:$0xff] %v3372_v12  ;;  %v3394_v17 = vsel %vm7874_vm1, %v5236_v14, %v5238_v6  ;;  %v5241_v15 = vld [vmem:[%s6411_s11 + $0x37] sm:$0xfe]  ;;  %v5242_v11 = vld [vmem:[%s6411_s11 + $0x3f] ss:$0 sm:$0xff] }
 0x31d   : >>> { %5237 = vst [vmem:[%s6411_s11 + $0x28] sm:$0xff] %v3383_v13  ;;  %v3409_v20 = vld [vmem:[%s6442_s17] ss:$0 sm:$0xff]  ;;  %5240 = vst [vmem:[%s6411_s11 + $0x30] sm:$0xff] %v3394_v17  ;;  %v3405_v21 = vsel %vm7874_vm1, %v5239_v16, %v5241_v15  ;;  %v5245_v22 = vld [vmem:[%s6442_s17 + $0x39] sm:$0x7f] }
 0x31e   : >>> { %5244 = vst [vmem:[%s6411_s11 + $0x1] sm:$0x1] %v3409_v20  ;;  %v5246_v18 = vld [vmem:[%s6442_s17 + $0x38] ss:$0 sm:$0xff]  ;;  %v5248_v19 = vld [vmem:[%s6442_s17 + $0x31] sm:$0x7f]  ;;  %v3418_v24 = vsel %vm7873_vm2, %v5242_v11, %v5245_v22 }
 0x31f   : >>> { %5243 = vst [vmem:[%s6411_s11 + $0x38] sm:$0xff] %v3405_v21  ;;  %v3427_v26 = vsel %vm7873_vm2, %v5246_v18, %v5248_v19  ;;  %v5249_v27 = vld [vmem:[%s6442_s17 + $0x30] ss:$0 sm:$0xff]  ;;  %v5251_v28 = vld [vmem:[%s6442_s17 + $0x29] sm:$0x7f]  ;;  %5247 = vst [vmem:[%s6442_s17 + $0x38] sm:$0xff] %v3418_v24 }
 0x320   : >>> { %v5252_v23 = vld [vmem:[%s6442_s17 + $0x28] ss:$0 sm:$0xff]  ;;  %5250 = vst [vmem:[%s6442_s17 + $0x30] sm:$0xff] %v3427_v26  ;;  %v3436_v30 = vsel %vm7873_vm2, %v5249_v27, %v5251_v28  ;;  %v5254_v32 = vld [vmem:[%s6442_s17 + $0x21] sm:$0x7f]  ;;  %s7150_s11 = smov [#allocation14] }
 0x321   : >>> { %v5255_v35 = vld [vmem:[%s6442_s17 + $0x20] ss:$0 sm:$0xff]  ;;  %v5257_v38 = vld [vmem:[%s6442_s17 + $0x19] sm:$0x7f]  ;;  %5253 = vst [vmem:[%s6442_s17 + $0x28] sm:$0xff] %v3436_v30  ;;  %v3445_v41 = vsel %vm7873_vm2, %v5252_v23, %v5254_v32 }
 0x322   : >>> { %v3454_v29 = vsel %vm7873_vm2, %v5255_v35, %v5257_v38  ;;  %v5258_v42 = vld [vmem:[%s6442_s17 + $0x18] ss:$0 sm:$0xff]  ;;  %v5260_v25 = vld [vmem:[%s6442_s17 + $0x11] sm:$0x7f]  ;;  %v5261_v40 = vld [vmem:[%s6442_s17 + $0x10] ss:$0 sm:$0xff] }
 0x323   : >>> { %5256 = vst [vmem:[%s6442_s17 + $0x20] sm:$0xff] %v3445_v41  ;;  %5259 = vst [vmem:[%s6442_s17 + $0x18] sm:$0xff] %v3454_v29  ;;  %v3463_v43 = vsel %vm7873_vm2, %v5258_v42, %v5260_v25  ;;  %v5263_v46 = vld [vmem:[%s6442_s17 + $0x9] sm:$0x7f]  ;;  %v5264_v47 = vld [vmem:[%s6442_s17 + $0x8] ss:$0 sm:$0xff] }
 0x324   : >>> { %v5266_v48 = vld [vmem:[%s6442_s17 + $0x1] sm:$0x7f]  ;;  %5262 = vst [vmem:[%s6442_s17 + $0x10] sm:$0xff] %v3463_v43  ;;  %v3472_v31 = vsel %vm7873_vm2, %v5261_v40, %v5263_v46  ;;  %v3485_v50 = vld [vmem:[%s6494_s14] ss:$0 sm:$0xff]  ;;  %v4863_v41 = vld [vmem:[%s6420_s26 + $0x8] sm:$0xff] }
 0x325   : >>> { %v3480_v49 = vsel %vm7873_vm2, %v5264_v47, %v5266_v48  ;;  %v5267_v51 = vld [vmem:[%s6494_s14 - $0x1] sm:$0xfe]  ;;  %v5268_v52 = vld [vmem:[%s6494_s14 + $0x7] ss:$0 sm:$0xff]  ;;  %5265 = vst [vmem:[%s6442_s17 + $0x8] sm:$0xff] %v3472_v31  ;;  %v4864_v29 = vld [vmem:[%s6422_s27 + $0x8] sm:$0xff]  ;;  %v1735_v25 = vmul.f32 %v4863_v41, %v6397_v45  ;;  %v1738_v43 = vmul.f32 %v4863_v41, %v6399_v44 }
 0x326   : >>> { %3482 = vst [vmem:[%s6442_s17] sm:$0xff] %v3480_v49  ;;  %v3492_v36 = vsel %vm7874_vm1, %v3485_v50, %v5267_v51  ;;  %v5269_v53 = vld [vmem:[%s6494_s14 + $0x7] sm:$0xfe]  ;;  %v5270_v54 = vld [vmem:[%s6494_s14 + $0xf] ss:$0 sm:$0xff]  ;;  %v5272_v55 = vld [vmem:[%s6494_s14 + $0xf] sm:$0xfe]  ;;  %v1736_v40 = vmul.f32 %v4864_v29, %v6399_v44  ;;  %v1739_v46 = vmul.f32 %v4864_v29, %v6397_v45 }
 0x327   : >>> { %3495 = vst [vmem:[%s6494_s14] sm:$0xff] %v3492_v36  ;;  %v3503_v56 = vsel %vm7874_vm1, %v5268_v52, %v5269_v53  ;;  %v3514_v37 = vsel %vm7874_vm1, %v5270_v54, %v5272_v55  ;;  %v5273_v58 = vld [vmem:[%s6494_s14 + $0x17] ss:$0 sm:$0xff]  ;;  %v5275_v59 = vld [vmem:[%s6494_s14 + $0x17] sm:$0xfe]  ;;  %v5276_v60 = vld [vmem:[%s6494_s14 + $0x1f] ss:$0 sm:$0xff] }
 0x328   : >>> { %5271 = vst [vmem:[%s6494_s14 + $0x8] sm:$0xff] %v3503_v56  ;;  %5274 = vst [vmem:[%s6494_s14 + $0x10] sm:$0xff] %v3514_v37  ;;  %v3525_v61 = vsel %vm7874_vm1, %v5273_v58, %v5275_v59  ;;  %v5278_v62 = vld [vmem:[%s6494_s14 + $0x1f] sm:$0xfe]  ;;  %v5279_v39 = vld [vmem:[%s6494_s14 + $0x27] ss:$0 sm:$0xff]  ;;  %v1737_v51 = vsub.f32 %v1735_v25, %v1736_v40  ;;  %v1740_v52 = vadd.f32 %v1739_v46, %v1738_v43 }
 0x329   : >>> { %v5281_v63 = vld [vmem:[%s6494_s14 + $0x27] sm:$0xfe]  ;;  %5277 = vst [vmem:[%s6494_s14 + $0x18] sm:$0xff] %v3525_v61  ;;  %v3536_v1 = vsel %vm7874_vm1, %v5276_v60, %v5278_v62  ;;  %v5282_v3 = vld [vmem:[%s6494_s14 + $0x2f] ss:$0 sm:$0xff]  ;;  %s7126_s17 = smov [#allocation14] }
 0x32a   : >>> { %v3547_v2 = vsel %vm7874_vm1, %v5279_v39, %v5281_v63  ;;  %v5284_v4 = vld [vmem:[%s6494_s14 + $0x2f] sm:$0xfe]  ;;  %v5285_v57 = vld [vmem:[%s6494_s14 + $0x37] ss:$0 sm:$0xff]  ;;  %5280 = vst [vmem:[%s6494_s14 + $0x20] sm:$0xff] %v3536_v1  ;;  %v4865_v42 = vld [vmem:[%s6429_s29 + $0x8] sm:$0xff] }
 0x32b   : >>> { %5283 = vst [vmem:[%s6494_s14 + $0x28] sm:$0xff] %v3547_v2  ;;  %v3558_v5 = vsel %vm7874_vm1, %v5282_v3, %v5284_v4  ;;  %v5287_v7 = vld [vmem:[%s6494_s14 + $0x37] sm:$0xfe]  ;;  %v5288_v8 = vld [vmem:[%s6494_s14 + $0x3f] ss:$0 sm:$0xff]  ;;  %v4866_v47 = vld [vmem:[%s6431_s22 + $0x8] sm:$0xff]  ;;  %v1741_v48 = vmul.f32 %v4865_v42, %v6397_v45  ;;  %v1744_v49 = vmul.f32 %v4865_v42, %v6399_v44 }
 0x32c   : >>> { %v3573_v9 = vld [vmem:[%s6534_s20] ss:$0 sm:$0xff]  ;;  %5286 = vst [vmem:[%s6494_s14 + $0x30] sm:$0xff] %v3558_v5  ;;  %v3569_v0 = vsel %vm7874_vm1, %v5285_v57, %v5287_v7  ;;  %v5291_v10 = vld [vmem:[%s6534_s20 + $0x39] sm:$0x7f]  ;;  %v1742_v31 = vmul.f32 %v4866_v47, %v6399_v44  ;;  %v1745_v50 = vmul.f32 %v4866_v47, %v6397_v45  ;;  %4867 = vst [vmem:[%s6420_s26 + $0x8] sm:$0xff] %v1737_v51 }
 0x32d   : >>> { %5290 = vst [vmem:[%s6494_s14 + $0x1] sm:$0x1] %v3573_v9  ;;  %v5292_v12 = vld [vmem:[%s6534_s20 + $0x38] ss:$0 sm:$0xff]  ;;  %v5294_v13 = vld [vmem:[%s6534_s20 + $0x31] sm:$0x7f]  ;;  %v3582_v14 = vsel %vm7873_vm2, %v5288_v8, %v5291_v10 }
 0x32e   : >>> { %5289 = vst [vmem:[%s6494_s14 + $0x38] sm:$0xff] %v3569_v0  ;;  %v3591_v6 = vsel %vm7873_vm2, %v5292_v12, %v5294_v13  ;;  %v5295_v16 = vld [vmem:[%s6534_s20 + $0x30] ss:$0 sm:$0xff]  ;;  %v5297_v17 = vld [vmem:[%s6534_s20 + $0x29] sm:$0x7f]  ;;  %5293 = vst [vmem:[%s6534_s20 + $0x38] sm:$0xff] %v3582_v14  ;;  %v1743_v36 = vsub.f32 %v1741_v48, %v1742_v31  ;;  %v1746_v53 = vadd.f32 %v1745_v50, %v1744_v49 }
 0x32f   : >>> { %v5298_v15 = vld [vmem:[%s6534_s20 + $0x28] ss:$0 sm:$0xff]  ;;  %5296 = vst [vmem:[%s6534_s20 + $0x30] sm:$0xff] %v3591_v6  ;;  %v3600_v11 = vsel %vm7873_vm2, %v5295_v16, %v5297_v17  ;;  %v5300_v20 = vld [vmem:[%s6534_s20 + $0x21] sm:$0x7f]  ;;  %4868 = vst [vmem:[%s6422_s27 + $0x8] sm:$0xff] %v1740_v52 }
 0x330   : >>> { %v5301_v21 = vld [vmem:[%s6534_s20 + $0x20] ss:$0 sm:$0xff]  ;;  %v5303_v22 = vld [vmem:[%s6534_s20 + $0x19] sm:$0x7f]  ;;  %5299 = vst [vmem:[%s6534_s20 + $0x28] sm:$0xff] %v3600_v11  ;;  %v3609_v18 = vsel %vm7873_vm2, %v5298_v15, %v5300_v20  ;;  %4869 = vst [vmem:[%s6429_s29 + $0x8] sm:$0xff] %v1743_v36 }
 0x331   : >>> { %v3618_v19 = vsel %vm7873_vm2, %v5301_v21, %v5303_v22  ;;  %v5304_v24 = vld [vmem:[%s6534_s20 + $0x18] ss:$0 sm:$0xff]  ;;  %v5306_v26 = vld [vmem:[%s6534_s20 + $0x11] sm:$0x7f]  ;;  %v5307_v27 = vld [vmem:[%s6534_s20 + $0x10] ss:$0 sm:$0xff] }
 0x332   : >>> { %5302 = vst [vmem:[%s6534_s20 + $0x20] sm:$0xff] %v3609_v18  ;;  %5305 = vst [vmem:[%s6534_s20 + $0x18] sm:$0xff] %v3618_v19  ;;  %v3627_v28 = vsel %vm7873_vm2, %v5304_v24, %v5306_v26  ;;  %v5309_v23 = vld [vmem:[%s6534_s20 + $0x9] sm:$0x7f]  ;;  %v5310_v30 = vld [vmem:[%s6534_s20 + $0x8] ss:$0 sm:$0xff] }
 0x333   : >>> { %v5312_v32 = vld [vmem:[%s6534_s20 + $0x1] sm:$0x7f]  ;;  %5308 = vst [vmem:[%s6534_s20 + $0x10] sm:$0xff] %v3627_v28  ;;  %v3636_v35 = vsel %vm7873_vm2, %v5307_v27, %v5309_v23  ;;  %4870 = vst [vmem:[%s6431_s22 + $0x8] sm:$0xff] %v1746_v53  ;;  %v4871_v54 = vld [vmem:[%s1751_s0 + $0x10] sm:$0xff]  ;;  %s1783_s26 = smov [#allocation14] }
 0x334   : >>> { %v3644_v38 = vsel %vm7873_vm2, %v5310_v30, %v5312_v32  ;;  %5311 = vst [vmem:[%s6534_s20 + $0x8] sm:$0xff] %v3636_v35  ;;  %v1763_v56 = vmul.f32 %v4871_v54, %v6397_v45  ;;  %v1766_v58 = vmul.f32 %v4871_v54, %v6399_v44  ;;  %s1785_s27 = smov [#allocation15]  ;;  %s1807_s29 = smov [#allocation12] }
 0x335   : >>> { %3646 = vst [vmem:[%s6534_s20] sm:$0xff] %v3644_v38  ;;  %s1809_s22 = smov [#allocation13]  ;;  %s7112_s20 = smov [#allocation13] }
 0x336   : >>> { %v4872_v55 = vld [vmem:[%s1753_s30 + $0x10] sm:$0xff]  ;;  %s7144_s14 = smov [#allocation15] }
 0x337   : >>> { %v1764_v37 = vmul.f32 %v4872_v55, %v6399_v44  ;;  %v1767_v59 = vmul.f32 %v4872_v55, %v6397_v45  ;;  %v4873_v60 = vld [vmem:[%s1755_s15 + $0x10] sm:$0xff] }
 0x338   : >>> { %v1769_v62 = vmul.f32 %v4873_v60, %v6397_v45  ;;  %v1772_v63 = vmul.f32 %v4873_v60, %v6399_v44 }
 0x339   : >>> { %v1765_v2 = vsub.f32 %v1763_v56, %v1764_v37  ;;  %v1768_v3 = vadd.f32 %v1767_v59, %v1766_v58 }
 0x33a   : >>> { %v4874_v61 = vld [vmem:[%s1757_s16 + $0x10] sm:$0xff] }
 0x33b   : >>> { %v1770_v39 = vmul.f32 %v4874_v61, %v6399_v44  ;;  %v1773_v1 = vmul.f32 %v4874_v61, %v6397_v45  ;;  %4875 = vst [vmem:[%s1751_s0 + $0x10] sm:$0xff] %v1765_v2  ;;  %4876 = vst [vmem:[%s1753_s30 + $0x10] sm:$0xff] %v1768_v3  ;;  %s1811_s0 = smov [#allocation14]  ;;  %s1813_s30 = smov [#allocation15] }
 0x33d   : >>> { %v1771_v4 = vsub.f32 %v1769_v62, %v1770_v39  ;;  %v1774_v57 = vadd.f32 %v1773_v1, %v1772_v63 }
 0x33f   : >>> { %4877 = vst [vmem:[%s1755_s15 + $0x10] sm:$0xff] %v1771_v4  ;;  %4878 = vst [vmem:[%s1757_s16 + $0x10] sm:$0xff] %v1774_v57  ;;  %s1835_s15 = smov [#allocation12]  ;;  %s1837_s16 = smov [#allocation13] }
 0x342   : >>> { %v4879_v5 = vld [vmem:[%s1779_s23 + $0x18] sm:$0xff] }
 0x343   : >>> { %v4880_v7 = vld [vmem:[%s1781_s24 + $0x18] sm:$0xff]  ;;  %v1791_v8 = vmul.f32 %v4879_v5, %v6397_v45  ;;  %v1794_v0 = vmul.f32 %v4879_v5, %v6399_v44 }
 0x344   : >>> { %v1792_v9 = vmul.f32 %v4880_v7, %v6399_v44  ;;  %v1795_v10 = vmul.f32 %v4880_v7, %v6397_v45 }
 0x346   : >>> { %v4881_v12 = vld [vmem:[%s1783_s26 + $0x18] sm:$0xff]  ;;  %v1793_v15 = vsub.f32 %v1791_v8, %v1792_v9  ;;  %v1796_v11 = vadd.f32 %v1795_v10, %v1794_v0  ;;  %v6684_v0 = vadd.s32 8, %v6667_v34  ;;  %v6687_v10 = vadd.s32 16, %v6667_v34 }
 0x347   : >>> { %v4882_v13 = vld [vmem:[%s1785_s27 + $0x18] sm:$0xff]  ;;  %v1797_v14 = vmul.f32 %v4881_v12, %v6397_v45  ;;  %v1800_v16 = vmul.f32 %v4881_v12, %v6399_v44  ;;  %v6690_v12 = vadd.s32 24, %v6667_v34 }
 0x348   : >>> { %v1798_v6 = vmul.f32 %v4882_v13, %v6399_v44  ;;  %v1801_v17 = vmul.f32 %v4882_v13, %v6397_v45  ;;  %4883 = vst [vmem:[%s1779_s23 + $0x18] sm:$0xff] %v1793_v15  ;;  %4884 = vst [vmem:[%s1781_s24 + $0x18] sm:$0xff] %v1796_v11  ;;  %s1839_s23 = smov [#allocation14]  ;;  %s1841_s24 = smov [#allocation15]  ;;  %v6693_v13 = vadd.s32 32, %v6667_v34  ;;  %vm1939_vm4 = vcmp.eq.s32.totalorder %v6684_v0, %v6674_v33 }
 0x349   : >>> { %vm1947_vm5 = vcmp.eq.s32.totalorder %v6687_v10, %v6674_v33  ;;  %vm1955_vm6 = vcmp.eq.s32.totalorder %v6690_v12, %v6674_v33 }
 0x34a   : >>> { %v1799_v20 = vsub.f32 %v1797_v14, %v1798_v6  ;;  %v1802_v21 = vadd.f32 %v1801_v17, %v1800_v16  ;;  %v6696_v14 = vadd.s32 40, %v6667_v34  ;;  %v6699_v6 = vadd.s32 48, %v6667_v34 }
 0x34b   : >>> { %v6702_v34 = vmov %v5612_v34  ;;  %vm1963_vm7 = vcmp.eq.s32.totalorder %v6693_v13, %v6674_v33  ;;  %v6756_v33 = vmov %v5610_v33 }
 0x34c   : >>> { %4885 = vst [vmem:[%s1783_s26 + $0x18] sm:$0xff] %v1799_v20  ;;  %4886 = vst [vmem:[%s1785_s27 + $0x18] sm:$0xff] %v1802_v21  ;;  %s1863_s26 = smov [#allocation12]  ;;  %s1865_s27 = smov [#allocation13]  ;;  %v6707_v34 = vmov %v5612_v34  ;;  %v6777_v33 = vmov %v5610_v33 }
 0x34d   : >>> { %vm2000_vm11 = vcmp.eq.s32.totalorder %v6707_v34, %v6756_v33 }
 0x34f   : >>> { %v4887_v22 = vld [vmem:[%s1807_s29 + $0x20] sm:$0xff] }
 0x350   : >>> { %v4888_v18 = vld [vmem:[%s1809_s22 + $0x20] sm:$0xff]  ;;  %v1819_v19 = vmul.f32 %v4887_v22, %v6397_v45  ;;  %v1822_v26 = vmul.f32 %v4887_v22, %v6399_v44 }
 0x351   : >>> { %v1820_v24 = vmul.f32 %v4888_v18, %v6399_v44  ;;  %v1823_v27 = vmul.f32 %v4888_v18, %v6397_v45 }
 0x353   : >>> { %v4889_v28 = vld [vmem:[%s1811_s0 + $0x20] sm:$0xff]  ;;  %v1821_v41 = vsub.f32 %v1819_v19, %v1820_v24  ;;  %v1824_v29 = vadd.f32 %v1823_v27, %v1822_v26 }
 0x354   : >>> { %v4890_v23 = vld [vmem:[%s1813_s30 + $0x20] sm:$0xff]  ;;  %v1825_v30 = vmul.f32 %v4889_v28, %v6397_v45  ;;  %v1828_v35 = vmul.f32 %v4889_v28, %v6399_v44  ;;  %v6720_v28 = vadd.s32 56, %v6667_v34 }
 0x355   : >>> { %v1826_v32 = vmul.f32 %v4890_v23, %v6399_v44  ;;  %v1829_v38 = vmul.f32 %v4890_v23, %v6397_v45  ;;  %4891 = vst [vmem:[%s1807_s29 + $0x20] sm:$0xff] %v1821_v41  ;;  %4892 = vst [vmem:[%s1809_s22 + $0x20] sm:$0xff] %v1824_v29  ;;  %s1867_s29 = smov [#allocation14]  ;;  %s1869_s22 = smov [#allocation15]  ;;  %v6723_v23 = vadd.s32 8, %v6702_v34  ;;  %v6740_v41 = vadd.s32 32, %v6702_v34 }
 0x356   : >>> { %v2006_v29 = vadd.s32 8, %v6707_v34 }
 0x357   : >>> { %v1827_v42 = vsub.f32 %v1825_v30, %v1826_v32  ;;  %v1830_v25 = vadd.f32 %v1829_v38, %v1828_v35  ;;  %v6728_v35 = vadd.s32 16, %v6702_v34  ;;  %v6731_v38 = vadd.s32 24, %v6702_v34 }
 0x358   : >>> { %vm2007_vm12 = vcmp.eq.s32.totalorder %v2006_v29, %v6756_v33 }
 0x359   : >>> { %4893 = vst [vmem:[%s1811_s0 + $0x20] sm:$0xff] %v1827_v42  ;;  %4894 = vst [vmem:[%s1813_s30 + $0x20] sm:$0xff] %v1830_v25  ;;  %s6669_s0 = smov [#allocation12]  ;;  %s6671_s30 = smov [#allocation13]  ;;  %v2013_v42 = vadd.s32 16, %v6707_v34  ;;  %v6747_v34 = vmov %v5612_v34  ;;  %v2020_v25 = vadd.s32 24, %v6707_v34 }
 0x35a   : >>> { %vm2062_vm8 = vcmp.eq.s32.totalorder %v6747_v34, %v6777_v33 }
 0x35b   : >>> { %vm2014_vm13 = vcmp.eq.s32.totalorder %v2013_v42, %v6756_v33  ;;  %vm2021_vm1 = vcmp.eq.s32.totalorder %v2020_v25, %v6756_v33 }
 0x35c   : >>> { %v4895_v40 = vld [vmem:[%s1835_s15 + $0x28] sm:$0xff] }
 0x35d   : >>> { %v4896_v43 = vld [vmem:[%s1837_s16 + $0x28] sm:$0xff]  ;;  %v1847_v46 = vmul.f32 %v4895_v40, %v6397_v45  ;;  %v1850_v48 = vmul.f32 %v4895_v40, %v6399_v44  ;;  %v2027_v40 = vadd.s32 32, %v6707_v34 }
 0x35e   : >>> { %v1848_v47 = vmul.f32 %v4896_v43, %v6399_v44  ;;  %v1851_v31 = vmul.f32 %v4896_v43, %v6397_v45  ;;  %v2034_v43 = vadd.s32 40, %v6707_v34 }
 0x35f   : >>> { %vm2028_vm0 = vcmp.eq.s32.totalorder %v2027_v40, %v6756_v33 }
 0x360   : >>> { %v4897_v49 = vld [vmem:[%s1839_s23 + $0x28] sm:$0xff]  ;;  %v1849_v54 = vsub.f32 %v1847_v46, %v1848_v47  ;;  %v1852_v55 = vadd.f32 %v1851_v31, %v1850_v48  ;;  %v6766_v46 = vadd.s32 40, %v6702_v34  ;;  %v6769_v47 = vadd.s32 48, %v6702_v34 }
 0x361   : >>> { %v4898_v50 = vld [vmem:[%s1841_s24 + $0x28] sm:$0xff]  ;;  %v1853_v51 = vmul.f32 %v4897_v49, %v6397_v45  ;;  %v1856_v36 = vmul.f32 %v4897_v49, %v6399_v44  ;;  %v2041_v48 = vadd.s32 48, %v6707_v34  ;;  %v2048_v31 = vadd.s32 56, %v6707_v34 }
 0x362   : >>> { %v1854_v52 = vmul.f32 %v4898_v50, %v6399_v44  ;;  %v1857_v53 = vmul.f32 %v4898_v50, %v6397_v45  ;;  %4899 = vst [vmem:[%s1835_s15 + $0x28] sm:$0xff] %v1849_v54  ;;  %4900 = vst [vmem:[%s1837_s16 + $0x28] sm:$0xff] %v1852_v55  ;;  %s6679_s15 = smov [#allocation14]  ;;  %s6681_s16 = smov [#allocation15]  ;;  %v6774_v49 = vadd.s32 56, %v6702_v34  ;;  %v6780_v50 = vadd.s32 8, %v6747_v34 }
 0x363   : >>> { %vm2035_vm10 = vcmp.eq.s32.totalorder %v2034_v43, %v6756_v33  ;;  %vm2042_vm14 = vcmp.eq.s32.totalorder %v2041_v48, %v6756_v33  ;;  %vm2049_vm9 = vcmp.eq.s32.totalorder %v2048_v31, %v6756_v33  ;;  %v6821_v54 = vadd.s32 40, %v6747_v34 }
 0x364   : >>> { %v1855_v56 = vsub.f32 %v1853_v51, %v1854_v52  ;;  %v1858_v37 = vadd.f32 %v1857_v53, %v1856_v36  ;;  %v6783_v51 = vadd.s32 16, %v6747_v34  ;;  %v6792_v52 = vadd.s32 24, %v6747_v34 }
 0x365   : >>> { %v6804_v36 = vadd.s32 32, %v6747_v34  ;;  %vm2069_vm2 = vcmp.eq.s32.totalorder %v6780_v50, %v6777_v33 }
 0x366   : >>> { %4901 = vst [vmem:[%s1839_s23 + $0x28] sm:$0xff] %v1855_v56  ;;  %4902 = vst [vmem:[%s1841_s24 + $0x28] sm:$0xff] %v1858_v37  ;;  %s1920_s23 = smov [#allocation19]  ;;  %s6785_s24 = smov [#allocation13]  ;;  %vm2083_vm15 = vcmp.eq.s32.totalorder %v6792_v52, %v6777_v33 }
 0x367   : >>> { %v6808_v53 = vld [vmem:[%s1920_s23] ss:$0 sm:$0xff]  ;;  %s7043_s23 = smov [#allocation13] }
 0x369   : >>> { %v4903_v58 = vld [vmem:[%s1863_s26 + $0x30] sm:$0xff] }
 0x36a   : >>> { %v4904_v59 = vld [vmem:[%s1865_s27 + $0x30] sm:$0xff]  ;;  %v1875_v60 = vmul.f32 %v4903_v58, %v6397_v45  ;;  %v1878_v62 = vmul.f32 %v4903_v58, %v6399_v44  ;;  %v6833_v58 = vadd.s32 48, %v6747_v34 }
 0x36b   : >>> { %v1876_v61 = vmul.f32 %v4904_v59, %v6399_v44  ;;  %v1879_v39 = vmul.f32 %v4904_v59, %v6397_v45  ;;  %v6836_v59 = vadd.s32 56, %v6747_v34 }
 0x36d   : >>> { %v4905_v63 = vld [vmem:[%s1867_s29 + $0x30] sm:$0xff]  ;;  %v1877_v5 = vsub.f32 %v1875_v60, %v1876_v61  ;;  %v1880_v7 = vadd.f32 %v1879_v39, %v1878_v62 }
 0x36e   : >>> { %v4906_v1 = vld [vmem:[%s1869_s22 + $0x30] sm:$0xff]  ;;  %v1881_v2 = vmul.f32 %v4905_v63, %v6397_v45  ;;  %v1884_v4 = vmul.f32 %v4905_v63, %v6399_v44 }
 0x36f   : >>> { %v1882_v3 = vmul.f32 %v4906_v1, %v6399_v44  ;;  %v1885_v57 = vmul.f32 %v4906_v1, %v6397_v45  ;;  %4907 = vst [vmem:[%s1863_s26 + $0x30] sm:$0xff] %v1877_v5  ;;  %4908 = vst [vmem:[%s1865_s27 + $0x30] sm:$0xff] %v1880_v7  ;;  %s6806_s26 = smov [#allocation12]  ;;  %s6810_s27 = smov [#allocation20] }
 0x371   : >>> { %v1883_v8 = vsub.f32 %v1881_v2, %v1882_v3  ;;  %v1886_v9 = vadd.f32 %v1885_v57, %v1884_v4 }
 0x373   : >>> { %4909 = vst [vmem:[%s1867_s29 + $0x30] sm:$0xff] %v1883_v8  ;;  %4910 = vst [vmem:[%s1869_s22 + $0x30] sm:$0xff] %v1886_v9  ;;  %s6826_s29 = smov [#allocation14]  ;;  %s6903_s22 = smov [#allocation15] }
 0x376   : >>> { %v4911_v16 = vld [vmem:[%s6669_s0 + $0x38] sm:$0xff] }
 0x377   : >>> { %v4912_v17 = vld [vmem:[%s6671_s30 + $0x38] sm:$0xff]  ;;  %v1906_v11 = vmul.f32 %v4911_v16, %v6399_v44  ;;  %v1903_v21 = vmul.f32 %v4911_v16, %v6397_v45 }
 0x378   : >>> { %v1904_v15 = vmul.f32 %v4912_v17, %v6399_v44  ;;  %v1907_v20 = vmul.f32 %v4912_v17, %v6397_v45 }
 0x37a   : >>> { %v4913_v22 = vld [vmem:[%s6679_s15 + $0x38] sm:$0xff]  ;;  %v1908_v30 = vadd.f32 %v1907_v20, %v1906_v11  ;;  %v1905_v32 = vsub.f32 %v1903_v21, %v1904_v15  ;;  %v6881_v20 = vld [vmem:[%s6810_s27] ss:$0 sm:$0xff]  ;;  %s7053_s27 = smov [#allocation14] }
 0x37b   : >>> { %v4914_v18 = vld [vmem:[%s6681_s16 + $0x38] sm:$0xff]  ;;  %v1909_v19 = vmul.f32 %v4913_v22, %v6397_v45  ;;  %v1912_v26 = vmul.f32 %v4913_v22, %v6399_v44 }
 0x37c   : >>> { %v1910_v24 = vmul.f32 %v4914_v18, %v6399_v44  ;;  %v1913_v27 = vmul.f32 %v4914_v18, %v6397_v45  ;;  %4916 = vst [vmem:[%s6671_s30 + $0x38] sm:$0xff] %v1908_v30  ;;  %4915 = vst [vmem:[%s6669_s0 + $0x38] sm:$0xff] %v1905_v32  ;;  %s6927_s0 = smov [#allocation13]  ;;  %s7015_s30 = smov [#allocation12] }
 0x37e   : >>> { %v1911_v44 = vsub.f32 %v1909_v19, %v1910_v24  ;;  %v1914_v45 = vadd.f32 %v1913_v27, %v1912_v26 }
 0x380   : >>> { %4917 = vst [vmem:[%s6679_s15 + $0x38] sm:$0xff] %v1911_v44  ;;  %4918 = vst [vmem:[%s6681_s16 + $0x38] sm:$0xff] %v1914_v45  ;;  %s5469_s15 = smov 1   ;;  %s7029_s16 = smov [#allocation12] }
 0x383   : >>> { %v1997_v55 = vld [vmem:[%s6785_s24] sm:$0xff]  ;;  %v4933_v56 = vld [vmem:[%s6785_s24 + $0x8] sm:$0xff]  ;;  %v4935_v37 = vld [vmem:[%s6785_s24 + $0x10] sm:$0xff] }
 0x384   : >>> { %v2001_v60 = vsel %vm2000_vm11, 0.0, %v1997_v55  ;;  %v2008_v61 = vsel %vm2007_vm12, 0.0, %v4933_v56  ;;  %v2015_v62 = vsel %vm2014_vm13, 0.0, %v4935_v37  ;;  %v4937_v39 = vld [vmem:[%s6785_s24 + $0x18] sm:$0xff]  ;;  %v4939_v63 = vld [vmem:[%s6785_s24 + $0x20] sm:$0xff]  ;;  %v4941_v1 = vld [vmem:[%s6785_s24 + $0x28] sm:$0xff]  ;;  %vm2090_vm11 = vcmp.eq.s32.totalorder %v6804_v36, %v6777_v33 }
 0x385   : >>> { %2002 = vst [vmem:[%s6785_s24] sm:$0xff] %v2001_v60  ;;  %4934 = vst [vmem:[%s6785_s24 + $0x8] sm:$0xff] %v2008_v61  ;;  %v2022_v2 = vsel %vm2021_vm1, 0.0, %v4937_v39  ;;  %v2029_v3 = vsel %vm2028_vm0, 0.0, %v4939_v63  ;;  %v2036_v4 = vsel %vm2035_vm10, 0.0, %v4941_v1  ;;  %v4943_v57 = vld [vmem:[%s6785_s24 + $0x30] sm:$0xff]  ;;  %v4945_v5 = vld [vmem:[%s6785_s24 + $0x38] sm:$0xff]  ;;  %vm2097_vm0 = vcmp.eq.s32.totalorder %v6821_v54, %v6777_v33 }
 0x386   : >>> { %4936 = vst [vmem:[%s6785_s24 + $0x10] sm:$0xff] %v2015_v62  ;;  %v1928_v7 = vld [vmem:[%s6806_s26] sm:$0xff]  ;;  %4938 = vst [vmem:[%s6785_s24 + $0x18] sm:$0xff] %v2022_v2  ;;  %v2043_v8 = vsel %vm2042_vm14, 0.0, %v4943_v57  ;;  %v2050_v9 = vsel %vm2049_vm9, 0.0, %v4945_v5  ;;  %v4919_v17 = vld [vmem:[%s6806_s26 + $0x8] sm:$0xff]  ;;  %vm2104_vm1 = vcmp.eq.s32.totalorder %v6833_v58, %v6777_v33  ;;  %vm2174_vm9 = vcmp.eq.s32.totalorder %v6769_v47, %v6677_v33 }
 0x387   : >>> { %4940 = vst [vmem:[%s6785_s24 + $0x20] sm:$0xff] %v2029_v3  ;;  %4942 = vst [vmem:[%s6785_s24 + $0x28] sm:$0xff] %v2036_v4  ;;  %v1932_v16 = vsel %vm1931_vm3, %v6808_v53, %v1928_v7  ;;  %v4921_v15 = vld [vmem:[%s6806_s26 + $0x10] sm:$0xff]  ;;  %v4923_v11 = vld [vmem:[%s6806_s26 + $0x18] sm:$0xff]  ;;  %v1940_v21 = vsel %vm1939_vm4, %v6808_v53, %v4919_v17  ;;  %vm7932_vm3 = vcmp.eq.s32.totalorder %v6696_v14, %v6674_v33 }
 0x388   : >>> { %4944 = vst [vmem:[%s6785_s24 + $0x30] sm:$0xff] %v2043_v8  ;;  %4946 = vst [vmem:[%s6785_s24 + $0x38] sm:$0xff] %v2050_v9  ;;  %v1948_v22 = vsel %vm1947_vm5, %v6808_v53, %v4921_v15  ;;  %v1956_v18 = vsel %vm1955_vm6, %v6808_v53, %v4923_v11  ;;  %v4925_v19 = vld [vmem:[%s6806_s26 + $0x20] sm:$0xff]  ;;  %v4927_v24 = vld [vmem:[%s6806_s26 + $0x28] sm:$0xff]  ;;  %vm7933_vm4 = vcmp.eq.s32.totalorder %v6699_v6, %v6674_v33  ;;  %s7876_s24 = smov 127  }
 0x389   : >>> { %1933 = vst [vmem:[%s6806_s26] sm:$0xff] %v1932_v16  ;;  %v4929_v26 = vld [vmem:[%s6806_s26 + $0x30] sm:$0xff]  ;;  %4920 = vst [vmem:[%s6806_s26 + $0x8] sm:$0xff] %v1940_v21  ;;  %v1964_v0 = vsel %vm1963_vm7, %v6808_v53, %v4925_v19  ;;  %v1972_v10 = vsel %vm7932_vm3, %v6808_v53, %v4927_v24  ;;  %v4931_v27 = vld [vmem:[%s6806_s26 + $0x38] sm:$0xff]  ;;  %vm2111_vm5 = vcmp.eq.s32.totalorder %v6836_v59, %v6777_v33  ;;  %vm7945_vm3 = vcmp.lt.s32.totalorder %v5610_v33, 64 }
 0x38a   : >>> { %4922 = vst [vmem:[%s6806_s26 + $0x10] sm:$0xff] %v1948_v22  ;;  %4924 = vst [vmem:[%s6806_s26 + $0x18] sm:$0xff] %v1956_v18  ;;  %v1980_v12 = vsel %vm7933_vm4, %v6808_v53, %v4929_v26  ;;  %v2059_v30 = vld [vmem:[%s6826_s29] sm:$0xff]  ;;  %v4947_v32 = vld [vmem:[%s6826_s29 + $0x8] sm:$0xff]  ;;  %vm2166_vm6 = vcmp.eq.s32.totalorder %v6766_v46, %v6677_v33  ;;  %vm7934_vm7 = vcmp.eq.s32.totalorder %v6720_v28, %v6674_v33 }
 0x38b   : >>> { %4926 = vst [vmem:[%s6806_s26 + $0x20] sm:$0xff] %v1964_v0  ;;  %4928 = vst [vmem:[%s6806_s26 + $0x28] sm:$0xff] %v1972_v10  ;;  %v1988_v13 = vsel %vm7934_vm7, %v6808_v53, %v4931_v27  ;;  %v2063_v14 = vsel %vm2062_vm8, 0.0, %v2059_v30  ;;  %v2070_v6 = vsel %vm2069_vm2, 0.0, %v4947_v32  ;;  %v4949_v44 = vld [vmem:[%s6826_s29 + $0x10] sm:$0xff]  ;;  %v4951_v45 = vld [vmem:[%s6826_s29 + $0x18] sm:$0xff]  ;;  %vm7935_vm8 = vcmp.eq.s32.totalorder %v6783_v51, %v6777_v33 }
 0x38c   : >>> { %4930 = vst [vmem:[%s6806_s26 + $0x30] sm:$0xff] %v1980_v12  ;;  %v4953_v29 = vld [vmem:[%s6826_s29 + $0x20] sm:$0xff]  ;;  %4932 = vst [vmem:[%s6806_s26 + $0x38] sm:$0xff] %v1988_v13  ;;  %v2077_v28 = vsel %vm7935_vm8, 0.0, %v4949_v44  ;;  %v2084_v42 = vsel %vm2083_vm15, 0.0, %v4951_v45  ;;  %v4955_v40 = vld [vmem:[%s6826_s29 + $0x28] sm:$0xff]  ;;  %vm2182_vm2 = vcmp.eq.s32.totalorder %v6774_v49, %v6677_v33  ;;  %vm7936_vm10 = vcmp.eq.s32.totalorder %v6702_v34, %v6677_v33 }
 0x38d   : >>> { %2064 = vst [vmem:[%s6826_s29] sm:$0xff] %v2063_v14  ;;  %4948 = vst [vmem:[%s6826_s29 + $0x8] sm:$0xff] %v2070_v6  ;;  %v2091_v25 = vsel %vm2090_vm11, 0.0, %v4953_v29  ;;  %v4957_v43 = vld [vmem:[%s6826_s29 + $0x30] sm:$0xff]  ;;  %v4959_v48 = vld [vmem:[%s6826_s29 + $0x38] sm:$0xff]  ;;  %v2098_v31 = vsel %vm2097_vm0, 0.0, %v4955_v40  ;;  %vm7937_vm12 = vcmp.eq.s32.totalorder %v6723_v23, %v6677_v33  ;;  %vm7938_vm13 = vcmp.eq.s32.totalorder %v6728_v35, %v6677_v33  ;;  %s7047_s26 = smov [#allocation13] }
 0x38e   : >>> { %4950 = vst [vmem:[%s6826_s29 + $0x10] sm:$0xff] %v2077_v28  ;;  %4952 = vst [vmem:[%s6826_s29 + $0x18] sm:$0xff] %v2084_v42  ;;  %v2105_v50 = vsel %vm2104_vm1, 0.0, %v4957_v43  ;;  %v2112_v51 = vsel %vm2111_vm5, 0.0, %v4959_v48  ;;  %v2123_v52 = vld [vmem:[%s6903_s22] sm:$0xff]  ;;  %v4961_v36 = vld [vmem:[%s6903_s22 + $0x8] sm:$0xff]  ;;  %vm7939_vm14 = vcmp.eq.s32.totalorder %v6731_v38, %v6677_v33  ;;  %vm7940_vm15 = vcmp.eq.s32.totalorder %v6740_v41, %v6677_v33 }
 0x38f   : >>> { %4954 = vst [vmem:[%s6826_s29 + $0x20] sm:$0xff] %v2091_v25  ;;  %v4963_v53 = vld [vmem:[%s6903_s22 + $0x10] sm:$0xff]  ;;  %4956 = vst [vmem:[%s6826_s29 + $0x28] sm:$0xff] %v2098_v31  ;;  %v4965_v54 = vld [vmem:[%s6903_s22 + $0x18] sm:$0xff]  ;;  %v2127_v37 = vsel %vm7936_vm10, %v6881_v20, %v2123_v52  ;;  %v2135_v58 = vsel %vm7937_vm12, %v6881_v20, %v4961_v36  ;;  %vm2196_vm11 = vcmp.eq.s32.totalorder %v5610_v33, 0  ;;  %vm2200_vm0 = vcmp.eq.s32.totalorder %v5610_v33, 1 }
 0x390   : >>> { %4958 = vst [vmem:[%s6826_s29 + $0x30] sm:$0xff] %v2105_v50  ;;  %4960 = vst [vmem:[%s6826_s29 + $0x38] sm:$0xff] %v2112_v51  ;;  %v4967_v55 = vld [vmem:[%s6903_s22 + $0x20] sm:$0xff]  ;;  %v4969_v56 = vld [vmem:[%s6903_s22 + $0x28] sm:$0xff]  ;;  %v2143_v59 = vsel %vm7938_vm13, %v6881_v20, %v4963_v53  ;;  %v2151_v62 = vsel %vm7939_vm14, %v6881_v20, %v4965_v54  ;;  %s7059_s29 = smov [#allocation12]  ;;  %vm2213_vm1 = vcmp.eq.s32.totalorder %v5610_v33, 63 }
 0x391   : >>> { %v4971_v60 = vld [vmem:[%s6903_s22 + $0x30] sm:$0xff]  ;;  %v4973_v61 = vld [vmem:[%s6903_s22 + $0x38] sm:$0xff]  ;;  %v2159_v23 = vsel %vm7940_vm15, %v6881_v20, %v4967_v55  ;;  %v2167_v35 = vsel %vm2166_vm6, %v6881_v20, %v4969_v56  ;;  %2128 = vst [vmem:[%s6903_s22] sm:$0xff] %v2127_v37  ;;  %4962 = vst [vmem:[%s6903_s22 + $0x8] sm:$0xff] %v2135_v58 }
 0x392   : >>> { %4964 = vst [vmem:[%s6903_s22 + $0x10] sm:$0xff] %v2143_v59  ;;  %v2187_v39 = vld [vmem:[%s6927_s0] sm:$0xff]  ;;  %v2175_v38 = vsel %vm2174_vm9, %v6881_v20, %v4971_v60  ;;  %v2183_v41 = vsel %vm2182_vm2, %v6881_v20, %v4973_v61  ;;  %4966 = vst [vmem:[%s6903_s22 + $0x18] sm:$0xff] %v2151_v62  ;;  %v4979_v49 = vld [vmem:[%s7043_s23 + $0x10] sm:$0xff] }
 0x393   : >>> { %4968 = vst [vmem:[%s6903_s22 + $0x20] sm:$0xff] %v2159_v23  ;;  %4970 = vst [vmem:[%s6903_s22 + $0x28] sm:$0xff] %v2167_v35  ;;  %2188 = vrot.lane.b32.xlu0 %v2187_v39, %s5469_s15  ;;  %v7034_v46 = vld [vmem:[%s7015_s30] sm:$0xff] }
 0x394   : >>> { %4972 = vst [vmem:[%s6903_s22 + $0x30] sm:$0xff] %v2175_v38  ;;  %4974 = vst [vmem:[%s6903_s22 + $0x38] sm:$0xff] %v2183_v41  ;;  %2192 = vrot.lane.b32.xlu1 %v7034_v46, %s5469_s15  ;;  %v7039_v47 = vld [vmem:[%s7029_s16 + $0x8] sm:$0xff]  ;;  %s7063_s22 = smov [#allocation14] }
 0x395   : >>> { %v4975_v63 = vld [vmem:[%s7047_s26 + $0x8] sm:$0xff]  ;;  %v7066_v2 = vld [vmem:[%s7059_s29 + $0x10] sm:$0xff]  ;;  %v4983_v4 = vld [vmem:[%s7073_s1 + $0x18] sm:$0xff] }
 0x396   : >>> { %v7096_v7 = vld [vmem:[%s7089_s18 + $0x18] sm:$0xff]  ;;  %v7115_v16 = vld [vmem:[%s7108_s9 + $0x20] sm:$0xff]  ;;  %v7139_v20 = vld [vmem:[%s7132_s7 + $0x28] sm:$0xff] }
 0x397   : >>> { %2224 = vrot.lane.b32.xlu0 %v7039_v47, %s5469_s15  ;;  %v7057_v1 = vld [vmem:[%s7053_s27] sm:$0xff]  ;;  %v7071_v3 = vld [vmem:[%s7063_s22 + $0x8] sm:$0xff]  ;;  %v7087_v5 = vld [vmem:[%s7083_s3 + $0x10] sm:$0xff] }
 0x398   : >>> { %2209 = vrot.lane.b32.xlu1 %v2187_v39, %s7876_s24  ;;  %v7106_v9 = vld [vmem:[%s7102_s13 + $0x18] sm:$0xff]  ;;  %v4987_v17 = vld [vmem:[%s7112_s20 + $0x20] sm:$0xff]  ;;  %v4991_v21 = vld [vmem:[%s7136_s6 + $0x28] sm:$0xff] }
 0x399   : >>> { %v7130_v11 = vld [vmem:[%s7126_s17 + $0x20] sm:$0xff]  ;;  %v7154_v18 = vld [vmem:[%s7150_s11 + $0x28] sm:$0xff]  ;;  %v7163_v19 = vld [vmem:[%s7156_s5 + $0x30] sm:$0xff] }
 0x39a   : >>> { %v4995_v24 = vld [vmem:[%s7160_s4 + $0x30] sm:$0xff]  ;;  %v7187_v10 = vld [vmem:[%s7180_s12 + $0x38] sm:$0xff]  ;;  %s7195_s4 = smov [#allocation15]  ;;  %vm7946_vm4 = vmmov %vm7945_vm3 }
 0x39b   : >>> { %2252 = vrot.lane.b32.xlu0 %v4979_v49, %s5469_s15  ;;  %v5020_v8 = vld [vmem:[%s7093_s10 + $0x8] sm:$0xff]  ;;  %v5021_v15 = vld [vmem:[%s7120_s8 + $0x10] sm:$0xff]  ;;  %v5025_v22 = vld [vmem:[%s7144_s14 + $0x18] sm:$0xff] }
 0x39c   : >>> { %2220 = vrot.lane.b32.xlu1 %v4975_v63, %s5469_s15  ;;  %v5029_v26 = vld [vmem:[%s7168_s19 + $0x20] sm:$0xff]  ;;  %v7178_v0 = vld [vmem:[%s7174_s28 + $0x30] sm:$0xff]  ;;  %v4999_v12 = vld [vmem:[%s7184_s25 + $0x38] sm:$0xff]  ;;  %s7203_s28 = smov [#allocation15]  ;;  %s7207_s25 = smov [#allocation14] }
 0x39d   : >>> { %v5033_v27 = vld [vmem:[%s7192_s21 + $0x28] sm:$0xff]  ;;  %v5037_v30 = vld [vmem:[%s7195_s4 + $0x30] sm:$0xff]  ;;  %v5041_v32 = vld [vmem:[%s7203_s28 + $0x38] sm:$0xff] }
 0x39e   : >>> { %v7211_v13 = vld [vmem:[%s7207_s25 + $0x38] sm:$0xff]  ;;  %vm7947_vm5 = vmmov %vm7945_vm3 }
 0x39f   : >>> { %2273 = vrot.lane.b32.xlu0 %v4979_v49, %s7876_s24  ;;  %vm7948_vm6 = vmmov %vm7945_vm3 }
 0x3a0   : >>> { %2241 = vrot.lane.b32.xlu1 %v4975_v63, %s7876_s24  ;;  %s7077_s24 = smov [#allocation15]  ;;  %vm7949_vm7 = vmmov %vm7945_vm3 }
 0x3a1   : >>> { %v2478_v57 = vld [vmem:[%s7077_s24] sm:$0xff]  ;;  %vm7950_vm9 = vmmov %vm7945_vm3 }
 0x3a2   : >>> { %vm7951_vm8 = vmmov %vm7945_vm3 }
 0x3a3   : >>> { %2462 = vrot.lane.b32.xlu0 %v7057_v1, %s5469_s15  ;;  %vm7952_vm2 = vmmov %vm7945_vm3 }
 0x3a4   : >>> { %2256 = vrot.lane.b32.xlu1 %v7066_v2, %s5469_s15  ;;  %vm7953_vm10 = vmmov %vm7952_vm2 }
 0x3a5   : >>> { %vm7954_vm12 = vmmov %vm7952_vm2 }
 0x3a6   : >>> { %vm7955_vm13 = vmmov %vm7952_vm2 }
 0x3a7   : >>> { %2494 = vrot.lane.b32.xlu0 %v7071_v3, %s5469_s15  ;;  %vm7956_vm14 = vmmov %vm7952_vm2 }
 0x3a8   : >>> { %2284 = vrot.lane.b32.xlu1 %v4983_v4, %s5469_s15  ;;  %vm7958_vm15 = vmmov %vm7952_vm2 }
 0x3ab   : >>> { %2479 = vrot.lane.b32.xlu0 %v2478_v57, %s7941_s2 }
 0x3ac   : >>> { %2458 = vrot.lane.b32.xlu1 %v2478_v57, %s5469_s15 }
 0x3af   : >>> { %2526 = vrot.lane.b32.xlu0 %v7087_v5, %s5469_s15 }
 0x3b0   : >>> { %2288 = vrot.lane.b32.xlu1 %v7096_v7, %s5469_s15 }
 0x3b3   : >>> { %2511 = vrot.lane.b32.xlu0 %v5020_v8, %s7941_s2 }
 0x3b4   : >>> { %2490 = vrot.lane.b32.xlu1 %v5020_v8, %s5469_s15 }
 0x3b7   : >>> { %2558 = vrot.lane.b32.xlu0 %v7106_v9, %s5469_s15 }
 0x3b8   : >>> { %2320 = vrot.lane.b32.xlu1 %v7115_v16, %s5469_s15 }
 0x3bb   : >>> { %2316 = vrot.lane.b32.xlu0 %v4987_v17, %s5469_s15 }
 0x3bc   : >>> { %2522 = vrot.lane.b32.xlu1 %v5021_v15, %s5469_s15 }
 0x3bf   : >>> { %2543 = vrot.lane.b32.xlu0 %v5021_v15, %s7941_s2 }
 0x3c0   : >>> { %2305 = vrot.lane.b32.xlu1 %v4983_v4, %s7941_s2 }
 0x3c3   : >>> { %2590 = vrot.lane.b32.xlu0 %v7130_v11, %s5469_s15 }
 0x3c4   : >>> { %2352 = vrot.lane.b32.xlu1 %v7139_v20, %s5469_s15 }
 0x3c7   : >>> { %2348 = vrot.lane.b32.xlu0 %v4991_v21, %s5469_s15 }
 0x3c8   : >>> { %2554 = vrot.lane.b32.xlu1 %v5025_v22, %s5469_s15 }
 0x3cb   : >>> { %2575 = vrot.lane.b32.xlu0 %v5025_v22, %s7941_s2 }
 0x3cc   : >>> { %2337 = vrot.lane.b32.xlu1 %v4987_v17, %s7941_s2 }
 0x3cf   : >>> { %2622 = vrot.lane.b32.xlu0 %v7154_v18, %s5469_s15 }
 0x3d0   : >>> { %2384 = vrot.lane.b32.xlu1 %v7163_v19, %s5469_s15 }
 0x3d3   : >>> { %2380 = vrot.lane.b32.xlu0 %v4995_v24, %s5469_s15 }
 0x3d4   : >>> { %2586 = vrot.lane.b32.xlu1 %v5029_v26, %s5469_s15 }
 0x3d7   : >>> { %2607 = vrot.lane.b32.xlu0 %v5029_v26, %s7941_s2 }
 0x3d8   : >>> { %2369 = vrot.lane.b32.xlu1 %v4991_v21, %s7941_s2 }
 0x3db   : >>> { %2654 = vrot.lane.b32.xlu0 %v7178_v0, %s5469_s15 }
 0x3dc   : >>> { %2416 = vrot.lane.b32.xlu1 %v7187_v10, %s5469_s15 }
 0x3df   : >>> { %2412 = vrot.lane.b32.xlu0 %v4999_v12, %s5469_s15 }
 0x3e0   : >>> { %2618 = vrot.lane.b32.xlu1 %v5033_v27, %s5469_s15 }
 0x3e3   : >>> { %2650 = vrot.lane.b32.xlu0 %v5037_v30, %s5469_s15 }
 0x3e4   : >>> { %2401 = vrot.lane.b32.xlu1 %v4995_v24, %s7941_s2 }
 0x3e7   : >>> { %2433 = vrot.lane.b32.xlu0 %v4999_v12, %s7941_s2 }
 0x3e8   : >>> { %2639 = vrot.lane.b32.xlu1 %v5033_v27, %s7941_s2 }
 0x3eb   : >>> { %2682 = vrot.lane.b32.xlu0 %v5041_v32, %s5469_s15 }
 0x3ec   : >>> { %2686 = vrot.lane.b32.xlu1 %v7211_v13, %s5469_s15 }
 0x3f0   : >>> { %2671 = vrot.lane.b32.xlu1 %v5037_v30, %s7941_s2 }
 0x3f4   : >>> { %2703 = vrot.lane.b32.xlu1 %v5041_v32, %s7941_s2  ;;  %s7959_s2 = sld [smem:[#allocation37_spill]] }
 0x405   : >>> { %v2189_v14 = vpop.permute.xlu0 %2188 }
 0x406   : >>> { %v2193_v6 = vpop.permute.xlu1 %2192 }
 0x407   : >>> { %v2197_v44 = vsel %vm2196_vm11, %v7034_v46, %v2193_v6 }
 0x408   : >>> { %v2201_v29 = vsel %vm2200_vm0, %v2189_v14, %v2197_v44 }
 0x409   : >>> { %v2225_v45 = vpop.permute.xlu0 %2224  ;;  %v2207_v28 = vsel %vm7945_vm3, %v2201_v29, 0.0  ;;  %vm7960_vm3 = vmmov %vm7952_vm2 }
 0x40a   : >>> { %v2210_v42 = vpop.permute.xlu1 %2209  ;;  %2439 = vst [vmem:[%s7015_s30] sm:$0xff] %v2207_v28  ;;  %v2229_v43 = vsel %vm2196_vm11, %v7039_v47, %v2225_v45 }
 0x40b   : >>> { %v2214_v25 = vsel %vm2213_vm1, %v7034_v46, %v2210_v42 }
 0x40c   : >>> { %2440 = vst [vmem:[%s6927_s0] sm:$0xff] %v2214_v25 }
 0x40d   : >>> { %v2253_v40 = vpop.permute.xlu0 %2252 }
 0x40e   : >>> { %v2221_v48 = vpop.permute.xlu1 %2220 }
 0x40f   : >>> { %v2233_v31 = vsel %vm2200_vm0, %v2221_v48, %v2229_v43 }
 0x410   : >>> { %v2239_v51 = vsel %vm7946_vm4, %v2233_v31, 0.0  ;;  %vm7962_vm4 = vmmov %vm7952_vm2 }
 0x411   : >>> { %v2274_v50 = vpop.permute.xlu0 %2273  ;;  %5003 = vst [vmem:[%s7029_s16 + $0x8] sm:$0xff] %v2239_v51 }
 0x412   : >>> { %v2278_v52 = vsel %vm2213_vm1, %v7066_v2, %v2274_v50  ;;  %v2242_v36 = vpop.permute.xlu1 %2241 }
 0x413   : >>> { %v2246_v53 = vsel %vm2213_vm1, %v7039_v47, %v2242_v36 }
 0x414   : >>> { %5004 = vst [vmem:[%s7047_s26 + $0x8] sm:$0xff] %v2246_v53 }
 0x415   : >>> { %v2463_v54 = vpop.permute.xlu0 %2462  ;;  %5006 = vst [vmem:[%s7043_s23 + $0x10] sm:$0xff] %v2278_v52 }
 0x416   : >>> { %v2257_v55 = vpop.permute.xlu1 %2256  ;;  %v2467_v23 = vsel %vm2196_vm11, %v7057_v1, %v2463_v54 }
 0x417   : >>> { %v2261_v56 = vsel %vm2196_vm11, %v7066_v2, %v2257_v55 }
 0x418   : >>> { %v2265_v58 = vsel %vm2200_vm0, %v2253_v40, %v2261_v56 }
 0x419   : >>> { %v2495_v37 = vpop.permute.xlu0 %2494  ;;  %v2271_v59 = vsel %vm7947_vm5, %v2265_v58, 0.0  ;;  %vm7963_vm5 = vcmp.eq.s32.totalorder %v5612_v34, 0 }
 0x41a   : >>> { %v2285_v60 = vpop.permute.xlu1 %2284  ;;  %5005 = vst [vmem:[%s7059_s29 + $0x10] sm:$0xff] %v2271_v59  ;;  %v2499_v4 = vsel %vm2196_vm11, %v7071_v3, %v2495_v37 }
 0x41d   : >>> { %v2480_v61 = vpop.permute.xlu0 %2479 }
 0x41e   : >>> { %v2484_v62 = vsel %vm2213_vm1, %v7057_v1, %v2480_v61  ;;  %v2459_v35 = vpop.permute.xlu1 %2458 }
 0x41f   : >>> { %2710 = vst [vmem:[%s7077_s24] sm:$0xff] %v2484_v62  ;;  %v2471_v39 = vsel %vm2200_vm0, %v2459_v35, %v2467_v23 }
 0x420   : >>> { %v2477_v41 = vsel %vm7948_vm6, %v2471_v39, 0.0  ;;  %vm7964_vm6 = vmmov %vm7963_vm5 }
 0x421   : >>> { %v2527_v38 = vpop.permute.xlu0 %2526  ;;  %2709 = vst [vmem:[%s7053_s27] sm:$0xff] %v2477_v41 }
 0x422   : >>> { %v2289_v46 = vpop.permute.xlu1 %2288  ;;  %v2531_v12 = vsel %vm2196_vm11, %v7087_v5, %v2527_v38 }
 0x423   : >>> { %v2293_v47 = vsel %vm2196_vm11, %v7096_v7, %v2289_v46 }
 0x424   : >>> { %v2297_v63 = vsel %vm2200_vm0, %v2285_v60, %v2293_v47 }
 0x425   : >>> { %v2512_v49 = vpop.permute.xlu0 %2511  ;;  %v2303_v2 = vsel %vm7949_vm7, %v2297_v63, 0.0  ;;  %vm7965_vm7 = vmmov %vm7963_vm5 }
 0x426   : >>> { %v2516_v1 = vsel %vm2213_vm1, %v7071_v3, %v2512_v49  ;;  %v2491_v57 = vpop.permute.xlu1 %2490  ;;  %5007 = vst [vmem:[%s7089_s18 + $0x18] sm:$0xff] %v2303_v2 }
 0x427   : >>> { %5046 = vst [vmem:[%s7093_s10 + $0x8] sm:$0xff] %v2516_v1  ;;  %v2503_v8 = vsel %vm2200_vm0, %v2491_v57, %v2499_v4 }
 0x428   : >>> { %v2509_v15 = vsel %vm7950_vm9, %v2503_v8, 0.0  ;;  %vm7966_vm9 = vmmov %vm7963_vm5 }
 0x429   : >>> { %v2559_v17 = vpop.permute.xlu0 %2558  ;;  %5045 = vst [vmem:[%s7063_s22 + $0x8] sm:$0xff] %v2509_v15 }
 0x42a   : >>> { %v2321_v21 = vpop.permute.xlu1 %2320 }
 0x42b   : >>> { %v2325_v22 = vsel %vm2196_vm11, %v7115_v16, %v2321_v21 }
 0x42d   : >>> { %v2317_v24 = vpop.permute.xlu0 %2316 }
 0x42e   : >>> { %v2329_v3 = vsel %vm2200_vm0, %v2317_v24, %v2325_v22  ;;  %v2523_v27 = vpop.permute.xlu1 %2522 }
 0x42f   : >>> { %v2335_v26 = vsel %vm7951_vm8, %v2329_v3, 0.0  ;;  %v2535_v30 = vsel %vm2200_vm0, %v2523_v27, %v2531_v12  ;;  %vm7967_vm8 = vmmov %vm7963_vm5 }
 0x430   : >>> { %5009 = vst [vmem:[%s7108_s9 + $0x20] sm:$0xff] %v2335_v26  ;;  %v2541_v14 = vsel %vm7952_vm2, %v2535_v30, 0.0  ;;  %vm7968_vm2 = vmmov %vm7963_vm5 }
 0x431   : >>> { %v2544_v32 = vpop.permute.xlu0 %2543  ;;  %5047 = vst [vmem:[%s7083_s3 + $0x10] sm:$0xff] %v2541_v14  ;;  %s7961_s3 = sld [smem:[#allocation39_spill]] }
 0x432   : >>> { %v2548_v6 = vsel %vm2213_vm1, %v7087_v5, %v2544_v32  ;;  %v2306_v44 = vpop.permute.xlu1 %2305 }
 0x433   : >>> { %5048 = vst [vmem:[%s7120_s8 + $0x10] sm:$0xff] %v2548_v6  ;;  %v2310_v45 = vsel %vm2213_vm1, %v7096_v7, %v2306_v44  ;;  %v2563_v7 = vsel %vm2196_vm11, %v7106_v9, %v2559_v17  ;;  %s7996_s8 = sld [smem:[#allocation36_spill]] }
 0x434   : >>> { %5008 = vst [vmem:[%s7073_s1 + $0x18] sm:$0xff] %v2310_v45  ;;  %s7957_s1 = sld [smem:[#allocation38_spill]] }
 0x435   : >>> { %v2591_v29 = vpop.permute.xlu0 %2590 }
 0x436   : >>> { %v2353_v28 = vpop.permute.xlu1 %2352 }
 0x437   : >>> { %v2357_v42 = vsel %vm2196_vm11, %v7139_v20, %v2353_v28 }
 0x439   : >>> { %v2349_v25 = vpop.permute.xlu0 %2348 }
 0x43a   : >>> { %v2361_v5 = vsel %vm2200_vm0, %v2349_v25, %v2357_v42  ;;  %v2555_v43 = vpop.permute.xlu1 %2554 }
 0x43b   : >>> { %v2367_v40 = vsel %vm7953_vm10, %v2361_v5, 0.0  ;;  %v2567_v48 = vsel %vm2200_vm0, %v2555_v43, %v2563_v7  ;;  %vm7969_vm10 = vmmov %vm7968_vm2 }
 0x43c   : >>> { %5011 = vst [vmem:[%s7132_s7 + $0x28] sm:$0xff] %v2367_v40  ;;  %v2573_v50 = vsel %vm7954_vm12, %v2567_v48, 0.0  ;;  %vm7970_vm12 = vmmov %vm7968_vm2  ;;  %s7500_s7 = smov [#allocation15] }
 0x43d   : >>> { %v2576_v31 = vpop.permute.xlu0 %2575  ;;  %5049 = vst [vmem:[%s7102_s13 + $0x18] sm:$0xff] %v2573_v50 }
 0x43e   : >>> { %v2580_v51 = vsel %vm2213_vm1, %v7106_v9, %v2576_v31  ;;  %v2338_v52 = vpop.permute.xlu1 %2337 }
 0x43f   : >>> { %5050 = vst [vmem:[%s7144_s14 + $0x18] sm:$0xff] %v2580_v51  ;;  %v2342_v36 = vsel %vm2213_vm1, %v7115_v16, %v2338_v52  ;;  %v2595_v16 = vsel %vm2196_vm11, %v7130_v11, %v2591_v29 }
 0x440   : >>> { %5010 = vst [vmem:[%s7112_s20 + $0x20] sm:$0xff] %v2342_v36 }
 0x441   : >>> { %v2623_v53 = vpop.permute.xlu0 %2622 }
 0x442   : >>> { %v2385_v54 = vpop.permute.xlu1 %2384 }
 0x443   : >>> { %v2389_v55 = vsel %vm2196_vm11, %v7163_v19, %v2385_v54 }
 0x445   : >>> { %v2381_v56 = vpop.permute.xlu0 %2380 }
 0x446   : >>> { %v2393_v9 = vsel %vm2200_vm0, %v2381_v56, %v2389_v55  ;;  %v2587_v58 = vpop.permute.xlu1 %2586 }
 0x447   : >>> { %v2399_v37 = vsel %vm7955_vm13, %v2393_v9, 0.0  ;;  %v2599_v59 = vsel %vm2200_vm0, %v2587_v58, %v2595_v16  ;;  %vm7971_vm13 = vmmov %vm7968_vm2 }
 0x448   : >>> { %5013 = vst [vmem:[%s7156_s5 + $0x30] sm:$0xff] %v2399_v37  ;;  %v2605_v61 = vsel %vm7956_vm14, %v2599_v59, 0.0  ;;  %s7383_s5 = smov [#allocation12]  ;;  %vm7972_vm14 = vmmov %vm7968_vm2 }
 0x449   : >>> { %v2608_v60 = vpop.permute.xlu0 %2607  ;;  %5051 = vst [vmem:[%s7126_s17 + $0x20] sm:$0xff] %v2605_v61 }
 0x44a   : >>> { %v2612_v62 = vsel %vm2213_vm1, %v7130_v11, %v2608_v60  ;;  %v2370_v23 = vpop.permute.xlu1 %2369 }
 0x44b   : >>> { %5052 = vst [vmem:[%s7168_s19 + $0x20] sm:$0xff] %v2612_v62  ;;  %v2374_v35 = vsel %vm2213_vm1, %v7139_v20, %v2370_v23  ;;  %v2627_v20 = vsel %vm2196_vm11, %v7154_v18, %v2623_v53 }
 0x44c   : >>> { %5012 = vst [vmem:[%s7136_s6 + $0x28] sm:$0xff] %v2374_v35  ;;  %s7390_s6 = smov [#allocation13] }
 0x44d   : >>> { %v2655_v39 = vpop.permute.xlu0 %2654 }
 0x44e   : >>> { %v2417_v38 = vpop.permute.xlu1 %2416  ;;  %v2659_v63 = vsel %vm2196_vm11, %v7178_v0, %v2655_v39 }
 0x44f   : >>> { %v2421_v41 = vsel %vm2196_vm11, %v7187_v10, %v2417_v38 }
 0x451   : >>> { %v2413_v46 = vpop.permute.xlu0 %2412 }
 0x452   : >>> { %v2425_v11 = vsel %vm2200_vm0, %v2413_v46, %v2421_v41  ;;  %v2619_v49 = vpop.permute.xlu1 %2618 }
 0x453   : >>> { %v2431_v47 = vsel %vm7958_vm15, %v2425_v11, 0.0  ;;  %v2631_v1 = vsel %vm2200_vm0, %v2619_v49, %v2627_v20  ;;  %vm7974_vm15 = vmmov %vm7968_vm2 }
 0x454   : >>> { %5015 = vst [vmem:[%s7180_s12 + $0x38] sm:$0xff] %v2431_v47  ;;  %v2637_v4 = vsel %vm7960_vm3, %v2631_v1, 0.0 }
 0x455   : >>> { %v2651_v2 = vpop.permute.xlu0 %2650  ;;  %5053 = vst [vmem:[%s7150_s11 + $0x28] sm:$0xff] %v2637_v4 }
 0x456   : >>> { %v2663_v57 = vsel %vm2200_vm0, %v2651_v2, %v2659_v63  ;;  %v2402_v17 = vpop.permute.xlu1 %2401 }
 0x457   : >>> { %v2669_v8 = vsel %vm7962_vm4, %v2663_v57, 0.0  ;;  %v2406_v15 = vsel %vm2213_vm1, %v7163_v19, %v2402_v17 }
 0x458   : >>> { %5055 = vst [vmem:[%s7957_s1 + $0x30] sm:$0xff] %v2669_v8  ;;  %5014 = vst [vmem:[%s7959_s2 + $0x30] sm:$0xff] %v2406_v15 }
 0x459   : >>> { %v2434_v21 = vpop.permute.xlu0 %2433 }
 0x45a   : >>> { %v2438_v22 = vsel %vm2213_vm1, %v7187_v10, %v2434_v21  ;;  %v2640_v32 = vpop.permute.xlu1 %2639 }
 0x45b   : >>> { %v2727_v24 = vld [vmem:[%s7383_s5] ss:$0 sm:$0xff]  ;;  %v5060_v26 = vld [vmem:[%s7383_s5 + $0x7] ss:$0 sm:$0xff]  ;;  %5016 = vst [vmem:[%s7961_s3 + $0x38] sm:$0xff] %v2438_v22  ;;  %v2644_v29 = vsel %vm2213_vm1, %v7154_v18, %v2640_v32 }
 0x45c   : >>> { %v5059_v3 = vld [vmem:[%s7383_s5 - $0x1] sm:$0xfe]  ;;  %v5061_v12 = vld [vmem:[%s7383_s5 + $0x7] sm:$0xfe]  ;;  %v5062_v27 = vld [vmem:[%s7383_s5 + $0xf] ss:$0 sm:$0xff] }
 0x45d   : >>> { %v2734_v19 = vsel %vm7963_vm5, %v2727_v24, %v5059_v3  ;;  %v5064_v30 = vld [vmem:[%s7383_s5 + $0xf] sm:$0xfe]  ;;  %v2745_v10 = vsel %vm7964_vm6, %v5060_v26, %v5061_v12  ;;  %v5065_v6 = vld [vmem:[%s7383_s5 + $0x17] ss:$0 sm:$0xff]  ;;  %v5067_v44 = vld [vmem:[%s7383_s5 + $0x17] sm:$0xfe]  ;;  %v2683_v53 = vpop.permute.xlu0 %2682 }
 0x45e   : >>> { %v2756_v14 = vsel %vm7965_vm7, %v5062_v27, %v5064_v30  ;;  %v5068_v45 = vld [vmem:[%s7383_s5 + $0x1f] ss:$0 sm:$0xff]  ;;  %2737 = vst [vmem:[%s7383_s5] sm:$0xff] %v2734_v19  ;;  %v2767_v28 = vsel %vm7966_vm9, %v5065_v6, %v5067_v44  ;;  %v5070_v42 = vld [vmem:[%s7383_s5 + $0x1f] sm:$0xfe]  ;;  %v5071_v25 = vld [vmem:[%s7383_s5 + $0x27] ss:$0 sm:$0xff]  ;;  %v2687_v52 = vpop.permute.xlu1 %2686 }
 0x45f   : >>> { %v5073_v5 = vld [vmem:[%s7383_s5 + $0x27] sm:$0xfe]  ;;  %5063 = vst [vmem:[%s7383_s5 + $0x8] sm:$0xff] %v2745_v10  ;;  %5066 = vst [vmem:[%s7383_s5 + $0x10] sm:$0xff] %v2756_v14  ;;  %v2778_v40 = vsel %vm7967_vm8, %v5068_v45, %v5070_v42  ;;  %v5074_v7 = vld [vmem:[%s7383_s5 + $0x2f] ss:$0 sm:$0xff]  ;;  %v2691_v54 = vsel %vm2196_vm11, %v7211_v13, %v2687_v52 }
 0x460   : >>> { %5054 = vst [vmem:[%s7192_s21 + $0x28] sm:$0xff] %v2644_v29  ;;  %v2789_v18 = vsel %vm7968_vm2, %v5071_v25, %v5073_v5  ;;  %v5076_v43 = vld [vmem:[%s7383_s5 + $0x2f] sm:$0xfe]  ;;  %v5077_v48 = vld [vmem:[%s7383_s5 + $0x37] ss:$0 sm:$0xff]  ;;  %5069 = vst [vmem:[%s7383_s5 + $0x18] sm:$0xff] %v2767_v28  ;;  %v2695_v39 = vsel %vm2200_vm0, %v2683_v53, %v2691_v54 }
 0x461   : >>> { %v2800_v31 = vsel %vm7969_vm10, %v5074_v7, %v5076_v43  ;;  %v5079_v50 = vld [vmem:[%s7383_s5 + $0x37] sm:$0xfe]  ;;  %5072 = vst [vmem:[%s7383_s5 + $0x20] sm:$0xff] %v2778_v40  ;;  %5075 = vst [vmem:[%s7383_s5 + $0x28] sm:$0xff] %v2789_v18  ;;  %v5080_v51 = vld [vmem:[%s7383_s5 + $0x3f] ss:$0 sm:$0xff] }
 0x462   : >>> { %v2811_v36 = vsel %vm7970_vm12, %v5077_v48, %v5079_v50  ;;  %5078 = vst [vmem:[%s7383_s5 + $0x30] sm:$0xff] %v2800_v31  ;;  %v2891_v55 = vld [vmem:[%s7390_s6] ss:$0 sm:$0xff]  ;;  %v5106_v9 = vld [vmem:[%s7390_s6 + $0x7] ss:$0 sm:$0xff]  ;;  %vm7973_vm11 = vmmov %vm7968_vm2  ;;  %v2672_v38 = vpop.permute.xlu1 %2671  ;;  %vm7978_vm5 = vcmp.lt.s32.totalorder %v5610_v33, 64 }
 0x463   : >>> { %5081 = vst [vmem:[%s7383_s5 + $0x38] sm:$0xff] %v2811_v36  ;;  %v5105_v56 = vld [vmem:[%s7390_s6 - $0x1] sm:$0xfe]  ;;  %v5107_v16 = vld [vmem:[%s7390_s6 + $0x7] sm:$0xfe]  ;;  %v2676_v20 = vsel %vm2213_vm1, %v7178_v0, %v2672_v38  ;;  %vm7975_vm0 = vmmov %vm7968_vm2  ;;  %v2701_v17 = vsel %vm7978_vm5, %v2695_v39, 0.0 }
 0x464   : >>> { %v2898_v37 = vsel %vm7971_vm13, %v2891_v55, %v5105_v56  ;;  %v5108_v58 = vld [vmem:[%s7390_s6 + $0xf] ss:$0 sm:$0xff]  ;;  %v5110_v59 = vld [vmem:[%s7390_s6 + $0xf] sm:$0xfe]  ;;  %v2909_v60 = vsel %vm7972_vm14, %v5106_v9, %v5107_v16  ;;  %v5111_v62 = vld [vmem:[%s7390_s6 + $0x17] ss:$0 sm:$0xff] }
 0x465   : >>> { %2901 = vst [vmem:[%s7390_s6] sm:$0xff] %v2898_v37  ;;  %v2920_v61 = vsel %vm7973_vm11, %v5108_v58, %v5110_v59  ;;  %v5113_v23 = vld [vmem:[%s7390_s6 + $0x17] sm:$0xfe]  ;;  %v5114_v35 = vld [vmem:[%s7390_s6 + $0x1f] ss:$0 sm:$0xff]  ;;  %5109 = vst [vmem:[%s7390_s6 + $0x8] sm:$0xff] %v2909_v60  ;;  %s939_s21 = sadd.s32 1, %s7996_s8  }
 0x466   : >>> { %5112 = vst [vmem:[%s7390_s6 + $0x10] sm:$0xff] %v2920_v61  ;;  %v2931_v41 = vsel %vm7974_vm15, %v5111_v62, %v5113_v23  ;;  %v5116_v46 = vld [vmem:[%s7390_s6 + $0x1f] sm:$0xfe]  ;;  %v5117_v11 = vld [vmem:[%s7390_s6 + $0x27] ss:$0 sm:$0xff]  ;;  %vm7976_vm3 = vmmov %vm7975_vm0  ;;  %v2704_v21 = vpop.permute.xlu1 %2703  ;;  %p936_p9 = scmp.ge.s32.totalorder %s939_s21, 127  }
 0x467   : >>> { %v5119_v47 = vld [vmem:[%s7390_s6 + $0x27] sm:$0xfe]  ;;  %5115 = vst [vmem:[%s7390_s6 + $0x18] sm:$0xff] %v2931_v41  ;;  %v2942_v49 = vsel %vm7975_vm0, %v5114_v35, %v5116_v46  ;;  %v5120_v1 = vld [vmem:[%s7390_s6 + $0x2f] ss:$0 sm:$0xff]  ;;  %5056 = vst [vmem:[%s7195_s4 + $0x30] sm:$0xff] %v2676_v20  ;;  %v2708_v22 = vsel %vm2213_vm1, %v7211_v13, %v2704_v21  ;;  %v705_v33 = vmov (%p936_p9), %v5610_v33 }
 0x468   : >>> { %v2953_v63 = vsel %vm7976_vm3, %v5117_v11, %v5119_v47  ;;  %v5122_v2 = vld [vmem:[%s7390_s6 + $0x2f] sm:$0xfe]  ;;  %v5123_v4 = vld [vmem:[%s7390_s6 + $0x37] ss:$0 sm:$0xff]  ;;  %5118 = vst [vmem:[%s7390_s6 + $0x20] sm:$0xff] %v2942_v49  ;;  %vm7977_vm4 = vmmov %vm7975_vm0  ;;  %s7498_s4 = smov [#allocation14] }
 0x469   : >>> { %5121 = vst [vmem:[%s7390_s6 + $0x28] sm:$0xff] %v2953_v63  ;;  %v2964_v57 = vsel %vm7977_vm4, %v5120_v1, %v5122_v2  ;;  %v5125_v0 = vld [vmem:[%s7390_s6 + $0x37] sm:$0xfe]  ;;  %v5126_v8 = vld [vmem:[%s7390_s6 + $0x3f] ss:$0 sm:$0xff]  ;;  %vm7979_vm6 = vmmov %vm7975_vm0  ;;  %vm7980_vm1 = vcmp.eq.s32.totalorder %v5612_v34, 7  ;;  %v708_v34 = vmov (%p936_p9), %v5612_v34 }
 0x46a   : >>> { %5124 = vst [vmem:[%s7390_s6 + $0x30] sm:$0xff] %v2964_v57  ;;  %v2975_v15 = vsel %vm7979_vm6, %v5123_v4, %v5125_v0  ;;  %5057 = vst [vmem:[%s7207_s25 + $0x38] sm:$0xff] %v2701_v17  ;;  %s7997_s25 = sld [smem:[#allocation35_spill]] (%p936_p9)  ;;  %s620_s10 = smov (%p936_p9), [#allocation12]  ;;  %v619_v34 = vmov (%p936_p9), %v5612_v34 }
 0x46b   : >>> { %5127 = vst [vmem:[%s7390_s6 + $0x38] sm:$0xff] %v2975_v15  ;;  %5058 = vst [vmem:[%s7203_s28 + $0x38] sm:$0xff] %v2708_v22  ;;  %s7602_s12 = smov (%p936_p9), [#allocation13]  ;;  %s7654_s13 = smov (%p936_p9), [#allocation14] }
 0x46c   : >>> { %vm7981_vm7 = vmmov %vm7980_vm1  ;;  %s7698_s18 = smov (%p936_p9), [#allocation15] }
 0x46d   : >>> { %vm7982_vm9 = vmmov %vm7980_vm1 }
 0x46e   : >>> { %vm7983_vm8 = vmmov %vm7980_vm1 }
 0x46f   : >>> { %vm7984_vm2 = vmmov %vm7980_vm1 }
 0x470   : >>> { %vm7985_vm10 = vmmov %vm7980_vm1  ;;  %s3647_s9 = sadd.s32 (%p936_p9), 1, %s7997_s25  }
 0x471   : >>> { %v2815_v24 = vld [vmem:[%s7498_s4] ss:$0 sm:$0xff]  ;;  %v5083_v3 = vld [vmem:[%s7498_s4 + $0x39] sm:$0x7f]  ;;  %v5084_v13 = vld [vmem:[%s7498_s4 + $0x38] ss:$0 sm:$0xff]  ;;  %s8029_s25 = smov (%p936_p9), %s3647_s9 }
 0x472   : >>> { %v5086_v26 = vld [vmem:[%s7498_s4 + $0x31] sm:$0x7f]  ;;  %v5087_v19 = vld [vmem:[%s7498_s4 + $0x30] ss:$0 sm:$0xff]  ;;  %v5089_v12 = vld [vmem:[%s7498_s4 + $0x29] sm:$0x7f]  ;;  %v2824_v27 = vsel %vm7980_vm1, %v5080_v51, %v5083_v3 }
 0x473   : >>> { %5082 = vst [vmem:[%s7383_s5 + $0x1] sm:$0x1] %v2815_v24  ;;  %v2833_v30 = vsel %vm7981_vm7, %v5084_v13, %v5086_v26  ;;  %v2842_v32 = vsel %vm7982_vm9, %v5087_v19, %v5089_v12  ;;  %v5090_v10 = vld [vmem:[%s7498_s4 + $0x28] ss:$0 sm:$0xff]  ;;  %v5092_v14 = vld [vmem:[%s7498_s4 + $0x21] sm:$0x7f]  ;;  %vm7986_vm12 = vmmov %vm7980_vm1 }
 0x474   : >>> { %v5093_v6 = vld [vmem:[%s7498_s4 + $0x20] ss:$0 sm:$0xff]  ;;  %5085 = vst [vmem:[%s7498_s4 + $0x38] sm:$0xff] %v2824_v27  ;;  %v2851_v44 = vsel %vm7983_vm8, %v5090_v10, %v5092_v14  ;;  %v5095_v45 = vld [vmem:[%s7498_s4 + $0x19] sm:$0x7f]  ;;  %5088 = vst [vmem:[%s7498_s4 + $0x30] sm:$0xff] %v2833_v30 }
 0x475   : >>> { %v5096_v29 = vld [vmem:[%s7498_s4 + $0x18] ss:$0 sm:$0xff]  ;;  %v5098_v28 = vld [vmem:[%s7498_s4 + $0x11] sm:$0x7f]  ;;  %5091 = vst [vmem:[%s7498_s4 + $0x28] sm:$0xff] %v2842_v32  ;;  %v2860_v42 = vsel %vm7984_vm2, %v5093_v6, %v5095_v45  ;;  %5094 = vst [vmem:[%s7498_s4 + $0x20] sm:$0xff] %v2851_v44 }
 0x476   : >>> { %v2869_v25 = vsel %vm7985_vm10, %v5096_v29, %v5098_v28  ;;  %v5099_v5 = vld [vmem:[%s7498_s4 + $0x10] ss:$0 sm:$0xff]  ;;  %v5101_v40 = vld [vmem:[%s7498_s4 + $0x9] sm:$0x7f]  ;;  %v5102_v18 = vld [vmem:[%s7498_s4 + $0x8] ss:$0 sm:$0xff] }
 0x477   : >>> { %v2878_v7 = vsel %vm7986_vm12, %v5099_v5, %v5101_v40  ;;  %v5104_v43 = vld [vmem:[%s7498_s4 + $0x1] sm:$0x7f]  ;;  %5097 = vst [vmem:[%s7498_s4 + $0x18] sm:$0xff] %v2860_v42  ;;  %5100 = vst [vmem:[%s7498_s4 + $0x10] sm:$0xff] %v2869_v25  ;;  %v2979_v48 = vld [vmem:[%s7500_s7] ss:$0 sm:$0xff] }
 0x478   : >>> { %v5129_v31 = vld [vmem:[%s7500_s7 + $0x39] sm:$0x7f]  ;;  %vm7987_vm13 = vmmov %vm7980_vm1  ;;  %5103 = vst [vmem:[%s7498_s4 + $0x8] sm:$0xff] %v2878_v7  ;;  %v5130_v52 = vld [vmem:[%s7500_s7 + $0x38] ss:$0 sm:$0xff]  ;;  %p932_p10 = scmp.ge.s32.totalorder (%p936_p9), %s3647_s9, 15 }
 0x479   : >>> { %v2886_v50 = vsel %vm7987_vm13, %v5102_v18, %v5104_v43  ;;  %5128 = vst [vmem:[%s7390_s6 + $0x1] sm:$0x1] %v2979_v48  ;;  %vm7988_vm14 = vmmov %vm7980_vm1  ;;  %v5132_v36 = vld [vmem:[%s7500_s7 + $0x31] sm:$0x7f]  ;;  %v5133_v53 = vld [vmem:[%s7500_s7 + $0x30] ss:$0 sm:$0xff] }
 0x47a   : >>> { %v2988_v51 = vsel %vm7988_vm14, %v5126_v8, %v5129_v31  ;;  %2888 = vst [vmem:[%s7498_s4] sm:$0xff] %v2886_v50  ;;  %vm7989_vm11 = vmmov %vm7980_vm1  ;;  %v5135_v55 = vld [vmem:[%s7500_s7 + $0x29] sm:$0x7f]  ;;  %v5136_v56 = vld [vmem:[%s7500_s7 + $0x28] ss:$0 sm:$0xff] }
 0x47b   : >>> { %5131 = vst [vmem:[%s7500_s7 + $0x38] sm:$0xff] %v2988_v51  ;;  %v2997_v54 = vsel %vm7989_vm11, %v5130_v52, %v5132_v36  ;;  %v5138_v9 = vld [vmem:[%s7500_s7 + $0x21] sm:$0x7f]  ;;  %vm7990_vm15 = vmmov %vm7980_vm1  ;;  %v5139_v58 = vld [vmem:[%s7500_s7 + $0x20] ss:$0 sm:$0xff]  ;;  %v638_v52 = vadd.s32 (%p936_p9), 8, %v619_v34 }
 0x47c   : >>> { %5134 = vst [vmem:[%s7500_s7 + $0x30] sm:$0xff] %v2997_v54  ;;  %v3006_v37 = vsel %vm7990_vm15, %v5133_v53, %v5135_v55  ;;  %vm7991_vm0 = vmmov %vm7980_vm1  ;;  %v5141_v59 = vld [vmem:[%s7500_s7 + $0x19] sm:$0x7f]  ;;  %v5142_v60 = vld [vmem:[%s7500_s7 + $0x18] ss:$0 sm:$0xff]  ;;  %938 = sbr.rel (!%p936_p9) target bundleno = 383 (0x17f), region = 857 }
 0x47d   : >>> { %v3015_v16 = vsel %vm7991_vm0, %v5136_v56, %v5138_v9  ;;  %5137 = vst [vmem:[%s7500_s7 + $0x28] sm:$0xff] %v3006_v37  ;;  %vm7992_vm3 = vmmov %vm7991_vm0  ;;  %v5144_v62 = vld [vmem:[%s7500_s7 + $0x11] sm:$0x7f]  ;;  %v5145_v23 = vld [vmem:[%s7500_s7 + $0x10] ss:$0 sm:$0xff]  ;;  %vm7998_vm1 = vcmp.lt.s32.totalorder (%p936_p9), %v5610_v33, 64  ;;  %v7626_v33 = vmov (%p936_p9), %v5610_v33 }
 0x47e   : >>> { %5140 = vst [vmem:[%s7500_s7 + $0x20] sm:$0xff] %v3015_v16  ;;  %v3024_v61 = vsel %vm7992_vm3, %v5139_v58, %v5141_v59  ;;  %v5147_v35 = vld [vmem:[%s7500_s7 + $0x9] sm:$0x7f]  ;;  %vm7993_vm4 = vmmov %vm7991_vm0  ;;  %v5148_v41 = vld [vmem:[%s7500_s7 + $0x8] ss:$0 sm:$0xff]  ;;  %v648_v59 = vadd.s32 (%p936_p9), 16, %v619_v34 }
 0x47f   : >>> { %5143 = vst [vmem:[%s7500_s7 + $0x18] sm:$0xff] %v3024_v61  ;;  %v3033_v39 = vsel %vm7993_vm4, %v5142_v60, %v5144_v62  ;;  %vm7994_vm5 = vmmov %vm7991_vm0  ;;  %v5150_v46 = vld [vmem:[%s7500_s7 + $0x1] sm:$0x7f]  ;;  %v5313_v20 = vld [vmem:[%s620_s10 + $0x8] sm:$0xff] (%p936_p9)  ;;  %vm631_vm4 = vcmp.eq.s32.totalorder (%p936_p9), %v619_v34, %v7626_v33 }
 0x480   : >>> { %v3042_v38 = vsel %vm7994_vm5, %v5145_v23, %v5147_v35  ;;  %5146 = vst [vmem:[%s7500_s7 + $0x10] sm:$0xff] %v3033_v39  ;;  %vm7995_vm6 = vmmov %vm7991_vm0  ;;  %v626_v47 = vld [vmem:[%s620_s10] sm:$0xff] (%p936_p9)  ;;  %v5314_v49 = vld [vmem:[%s620_s10 + $0x10] sm:$0xff] (%p936_p9)  ;;  %v658_v23 = vadd.s32 (%p936_p9), 24, %v619_v34  ;;  %v668_v35 = vadd.s32 (%p936_p9), 32, %v619_v34 }
 0x481   : >>> { %5149 = vst [vmem:[%s7500_s7 + $0x8] sm:$0xff] %v3042_v38  ;;  %v3050_v11 = vsel %vm7995_vm6, %v5148_v41, %v5150_v46  ;;  %v627_v63 = vsel (%p936_p9), %vm7998_vm1, %v626_v47, 0.0  ;;  %vm7999_vm7 = vmmov (%p936_p9), %vm7998_vm1  ;;  %v5315_v4 = vld [vmem:[%s620_s10 + $0x18] sm:$0xff] (%p936_p9)  ;;  %v5316_v57 = vld [vmem:[%s620_s10 + $0x20] sm:$0xff] (%p936_p9)  ;;  %vm639_vm6 = vcmp.eq.s32.totalorder (%p936_p9), %v638_v52, %v7626_v33  ;;  %v678_v38 = vadd.s32 (%p936_p9), 40, %v619_v34 }
 0x482   : >>> { %3052 = vst [vmem:[%s7500_s7] sm:$0xff] %v3050_v11  ;;  %v635_v1 = vsel (%p936_p9), %vm7999_vm7, %v5313_v20, 0.0  ;;  %vm8000_vm9 = vmmov (%p936_p9), %vm7998_vm1  ;;  %v628_v0 = vmul.f32 (%p936_p9), %v627_v63, %v627_v63  ;;  %v5317_v21 = vld [vmem:[%s620_s10 + $0x28] sm:$0xff] (%p936_p9)  ;;  %v5318_v13 = vld [vmem:[%s620_s10 + $0x30] sm:$0xff] (%p936_p9)  ;;  %v688_v41 = vadd.s32 (%p936_p9), 48, %v619_v34  ;;  %vm659_vm7 = vcmp.eq.s32.totalorder (%p936_p9), %v658_v23, %v7626_v33 }
 0x483   : >> { %v645_v2 = vsel %vm8000_vm9, %v5314_v49, 0.0  ;;  %v636_v8 = vmul.f32 %v635_v1, %v635_v1  ;;  %vm8001_vm8 = vmmov %vm7998_vm1  ;;  %v5319_v27 = vld [vmem:[%s620_s10 + $0x38] sm:$0xff]  ;;  %v715_v14 = vld [vmem:[%s7602_s12] sm:$0xff]  ;;  %vm669_vm9 = vcmp.eq.s32.totalorder %v668_v35, %v7626_v33 }
 0x484   : >> { %v646_v17 = vmul.f32 %v645_v2, %v645_v2  ;;  %v655_v15 = vsel %vm8001_vm8, %v5315_v4, 0.0  ;;  %vm8002_vm2 = vmmov %vm7998_vm1  ;;  %v5320_v29 = vld [vmem:[%s7602_s12 + $0x8] sm:$0xff]  ;;  %v5321_v5 = vld [vmem:[%s7602_s12 + $0x10] sm:$0xff]  ;;  %v632_v58 = vsel %vm631_vm4, 0.0, %v628_v0 }
 0x485   : >> { %v665_v22 = vsel %vm8002_vm2, %v5316_v57, 0.0  ;;  %v642_v24 = vadd.f32 %v636_v8, %v628_v0  ;;  %v656_v3 = vmul.f32 %v655_v15, %v655_v15  ;;  %vm8003_vm10 = vmmov %vm7998_vm1  ;;  %v5322_v40 = vld [vmem:[%s7602_s12 + $0x18] sm:$0xff]  ;;  %v5323_v7 = vld [vmem:[%s7602_s12 + $0x20] sm:$0xff]  ;;  %v640_v62 = vsel %vm639_vm6, 0.0, %v636_v8 }
 0x486   : >> { %v675_v26 = vsel %vm8003_vm10, %v5317_v21, 0.0  ;;  %v666_v12 = vmul.f32 %v665_v22, %v665_v22  ;;  %vm8004_vm12 = vmmov %vm7998_vm1  ;;  %v5324_v51 = vld [vmem:[%s7602_s12 + $0x28] sm:$0xff]  ;;  %v5325_v61 = vld [vmem:[%s7602_s12 + $0x30] sm:$0xff]  ;;  %v641_v39 = vadd.f32 %v640_v62, %v632_v58  ;;  %vm679_vm2 = vcmp.eq.s32.totalorder %v678_v38, %v7626_v33 }
 0x487   : >> { %v652_v19 = vadd.f32 %v646_v17, %v642_v24  ;;  %v685_v30 = vsel %vm8004_vm12, %v5318_v13, 0.0  ;;  %v7606_v10 = vmul.f32 %v675_v26, %v675_v26  ;;  %vm8005_vm13 = vmmov %vm7998_vm1  ;;  %v5326_v11 = vld [vmem:[%s7602_s12 + $0x38] sm:$0xff]  ;;  %v660_v63 = vsel %vm659_vm7, 0.0, %v656_v3  ;;  %v774_v4 = vld [vmem:[%s7654_s13] sm:$0xff] }
 0x488   : >> { %v695_v6 = vsel %vm8005_vm13, %v5319_v27, 0.0  ;;  %v7611_v45 = vmul.f32 %v685_v30, %v685_v30  ;;  %vm8006_vm14 = vmmov %vm7998_vm1  ;;  %v670_v57 = vsel %vm669_vm9, 0.0, %v666_v12  ;;  %v698_v0 = vadd.s32 56, %v619_v34  ;;  %v5327_v22 = vld [vmem:[%s7654_s13 + $0x8] sm:$0xff] }
 0x489   : >> { %v662_v32 = vadd.f32 %v656_v3, %v652_v19  ;;  %v716_v28 = vsel %vm8006_vm14, %v715_v14, 0.0  ;;  %v7617_v25 = vmul.f32 %v695_v6, %v695_v6  ;;  %vm8007_vm11 = vmmov %vm7998_vm1  ;;  %vm689_vm12 = vcmp.eq.s32.totalorder %v688_v41, %v7626_v33  ;;  %v5329_v6 = vld [vmem:[%s7654_s13 + $0x18] sm:$0xff]  ;;  %v833_v23 = vld [vmem:[%s7698_s18] sm:$0xff] }
 0x48a   : >> { %v722_v18 = vsel %vm8007_vm11, %v5320_v29, 0.0  ;;  %v7629_v48 = vmul.f32 %v716_v28, %v716_v28  ;;  %vm8008_vm15 = vmmov %vm7998_vm1  ;;  %v680_v24 = vsel %vm679_vm2, 0.0, %v7606_v10  ;;  %vm699_vm14 = vcmp.eq.s32.totalorder %v698_v0, %v7626_v33  ;;  %v5334_v41 = vld [vmem:[%s7698_s18 + $0x8] sm:$0xff] }
 0x48b   : >> { %v672_v44 = vadd.f32 %v666_v12, %v662_v32  ;;  %v728_v31 = vsel %vm8008_vm15, %v5321_v5, 0.0  ;;  %vm8009_vm0 = vmmov %vm7998_vm1  ;;  %v7637_v53 = vmul.f32 %v722_v18, %v722_v18  ;;  %vm649_vm1 = vcmp.eq.s32.totalorder %v648_v59, %v7626_v33  ;;  %v5328_v12 = vld [vmem:[%s7654_s13 + $0x10] sm:$0xff]  ;;  %v5330_v5 = vld [vmem:[%s7654_s13 + $0x20] sm:$0xff] }
 0x48c   : >> { %v734_v50 = vsel %vm8009_vm0, %v5322_v40, 0.0  ;;  %vm8010_vm3 = vmmov %vm8009_vm0  ;;  %v7643_v56 = vmul.f32 %v728_v31, %v728_v31  ;;  %v650_v47 = vsel %vm649_vm1, 0.0, %v646_v17  ;;  %v690_v27 = vsel %vm689_vm12, 0.0, %v7611_v45  ;;  %v5333_v59 = vld [vmem:[%s7654_s13 + $0x38] sm:$0xff] }
 0x48d   : >> { %v682_v42 = vadd.f32 %v7606_v10, %v672_v44  ;;  %v740_v54 = vsel %vm8010_vm3, %v5323_v7, 0.0  ;;  %v7645_v9 = vmul.f32 %v734_v50, %v734_v50  ;;  %vm8011_vm5 = vmmov %vm8009_vm0  ;;  %v651_v49 = vadd.f32 %v650_v47, %v641_v39 }
 0x48e   : >> { %v746_v37 = vsel %vm8011_vm5, %v5324_v51, 0.0  ;;  %v7649_v16 = vmul.f32 %v740_v54, %v740_v54  ;;  %vm8012_vm8 = vmmov %vm8009_vm0  ;;  %v700_v44 = vsel %vm699_vm14, 0.0, %v7617_v25  ;;  %v764_v33 = vmov %v5610_v33 }
 0x48f   : >> { %v692_v43 = vadd.f32 %v7611_v45, %v682_v42  ;;  %v752_v20 = vsel %vm8012_vm8, %v5325_v61, 0.0  ;;  %v7665_v2 = vmul.f32 %v746_v37, %v746_v37  ;;  %vm8013_vm10 = vmmov %vm8009_vm0  ;;  %v661_v17 = vadd.f32 %v660_v63, %v651_v49 }
 0x490   : >> { %v758_v8 = vsel %vm8013_vm10, %v5326_v11, 0.0  ;;  %v753_v21 = vmul.f32 %v752_v20, %v752_v20  ;;  %vm8014_vm13 = vmmov %vm8009_vm0  ;;  %v767_v34 = vmov %v5612_v34  ;;  %v793_v40 = vsel %vm8009_vm0, %v5329_v6, 0.0  ;;  %v5335_v20 = vld [vmem:[%s7698_s18 + $0x10] sm:$0xff] }
 0x491   : >> { %v702_v36 = vadd.f32 %v7617_v25, %v692_v43  ;;  %v775_v3 = vsel %vm8014_vm13, %v774_v4, 0.0  ;;  %v671_v13 = vadd.f32 %v670_v57, %v661_v17  ;;  %v759_v19 = vmul.f32 %v758_v8, %v758_v8  ;;  %vm8015_vm11 = vmmov %vm8009_vm0  ;;  %v5331_v25 = vld [vmem:[%s7654_s13 + $0x28] sm:$0xff]  ;;  %v5336_v4 = vld [vmem:[%s7698_s18 + $0x18] sm:$0xff] }
 0x492   : >> { %v781_v30 = vsel %vm8015_vm11, %v5327_v22, 0.0  ;;  %v776_v10 = vmul.f32 %v775_v3, %v775_v3  ;;  %vm8016_vm15 = vmmov %vm8009_vm0  ;;  %v794_v52 = vmul.f32 %v793_v40, %v793_v40  ;;  %v826_v34 = vmov %v5612_v34 }
 0x493   : >> { %v719_v55 = vadd.f32 %v7629_v48, %v702_v36  ;;  %v681_v32 = vadd.f32 %v680_v24, %v671_v13  ;;  %v787_v29 = vsel %vm8016_vm15, %v5328_v12, 0.0  ;;  %v782_v42 = vmul.f32 %v781_v30, %v781_v30  ;;  %vm8017_vm3 = vmmov %vm8009_vm0  ;;  %v5332_v36 = vld [vmem:[%s7654_s13 + $0x30] sm:$0xff]  ;;  %v5338_v13 = vld [vmem:[%s7698_s18 + $0x28] sm:$0xff] }
 0x494   : >> { %v788_v43 = vmul.f32 %v787_v29, %v787_v29  ;;  %v799_v31 = vsel %vm8017_vm3, %v5330_v5, 0.0  ;;  %vm8018_vm4 = vmmov %vm8009_vm0  ;;  %v5339_v30 = vld [vmem:[%s7698_s18 + $0x30] sm:$0xff]  ;;  %v823_v33 = vmov %v5610_v33 }
 0x495   : >> { %v725_v60 = vadd.f32 %v7637_v53, %v719_v55  ;;  %v691_v28 = vadd.f32 %v690_v27, %v681_v32  ;;  %v805_v54 = vsel %vm8018_vm4, %v5331_v25, 0.0  ;;  %v800_v58 = vmul.f32 %v799_v31, %v799_v31  ;;  %vm8019_vm5 = vmmov %vm8009_vm0 }
 0x496   : >> { %v806_v62 = vmul.f32 %v805_v54, %v805_v54  ;;  %vm8020_vm6 = vmmov %vm8009_vm0  ;;  %vm838_vm14 = vcmp.eq.s32.totalorder %v826_v34, %v823_v33  ;;  %v867_v54 = vadd.s32 24, %v826_v34 }
 0x497   : >> { %v731_v46 = vadd.f32 %v7643_v56, %v725_v60  ;;  %v701_v18 = vadd.f32 %v700_v44, %v691_v28  ;;  %v811_v60 = vsel %vm8019_vm5, %v5332_v36, 0.0  ;;  %v817_v35 = vsel %vm8020_vm6, %v5333_v59, 0.0  ;;  %vm8021_vm1 = vmmov %vm8009_vm0  ;;  %v5340_v44 = vld [vmem:[%s7698_s18 + $0x38] sm:$0xff] }
 0x498   : >> { %vm8022_vm7 = vmmov %vm8009_vm0 }
 0x499   : >> { %v737_v1 = vadd.f32 %v7645_v9, %v731_v46  ;;  %v718_v50 = vadd.f32 %v7629_v48, %v701_v18  ;;  %v834_v46 = vsel %vm8021_vm1, %v833_v23, 0.0  ;;  %v844_v49 = vsel %vm8022_vm7, %v5334_v41, 0.0  ;;  %vm8023_vm9 = vmmov %vm8009_vm0 }
 0x49a   : >> { %v854_v57 = vsel %vm8023_vm9, %v5335_v20, 0.0  ;;  %v845_v17 = vmul.f32 %v844_v49, %v844_v49  ;;  %vm8024_vm8 = vmmov %vm8009_vm0 }
 0x49b   : >> { %v743_v15 = vadd.f32 %v7649_v16, %v737_v1  ;;  %v724_v55 = vadd.f32 %v7637_v53, %v718_v50  ;;  %v812_v53 = vmul.f32 %v811_v60, %v811_v60  ;;  %v855_v3 = vmul.f32 %v854_v57, %v854_v57  ;;  %vm8025_vm2 = vmmov %vm8009_vm0 }
 0x49c   : >> { %vm8026_vm10 = vmmov %vm8009_vm0 }
 0x49d   : >> { %v749_v26 = vadd.f32 %v7665_v2, %v743_v15  ;;  %v730_v48 = vadd.f32 %v7643_v56, %v724_v55  ;;  %v818_v56 = vmul.f32 %v817_v35, %v817_v35  ;;  %v864_v15 = vsel %vm8024_vm8, %v5336_v4, 0.0  ;;  %vm8027_vm12 = vmmov %vm8009_vm0 }
 0x49e   : >> { %v865_v27 = vmul.f32 %v864_v15, %v864_v15  ;;  %vm8028_vm13 = vmmov %vm8009_vm0  ;;  %vm868_vm0 = vcmp.eq.s32.totalorder %v867_v54, %v823_v33 }
 0x49f   : >> { %v755_v14 = vadd.f32 %v753_v21, %v749_v26  ;;  %v736_v39 = vadd.f32 %v7645_v9, %v730_v48  ;;  %v835_v9 = vmul.f32 %v834_v46, %v834_v46 }
 0x4a0   : >> { %v869_v35 = vsel %vm868_vm0, 0.0, %v865_v27 }
 0x4a1   : >> { %v761_v45 = vadd.f32 %v759_v19, %v755_v14  ;;  %v742_v11 = vadd.f32 %v7649_v16, %v736_v39  ;;  %v5337_v16 = vld [vmem:[%s7698_s18 + $0x20] sm:$0xff] }
 0x4a3   : >> { %v778_v7 = vadd.f32 %v776_v10, %v761_v45  ;;  %v748_v63 = vadd.f32 %v7665_v2, %v742_v11  ;;  %v874_v2 = vsel %vm8025_vm2, %v5337_v16, 0.0 }
 0x4a4   : >> { %v875_v6 = vmul.f32 %v874_v2, %v874_v2 }
 0x4a5   : >> { %v784_v51 = vadd.f32 %v782_v42, %v778_v7  ;;  %v754_v0 = vadd.f32 %v753_v21, %v748_v63  ;;  %v884_v21 = vsel %vm8026_vm10, %v5338_v13, 0.0  ;;  %v847_v7 = vadd.s32 8, %v826_v34 }
 0x4a6   : >> { %v885_v45 = vmul.f32 %v884_v21, %v884_v21 }
 0x4a7   : >> { %v790_v37 = vadd.f32 %v788_v43, %v784_v51  ;;  %v760_v22 = vadd.f32 %v759_v19, %v754_v0  ;;  %v894_v19 = vsel %vm8027_vm12, %v5339_v30, 0.0  ;;  %v857_v51 = vadd.s32 16, %v826_v34 }
 0x4a8   : >> { %v895_v18 = vmul.f32 %v894_v19, %v894_v19  ;;  %vm848_vm11 = vcmp.eq.s32.totalorder %v847_v7, %v823_v33 }
 0x4a9   : >> { %v796_v61 = vadd.f32 %v794_v52, %v790_v37  ;;  %v777_v26 = vadd.f32 %v776_v10, %v760_v22  ;;  %v904_v10 = vsel %vm8028_vm13, %v5340_v44, 0.0  ;;  %v839_v37 = vsel %vm838_vm14, 0.0, %v835_v9 }
 0x4aa   : >> { %v905_v31 = vmul.f32 %v904_v10, %v904_v10  ;;  %vm858_vm15 = vcmp.eq.s32.totalorder %v857_v51, %v823_v33  ;;  %v849_v60 = vsel %vm848_vm11, 0.0, %v845_v17 }
 0x4ab   : >> { %v802_v38 = vadd.f32 %v800_v58, %v796_v61  ;;  %v783_v32 = vadd.f32 %v782_v42, %v777_v26  ;;  %v859_v61 = vsel %vm858_vm15, 0.0, %v855_v3 }
 0x4ad   : >> { %v808_v47 = vadd.f32 %v806_v62, %v802_v38  ;;  %v789_v29 = vadd.f32 %v788_v43, %v783_v32  ;;  %v907_v38 = vadd.s32 56, %v826_v34 }
 0x4af   : >> { %v814_v1 = vadd.f32 %v812_v53, %v808_v47  ;;  %v795_v5 = vadd.f32 %v794_v52, %v789_v29  ;;  %v877_v52 = vadd.s32 32, %v826_v34  ;;  %vm908_vm6 = vcmp.eq.s32.totalorder %v907_v38, %v823_v33 }
 0x4b0   : >> { %v909_v20 = vsel %vm908_vm6, 0.0, %v905_v31 }
 0x4b1   : >> { %v820_v8 = vadd.f32 %v818_v56, %v814_v1  ;;  %v801_v42 = vadd.f32 %v800_v58, %v795_v5  ;;  %v887_v58 = vadd.s32 40, %v826_v34  ;;  %vm878_vm3 = vcmp.eq.s32.totalorder %v877_v52, %v823_v33 }
 0x4b3   : >> { %v841_v24 = vadd.f32 %v835_v9, %v820_v8  ;;  %v807_v50 = vadd.f32 %v806_v62, %v801_v42  ;;  %v897_v62 = vadd.s32 48, %v826_v34  ;;  %vm888_vm4 = vcmp.eq.s32.totalorder %v887_v58, %v823_v33 }
 0x4b4   : >> { %v889_v46 = vsel %vm888_vm4, 0.0, %v885_v45 }
 0x4b5   : >> { %v851_v12 = vadd.f32 %v845_v17, %v841_v24  ;;  %v813_v36 = vadd.f32 %v812_v53, %v807_v50  ;;  %v879_v53 = vsel %vm878_vm3, 0.0, %v875_v6  ;;  %vm898_vm5 = vcmp.eq.s32.totalorder %v897_v62, %v823_v33 }
 0x4b6   : >> { %v899_v47 = vsel %vm898_vm5, 0.0, %v895_v18 }
 0x4b7   : >> { %v861_v14 = vadd.f32 %v855_v3, %v851_v12  ;;  %v819_v59 = vadd.f32 %v818_v56, %v813_v36 }
 0x4b9   : >> { %v871_v28 = vadd.f32 %v865_v27, %v861_v14  ;;  %v840_v48 = vadd.f32 %v839_v37, %v819_v59 }
 0x4bb   : >> { %v881_v40 = vadd.f32 %v875_v6, %v871_v28  ;;  %v850_v23 = vadd.f32 %v849_v60, %v840_v48 }
 0x4bd   : >> { %v891_v25 = vadd.f32 %v885_v45, %v881_v40  ;;  %v860_v39 = vadd.f32 %v859_v61, %v850_v23 }
 0x4bf   : >> { %v901_v43 = vadd.f32 %v895_v18, %v891_v25  ;;  %v870_v41 = vadd.f32 %v869_v35, %v860_v39 }
 0x4c1   : >> { %v911_v55 = vadd.f32 %v905_v31, %v901_v43  ;;  %v880_v11 = vadd.f32 %v879_v53, %v870_v41 }
 0x4c3   : >> { %912 = vadd.xlane.f32.xlu0 %v911_v55  ;;  %v890_v56 = vadd.f32 %v889_v46, %v880_v11 }
 0x4c5   : >> { %v900_v49 = vadd.f32 %v899_v47, %v890_v56 }
 0x4c7   : >> { %v910_v63 = vadd.f32 %v909_v20, %v900_v49 }
 0x4c9   : >> { %920 = vadd.xlane.f32.xlu0 %v910_v63 }
 0x550   : >> { %v913_v1 = vpop.xlane.xlu0 %912 }
 0x551   : >> { %v914_v9 = vrot.slane %v913_v1, 4 }
 0x553   : >> { %v915_v4 = vadd.f32 %v914_v9, %v913_v1 }
 0x555   : >> { %v916_v57 = vrot.slane %v915_v4, 2 }
 0x556   : >> { %v921_v0 = vpop.xlane.xlu0 %920 }
 0x557   : >> { %v922_v8 = vrot.slane %v921_v0, 4  ;;  %v917_v16 = vadd.f32 %v916_v57, %v915_v4 }
 0x559   : >> { %v923_v17 = vadd.f32 %v922_v8, %v921_v0  ;;  %v918_v24 = vrot.slane %v917_v16, 1 }
 0x55b   : >> { %v924_v15 = vrot.slane %v923_v17, 2  ;;  %v919_v2 = vadd.f32 %v918_v24, %v917_v16 }
 0x55d   : >> { %v925_v22 = vadd.f32 %v924_v15, %v923_v17 }
 0x55f   : >> { %v926_v3 = vrot.slane %v925_v22, 1 }
 0x561   : >> { %v927_v13 = vadd.f32 %v926_v3, %v925_v22 }
 0x563   : >> { %5373 = vpush %v927_v13 }
 0x564   : >> { %5375 = vpush %v919_v2 }
 0x594   : >> { %s5374_s19 = spop %5373 }
 0x595   : >> { %s5376_s28 = spop %5375 }
 0x596   : >> { %s930_s11 = smul.f32 1e-10, %s5376_s28 }
 0x598   : >> { %p931_p11 = scmp.le.f32.partialorder %s5374_s19, %s930_s11 }
 0x59a   : >> { %p933_p12 = por %p932_p10, %p931_p11 }
 0x59c   : > { %3649 = sbr.rel (!%p933_p12) target bundleno = 382 (0x17e), region = 868 }
 0x5a3 PF: > { %s7742_s14 = smov [#allocation12]  ;;  %v3658_v33 = vmov %v5610_v33  ;;  %v3661_v34 = vmov %v5612_v34  ;;  %s7756_s17 = smov [#allocation15] }
 0x5a4   : > { %v7747_v33 = vmov %v5610_v33  ;;  %v3723_v34 = vmov %v5612_v34  ;;  %v3662_v26 = vld [vmem:[%s7742_s14] sm:$0xff]  ;;  %vm3665_vm1 = vcmp.eq.s32.totalorder %v3661_v34, %v3658_v33  ;;  %v5341_v12 = vld [vmem:[%s7742_s14 + $0x8] sm:$0xff]  ;;  %v3670_v27 = vadd.s32 8, %v3661_v34  ;;  %v5342_v21 = vld [vmem:[%s7742_s14 + $0x10] sm:$0xff]  ;;  %s8030_s20 = sld [smem:[#allocation26_spill]]  ;;  %s8031_s21 = sld [smem:[#allocation30_spill]] }
 0x5a5   : > { %vm3727_vm7 = vcmp.eq.s32.totalorder %v3723_v34, %v7747_v33  ;;  %v3666_v30 = vsel %vm3665_vm1, %v3662_v26, 0.0  ;;  %v3676_v32 = vadd.s32 16, %v3661_v34  ;;  %v3682_v14 = vadd.s32 24, %v3661_v34  ;;  %v5343_v44 = vld [vmem:[%s7742_s14 + $0x18] sm:$0xff]  ;;  %v5344_v10 = vld [vmem:[%s7742_s14 + $0x20] sm:$0xff]  ;;  %v5345_v40 = vld [vmem:[%s7742_s14 + $0x28] sm:$0xff] }
 0x5a6   : > { %v3688_v6 = vadd.s32 32, %v3661_v34  ;;  %vm3671_vm9 = vcmp.eq.s32.totalorder %v3670_v27, %v3658_v33  ;;  %v3694_v19 = vadd.s32 40, %v3661_v34  ;;  %v3700_v29 = vadd.s32 48, %v3661_v34  ;;  %v3724_v18 = vld [vmem:[%s7756_s17] sm:$0xff]  ;;  %v5346_v7 = vld [vmem:[%s7742_s14 + $0x30] sm:$0xff]  ;;  %v5348_v31 = vld [vmem:[%s7756_s17 + $0x8] sm:$0xff] }
 0x5a7   : > { %v3706_v28 = vadd.s32 56, %v3661_v34  ;;  %v3672_v45 = vsel %vm3671_vm9, %v5341_v12, %v3666_v30  ;;  %vm3677_vm8 = vcmp.eq.s32.totalorder %v3676_v32, %v3658_v33  ;;  %vm3683_vm2 = vcmp.eq.s32.totalorder %v3682_v14, %v3658_v33  ;;  %v5347_v36 = vld [vmem:[%s7742_s14 + $0x38] sm:$0xff]  ;;  %v5349_v54 = vld [vmem:[%s7756_s17 + $0x10] sm:$0xff]  ;;  %v5351_v23 = vld [vmem:[%s7756_s17 + $0x20] sm:$0xff]  ;;  %s8035_s24 = sld [smem:[#allocation26_spill]] (%p5551_p3)  ;;  %s8036_s26 = sld [smem:[#allocation30_spill]] (%p5551_p3) }
 0x5a8   : > { %vm3689_vm10 = vcmp.eq.s32.totalorder %v3688_v6, %v3658_v33  ;;  %v3678_v5 = vsel %vm3677_vm8, %v5342_v21, %v3672_v45  ;;  %vm3695_vm12 = vcmp.eq.s32.totalorder %v3694_v19, %v3658_v33  ;;  %vm3701_vm13 = vcmp.eq.s32.totalorder %v3700_v29, %v3658_v33  ;;  %v5350_v60 = vld [vmem:[%s7756_s17 + $0x18] sm:$0xff]  ;;  %v5352_v39 = vld [vmem:[%s7756_s17 + $0x28] sm:$0xff]  ;;  %v5353_v41 = vld [vmem:[%s7756_s17 + $0x30] sm:$0xff]  ;;  %s8038_s3 = sld [smem:[#allocation44_spill]] (%p5551_p3) }
 0x5a9   : > { %vm3707_vm14 = vcmp.eq.s32.totalorder %v3706_v28, %v3658_v33  ;;  %v3684_v42 = vsel %vm3683_vm2, %v5343_v44, %v3678_v5  ;;  %v3728_v25 = vsel %vm3727_vm7, %v3724_v18, 0.0  ;;  %v3732_v50 = vadd.s32 8, %v3723_v34  ;;  %v5354_v47 = vld [vmem:[%s7756_s17 + $0x38] sm:$0xff] }
 0x5aa   : > { %v3738_v51 = vadd.s32 16, %v3723_v34  ;;  %v3690_v43 = vsel %vm3689_vm10, %v5344_v10, %v3684_v42  ;;  %v3744_v55 = vadd.s32 24, %v3723_v34  ;;  %v3750_v37 = vadd.s32 32, %v3723_v34  ;;  %s3650_s25 = sand.u32 7, %s8030_s20   ;;  %s8032_s15 = scalar_lea.vmem [#allocation5], %s8031_s21 }
 0x5ab   : > { %v3756_v59 = vadd.s32 40, %v3723_v34  ;;  %v3696_v52 = vsel %vm3695_vm12, %v5345_v40, %v3690_v43  ;;  %vm3733_vm11 = vcmp.eq.s32.totalorder %v3732_v50, %v7747_v33  ;;  %v3762_v48 = vadd.s32 48, %v3723_v34  ;;  %s3651_s0 = scalar_lea.vmem [#allocation4], %s3650_s25  ;;  %s3653_s30 = scalar_lea.vmem [#allocation6], %s3650_s25 }
 0x5ac   : > { %vm3739_vm15 = vcmp.eq.s32.totalorder %v3738_v51, %v7747_v33  ;;  %v3702_v58 = vsel %vm3701_vm13, %v5346_v7, %v3696_v52  ;;  %v3734_v61 = vsel %vm3733_vm11, %v5348_v31, %v3728_v25  ;;  %vm3745_vm0 = vcmp.eq.s32.totalorder %v3744_v55, %v7747_v33  ;;  %s3655_s0 = smov %s3651_s0  ;;  %s3717_s30 = smov %s3653_s30 }
 0x5ad   : > { %vm3751_vm3 = vcmp.eq.s32.totalorder %v3750_v37, %v7747_v33  ;;  %v3708_v62 = vsel %vm3707_vm14, %v5347_v36, %v3702_v58  ;;  %v3740_v35 = vsel %vm3739_vm15, %v5349_v54, %v3734_v61  ;;  %vm3757_vm4 = vcmp.eq.s32.totalorder %v3756_v59, %v7747_v33  ;;  %s8033_s16 = scalar_lea.vmem [#allocation7], %s8031_s21  ;;  %s3817_s27 = sshrl.u32 (%p5551_p3), %s8035_s24, 3 }
 0x5ae   : > { %v3709_v38 = vrot.slane %v3708_v62, 4  ;;  %v3746_v53 = vsel %vm3745_vm0, %v5350_v60, %v3740_v35  ;;  %vm3763_vm5 = vcmp.eq.s32.totalorder %v3762_v48, %v7747_v33  ;;  %v3768_v46 = vadd.s32 56, %v3723_v34  ;;  %s8037_s29 = scalar_lea.vmem (%p5551_p3), [#allocation5], %s8036_s26  ;;  %s5361_s22 = sshll.u32 (%p5551_p3), %s3817_s27, 1 }
 0x5af   : > { %v3752_v11 = vsel %vm3751_vm3, %v5351_v23, %v3746_v53  ;;  %s3819_s5 = scalar_lea.vmem (%p5551_p3), %s8038_s3, %s5361_s22 }
 0x5b0   : > { %v3710_v56 = vadd.f32 %v3709_v38, %v3708_v62  ;;  %v3758_v20 = vsel %vm3757_vm4, %v5352_v39, %v3752_v11  ;;  %vm3769_vm6 = vcmp.eq.s32.totalorder %v3768_v46, %v7747_v33 }
 0x5b1   : > { %v3764_v49 = vsel %vm3763_vm5, %v5353_v41, %v3758_v20 }
 0x5b2   : > { %v3711_v63 = vrot.slane %v3710_v56, 2  ;;  %v3770_v1 = vsel %vm3769_vm6, %v5354_v47, %v3764_v49 }
 0x5b3   : > { %v3771_v9 = vrot.slane %v3770_v1, 4 }
 0x5b4   : > { %v3712_v4 = vadd.f32 %v3711_v63, %v3710_v56 }
 0x5b5   : > { %v3772_v57 = vadd.f32 %v3771_v9, %v3770_v1 }
 0x5b6   : > { %v3713_v0 = vrot.slane %v3712_v4, 1 }
 0x5b7   : > { %v3773_v8 = vrot.slane %v3772_v57, 2 }
 0x5b8   : > { %v3714_v34 = vadd.f32 %v3713_v0, %v3712_v4 }
 0x5b9   : > { %v3774_v17 = vadd.f32 %v3773_v8, %v3772_v57 }
 0x5ba   : > { %3715 = vst [vmem:[%s3655_s0] sm:$0x1] %v3714_v34 }
 0x5bb   : > { %v3775_v16 = vrot.slane %v3774_v17, 1 }
 0x5bd   : > { %v3776_v33 = vadd.f32 %v3775_v16, %v3774_v17 }
 0x5bf   : > { %3777 = vst [vmem:[%s3717_s30] sm:$0x1] %v3776_v33 }
 0x5c1   : > { %v3781_v15 = vld [vmem:[#allocation4] sm:$0x3]  ;;  %3816 = sbr.rel (!%p5551_p3) target bundleno = 1483 (0x5cb), region = 114 }
 0x5c2   : > { %3783 = vst [vmem:[%s8032_s15] sm:$0x3] %v3781_v15 }
 0x5c6   : > { %v3787_v22 = vld [vmem:[#allocation6] sm:$0x3] }
 0x5c7   : > { %3789 = vst [vmem:[%s8033_s16] sm:$0x3] %v3787_v22 }
 0x5c9   : > { %v3835_v24 = vld [vmem:[%s8037_s29] sm:$0x3] }
 0x5ca   : > { %3836 = vst [vmem:[%s3819_s5] sm:$0x3] %v3835_v24 }
 0x5cb PF: > { %3853 = sbr.rel (!%p5551_p3) target bundleno = 1493 (0x5d5), region = 148  ;;  %s8040_s4 = sld [smem:[#allocation26_spill]] (%p5551_p3) }
 0x5cc   : > { %s8041_s7 = sld [smem:[#allocation30_spill]] (%p5551_p3)  ;;  %s8043_s18 = sld [smem:[#allocation45_spill]] (%p5551_p3) }
 0x5d1   : > { %s3854_s8 = sshrl.u32 (%p5551_p3), %s8040_s4, 3 }
 0x5d2   : > { %s8042_s9 = scalar_lea.vmem [#allocation7], %s8041_s7  ;;  %s5362_s10 = sshll.u32 %s3854_s8, 1 }
 0x5d3   : > { %v3872_v3 = vld [vmem:[%s8042_s9] sm:$0x3]  ;;  %s3856_s19 = scalar_lea.vmem %s8043_s18, %s5362_s10 }
 0x5d4   : > { %3873 = vst [vmem:[%s3856_s19] sm:$0x3] %v3872_v3 }
 0x5d5 PF: > { %s8044_s28 = sld [smem:[#allocation26_spill]]  ;;  %s8045_s11 = sld [smem:[#allocation31_spill]] }
 0x5d6   : > { %s8046_s17 = sld [smem:[#allocation32_spill]]  ;;  %s8047_s21 = sld [smem:[#allocation46_spill]] }
 0x5d7   : > { %s8048_s16 = sld [smem:[#allocation47_spill]]  ;;  %s8049_s24 = sld [smem:[#allocation33_spill]] }
 0x5d8   : > { %s8050_s29 = sld [smem:[#allocation48_spill]]  ;;  %s8051_s1 = sld [smem:[#allocation34_spill]] }
 0x5d9   : > { %s8052_s5 = sld [smem:[#allocation49_spill]] }
 0x5db   : > { %s7803_s14 = sshll.u32 %s8044_s28, 6  ;;  %v3902_v13 = vld [vmem:[%s8045_s11] sm:$0xff]  ;;  %v3904_v2 = vld [vmem:[%s8045_s11 + $0x8] sm:$0xff]  ;;  %v3906_v26 = vld [vmem:[%s8045_s11 + $0x10] sm:$0xff] }
 0x5dc   : > { %s3889_s0 = scalar_lea.vmem %s8047_s21, %s7803_s14  ;;  %v3908_v12 = vld [vmem:[%s8045_s11 + $0x18] sm:$0xff]  ;;  %v3910_v27 = vld [vmem:[%s8045_s11 + $0x20] sm:$0xff]  ;;  %v3912_v30 = vld [vmem:[%s8045_s11 + $0x28] sm:$0xff] }
 0x5dd   : > { %s3922_s23 = scalar_lea.vmem %s8048_s16, %s7803_s14  ;;  %3903 = vst [vmem:[%s3889_s0] sm:$0xff] %v3902_v13  ;;  %3905 = vst [vmem:[%s3889_s0 + $0x8] sm:$0xff] %v3904_v2  ;;  %v3914_v21 = vld [vmem:[%s8045_s11 + $0x30] sm:$0xff]  ;;  %v3916_v32 = vld [vmem:[%s8045_s11 + $0x38] sm:$0xff] }
 0x5de   : > { %3907 = vst [vmem:[%s3889_s0 + $0x10] sm:$0xff] %v3906_v26  ;;  %3909 = vst [vmem:[%s3889_s0 + $0x18] sm:$0xff] %v3908_v12  ;;  %v3935_v14 = vld [vmem:[%s8046_s17] sm:$0xff]  ;;  %v3937_v6 = vld [vmem:[%s8046_s17 + $0x8] sm:$0xff]  ;;  %s3955_s22 = scalar_lea.vmem %s8050_s29, %s7803_s14 }
 0x5df   : > { %3911 = vst [vmem:[%s3889_s0 + $0x20] sm:$0xff] %v3910_v27  ;;  %3913 = vst [vmem:[%s3889_s0 + $0x28] sm:$0xff] %v3912_v30  ;;  %v3939_v44 = vld [vmem:[%s8046_s17 + $0x10] sm:$0xff]  ;;  %v3941_v19 = vld [vmem:[%s8046_s17 + $0x18] sm:$0xff]  ;;  %s3988_s6 = scalar_lea.vmem %s8052_s5, %s7803_s14 }
 0x5e0   : > { %3915 = vst [vmem:[%s3889_s0 + $0x30] sm:$0xff] %v3914_v21  ;;  %3917 = vst [vmem:[%s3889_s0 + $0x38] sm:$0xff] %v3916_v32  ;;  %v3943_v29 = vld [vmem:[%s8046_s17 + $0x20] sm:$0xff]  ;;  %v3945_v28 = vld [vmem:[%s8046_s17 + $0x28] sm:$0xff] }
 0x5e1   : > { %3936 = vst [vmem:[%s3922_s23] sm:$0xff] %v3935_v14  ;;  %3938 = vst [vmem:[%s3922_s23 + $0x8] sm:$0xff] %v3937_v6  ;;  %v3947_v45 = vld [vmem:[%s8046_s17 + $0x30] sm:$0xff]  ;;  %v3949_v10 = vld [vmem:[%s8046_s17 + $0x38] sm:$0xff] }
 0x5e2   : > { %3940 = vst [vmem:[%s3922_s23 + $0x10] sm:$0xff] %v3939_v44  ;;  %3942 = vst [vmem:[%s3922_s23 + $0x18] sm:$0xff] %v3941_v19  ;;  %v3968_v5 = vld [vmem:[%s8049_s24] sm:$0xff]  ;;  %v3970_v40 = vld [vmem:[%s8049_s24 + $0x8] sm:$0xff] }
 0x5e3   : > { %3944 = vst [vmem:[%s3922_s23 + $0x20] sm:$0xff] %v3943_v29  ;;  %3946 = vst [vmem:[%s3922_s23 + $0x28] sm:$0xff] %v3945_v28  ;;  %v3972_v18 = vld [vmem:[%s8049_s24 + $0x10] sm:$0xff]  ;;  %v3974_v42 = vld [vmem:[%s8049_s24 + $0x18] sm:$0xff] }
 0x5e4   : > { %3948 = vst [vmem:[%s3922_s23 + $0x30] sm:$0xff] %v3947_v45  ;;  %3950 = vst [vmem:[%s3922_s23 + $0x38] sm:$0xff] %v3949_v10  ;;  %v3976_v7 = vld [vmem:[%s8049_s24 + $0x20] sm:$0xff]  ;;  %v3978_v25 = vld [vmem:[%s8049_s24 + $0x28] sm:$0xff] }
 0x5e5   : > { %3969 = vst [vmem:[%s3955_s22] sm:$0xff] %v3968_v5  ;;  %3971 = vst [vmem:[%s3955_s22 + $0x8] sm:$0xff] %v3970_v40  ;;  %v3980_v31 = vld [vmem:[%s8049_s24 + $0x30] sm:$0xff]  ;;  %v3982_v50 = vld [vmem:[%s8049_s24 + $0x38] sm:$0xff] }
 0x5e6   : > { %3973 = vst [vmem:[%s3955_s22 + $0x10] sm:$0xff] %v3972_v18  ;;  %3975 = vst [vmem:[%s3955_s22 + $0x18] sm:$0xff] %v3974_v42  ;;  %v4001_v51 = vld [vmem:[%s8051_s1] sm:$0xff]  ;;  %v4003_v43 = vld [vmem:[%s8051_s1 + $0x8] sm:$0xff] }
 0x5e7   : > { %3977 = vst [vmem:[%s3955_s22 + $0x20] sm:$0xff] %v3976_v7  ;;  %3979 = vst [vmem:[%s3955_s22 + $0x28] sm:$0xff] %v3978_v25  ;;  %v4005_v36 = vld [vmem:[%s8051_s1 + $0x10] sm:$0xff]  ;;  %v4007_v54 = vld [vmem:[%s8051_s1 + $0x18] sm:$0xff] }
 0x5e8   : > { %3981 = vst [vmem:[%s3955_s22 + $0x30] sm:$0xff] %v3980_v31  ;;  %3983 = vst [vmem:[%s3955_s22 + $0x38] sm:$0xff] %v3982_v50  ;;  %v4009_v55 = vld [vmem:[%s8051_s1 + $0x20] sm:$0xff]  ;;  %v4011_v37 = vld [vmem:[%s8051_s1 + $0x28] sm:$0xff] }
 0x5e9   : > { %4002 = vst [vmem:[%s3988_s6] sm:$0xff] %v4001_v51  ;;  %4004 = vst [vmem:[%s3988_s6 + $0x8] sm:$0xff] %v4003_v43  ;;  %v4013_v59 = vld [vmem:[%s8051_s1 + $0x30] sm:$0xff]  ;;  %v4015_v52 = vld [vmem:[%s8051_s1 + $0x38] sm:$0xff] }
 0x5ea   : > { %4006 = vst [vmem:[%s3988_s6 + $0x10] sm:$0xff] %v4005_v36  ;;  %4008 = vst [vmem:[%s3988_s6 + $0x18] sm:$0xff] %v4007_v54 }
 0x5eb   : > { %4010 = vst [vmem:[%s3988_s6 + $0x20] sm:$0xff] %v4009_v55  ;;  %4012 = vst [vmem:[%s3988_s6 + $0x28] sm:$0xff] %v4011_v37 }
 0x5ec   : > { %4014 = vst [vmem:[%s3988_s6 + $0x30] sm:$0xff] %v4013_v59  ;;  %4016 = vst [vmem:[%s3988_s6 + $0x38] sm:$0xff] %v4015_v52 }
 0x5ed PF: > { %s8053_s11 = sld [smem:[#allocation27_spill]]  ;;  %s8054_s30 = sld [smem:[#allocation25_spill]] }
 0x5ee   : > { %s8055_s10 = sld [smem:[#allocation28_spill]] }
 0x5f3   : > { %p13_p13 = scmp.ge.s32.totalorder %s8053_s11, 4  }
 0x5f5   :  { %15 = sbr.rel (!%p13_p13) target bundleno = 13 (0xd), region = 879 }

// kernel: forward.3
= control target key start
LH: loop header
LB: loop body
LE: loop exit
PB: predicated region body
PF: predicated region fallthrough
CT: control target
= control target key end

     0   :  { %s2412_s0 = inlined_call_operand.hbm [shape: s32[2], index: 0, kind: input, shape index: {}]   ;;  %s2413_s1 = inlined_call_operand.hbm [shape: f32[42,32], index: 1, kind: input, shape index: {}]   ;;  %s2414_s2 = inlined_call_operand.hbm [shape: f32[5,32,32], index: 2, kind: input, shape index: {}]   ;;  %s2415_s3 = inlined_call_operand.hbm [shape: f32[16,32], index: 3, kind: input, shape index: {}]   ;;  %s2416_s4 = inlined_call_operand.hbm [shape: f32[2,24,128], index: 4, kind: input, shape index: {}]   ;;  %s2417_s5 = inlined_call_operand.hbm [shape: f32[2,1,128], index: 5, kind: output, shape index: {}]  }
   0x1   :  { %s1748_s20 = scalar_lea.hbm %s2412_s0, 16 }
   0x2   :  { %p1749_p0 = scmp.ne.s32.totalorder %s2412_s0, %s1748_s20  ;;  %p1752_p1 = scmp.lt.u32.totalorder %s1748_s20, %s2412_s0 }
   0x4   :  { %p1754_p2 = pnand %p1752_p1, %p1749_p0 }
   0x6   :  { %1757 = shalt.err (!%p1754_p2)  }
   0x7   :  { %s1950_s25 = smov [#allocation4]  }
   0x8   :  { %11 = dma.hbm_to_smem %s2412_s0, 16, %s1950_s25, [#allocation3] }
   0x9   :  { %1916 = dma.done.wait [#allocation3], 16 }
   0xa   :  { %1917 = vsyncadd [#allocation3], 4294967280 }
   0xb   :  { %13 = sfence }
   0xc   :  { %14 = vsyncpa [#allocation6], 0 }
   0xd   :  { %15 = vsyncpa [#allocation9], 0 }
   0xe   :  { %16 = vsyncpa [#allocation12], 0 }
   0xf   :  { %18 = vsyncpa [#allocation12 + $0x1], 0 }
  0x10   :  { %19 = vsyncpa [#allocation7], 0 }
  0x11   :  { %21 = vsyncpa [#allocation7 + $0x1], 0  ;;  %s2002_s28 = smov 0   ;;  %s2004_s29 = smov 0  }
  0x12   :  { %s2006_s30 = smov 0   ;;  %s2008_s6 = smov 0  }
  0x13 LB: > { %s2023_s0 = sadd.s32 4294967295, %s1948_s6   ;;  %s1429_s7 = sadd.s32 4294967294, %s1948_s6   ;;  %s1948_s6 = sphi %s2008_s6, %s2441_s6   ;;  %s1944_s30 = sphi %s2006_s30, %s2440_s30   ;;  %s1940_s29 = sphi %s2004_s29, %s2439_s29   ;;  %s1936_s28 = sphi %s2002_s28, %s2438_s28  }
  0x14   : > { %p110_p3 = scmp.ne.s32.totalorder %s1940_s29, %s1936_s28  ;;  %p2418_p4 = scmp.eq.s32.totalorder %s2023_s0, 0 }
  0x15   : > { %p140_p6 = scmp.eq.s32.totalorder %s1429_s7, 1  ;;  %p1430_p8 = scmp.ge.s32.totalorder %s1948_s6, 1 }
  0x16   : > { %p2032_p7 = por %p2418_p4, %p110_p3  ;;  %p147_p10 = scmp.lt.s32.totalorder %s1948_s6, 3 }
  0x17   : > { %p2037_p9 = por %p140_p6, %p110_p3  ;;  %s1951_s11 = smov [#allocation8]  }
  0x18   : > { %s2421_s8 = scalar_select %p2032_p7, 1, 0 }
  0x19   : > { %s2422_s9 = scalar_select %p2037_p9, 1, 0 }
  0x1a   : > { %p2043_p12 = pnand %p1430_p8, %p147_p10  ;;  %s172_s12 = sshll.u32 %s1951_s11, 4  ;;  %s2050_s12 = int_to_ptr.vmem [resolvable:$true] %s172_s12 }
  0x1b   : > { %s1952_s14 = smov [#allocation5]   ;;  %s1953_s16 = smov [#allocation10]  }
  0x1c   : > { %s2423_s10 = scalar_select %p2043_p12, 1, 0 }
  0x1d   : > { %p1672_p0 = pneg %p2043_p12  ;;  %s159_s15 = sshll.u32 %s1952_s14, 4  ;;  %s2058_s15 = int_to_ptr.vmem [resolvable:$true] %s159_s15 }
  0x1e   : > { %s2060_s17 = sshll.u32 %s1953_s16, 4  ;;  %s1758_s20 = scalar_lea.hbm %s2414_s2, 2560  ;;  %s186_s17 = int_to_ptr.vmem [resolvable:$true] %s2060_s17 }
  0x1f   : > { %p2054_p1 = pnand %p1672_p0, %p2418_p4  ;;  %p1759_p2 = scmp.ne.s32.totalorder %s2414_s2, %s1758_s20 }
  0x20   : > { %p1765_p10 = scmp.lt.u32.totalorder %s1758_s20, %s2414_s2 }
  0x21   : > { %p2070_p3 = pneg %p2054_p1 }
  0x23   : > { %p1761_p6 = pnand %p2070_p3, %p1759_p2 }
  0x25   : > { %p1762_p8 = pneg %p1761_p6 }
  0x27   : > { %p1767_p0 = pnand %p1765_p10, %p1762_p8 }
  0x29   : > { %1770 = shalt.err (!%p1767_p0)
}
  0x2a   : > { %s1771_s26 = scalar_lea.vmem %s2050_s12, 2560  ;;  %p1779_p5 = scmp.lt.s32.totalorder %s2050_s12, %s2050_s12 }
  0x2b   : > { %p1772_p13 = scmp.ne.s32.totalorder %s2050_s12, %s1771_s26  ;;  %p1780_p9 = scmp.lt.s32.totalorder %s1771_s26, %s1771_s26 }
  0x2d   : > { %p1774_p11 = pnand %p1772_p13, %p2070_p3  ;;  %p1781_p2 = por %p1780_p9, %p1779_p5 }
  0x2f   : > { %p1775_p4 = pneg %p1774_p11 }
  0x31   : > { %p1782_p6 = pnand %p1781_p2, %p1775_p4 }
  0x33   : > { %1785 = shalt.err (!%p1782_p6)
}
  0x34   : > { %s1954_s27 = smov 128   ;;  %s1955_s7 = smov 8  }
  0x35   : > { %1678 = dma.hbm_to_vmem [thread:$0]  (!%p2054_p1), %s2414_s2, 2560, %s2050_s12, [#allocation9], %s1954_s27, %s1954_s27, %s1955_s7  }
  0x36   : > { %s1786_s19 = scalar_lea.hbm %s2413_s1, 768 }
  0x37   : > { %p1787_p4 = scmp.ne.s32.totalorder %s2413_s1, %s1786_s19  ;;  %p1793_p11 = scmp.lt.u32.totalorder %s1786_s19, %s2413_s1 }
  0x39   : > { %p1789_p5 = pnand %p1787_p4, %p2070_p3 }
  0x3b   : > { %p1790_p9 = pneg %p1789_p5 }
  0x3d   : > { %p1795_p13 = pnand %p1793_p11, %p1790_p9 }
  0x3f   : > { %1798 = shalt.err (!%p1795_p13)
}
  0x40   : > { %s1799_s12 = scalar_lea.vmem %s2058_s15, 768  ;;  %p1807_p2 = scmp.lt.s32.totalorder %s2058_s15, %s2058_s15 }
  0x41   : > { %p1800_p8 = scmp.ne.s32.totalorder %s2058_s15, %s1799_s12  ;;  %p1808_p6 = scmp.lt.s32.totalorder %s1799_s12, %s1799_s12 }
  0x43   : > { %p1802_p10 = pnand %p1800_p8, %p2070_p3  ;;  %p1809_p4 = por %p1808_p6, %p1807_p2 }
  0x45   : > { %p1803_p0 = pneg %p1802_p10 }
  0x47   : > { %p1810_p5 = pnand %p1809_p4, %p1803_p0 }
  0x49   : > { %1813 = shalt.err (!%p1810_p5)
}
  0x4a   : > { %1675 = dma.hbm_to_vmem [thread:$0]  (!%p2054_p1), %s2413_s1, 768, %s2058_s15, [#allocation6], %s1954_s27, %s1954_s27, %s1955_s7  }
  0x4b   : > { %s1814_s16 = scalar_lea.hbm %s2415_s3, 256 }
  0x4c   : > { %p1815_p9 = scmp.ne.s32.totalorder %s2415_s3, %s1814_s16  ;;  %p1821_p8 = scmp.lt.u32.totalorder %s1814_s16, %s2415_s3 }
  0x4e   : > { %p1817_p11 = pnand %p1815_p9, %p2070_p3 }
  0x50   : > { %p1818_p13 = pneg %p1817_p11 }
  0x52   : > { %p1823_p10 = pnand %p1821_p8, %p1818_p13 }
  0x54   : > { %1826 = shalt.err (!%p1823_p10)
}
  0x55   : > { %s1827_s22 = scalar_lea.vmem %s186_s17, 256  ;;  %p1835_p4 = scmp.lt.s32.totalorder %s186_s17, %s186_s17 }
  0x56   : > { %p1828_p0 = scmp.ne.s32.totalorder %s186_s17, %s1827_s22  ;;  %p1836_p5 = scmp.lt.s32.totalorder %s1827_s22, %s1827_s22 }
  0x58   : > { %p1830_p2 = pnand %p1828_p0, %p2070_p3  ;;  %p1837_p7 = por %p1836_p5, %p1835_p4 }
  0x5a   : > { %p1831_p6 = pneg %p1830_p2 }
  0x5c   : > { %p1838_p12 = pnand %p1837_p7, %p1831_p6 }
  0x5e   : > { %1841 = shalt.err (!%p1838_p12)
}
  0x5f   : > { %1681 = dma.hbm_to_vmem [thread:$0]  (!%p2054_p1), %s2415_s3, 256, %s186_s17, [#allocation9], %s1954_s27, %s1954_s27, %s1955_s7  }
  0x60   : > { %s2143_s23 = sadd.s32 1, %s1948_s6   ;;  %s97_s12 = sadd.s32 1, %s1944_s30 }
  0x61   : > { %s94_s13 = ssub.s32 %s1948_s6, %s2143_s23  ;;  %p104_p12 = scmp.ne.s32.totalorder %s1944_s30, %s1940_s29 }
  0x62   : > { %p95_p7 = scmp.eq.s32.totalorder %s94_s13, 0  ;;  %p105_p3 = scmp.eq.s32.totalorder %s1948_s6, 0 }
  0x63   : > { %p1693_p9 = scmp.lt.s32.totalorder %s1948_s6, 2  ;;  %p2426_p13 = scmp.eq.s32.totalorder %s2023_s0, 1 }
  0x64   : > { %s2153_s25 = scalar_select %p95_p7, %s1944_s30, %s97_s12  }
  0x65   : > { %p106_p11 = por %p105_p3, %p104_p12  ;;  %p2157_p8 = por %p2426_p13, %p104_p12 }
  0x66   : > { %s199_s11 = sand.u32 1, %s1944_s30   ;;  %s1654_s14 = smul.u32 384, %s1948_s6 }
  0x67   : > { %s1653_s17 = smul.u32 24, %s199_s11  ;;  %p2163_p1 = pnand %p1693_p9, %p106_p11 }
  0x68   : > { %s2170_s20 = scalar_lea.hbm %s2416_s4, %s1654_s14  ;;  %s2174_s15 = scalar_lea.sflag [#allocation12], %s199_s11 }
  0x69   : > { %s203_s21 = scalar_lea.vmem [#allocation11], %s1653_s17  ;;  %s1842_s24 = scalar_lea.hbm %s2170_s20, 384 }
  0x6a   : > { %s210_s22 = sshll.u32 %s203_s21, 4  ;;  %p1843_p10 = scmp.ne.s32.totalorder %s2170_s20, %s1842_s24  ;;  %s2172_s22 = int_to_ptr.vmem [resolvable:$true] %s210_s22 }
  0x6b   : > { %p1844_p0 = pneg %p2163_p1  ;;  %s1847_s14 = scalar_lea.hbm %s2416_s4, 768 }
  0x6c   : > { %p1848_p4 = scmp.lt.u32.totalorder %s2170_s20, %s2416_s4  ;;  %p1849_p5 = scmp.lt.u32.totalorder %s1847_s14, %s1842_s24 }
  0x6d   : > { %p1845_p2 = pnand %p1844_p0, %p1843_p10  ;;  %p1851_p12 = scmp.lt.u32.totalorder %s1842_s24, %s2170_s20 }
  0x6e   : > { %p1850_p7 = por %p1849_p5, %p1848_p4 }
  0x6f   : > { %p1846_p6 = pneg %p1845_p2 }
  0x70   : > { %p1852_p3 = por %p1851_p12, %p1850_p7 }
  0x72   : > { %p1853_p9 = pnand %p1852_p3, %p1846_p6 }
  0x74   : > { %1856 = shalt.err (!%p1853_p9)
}
  0x75   : > { %s1857_s11 = scalar_lea.vmem %s2172_s22, 384  ;;  %s1956_s17 = smov [#allocation11]  }
  0x76   : > { %p1858_p11 = scmp.ne.s32.totalorder %s2172_s22, %s1857_s11  ;;  %s1862_s21 = sshll.u32 %s1956_s17, 4  ;;  %s1863_s21 = int_to_ptr.vmem [resolvable:$false] %s1862_s21 }
  0x77   : > { %s1864_s13 = scalar_lea.vmem %s1863_s21, 768  ;;  %p1865_p2 = scmp.lt.s32.totalorder %s2172_s22, %s1863_s21 }
  0x78   : > { %p1860_p13 = pnand %p1858_p11, %p1844_p0  ;;  %p1866_p4 = scmp.lt.s32.totalorder %s1864_s13, %s1857_s11 }
  0x7a   : > { %p1861_p10 = pneg %p1860_p13  ;;  %p1867_p5 = por %p1866_p4, %p1865_p2 }
  0x7c   : > { %p1868_p7 = pnand %p1867_p5, %p1861_p10 }
  0x7e   : > { %1871 = shalt.err (!%p1868_p7)
}
  0x7f   : > { %1685 = dma.hbm_to_vmem [thread:$0]  (!%p2163_p1), %s2170_s20, 384, %s2172_s22, %s2174_s15, %s1954_s27, %s1954_s27, %s1955_s7  }
  0x80   : > { %p2429_p0 = scmp.ne.s32.totalorder %s2423_s10, 0 }
  0x81   : > { %p2430_p6 = scmp.eq.s32.totalorder (!%p2429_p0), %s2023_s0, 0 }
  0x82   : > { %222 = sbr.rel (%p2429_p0) target bundleno = 1734 (0x6c6), region = 36 }
  0x89   : > { %1919 = dma.done.wait (%p2430_p6), [#allocation6], 768   ;;  %p2431_p12 = pmov %p2430_p6 }
  0x8a   : > { %p2432_p3 = pmov %p2430_p6 }
  0x8b   : > { %1921 = vsyncadd (%p2431_p12), [#allocation6], 4294966528 }
  0x8c   : > { %1923 = dma.done.wait (%p2432_p3), [#allocation9], 2816   ;;  %p2433_p9 = pmov %p2432_p3 }
  0x8d   : > { %s2216_s16 = sand.u32 1, %s1940_s29   ;;  %p2434_p1 = scmp.ne.s32.totalorder %s2421_s8, 0 }
  0x8e   : > { %1925 = vsyncadd (%p2433_p9), [#allocation9], 4294964480  ;;  %s1655_s10 = smul.u32 24, %s2216_s16  ;;  %s237_s27 = scalar_lea.sflag [#allocation12], %s2216_s16 }
  0x90   : > { %s2220_s7 = scalar_lea.vmem [#allocation11], %s1655_s10 }
  0x91   : > { %1927 = dma.done.wait (%p2434_p1), %s237_s27, 384  }
  0x92   : > { %1929 = vsyncadd (%p2434_p1), %s237_s27, 4294966912  ;;  %s263_s20 = scalar_lea.vmem [#allocation13], %s2216_s16  ;;  %p2435_p11 = scmp.ne.s32.totalorder %s2023_s0, 0 }
  0x93   : > { %v286_v0 = vld [vmem:[#allocation8] sm:$0xff] (!%p2435_p11)  ;;  %v287_v1 = vld [vmem:[#allocation8 + $0x8] sm:$0xff] (!%p2435_p11)  ;;  %v288_v2 = vld [vmem:[#allocation8 + $0x10] sm:$0xff] (!%p2435_p11)  ;;  %vm294_vm0 = vcmask (!%p2435_p11), 261120   ;;  %v290_v18 = vlaneseq (!%p2435_p11)  ;;  %vm417_vm1 = vcmask (!%p2435_p11), 254976  }
  0x94   : > { %267 = sbr.rel (%p2435_p11) target bundleno = 1558 (0x616), region = 56  ;;  %v1609_v3 = vpack.c.bf16 (!%p2435_p11), %v287_v1, %v286_v0  ;;  %v289_v4 = vld [vmem:[#allocation8 + $0x18] sm:$0xff] (!%p2435_p11)  ;;  %v278_v5 = vld [vmem:[#allocation5] sm:$0xff] (!%p2435_p11)  ;;  %v280_v10 = vld [vmem:[#allocation5 + $0x10] sm:$0xff] (!%p2435_p11) }
  0x95   : > { %v1613_v6 = vpack.c.bf16 (!%p2435_p11), %v289_v4, %v288_v2  ;;  %1532 = vmatprep.mubr.msk.f32.mxu0 (!%p2435_p11), %vm294_vm0, %v278_v5  ;;  %v282_v7 = vld [vmem:[#allocation5 + $0x20] sm:$0xff] (!%p2435_p11)  ;;  %v279_v8 = vld [vmem:[#allocation5 + $0x8] sm:$0xff] (!%p2435_p11)  ;;  %v281_v11 = vld [vmem:[#allocation5 + $0x18] sm:$0xff] (!%p2435_p11)  ;;  %v2235_v19 = vshrl.u32 (!%p2435_p11), %v290_v18, 7 }
  0x96   : > { %1610 = vmatprep.subr.bf16.mxu0 (!%p2435_p11), %v1609_v3  ;;  %1649 = vmatprep.subr.bf16.mxu1 (!%p2435_p11), %v1609_v3  ;;  %v283_v9 = vld [vmem:[#allocation5 + $0x28] sm:$0x3] (!%p2435_p11)  ;;  %v505_v12 = vld [vmem:[#allocation8 + $0x20] sm:$0xff] (!%p2435_p11)  ;;  %v506_v13 = vld [vmem:[#allocation8 + $0x28] sm:$0xff] (!%p2435_p11) }
  0x97   : > { %1612 = vmatpush3.bf16.msra.mxu0 (!%p2435_p11), %v1609_v3  ;;  %1651 = vmatpush3.bf16.msra.mxu1 (!%p2435_p11), %v1609_v3  ;;  %v1617_v14 = vpack.c.bf16 (!%p2435_p11), %v506_v13, %v505_v12  ;;  %v507_v15 = vld [vmem:[#allocation8 + $0x30] sm:$0xff] (!%p2435_p11)  ;;  %v508_v16 = vld [vmem:[#allocation8 + $0x38] sm:$0xff] (!%p2435_p11)  ;;  %v292_v20 = vsub.s32 (!%p2435_p11), 0, %v2235_v19  ;;  %v2238_v21 = vld [vmem:[#allocation10] sm:$0xff] (!%p2435_p11) }
  0x98   : > { %1614 = vmatprep.subr.bf16.mxu0 (!%p2435_p11), %v1613_v6  ;;  %1650 = vmatprep.subr.bf16.mxu1 (!%p2435_p11), %v1613_v6  ;;  %v1621_v17 = vpack.c.bf16 (!%p2435_p11), %v508_v16, %v507_v15 }
  0x99   : > { %1538 = vmatprep.mubr.msk.f32.mxu1 (!%p2435_p11), %vm294_vm0, %v282_v7  ;;  %v293_v22 = vrot.slane (!%p2435_p11), %v2238_v21, %v292_v20 }
  0x9b   : > { %1616 = vmatpush3.bf16.msra.mxu0 %v1613_v6  ;;  %1652 = vmatpush3.bf16.msra.mxu1 %v1613_v6 }
  0x9c   : > { %1618 = vmatprep.subr.bf16.mxu1 %v1617_v14 }
  0x9e   : > { %1533 = vmatmul.mubr.msk.f32.vlgmr.msra.gmra.mrb[0].mxu0 %vm294_vm0, %v279_v8  ;;  %1539 = vmatmul.mubr.msk.f32.vlgmr.msra.gmra.mrb[0].mxu1 %vm294_vm0, %v283_v9 }
  0x9f   : > { %1535 = vmatprep.mubr.msk.f32.mxu0 %vm294_vm0, %v280_v10  ;;  %1620 = vmatpush3.bf16.msra.mxu1 %v1617_v14 }
  0xa0   : > { %1622 = vmatprep.subr.bf16.mxu1 %v1621_v17 }
  0xa2   : > { %1536 = vmatmul.mubr.msk.f32.gmra.mrb[2].mxu0 %vm294_vm0, %v281_v11 }
  0xa3   : > { %1624 = vmatpush3.bf16.msra.mxu1 %v1621_v17 }
 0x171   : > { %v1534_v23 = vpop.f32.mrb[0].mxu0  ;;  %v1540_v24 = vpop.f32.mrb[0].mxu1 }
 0x172   : > { %v385_v25 = vadd.f32 %v1534_v23, %v293_v22  ;;  %v379_v26 = vpop.f32.mrb[1].mxu0  ;;  %v399_v27 = vpop.f32.mrb[1].mxu1  ;;  %v405_v40 = vadd.f32 %v1540_v24, %v293_v22  ;;  %v468_v23 = vsub.s32 5, %v2235_v19  ;;  %v478_v24 = vsub.s32 1, %v2235_v19 }
 0x173   : > { %v380_v28 = vadd.f32 %v379_v26, %v293_v22  ;;  %v400_v36 = vadd.f32 %v399_v27, %v293_v22 }
 0x174   : > { %v409_v29 = vsel %vm294_vm0, %v385_v25, 0.0  ;;  %v418_v44 = vsel %vm417_vm1, %v405_v40, 0.0  ;;  %v469_v26 = vrot.slane %v2238_v21, %v468_v23 }
 0x175   : > { %v408_v30 = vsel %vm294_vm0, %v380_v28, 0.0  ;;  %v1537_v31 = vpop.f32.mrb[2].mxu0  ;;  %v415_v41 = vsel %vm294_vm0, %v400_v36, 0.0 }
 0x176   : > { %v410_v32 = vadd.f32 %v409_v29, %v408_v30  ;;  %v389_v33 = vpop.f32.mrb[3].mxu0  ;;  %v395_v34 = vadd.f32 %v1537_v31, %v293_v22 }
 0x177   : > { %v390_v35 = vadd.f32 %v389_v33, %v293_v22 }
 0x178   : > { %v413_v39 = vsel %vm294_vm0, %v395_v34, 0.0 }
 0x179   : > { %v411_v37 = vsel %vm294_vm0, %v390_v35, 0.0 }
 0x17a   : > { %v412_v38 = vadd.f32 %v411_v37, %v410_v32 }
 0x17c   : > { %v414_v42 = vadd.f32 %v413_v39, %v412_v38 }
 0x17e   : > { %v416_v43 = vadd.f32 %v415_v41, %v414_v42 }
 0x180   : > { %v419_v45 = vadd.f32 %v418_v44, %v416_v43 }
 0x182   : > { %v420_v46 = vrot.slane %v419_v45, 4 }
 0x184   : > { %v421_v47 = vadd.f32 %v420_v46, %v419_v45 }
 0x186   : > { %v422_v48 = vrot.slane %v421_v47, 2 }
 0x188   : > { %v423_v49 = vadd.f32 %v422_v48, %v421_v47 }
 0x18a   : > { %v424_v50 = vrot.slane %v423_v49, 1 }
 0x18c   : > { %v425_v51 = vadd.f32 %v424_v50, %v423_v49 }
 0x18e   : > { %v427_v52 = vmul.f32 0.023809524, %v425_v51 }
 0x190   : > { %v428_v53 = vsub.f32 %v380_v28, %v427_v52  ;;  %v429_v54 = vsub.f32 %v385_v25, %v427_v52  ;;  %v430_v55 = vsub.f32 %v390_v35, %v427_v52  ;;  %v431_v56 = vsub.f32 %v395_v34, %v427_v52  ;;  %v2257_v25 = vld [vmem:[#allocation10 + $0x8] sm:$0xff] }
 0x191   : > { %v432_v57 = vsub.f32 %v400_v36, %v427_v52  ;;  %v433_v58 = vsub.f32 %v405_v40, %v427_v52  ;;  %v479_v28 = vrot.slane %v2257_v25, %v478_v24 }
 0x192   : > { %v434_v59 = vmul.f32 %v428_v53, %v428_v53  ;;  %v435_v60 = vmul.f32 %v429_v54, %v429_v54  ;;  %v436_v61 = vmul.f32 %v430_v55, %v430_v55  ;;  %v437_v62 = vmul.f32 %v431_v56, %v431_v56 }
 0x193   : > { %v438_v2 = vmul.f32 %v432_v57, %v432_v57  ;;  %v439_v5 = vmul.f32 %v433_v58, %v433_v58 }
 0x194   : > { %v440_v63 = vsel %vm294_vm0, %v434_v59, 0.0  ;;  %v441_v0 = vsel %vm294_vm0, %v435_v60, 0.0  ;;  %v443_v3 = vsel %vm294_vm0, %v436_v61, 0.0  ;;  %v445_v6 = vsel %vm294_vm0, %v437_v62, 0.0  ;;  %v721_v59 = vld [vmem:[#allocation8 + $0x40] sm:$0xff]  ;;  %v722_v60 = vld [vmem:[#allocation8 + $0x48] sm:$0xff] }
 0x195   : > { %v442_v1 = vadd.f32 %v441_v0, %v440_v63  ;;  %v447_v8 = vsel %vm294_vm0, %v438_v2, 0.0  ;;  %v449_v10 = vsel %vm417_vm1, %v439_v5, 0.0  ;;  %v723_v61 = vld [vmem:[#allocation8 + $0x50] sm:$0xff]  ;;  %v1625_v62 = vpack.c.bf16 %v722_v60, %v721_v59  ;;  %v724_v63 = vld [vmem:[#allocation8 + $0x58] sm:$0xff] }
 0x196   : > { %v1629_v0 = vpack.c.bf16 %v724_v63, %v723_v61 }
 0x197   : > { %v444_v4 = vadd.f32 %v443_v3, %v442_v1  ;;  %1626 = vmatprep.subr.bf16.mxu0 %v1625_v62  ;;  %v512_v1 = vrot.slane %v2238_v21, %v478_v24 }
 0x198   : > { %1628 = vmatpush3.bf16.msra.mxu0 %v1625_v62 }
 0x199   : > { %v446_v7 = vadd.f32 %v445_v6, %v444_v4  ;;  %1630 = vmatprep.subr.bf16.mxu0 %v1629_v0 }
 0x19b   : > { %v448_v9 = vadd.f32 %v447_v8, %v446_v7 }
 0x19c   : > { %1632 = vmatpush3.bf16.msra.mxu0 %v1629_v0 }
 0x19d   : > { %v450_v11 = vadd.f32 %v449_v10, %v448_v9 }
 0x19f   : > { %v451_v12 = vrot.slane %v450_v11, 4 }
 0x1a1   : > { %v452_v13 = vadd.f32 %v451_v12, %v450_v11 }
 0x1a3   : > { %v453_v14 = vrot.slane %v452_v13, 2 }
 0x1a5   : > { %v454_v15 = vadd.f32 %v453_v14, %v452_v13 }
 0x1a7   : > { %v455_v16 = vrot.slane %v454_v15, 1 }
 0x1a9   : > { %v456_v17 = vadd.f32 %v455_v16, %v454_v15 }
 0x1ab   : > { %v457_v18 = vmul.f32 0.023809524, %v456_v17 }
 0x1ad   : > { %v458_v22 = vadd.f32 1e-05, %v457_v18 }
 0x1af   : > { %1738 = vrsqrt.f32 %v458_v22 }
 0x1b9   : > { %v1739_v27 = vpop.eup %1738 }
 0x1ba   : > { %v464_v29 = vmul.f32 %v1739_v27, %v432_v57  ;;  %v460_v30 = vmul.f32 %v1739_v27, %v428_v53  ;;  %v461_v31 = vmul.f32 %v1739_v27, %v429_v54  ;;  %v462_v32 = vmul.f32 %v1739_v27, %v430_v55 }
 0x1bb   : > { %v463_v33 = vmul.f32 %v1739_v27, %v431_v56  ;;  %v465_v34 = vmul.f32 %v1739_v27, %v433_v58 }
 0x1bc   : > { %v474_v35 = vmul.f32 %v469_v26, %v464_v29  ;;  %v470_v36 = vmul.f32 %v469_v26, %v460_v30  ;;  %v471_v37 = vmul.f32 %v469_v26, %v461_v31  ;;  %v472_v38 = vmul.f32 %v469_v26, %v462_v32 }
 0x1bd   : > { %v473_v39 = vmul.f32 %v469_v26, %v463_v33  ;;  %v475_v45 = vmul.f32 %v469_v26, %v465_v34 }
 0x1be   : > { %v480_v40 = vadd.f32 %v479_v28, %v470_v36  ;;  %v481_v41 = vadd.f32 %v479_v28, %v471_v37  ;;  %v482_v42 = vadd.f32 %v479_v28, %v472_v38  ;;  %v484_v44 = vadd.f32 %v479_v28, %v474_v35 }
 0x1bf   : > { %v483_v43 = vadd.f32 %v479_v28, %v473_v39  ;;  %v485_v52 = vadd.f32 %v479_v28, %v475_v45 }
 0x1c0   : > { %vm486_vm2 = vcmp.ge.f32.partialorder %v480_v40, 0.0  ;;  %v492_v46 = vmul.f32 0.01, %v480_v40  ;;  %vm487_vm3 = vcmp.ge.f32.partialorder %v481_v41, 0.0  ;;  %v493_v47 = vmul.f32 0.01, %v481_v41 }
 0x1c1   : > { %vm488_vm4 = vcmp.ge.f32.partialorder %v482_v42, 0.0  ;;  %v494_v48 = vmul.f32 0.01, %v482_v42  ;;  %v495_v51 = vmul.f32 0.01, %v483_v43  ;;  %vm489_vm5 = vcmp.ge.f32.partialorder %v483_v43, 0.0 }
 0x1c2   : > { %v498_v49 = vsel %vm486_vm2, %v480_v40, %v492_v46  ;;  %v499_v50 = vsel %vm487_vm3, %v481_v41, %v493_v47  ;;  %v496_v54 = vmul.f32 0.01, %v484_v44  ;;  %vm490_vm6 = vcmp.ge.f32.partialorder %v484_v44, 0.0 }
 0x1c3   : > { %1549 = vmatprep.mubr.msk.f32.mxu1 %vm294_vm0, %v498_v49  ;;  %v500_v53 = vsel %vm488_vm4, %v482_v42, %v494_v48  ;;  %v501_v55 = vsel %vm489_vm5, %v483_v43, %v495_v51  ;;  %v497_v56 = vmul.f32 0.01, %v485_v52  ;;  %vm491_vm7 = vcmp.ge.f32.partialorder %v485_v52, 0.0 }
 0x1c4   : > { %1550 = vmatmul.mubr.msk.f32.vlgmr.msra.gmra.mrb[2].mxu1 %vm294_vm0, %v499_v50  ;;  %v502_v57 = vsel %vm490_vm6, %v484_v44, %v496_v54  ;;  %vm268_vm6 = vcmask 7168  }
 0x1c5   : > { %1552 = vmatprep.mubr.msk.f32.mxu1 %vm294_vm0, %v500_v53  ;;  %v503_v58 = vsel %vm491_vm7, %v485_v52, %v497_v56 }
 0x1c8   : > { %1553 = vmatmul.mubr.msk.f32.gmra.mrb[4].mxu1 %vm294_vm0, %v501_v55 }
 0x1c9   : > { %1555 = vmatprep.mubr.msk.f32.mxu1 %vm294_vm0, %v502_v57 }
 0x1cc   : > { %1556 = vmatmul.mubr.msk.f32.gmra.mrb[6].mxu1 %vm294_vm0, %v503_v58 }
 0x297   : > { %v1551_v2 = vpop.f32.mrb[2].mxu1 }
 0x298   : > { %v603_v3 = vadd.f32 %v1551_v2, %v512_v1  ;;  %v597_v4 = vpop.f32.mrb[3].mxu1 }
 0x299   : > { %v598_v5 = vadd.f32 %v597_v4, %v512_v1  ;;  %v694_v4 = vsub.s32 2, %v2235_v19 }
 0x29a   : > { %v627_v6 = vsel %vm294_vm0, %v603_v3, 0.0 }
 0x29b   : > { %v626_v7 = vsel %vm294_vm0, %v598_v5, 0.0  ;;  %v1554_v8 = vpop.f32.mrb[4].mxu1 }
 0x29c   : > { %v628_v9 = vadd.f32 %v627_v6, %v626_v7  ;;  %v613_v10 = vadd.f32 %v1554_v8, %v512_v1  ;;  %v607_v11 = vpop.f32.mrb[5].mxu1  ;;  %v695_v7 = vrot.slane %v2257_v25, %v694_v4 }
 0x29d   : > { %v608_v12 = vadd.f32 %v607_v11, %v512_v1 }
 0x29e   : > { %v631_v18 = vsel %vm294_vm0, %v613_v10, 0.0 }
 0x29f   : > { %v629_v13 = vsel %vm294_vm0, %v608_v12, 0.0  ;;  %v1557_v14 = vpop.f32.mrb[6].mxu1 }
 0x2a0   : > { %v630_v15 = vadd.f32 %v629_v13, %v628_v9  ;;  %v623_v16 = vadd.f32 %v1557_v14, %v512_v1  ;;  %v617_v17 = vpop.f32.mrb[7].mxu1 }
 0x2a1   : > { %v618_v22 = vadd.f32 %v617_v17, %v512_v1 }
 0x2a2   : > { %v632_v23 = vadd.f32 %v631_v18, %v630_v15  ;;  %v635_v27 = vsel %vm417_vm1, %v623_v16, 0.0 }
 0x2a3   : > { %v633_v24 = vsel %vm294_vm0, %v618_v22, 0.0 }
 0x2a4   : > { %v634_v26 = vadd.f32 %v633_v24, %v632_v23 }
 0x2a6   : > { %v636_v28 = vadd.f32 %v635_v27, %v634_v26 }
 0x2a8   : > { %v637_v29 = vrot.slane %v636_v28, 4 }
 0x2aa   : > { %v638_v30 = vadd.f32 %v637_v29, %v636_v28 }
 0x2ac   : > { %v639_v31 = vrot.slane %v638_v30, 2 }
 0x2ae   : > { %v640_v32 = vadd.f32 %v639_v31, %v638_v30 }
 0x2b0   : > { %v641_v33 = vrot.slane %v640_v32, 1 }
 0x2b2   : > { %v642_v34 = vadd.f32 %v641_v33, %v640_v32 }
 0x2b4   : > { %v643_v35 = vmul.f32 0.023809524, %v642_v34 }
 0x2b6   : > { %v644_v36 = vsub.f32 %v598_v5, %v643_v35  ;;  %v645_v37 = vsub.f32 %v603_v3, %v643_v35  ;;  %v646_v38 = vsub.f32 %v608_v12, %v643_v35  ;;  %v647_v39 = vsub.f32 %v613_v10, %v643_v35 }
 0x2b7   : > { %v648_v40 = vsub.f32 %v618_v22, %v643_v35  ;;  %v649_v41 = vsub.f32 %v623_v16, %v643_v35  ;;  %v684_v3 = vsub.s32 6, %v2235_v19 }
 0x2b8   : > { %v650_v42 = vmul.f32 %v644_v36, %v644_v36  ;;  %v651_v43 = vmul.f32 %v645_v37, %v645_v37  ;;  %v652_v44 = vmul.f32 %v646_v38, %v646_v38  ;;  %v653_v45 = vmul.f32 %v647_v39, %v647_v39 }
 0x2b9   : > { %v654_v49 = vmul.f32 %v648_v40, %v648_v40  ;;  %v655_v52 = vmul.f32 %v649_v41, %v649_v41  ;;  %v685_v5 = vrot.slane %v2238_v21, %v684_v3 }
 0x2ba   : > { %v656_v46 = vsel %vm294_vm0, %v650_v42, 0.0  ;;  %v657_v47 = vsel %vm294_vm0, %v651_v43, 0.0  ;;  %v659_v50 = vsel %vm294_vm0, %v652_v44, 0.0  ;;  %v661_v53 = vsel %vm294_vm0, %v653_v45, 0.0  ;;  %v937_v42 = vld [vmem:[#allocation8 + $0x60] sm:$0xff]  ;;  %v938_v43 = vld [vmem:[#allocation8 + $0x68] sm:$0xff] }
 0x2bb   : > { %v658_v48 = vadd.f32 %v657_v47, %v656_v46  ;;  %v663_v55 = vsel %vm294_vm0, %v654_v49, 0.0  ;;  %v665_v57 = vsel %vm417_vm1, %v655_v52, 0.0  ;;  %v939_v44 = vld [vmem:[#allocation8 + $0x70] sm:$0xff]  ;;  %v1633_v45 = vpack.c.bf16 %v938_v43, %v937_v42  ;;  %v940_v46 = vld [vmem:[#allocation8 + $0x78] sm:$0xff] }
 0x2bc   : > { %v1637_v47 = vpack.c.bf16 %v940_v46, %v939_v44 }
 0x2bd   : > { %v660_v51 = vadd.f32 %v659_v50, %v658_v48  ;;  %1634 = vmatprep.subr.bf16.mxu1 %v1633_v45  ;;  %v728_v48 = vrot.slane %v2238_v21, %v694_v4 }
 0x2be   : > { %1636 = vmatpush3.bf16.msra.mxu1 %v1633_v45 }
 0x2bf   : > { %v662_v54 = vadd.f32 %v661_v53, %v660_v51  ;;  %1638 = vmatprep.subr.bf16.mxu1 %v1637_v47 }
 0x2c1   : > { %v664_v56 = vadd.f32 %v663_v55, %v662_v54 }
 0x2c2   : > { %1640 = vmatpush3.bf16.msra.mxu1 %v1637_v47 }
 0x2c3   : > { %v666_v58 = vadd.f32 %v665_v57, %v664_v56 }
 0x2c5   : > { %v667_v59 = vrot.slane %v666_v58, 4 }
 0x2c7   : > { %v668_v60 = vadd.f32 %v667_v59, %v666_v58 }
 0x2c9   : > { %v669_v61 = vrot.slane %v668_v60, 2 }
 0x2cb   : > { %v670_v62 = vadd.f32 %v669_v61, %v668_v60 }
 0x2cd   : > { %v671_v63 = vrot.slane %v670_v62, 1 }
 0x2cf   : > { %v672_v0 = vadd.f32 %v671_v63, %v670_v62 }
 0x2d1   : > { %v673_v1 = vmul.f32 0.023809524, %v672_v0 }
 0x2d3   : > { %v674_v2 = vadd.f32 1e-05, %v673_v1 }
 0x2d5   : > { %1740 = vrsqrt.f32 %v674_v2 }
 0x2df   : > { %v1741_v6 = vpop.eup %1740 }
 0x2e0   : > { %v680_v8 = vmul.f32 %v1741_v6, %v648_v40  ;;  %v676_v9 = vmul.f32 %v1741_v6, %v644_v36  ;;  %v677_v10 = vmul.f32 %v1741_v6, %v645_v37  ;;  %v678_v11 = vmul.f32 %v1741_v6, %v646_v38 }
 0x2e1   : > { %v679_v12 = vmul.f32 %v1741_v6, %v647_v39  ;;  %v681_v13 = vmul.f32 %v1741_v6, %v649_v41 }
 0x2e2   : > { %v690_v14 = vmul.f32 %v685_v5, %v680_v8  ;;  %v686_v15 = vmul.f32 %v685_v5, %v676_v9  ;;  %v687_v16 = vmul.f32 %v685_v5, %v677_v10  ;;  %v688_v17 = vmul.f32 %v685_v5, %v678_v11 }
 0x2e3   : > { %v689_v18 = vmul.f32 %v685_v5, %v679_v12  ;;  %v691_v28 = vmul.f32 %v685_v5, %v681_v13 }
 0x2e4   : > { %v696_v22 = vadd.f32 %v695_v7, %v686_v15  ;;  %v697_v23 = vadd.f32 %v695_v7, %v687_v16  ;;  %v698_v24 = vadd.f32 %v695_v7, %v688_v17  ;;  %v700_v27 = vadd.f32 %v695_v7, %v690_v14 }
 0x2e5   : > { %v699_v26 = vadd.f32 %v695_v7, %v689_v18  ;;  %v701_v35 = vadd.f32 %v695_v7, %v691_v28 }
 0x2e6   : > { %vm702_vm8 = vcmp.ge.f32.partialorder %v696_v22, 0.0  ;;  %v708_v29 = vmul.f32 0.01, %v696_v22  ;;  %vm703_vm9 = vcmp.ge.f32.partialorder %v697_v23, 0.0  ;;  %v709_v30 = vmul.f32 0.01, %v697_v23 }
 0x2e7   : > { %vm704_vm10 = vcmp.ge.f32.partialorder %v698_v24, 0.0  ;;  %v710_v31 = vmul.f32 0.01, %v698_v24  ;;  %v711_v34 = vmul.f32 0.01, %v699_v26  ;;  %vm705_vm11 = vcmp.ge.f32.partialorder %v699_v26, 0.0 }
 0x2e8   : > { %v714_v32 = vsel %vm702_vm8, %v696_v22, %v708_v29  ;;  %v715_v33 = vsel %vm703_vm9, %v697_v23, %v709_v30  ;;  %v712_v37 = vmul.f32 0.01, %v700_v27  ;;  %vm706_vm12 = vcmp.ge.f32.partialorder %v700_v27, 0.0 }
 0x2e9   : > { %1566 = vmatprep.mubr.msk.f32.mxu0 %vm294_vm0, %v714_v32  ;;  %v716_v36 = vsel %vm704_vm10, %v698_v24, %v710_v31  ;;  %v717_v38 = vsel %vm705_vm11, %v699_v26, %v711_v34  ;;  %v713_v39 = vmul.f32 0.01, %v701_v35  ;;  %vm707_vm13 = vcmp.ge.f32.partialorder %v701_v35, 0.0 }
 0x2ea   : > { %1567 = vmatmul.mubr.msk.f32.vlgmr.msra.gmra.mrb[4].mxu0 %vm294_vm0, %v715_v33  ;;  %v718_v40 = vsel %vm706_vm12, %v700_v27, %v712_v37 }
 0x2eb   : > { %1569 = vmatprep.mubr.msk.f32.mxu0 %vm294_vm0, %v716_v36  ;;  %v719_v41 = vsel %vm707_vm13, %v701_v35, %v713_v39 }
 0x2ee   : > { %1570 = vmatmul.mubr.msk.f32.gmra.mrb[6].mxu0 %vm294_vm0, %v717_v38 }
 0x2ef   : > { %1572 = vmatprep.mubr.msk.f32.mxu0 %vm294_vm0, %v718_v40 }
 0x2f2   : > { %1573 = vmatmul.mubr.msk.f32.gmra.mrb[8].mxu0 %vm294_vm0, %v719_v41 }
 0x3bd   : > { %v1568_v49 = vpop.f32.mrb[4].mxu0 }
 0x3be   : > { %v819_v50 = vadd.f32 %v1568_v49, %v728_v48  ;;  %v813_v51 = vpop.f32.mrb[5].mxu0 }
 0x3bf   : > { %v814_v52 = vadd.f32 %v813_v51, %v728_v48  ;;  %v910_v51 = vsub.s32 3, %v2235_v19 }
 0x3c0   : > { %v843_v53 = vsel %vm294_vm0, %v819_v50, 0.0 }
 0x3c1   : > { %v842_v54 = vsel %vm294_vm0, %v814_v52, 0.0  ;;  %v1571_v55 = vpop.f32.mrb[6].mxu0 }
 0x3c2   : > { %v844_v56 = vadd.f32 %v843_v53, %v842_v54  ;;  %v829_v57 = vadd.f32 %v1571_v55, %v728_v48  ;;  %v823_v58 = vpop.f32.mrb[7].mxu0  ;;  %v911_v54 = vrot.slane %v2257_v25, %v910_v51 }
 0x3c3   : > { %v824_v59 = vadd.f32 %v823_v58, %v728_v48 }
 0x3c4   : > { %v847_v1 = vsel %vm294_vm0, %v829_v57, 0.0 }
 0x3c5   : > { %v845_v60 = vsel %vm294_vm0, %v824_v59, 0.0  ;;  %v1574_v61 = vpop.f32.mrb[8].mxu0 }
 0x3c6   : > { %v846_v62 = vadd.f32 %v845_v60, %v844_v56  ;;  %v839_v63 = vadd.f32 %v1574_v61, %v728_v48  ;;  %v833_v0 = vpop.f32.mrb[9].mxu0 }
 0x3c7   : > { %v834_v2 = vadd.f32 %v833_v0, %v728_v48 }
 0x3c8   : > { %v848_v3 = vadd.f32 %v847_v1, %v846_v62  ;;  %v851_v6 = vsel %vm417_vm1, %v839_v63, 0.0 }
 0x3c9   : > { %v849_v4 = vsel %vm294_vm0, %v834_v2, 0.0 }
 0x3ca   : > { %v850_v5 = vadd.f32 %v849_v4, %v848_v3 }
 0x3cc   : > { %v852_v7 = vadd.f32 %v851_v6, %v850_v5 }
 0x3ce   : > { %v853_v8 = vrot.slane %v852_v7, 4 }
 0x3d0   : > { %v854_v9 = vadd.f32 %v853_v8, %v852_v7 }
 0x3d2   : > { %v855_v10 = vrot.slane %v854_v9, 2 }
 0x3d4   : > { %v856_v11 = vadd.f32 %v855_v10, %v854_v9 }
 0x3d6   : > { %v857_v12 = vrot.slane %v856_v11, 1 }
 0x3d8   : > { %v858_v13 = vadd.f32 %v857_v12, %v856_v11 }
 0x3da   : > { %v859_v14 = vmul.f32 0.023809524, %v858_v13 }
 0x3dc   : > { %v860_v15 = vsub.f32 %v814_v52, %v859_v14  ;;  %v861_v16 = vsub.f32 %v819_v50, %v859_v14  ;;  %v862_v17 = vsub.f32 %v824_v59, %v859_v14  ;;  %v863_v18 = vsub.f32 %v829_v57, %v859_v14 }
 0x3dd   : > { %v864_v22 = vsub.f32 %v834_v2, %v859_v14  ;;  %v865_v23 = vsub.f32 %v839_v63, %v859_v14  ;;  %v900_v50 = vsub.s32 7, %v2235_v19 }
 0x3de   : > { %v866_v24 = vmul.f32 %v860_v15, %v860_v15  ;;  %v867_v26 = vmul.f32 %v861_v16, %v861_v16  ;;  %v868_v27 = vmul.f32 %v862_v17, %v862_v17  ;;  %v869_v28 = vmul.f32 %v863_v18, %v863_v18 }
 0x3df   : > { %v870_v32 = vmul.f32 %v864_v22, %v864_v22  ;;  %v871_v35 = vmul.f32 %v865_v23, %v865_v23  ;;  %v901_v52 = vrot.slane %v2238_v21, %v900_v50 }
 0x3e0   : > { %v872_v29 = vsel %vm294_vm0, %v866_v24, 0.0  ;;  %v873_v30 = vsel %vm294_vm0, %v867_v26, 0.0  ;;  %v875_v33 = vsel %vm294_vm0, %v868_v27, 0.0  ;;  %v877_v36 = vsel %vm294_vm0, %v869_v28, 0.0  ;;  %v1153_v24 = vld [vmem:[#allocation8 + $0x80] sm:$0xff]  ;;  %v1154_v26 = vld [vmem:[#allocation8 + $0x88] sm:$0xff] }
 0x3e1   : > { %v874_v31 = vadd.f32 %v873_v30, %v872_v29  ;;  %v879_v38 = vsel %vm294_vm0, %v870_v32, 0.0  ;;  %v881_v40 = vsel %vm417_vm1, %v871_v35, 0.0  ;;  %v1155_v27 = vld [vmem:[#allocation8 + $0x90] sm:$0xff]  ;;  %v1641_v28 = vpack.c.bf16 %v1154_v26, %v1153_v24  ;;  %v1156_v29 = vld [vmem:[#allocation8 + $0x98] sm:$0xff] }
 0x3e2   : > { %v1645_v30 = vpack.c.bf16 %v1156_v29, %v1155_v27  ;;  %v944_v32 = vrot.slane %v2238_v21, %v910_v51 }
 0x3e3   : > { %v876_v34 = vadd.f32 %v875_v33, %v874_v31  ;;  %1642 = vmatprep.subr.bf16.mxu0 %v1641_v28  ;;  %v1957_v31 = vmov 0.0  }
 0x3e4   : > { %1644 = vmatpush3.bf16.msra.mxu0 %v1641_v28  ;;  %270 = vst.msk [vmem:[#allocation2 + $0x8] sm:$0xff] %vm268_vm6, %v1957_v31  ;;  %275 = vst.msk [vmem:[#allocation2 + $0x30] sm:$0xff] %vm268_vm6, %v1957_v31 }
 0x3e5   : > { %v878_v37 = vadd.f32 %v877_v36, %v876_v34  ;;  %1646 = vmatprep.subr.bf16.mxu0 %v1645_v30  ;;  %276 = vst.msk [vmem:[#allocation2 + $0x38] sm:$0xff] %vm268_vm6, %v1957_v31  ;;  %277 = vst.msk [vmem:[#allocation2 + $0x40] sm:$0xff] %vm268_vm6, %v1957_v31 }
 0x3e6   : > { %269 = vst.msk [vmem:[#allocation2] sm:$0xff] %vm268_vm6, %v1957_v31  ;;  %271 = vst.msk [vmem:[#allocation2 + $0x10] sm:$0xff] %vm268_vm6, %v1957_v31 }
 0x3e7   : > { %v880_v39 = vadd.f32 %v879_v38, %v878_v37  ;;  %272 = vst.msk [vmem:[#allocation2 + $0x18] sm:$0xff] %vm268_vm6, %v1957_v31  ;;  %273 = vst.msk [vmem:[#allocation2 + $0x20] sm:$0xff] %vm268_vm6, %v1957_v31 }
 0x3e8   : > { %1648 = vmatpush3.bf16.msra.mxu0 %v1645_v30  ;;  %274 = vst.msk [vmem:[#allocation2 + $0x28] sm:$0xff] %vm268_vm6, %v1957_v31 }
 0x3e9   : > { %v882_v41 = vadd.f32 %v881_v40, %v880_v39 }
 0x3eb   : > { %v883_v42 = vrot.slane %v882_v41, 4 }
 0x3ed   : > { %v884_v43 = vadd.f32 %v883_v42, %v882_v41 }
 0x3ef   : > { %v885_v44 = vrot.slane %v884_v43, 2 }
 0x3f1   : > { %v886_v45 = vadd.f32 %v885_v44, %v884_v43 }
 0x3f3   : > { %v887_v46 = vrot.slane %v886_v45, 1 }
 0x3f5   : > { %v888_v47 = vadd.f32 %v887_v46, %v886_v45 }
 0x3f7   : > { %v889_v48 = vmul.f32 0.023809524, %v888_v47 }
 0x3f9   : > { %v890_v49 = vadd.f32 1e-05, %v889_v48 }
 0x3fb   : > { %1742 = vrsqrt.f32 %v890_v49 }
 0x405   : > { %v1743_v53 = vpop.eup %1742 }
 0x406   : > { %v896_v55 = vmul.f32 %v1743_v53, %v864_v22  ;;  %v892_v56 = vmul.f32 %v1743_v53, %v860_v15  ;;  %v893_v57 = vmul.f32 %v1743_v53, %v861_v16  ;;  %v894_v58 = vmul.f32 %v1743_v53, %v862_v17 }
 0x407   : > { %v895_v59 = vmul.f32 %v1743_v53, %v863_v18  ;;  %v897_v60 = vmul.f32 %v1743_v53, %v865_v23 }
 0x408   : > { %v906_v61 = vmul.f32 %v901_v52, %v896_v55  ;;  %v902_v62 = vmul.f32 %v901_v52, %v892_v56  ;;  %v903_v63 = vmul.f32 %v901_v52, %v893_v57  ;;  %v904_v0 = vmul.f32 %v901_v52, %v894_v58 }
 0x409   : > { %v905_v1 = vmul.f32 %v901_v52, %v895_v59  ;;  %v907_v7 = vmul.f32 %v901_v52, %v897_v60 }
 0x40a   : > { %v912_v2 = vadd.f32 %v911_v54, %v902_v62  ;;  %v913_v3 = vadd.f32 %v911_v54, %v903_v63  ;;  %v914_v4 = vadd.f32 %v911_v54, %v904_v0  ;;  %v916_v6 = vadd.f32 %v911_v54, %v906_v61 }
 0x40b   : > { %v915_v5 = vadd.f32 %v911_v54, %v905_v1  ;;  %v917_v14 = vadd.f32 %v911_v54, %v907_v7 }
 0x40c   : > { %vm918_vm14 = vcmp.ge.f32.partialorder %v912_v2, 0.0  ;;  %v924_v8 = vmul.f32 0.01, %v912_v2  ;;  %vm919_vm15 = vcmp.ge.f32.partialorder %v913_v3, 0.0  ;;  %v925_v9 = vmul.f32 0.01, %v913_v3 }
 0x40d   : > { %vm920_vm2 = vcmp.ge.f32.partialorder %v914_v4, 0.0  ;;  %v926_v10 = vmul.f32 0.01, %v914_v4  ;;  %v927_v13 = vmul.f32 0.01, %v915_v5  ;;  %vm921_vm3 = vcmp.ge.f32.partialorder %v915_v5, 0.0 }
 0x40e   : > { %v930_v11 = vsel %vm918_vm14, %v912_v2, %v924_v8  ;;  %v931_v12 = vsel %vm919_vm15, %v913_v3, %v925_v9  ;;  %v928_v16 = vmul.f32 0.01, %v916_v6  ;;  %vm922_vm4 = vcmp.ge.f32.partialorder %v916_v6, 0.0 }
 0x40f   : > { %1583 = vmatprep.mubr.msk.f32.mxu1 %vm294_vm0, %v930_v11  ;;  %v932_v15 = vsel %vm920_vm2, %v914_v4, %v926_v10  ;;  %v933_v17 = vsel %vm921_vm3, %v915_v5, %v927_v13  ;;  %v929_v18 = vmul.f32 0.01, %v917_v14  ;;  %vm923_vm5 = vcmp.ge.f32.partialorder %v917_v14, 0.0 }
 0x410   : > { %1584 = vmatmul.mubr.msk.f32.vlgmr.msra.gmra.mrb[8].mxu1 %vm294_vm0, %v931_v12  ;;  %v934_v22 = vsel %vm922_vm4, %v916_v6, %v928_v16 }
 0x411   : > { %1586 = vmatprep.mubr.msk.f32.mxu1 %vm294_vm0, %v932_v15  ;;  %v935_v23 = vsel %vm923_vm5, %v917_v14, %v929_v18 }
 0x414   : > { %1587 = vmatmul.mubr.msk.f32.gmra.mrb[10].mxu1 %vm294_vm0, %v933_v17 }
 0x415   : > { %1589 = vmatprep.mubr.msk.f32.mxu1 %vm294_vm0, %v934_v22 }
 0x418   : > { %1590 = vmatmul.mubr.msk.f32.gmra.mrb[12].mxu1 %vm294_vm0, %v935_v23 }
 0x4e3   : > { %v1585_v33 = vpop.f32.mrb[8].mxu1 }
 0x4e4   : > { %v1035_v34 = vadd.f32 %v1585_v33, %v944_v32  ;;  %v1029_v35 = vpop.f32.mrb[9].mxu1 }
 0x4e5   : > { %v1030_v36 = vadd.f32 %v1029_v35, %v944_v32  ;;  %v1117_v35 = vrot.slane %v2257_v25, %v292_v20 }
 0x4e6   : > { %v1059_v37 = vsel %vm294_vm0, %v1035_v34, 0.0 }
 0x4e7   : > { %v1058_v38 = vsel %vm294_vm0, %v1030_v36, 0.0  ;;  %v1588_v39 = vpop.f32.mrb[10].mxu1 }
 0x4e8   : > { %v1060_v40 = vadd.f32 %v1059_v37, %v1058_v38  ;;  %v1045_v41 = vadd.f32 %v1588_v39, %v944_v32  ;;  %v1039_v42 = vpop.f32.mrb[11].mxu1 }
 0x4e9   : > { %v1040_v43 = vadd.f32 %v1039_v42, %v944_v32 }
 0x4ea   : > { %v1063_v49 = vsel %vm294_vm0, %v1045_v41, 0.0 }
 0x4eb   : > { %v1061_v44 = vsel %vm294_vm0, %v1040_v43, 0.0  ;;  %v1591_v45 = vpop.f32.mrb[12].mxu1 }
 0x4ec   : > { %v1062_v46 = vadd.f32 %v1061_v44, %v1060_v40  ;;  %v1055_v47 = vadd.f32 %v1591_v45, %v944_v32  ;;  %v1049_v48 = vpop.f32.mrb[13].mxu1 }
 0x4ed   : > { %v1050_v50 = vadd.f32 %v1049_v48, %v944_v32 }
 0x4ee   : > { %v1064_v51 = vadd.f32 %v1063_v49, %v1062_v46  ;;  %v1067_v54 = vsel %vm417_vm1, %v1055_v47, 0.0 }
 0x4ef   : > { %v1065_v52 = vsel %vm294_vm0, %v1050_v50, 0.0 }
 0x4f0   : > { %v1066_v53 = vadd.f32 %v1065_v52, %v1064_v51 }
 0x4f2   : > { %v1068_v55 = vadd.f32 %v1067_v54, %v1066_v53 }
 0x4f4   : > { %v1069_v56 = vrot.slane %v1068_v55, 4 }
 0x4f6   : > { %v1070_v57 = vadd.f32 %v1069_v56, %v1068_v55 }
 0x4f8   : > { %v1071_v58 = vrot.slane %v1070_v57, 2 }
 0x4fa   : > { %v1072_v59 = vadd.f32 %v1071_v58, %v1070_v57 }
 0x4fc   : > { %v1073_v60 = vrot.slane %v1072_v59, 1 }
 0x4fe   : > { %v1074_v61 = vadd.f32 %v1073_v60, %v1072_v59 }
 0x500   : > { %v1075_v62 = vmul.f32 0.023809524, %v1074_v61 }
 0x502   : > { %v1076_v63 = vsub.f32 %v1030_v36, %v1075_v62  ;;  %v1077_v0 = vsub.f32 %v1035_v34, %v1075_v62  ;;  %v1078_v1 = vsub.f32 %v1040_v43, %v1075_v62  ;;  %v1079_v2 = vsub.f32 %v1045_v41, %v1075_v62 }
 0x503   : > { %v1080_v3 = vsub.f32 %v1050_v50, %v1075_v62  ;;  %v1081_v4 = vsub.f32 %v1055_v47, %v1075_v62  ;;  %v1126_v34 = vsub.s32 4, %v2235_v19 }
 0x504   : > { %v1082_v5 = vmul.f32 %v1076_v63, %v1076_v63  ;;  %v1083_v6 = vmul.f32 %v1077_v0, %v1077_v0  ;;  %v1084_v7 = vmul.f32 %v1078_v1, %v1078_v1  ;;  %v1085_v8 = vmul.f32 %v1079_v2, %v1079_v2 }
 0x505   : > { %v1086_v12 = vmul.f32 %v1080_v3, %v1080_v3  ;;  %v1087_v15 = vmul.f32 %v1081_v4, %v1081_v4  ;;  %v1127_v37 = vrot.slane %v2257_v25, %v1126_v34 }
 0x506   : > { %v1088_v9 = vsel %vm294_vm0, %v1082_v5, 0.0  ;;  %v1089_v10 = vsel %vm294_vm0, %v1083_v6, 0.0  ;;  %v1091_v13 = vsel %vm294_vm0, %v1084_v7, 0.0  ;;  %v1093_v16 = vsel %vm294_vm0, %v1085_v8, 0.0 }
 0x507   : > { %v1090_v11 = vadd.f32 %v1089_v10, %v1088_v9  ;;  %v1095_v18 = vsel %vm294_vm0, %v1086_v12, 0.0  ;;  %v1097_v23 = vsel %vm417_vm1, %v1087_v15, 0.0 }
 0x509   : > { %v1092_v14 = vadd.f32 %v1091_v13, %v1090_v11 }
 0x50b   : > { %v1094_v17 = vadd.f32 %v1093_v16, %v1092_v14 }
 0x50d   : > { %v1096_v22 = vadd.f32 %v1095_v18, %v1094_v17 }
 0x50f   : > { %v1098_v24 = vadd.f32 %v1097_v23, %v1096_v22 }
 0x511   : > { %v1099_v26 = vrot.slane %v1098_v24, 4 }
 0x513   : > { %v1100_v27 = vadd.f32 %v1099_v26, %v1098_v24 }
 0x515   : > { %v1101_v28 = vrot.slane %v1100_v27, 2 }
 0x517   : > { %v1102_v29 = vadd.f32 %v1101_v28, %v1100_v27 }
 0x519   : > { %v1103_v30 = vrot.slane %v1102_v29, 1 }
 0x51b   : > { %v1104_v31 = vadd.f32 %v1103_v30, %v1102_v29 }
 0x51d   : > { %v1105_v32 = vmul.f32 0.023809524, %v1104_v31 }
 0x51f   : > { %v1106_v33 = vadd.f32 1e-05, %v1105_v32 }
 0x521   : > { %1744 = vrsqrt.f32 %v1106_v33 }
 0x52b   : > { %v1745_v36 = vpop.eup %1744 }
 0x52c   : > { %v1112_v38 = vmul.f32 %v1745_v36, %v1080_v3  ;;  %v1108_v39 = vmul.f32 %v1745_v36, %v1076_v63  ;;  %v1109_v40 = vmul.f32 %v1745_v36, %v1077_v0  ;;  %v1110_v41 = vmul.f32 %v1745_v36, %v1078_v1 }
 0x52d   : > { %v1111_v42 = vmul.f32 %v1745_v36, %v1079_v2  ;;  %v1113_v43 = vmul.f32 %v1745_v36, %v1081_v4  ;;  %v1160_v1 = vrot.slane %v2238_v21, %v1126_v34 }
 0x52e   : > { %v1122_v44 = vmul.f32 %v1117_v35, %v1112_v38  ;;  %v1118_v45 = vmul.f32 %v1117_v35, %v1108_v39  ;;  %v1119_v46 = vmul.f32 %v1117_v35, %v1109_v40  ;;  %v1120_v47 = vmul.f32 %v1117_v35, %v1110_v41 }
 0x52f   : > { %v1121_v48 = vmul.f32 %v1117_v35, %v1111_v42  ;;  %v1123_v20 = vmul.f32 %v1117_v35, %v1113_v43 }
 0x530   : > { %v1128_v49 = vadd.f32 %v1127_v37, %v1118_v45  ;;  %v1129_v50 = vadd.f32 %v1127_v37, %v1119_v46  ;;  %v1130_v51 = vadd.f32 %v1127_v37, %v1120_v47  ;;  %v1132_v52 = vadd.f32 %v1127_v37, %v1122_v44 }
 0x531   : > { %v1131_v19 = vadd.f32 %v1127_v37, %v1121_v48  ;;  %v1133_v58 = vadd.f32 %v1127_v37, %v1123_v20 }
 0x532   : > { %vm1134_vm1 = vcmp.ge.f32.partialorder %v1128_v49, 0.0  ;;  %v1140_v53 = vmul.f32 0.01, %v1128_v49  ;;  %vm1135_vm7 = vcmp.ge.f32.partialorder %v1129_v50, 0.0  ;;  %v1141_v25 = vmul.f32 0.01, %v1129_v50 }
 0x533   : > { %vm1136_vm8 = vcmp.ge.f32.partialorder %v1130_v51, 0.0  ;;  %v1142_v54 = vmul.f32 0.01, %v1130_v51  ;;  %v1143_v57 = vmul.f32 0.01, %v1131_v19  ;;  %vm1137_vm9 = vcmp.ge.f32.partialorder %v1131_v19, 0.0 }
 0x534   : > { %v1146_v55 = vsel %vm1134_vm1, %v1128_v49, %v1140_v53  ;;  %v1147_v56 = vsel %vm1135_vm7, %v1129_v50, %v1141_v25  ;;  %v1144_v60 = vmul.f32 0.01, %v1132_v52  ;;  %vm1138_vm10 = vcmp.ge.f32.partialorder %v1132_v52, 0.0 }
 0x535   : > { %1600 = vmatprep.mubr.msk.f32.mxu0 %vm294_vm0, %v1146_v55  ;;  %v1148_v59 = vsel %vm1136_vm8, %v1130_v51, %v1142_v54  ;;  %v1149_v61 = vsel %vm1137_vm9, %v1131_v19, %v1143_v57  ;;  %v1145_v62 = vmul.f32 0.01, %v1133_v58  ;;  %vm1139_vm11 = vcmp.ge.f32.partialorder %v1133_v58, 0.0 }
 0x536   : > { %1601 = vmatmul.mubr.msk.f32.vlgmr.msra.gmra.mrb[10].mxu0 %vm294_vm0, %v1147_v56  ;;  %v1150_v63 = vsel %vm1138_vm10, %v1132_v52, %v1144_v60 }
 0x537   : > { %1603 = vmatprep.mubr.msk.f32.mxu0 %vm294_vm0, %v1148_v59  ;;  %v1151_v0 = vsel %vm1139_vm11, %v1133_v58, %v1145_v62 }
 0x53a   : > { %1604 = vmatmul.mubr.msk.f32.gmra.mrb[12].mxu0 %vm294_vm0, %v1149_v61 }
 0x53b   : > { %1606 = vmatprep.mubr.msk.f32.mxu0 %vm294_vm0, %v1150_v63 }
 0x53e   : > { %1607 = vmatmul.mubr.msk.f32.gmra.mrb[14].mxu0 %vm294_vm0, %v1151_v0  ;;  %vm1279_vm0 = vcmask 1024  }
 0x609   : > { %v1602_v2 = vpop.f32.mrb[10].mxu0 }
 0x60a   : > { %v1251_v3 = vadd.f32 %v1602_v2, %v1160_v1  ;;  %v1245_v4 = vpop.f32.mrb[11].mxu0 }
 0x60b   : > { %v1246_v5 = vadd.f32 %v1245_v4, %v1160_v1 }
 0x60c   : > { %1275 = vst.msk [vmem:[#allocation2 + $0x8] sm:$0xff] %vm268_vm6, %v1251_v3 }
 0x60d   : > { %1274 = vst.msk [vmem:[#allocation2] sm:$0xff] %vm268_vm6, %v1246_v5  ;;  %v1605_v6 = vpop.f32.mrb[12].mxu0 }
 0x60e   : > { %v1261_v7 = vadd.f32 %v1605_v6, %v1160_v1  ;;  %v1255_v8 = vpop.f32.mrb[13].mxu0 }
 0x60f   : > { %v1256_v9 = vadd.f32 %v1255_v8, %v1160_v1 }
 0x610   : > { %1277 = vst.msk [vmem:[#allocation2 + $0x18] sm:$0xff] %vm268_vm6, %v1261_v7 }
 0x611   : > { %1276 = vst.msk [vmem:[#allocation2 + $0x10] sm:$0xff] %vm268_vm6, %v1256_v9  ;;  %v1608_v10 = vpop.f32.mrb[14].mxu0 }
 0x612   : > { %v1271_v11 = vadd.f32 %v1608_v10, %v1160_v1  ;;  %v1265_v21 = vpop.f32.mrb[15].mxu0 }
 0x613   : > { %v1266_v12 = vadd.f32 %v1265_v21, %v1160_v1 }
 0x614   : > { %1280 = vst.msk [vmem:[#allocation2 + $0x28] sm:$0x3] %vm1279_vm0, %v1271_v11 }
 0x615   : > { %1278 = vst.msk [vmem:[#allocation2 + $0x20] sm:$0xff] %vm268_vm6, %v1266_v12 }
 0x616 PF: > { %s1281_s8 = sld [smem:[#allocation4 + %s2023_s0]]  ;;  %v1958_v13 = vmov 0   ;;  %v1286_v18 = vld [vmem:[%s2220_s7] sm:$0xff]  ;;  %v1287_v22 = vld [vmem:[%s2220_s7 + $0x8] sm:$0xff]  ;;  %v1288_v23 = vld [vmem:[%s2220_s7 + $0x10] sm:$0xff]  ;;  %s1471_s15 = sshll.u32 %s2023_s0, 4 }
 0x617   : > { %1746 = vset.pattern.permute.xlu0 %v1958_v13  ;;  %1747 = vset.pattern.permute.xlu1 %v1958_v13  ;;  %s1331_s24 = sshll.u32 %s263_s20, 4  ;;  %s2366_s18 = scalar_lea.hbm %s2417_s5, %s1471_s15  ;;  %s2368_s24 = int_to_ptr.vmem [resolvable:$true] %s1331_s24 }
 0x618   : > { %s1319_s19 = scalar_lea.sflag [#allocation7], %s2216_s16  ;;  %s1872_s11 = scalar_lea.vmem %s2368_s24, 16 }
 0x619   : > { %p1873_p13 = scmp.ne.s32.totalorder %s2368_s24, %s1872_s11  ;;  %s1959_s0 = smov [#allocation13]  }
 0x61a   : > { %s1876_s17 = sshll.u32 %s1959_s0, 4  ;;  %s1877_s17 = int_to_ptr.vmem [resolvable:$false] %s1876_s17 }
 0x61b   : > { %p1874_p10 = pnand %p1873_p13, %p2157_p8  ;;  %s1878_s21 = scalar_lea.vmem %s1877_s17, 32 }
 0x61c   : > { %s1282_s22 = scalar_lea.vmem [#allocation2], %s1281_s8  ;;  %p1879_p4 = scmp.lt.s32.totalorder %s2368_s24, %s1877_s17 }
 0x61d   : > { %v1283_v14 = vld [vmem:[%s1282_s22] sm:$0xff]  ;;  %v1285_v15 = vld [vmem:[%s1282_s22 + $0x10] sm:$0xff]  ;;  %v1284_v16 = vld [vmem:[%s1282_s22 + $0x8] sm:$0xff]  ;;  %p1875_p2 = pneg %p1874_p10  ;;  %p1880_p5 = scmp.lt.s32.totalorder %s1878_s21, %s1872_s11 }
 0x61e   : > { %1291 = vperm.xlu0 %1746, %v1283_v14   ;;  %1301 = vperm.xlu1 %1747, %v1285_v15  }
 0x61f   : > { %p1881_p7 = por %p1880_p5, %p1879_p4 }
 0x621   : > { %p1882_p0 = pnand %p1881_p7, %p1875_p2 }
 0x622   : > { %1296 = vperm.xlu0 %1746, %v1284_v16  }
 0x69d   : > { %v1292_v17 = vpop.permute.xlu0 %1291  ;;  %v1302_v24 = vpop.permute.xlu1 %1301 }
 0x69e   : > { %v1304_v27 = vmul.f32 %v1292_v17, %v1286_v18  ;;  %v1306_v29 = vmul.f32 %v1302_v24, %v1288_v23 }
 0x6a1   : > { %v1297_v26 = vpop.permute.xlu0 %1296 }
 0x6a2   : > { %v1305_v28 = vmul.f32 %v1297_v26, %v1287_v22 }
 0x6a4   : > { %v1307_v30 = vadd.f32 %v1305_v28, %v1304_v27 }
 0x6a6   : > { %v1308_v31 = vadd.f32 %v1307_v30, %v1306_v29 }
 0x6a8   : > { %v1309_v32 = vrot.slane %v1308_v31, 4 }
 0x6aa   : > { %v1310_v33 = vadd.f32 %v1309_v32, %v1308_v31 }
 0x6ac   : > { %v1311_v34 = vrot.slane %v1310_v33, 2 }
 0x6ae   : > { %v1312_v35 = vadd.f32 %v1311_v34, %v1310_v33 }
 0x6b0   : > { %v1313_v36 = vrot.slane %v1312_v35, 1 }
 0x6b2   : > { %v1314_v37 = vadd.f32 %v1313_v36, %v1312_v35 }
 0x6b4   : > { %v1315_v38 = vmul.f32 %v1314_v37, %v1314_v37 }
 0x6b6   : > { %v1316_v39 = vadd.f32 0.01, %v1315_v38 }
 0x6b8   : > { %1317 = vst [vmem:[%s263_s20] sm:$0x1] %v1316_v39 }
 0x6b9   : > { %1885 = shalt.err (!%p1882_p0)
}
 0x6ba   : > { %s1886_s13 = scalar_lea.hbm %s2366_s18, 16  ;;  %s1890_s27 = scalar_lea.hbm %s2417_s5, 32 }
 0x6bb   : > { %p1887_p6 = scmp.ne.s32.totalorder %s2366_s18, %s1886_s13  ;;  %p1891_p9 = scmp.lt.u32.totalorder %s2366_s18, %s2417_s5 }
 0x6bc   : > { %p1892_p1 = scmp.lt.u32.totalorder %s1890_s27, %s1886_s13  ;;  %p1894_p13 = scmp.lt.u32.totalorder %s1886_s13, %s2366_s18 }
 0x6bd   : > { %p1888_p12 = pnand %p1887_p6, %p2157_p8 }
 0x6be   : > { %p1893_p11 = por %p1892_p1, %p1891_p9 }
 0x6bf   : > { %p1889_p3 = pneg %p1888_p12 }
 0x6c0   : > { %p1895_p10 = por %p1894_p13, %p1893_p11 }
 0x6c2   : > { %p1896_p2 = pnand %p1895_p10, %p1889_p3 }
 0x6c4   : > { %1899 = shalt.err (!%p1896_p2)
}
 0x6c5   : > { %1670 = dma.vmem_to_hbm [thread:$0]  (%p2157_p8), %s2368_s24, 16, %s2366_s18, %s1319_s19  }
 0x6c6 PF: > { %s1343_s8 = sand.u32 1, %s1936_s28   ;;  %p2436_p4 = scmp.ne.s32.totalorder %s2422_s9, 0 }
 0x6c7   : > { %p2437_p5 = scmp.ge.s32.totalorder %s1948_s6, 2  ;;  %s1344_s22 = scalar_lea.sflag [#allocation7], %s1343_s8 }
 0x6c9   : > { %p1687_p7 = pnand %p2437_p5, %p2436_p4 }
 0x6cb   : > { %1931 = dma.done.wait (!%p1687_p7), %s1344_s22, 16  }
 0x6cc   : > { %1933 = vsyncadd (!%p1687_p7), %s1344_s22, 4294967280  ;;  %p24_p0 = scmp.ge.s32.totalorder %s2143_s23, 4   ;;  %s2438_s28 = smov %s1940_s29 }
 0x6cd   : > { %s2439_s29 = smov %s1944_s30  ;;  %s2440_s30 = smov %s2153_s25 }
 0x6ce   : > { %s2441_s6 = smov %s2143_s23  ;;  %26 = sbr.rel (!%p24_p0) target bundleno = 19 (0x13), region = 103 }
 0x6d5   :  { %1348 = vsyncpa [#allocation6], 1 }
 0x6d6   :  { %1350 = vsyncpa [#allocation6 + $0x1], 1 }
 0x6d7   :  { %1351 = vsyncpa [#allocation9], 1 }
 0x6d8   :  { %1352 = vsyncpa [#allocation12], 1 }
 0x6d9   :  { %1354 = vsyncpa [#allocation12 + $0x1], 1 }
 0x6da   :  { %1355 = vsyncpa [#allocation7], 1 }
 0x6db   :  { %1357 = vsyncpa [#allocation7 + $0x1], 1 }

// kernel: forward.4
= control target key start
LH: loop header
LB: loop body
LE: loop exit
PB: predicated region body
PF: predicated region fallthrough
CT: control target
= control target key end

     0   :  { %s3372_s0 = inlined_call_operand.hbm [shape: s32[2], index: 0, kind: input, shape index: {}]   ;;  %s3373_s1 = inlined_call_operand.hbm [shape: f32[76,32], index: 1, kind: input, shape index: {}]   ;;  %s3374_s2 = inlined_call_operand.hbm [shape: f32[5,32,32], index: 2, kind: input, shape index: {}]   ;;  %s3375_s3 = inlined_call_operand.hbm [shape: f32[16,32], index: 3, kind: input, shape index: {}]   ;;  %s3376_s4 = inlined_call_operand.hbm [shape: f32[2,48,128], index: 4, kind: input, shape index: {}]   ;;  %s3377_s5 = inlined_call_operand.hbm [shape: f32[2,128,128], index: 5, kind: output, shape index: {}]  }
   0x1   :  { %s2570_s20 = scalar_lea.hbm %s3372_s0, 16 }
   0x2   :  { %p2571_p0 = scmp.ne.s32.totalorder %s3372_s0, %s2570_s20  ;;  %p2574_p1 = scmp.lt.u32.totalorder %s2570_s20, %s3372_s0 }
   0x4   :  { %p2576_p2 = pnand %p2574_p1, %p2571_p0 }
   0x6   :  { %2579 = shalt.err (!%p2576_p2)  }
   0x7   :  { %s2772_s25 = smov [#allocation4]  }
   0x8   :  { %11 = dma.hbm_to_smem %s3372_s0, 16, %s2772_s25, [#allocation3] }
   0x9   :  { %2738 = dma.done.wait [#allocation3], 16 }
   0xa   :  { %2739 = vsyncadd [#allocation3], 4294967280 }
   0xb   :  { %13 = sfence }
   0xc   :  { %14 = vsyncpa [#allocation6], 0 }
   0xd   :  { %15 = vsyncpa [#allocation9], 0 }
   0xe   :  { %16 = vsyncpa [#allocation12], 0 }
   0xf   :  { %18 = vsyncpa [#allocation12 + $0x1], 0 }
  0x10   :  { %19 = vsyncpa [#allocation7], 0 }
  0x11   :  { %21 = vsyncpa [#allocation7 + $0x1], 0  ;;  %s2826_s28 = smov 0   ;;  %s2828_s29 = smov 0  }
  0x12   :  { %s2830_s30 = smov 0   ;;  %s2832_s6 = smov 0  }
  0x13 LB: > { %s2847_s0 = sadd.s32 4294967295, %s2770_s6   ;;  %s2080_s7 = sadd.s32 4294967294, %s2770_s6   ;;  %s2770_s6 = sphi %s2832_s6, %s3401_s6   ;;  %s2766_s30 = sphi %s2830_s30, %s3400_s30   ;;  %s2762_s29 = sphi %s2828_s29, %s3399_s29   ;;  %s2758_s28 = sphi %s2826_s28, %s3398_s28  }
  0x14   : > { %p110_p3 = scmp.ne.s32.totalorder %s2762_s29, %s2758_s28  ;;  %p3378_p4 = scmp.eq.s32.totalorder %s2847_s0, 0 }
  0x15   : > { %p140_p6 = scmp.eq.s32.totalorder %s2080_s7, 1  ;;  %p2081_p8 = scmp.ge.s32.totalorder %s2770_s6, 1 }
  0x16   : > { %p2856_p7 = por %p3378_p4, %p110_p3  ;;  %p147_p10 = scmp.lt.s32.totalorder %s2770_s6, 3 }
  0x17   : > { %p2861_p9 = por %p140_p6, %p110_p3  ;;  %s2773_s11 = smov [#allocation8]  }
  0x18   : > { %s3381_s8 = scalar_select %p2856_p7, 1, 0 }
  0x19   : > { %s3382_s9 = scalar_select %p2861_p9, 1, 0 }
  0x1a   : > { %p2867_p12 = pnand %p2081_p8, %p147_p10  ;;  %s172_s12 = sshll.u32 %s2773_s11, 4  ;;  %s2874_s12 = int_to_ptr.vmem [resolvable:$true] %s172_s12 }
  0x1b   : > { %s2774_s14 = smov [#allocation5]   ;;  %s2775_s16 = smov [#allocation10]  }
  0x1c   : > { %s3383_s10 = scalar_select %p2867_p12, 1, 0 }
  0x1d   : > { %p2489_p0 = pneg %p2867_p12  ;;  %s159_s15 = sshll.u32 %s2774_s14, 4  ;;  %s2882_s15 = int_to_ptr.vmem [resolvable:$true] %s159_s15 }
  0x1e   : > { %s2884_s17 = sshll.u32 %s2775_s16, 4  ;;  %s2580_s20 = scalar_lea.hbm %s3374_s2, 2560  ;;  %s186_s17 = int_to_ptr.vmem [resolvable:$true] %s2884_s17 }
  0x1f   : > { %p2878_p1 = pnand %p2489_p0, %p3378_p4  ;;  %p2581_p2 = scmp.ne.s32.totalorder %s3374_s2, %s2580_s20 }
  0x20   : > { %p2587_p10 = scmp.lt.u32.totalorder %s2580_s20, %s3374_s2 }
  0x21   : > { %p2894_p3 = pneg %p2878_p1 }
  0x23   : > { %p2583_p6 = pnand %p2894_p3, %p2581_p2 }
  0x25   : > { %p2584_p8 = pneg %p2583_p6 }
  0x27   : > { %p2589_p0 = pnand %p2587_p10, %p2584_p8 }
  0x29   : > { %2592 = shalt.err (!%p2589_p0)
}
  0x2a   : > { %s2593_s26 = scalar_lea.vmem %s2874_s12, 2560  ;;  %p2601_p5 = scmp.lt.s32.totalorder %s2874_s12, %s2874_s12 }
  0x2b   : > { %p2594_p13 = scmp.ne.s32.totalorder %s2874_s12, %s2593_s26  ;;  %p2602_p9 = scmp.lt.s32.totalorder %s2593_s26, %s2593_s26 }
  0x2d   : > { %p2596_p11 = pnand %p2594_p13, %p2894_p3  ;;  %p2603_p2 = por %p2602_p9, %p2601_p5 }
  0x2f   : > { %p2597_p4 = pneg %p2596_p11 }
  0x31   : > { %p2604_p6 = pnand %p2603_p2, %p2597_p4 }
  0x33   : > { %2607 = shalt.err (!%p2604_p6)
}
  0x34   : > { %s2776_s27 = smov 128   ;;  %s2777_s7 = smov 8  }
  0x35   : > { %2495 = dma.hbm_to_vmem [thread:$0]  (!%p2878_p1), %s3374_s2, 2560, %s2874_s12, [#allocation9], %s2776_s27, %s2776_s27, %s2777_s7  }
  0x36   : > { %s2608_s19 = scalar_lea.hbm %s3373_s1, 1280 }
  0x37   : > { %p2609_p4 = scmp.ne.s32.totalorder %s3373_s1, %s2608_s19  ;;  %p2615_p11 = scmp.lt.u32.totalorder %s2608_s19, %s3373_s1 }
  0x39   : > { %p2611_p5 = pnand %p2609_p4, %p2894_p3 }
  0x3b   : > { %p2612_p9 = pneg %p2611_p5 }
  0x3d   : > { %p2617_p13 = pnand %p2615_p11, %p2612_p9 }
  0x3f   : > { %2620 = shalt.err (!%p2617_p13)
}
  0x40   : > { %s2621_s12 = scalar_lea.vmem %s2882_s15, 1280  ;;  %p2629_p2 = scmp.lt.s32.totalorder %s2882_s15, %s2882_s15 }
  0x41   : > { %p2622_p8 = scmp.ne.s32.totalorder %s2882_s15, %s2621_s12  ;;  %p2630_p6 = scmp.lt.s32.totalorder %s2621_s12, %s2621_s12 }
  0x43   : > { %p2624_p10 = pnand %p2622_p8, %p2894_p3  ;;  %p2631_p4 = por %p2630_p6, %p2629_p2 }
  0x45   : > { %p2625_p0 = pneg %p2624_p10 }
  0x47   : > { %p2632_p5 = pnand %p2631_p4, %p2625_p0 }
  0x49   : > { %2635 = shalt.err (!%p2632_p5)
}
  0x4a   : > { %2492 = dma.hbm_to_vmem [thread:$0]  (!%p2878_p1), %s3373_s1, 1280, %s2882_s15, [#allocation6], %s2776_s27, %s2776_s27, %s2777_s7  }
  0x4b   : > { %s2636_s16 = scalar_lea.hbm %s3375_s3, 256 }
  0x4c   : > { %p2637_p9 = scmp.ne.s32.totalorder %s3375_s3, %s2636_s16  ;;  %p2643_p8 = scmp.lt.u32.totalorder %s2636_s16, %s3375_s3 }
  0x4e   : > { %p2639_p11 = pnand %p2637_p9, %p2894_p3 }
  0x50   : > { %p2640_p13 = pneg %p2639_p11 }
  0x52   : > { %p2645_p10 = pnand %p2643_p8, %p2640_p13 }
  0x54   : > { %2648 = shalt.err (!%p2645_p10)
}
  0x55   : > { %s2649_s22 = scalar_lea.vmem %s186_s17, 256  ;;  %p2657_p4 = scmp.lt.s32.totalorder %s186_s17, %s186_s17 }
  0x56   : > { %p2650_p0 = scmp.ne.s32.totalorder %s186_s17, %s2649_s22  ;;  %p2658_p5 = scmp.lt.s32.totalorder %s2649_s22, %s2649_s22 }
  0x58   : > { %p2652_p2 = pnand %p2650_p0, %p2894_p3  ;;  %p2659_p7 = por %p2658_p5, %p2657_p4 }
  0x5a   : > { %p2653_p6 = pneg %p2652_p2 }
  0x5c   : > { %p2660_p12 = pnand %p2659_p7, %p2653_p6 }
  0x5e   : > { %2663 = shalt.err (!%p2660_p12)
}
  0x5f   : > { %2498 = dma.hbm_to_vmem [thread:$0]  (!%p2878_p1), %s3375_s3, 256, %s186_s17, [#allocation9], %s2776_s27, %s2776_s27, %s2777_s7  }
  0x60   : > { %s2967_s23 = sadd.s32 1, %s2770_s6   ;;  %s97_s12 = sadd.s32 1, %s2766_s30 }
  0x61   : > { %s94_s13 = ssub.s32 %s2770_s6, %s2967_s23  ;;  %p104_p12 = scmp.ne.s32.totalorder %s2766_s30, %s2762_s29 }
  0x62   : > { %p95_p7 = scmp.eq.s32.totalorder %s94_s13, 0  ;;  %p105_p3 = scmp.eq.s32.totalorder %s2770_s6, 0 }
  0x63   : > { %p2510_p9 = scmp.lt.s32.totalorder %s2770_s6, 2  ;;  %p3386_p13 = scmp.eq.s32.totalorder %s2847_s0, 1 }
  0x64   : > { %s2977_s25 = scalar_select %p95_p7, %s2766_s30, %s97_s12  }
  0x65   : > { %p106_p11 = por %p105_p3, %p104_p12  ;;  %p2981_p8 = por %p3386_p13, %p104_p12 }
  0x66   : > { %s199_s11 = sand.u32 1, %s2766_s30   ;;  %s2471_s14 = smul.u32 768, %s2770_s6 }
  0x67   : > { %s2470_s17 = smul.u32 48, %s199_s11  ;;  %p2987_p1 = pnand %p2510_p9, %p106_p11 }
  0x68   : > { %s2994_s20 = scalar_lea.hbm %s3376_s4, %s2471_s14  ;;  %s2998_s15 = scalar_lea.sflag [#allocation12], %s199_s11 }
  0x69   : > { %s203_s21 = scalar_lea.vmem [#allocation11], %s2470_s17  ;;  %s2664_s24 = scalar_lea.hbm %s2994_s20, 768 }
  0x6a   : > { %s210_s22 = sshll.u32 %s203_s21, 4  ;;  %p2665_p10 = scmp.ne.s32.totalorder %s2994_s20, %s2664_s24  ;;  %s2996_s22 = int_to_ptr.vmem [resolvable:$true] %s210_s22 }
  0x6b   : > { %p2666_p0 = pneg %p2987_p1  ;;  %s2669_s14 = scalar_lea.hbm %s3376_s4, 1536 }
  0x6c   : > { %p2670_p4 = scmp.lt.u32.totalorder %s2994_s20, %s3376_s4  ;;  %p2671_p5 = scmp.lt.u32.totalorder %s2669_s14, %s2664_s24 }
  0x6d   : > { %p2667_p2 = pnand %p2666_p0, %p2665_p10  ;;  %p2673_p12 = scmp.lt.u32.totalorder %s2664_s24, %s2994_s20 }
  0x6e   : > { %p2672_p7 = por %p2671_p5, %p2670_p4 }
  0x6f   : > { %p2668_p6 = pneg %p2667_p2 }
  0x70   : > { %p2674_p3 = por %p2673_p12, %p2672_p7 }
  0x72   : > { %p2675_p9 = pnand %p2674_p3, %p2668_p6 }
  0x74   : > { %2678 = shalt.err (!%p2675_p9)
}
  0x75   : > { %s2679_s11 = scalar_lea.vmem %s2996_s22, 768  ;;  %s2778_s17 = smov [#allocation11]  }
  0x76   : > { %p2680_p11 = scmp.ne.s32.totalorder %s2996_s22, %s2679_s11  ;;  %s2684_s21 = sshll.u32 %s2778_s17, 4  ;;  %s2685_s21 = int_to_ptr.vmem [resolvable:$false] %s2684_s21 }
  0x77   : > { %s2686_s13 = scalar_lea.vmem %s2685_s21, 1536  ;;  %p2687_p2 = scmp.lt.s32.totalorder %s2996_s22, %s2685_s21 }
  0x78   : > { %p2682_p13 = pnand %p2680_p11, %p2666_p0  ;;  %p2688_p4 = scmp.lt.s32.totalorder %s2686_s13, %s2679_s11 }
  0x7a   : > { %p2683_p10 = pneg %p2682_p13  ;;  %p2689_p5 = por %p2688_p4, %p2687_p2 }
  0x7c   : > { %p2690_p7 = pnand %p2689_p5, %p2683_p10 }
  0x7e   : > { %2693 = shalt.err (!%p2690_p7)
}
  0x7f   : > { %2502 = dma.hbm_to_vmem [thread:$0]  (!%p2987_p1), %s2994_s20, 768, %s2996_s22, %s2998_s15, %s2776_s27, %s2776_s27, %s2777_s7  }
  0x80   : > { %p3389_p0 = scmp.ne.s32.totalorder %s3383_s10, 0 }
  0x81   : > { %p3390_p6 = scmp.eq.s32.totalorder (!%p3389_p0), %s2847_s0, 0 }
  0x82   : > { %222 = sbr.rel (%p3389_p0) target bundleno = 2097 (0x831), region = 36 }
  0x89   : > { %2741 = dma.done.wait (%p3390_p6), [#allocation6], 1280   ;;  %p3391_p12 = pmov %p3390_p6 }
  0x8a   : > { %p3392_p3 = pmov %p3390_p6 }
  0x8b   : > { %2743 = vsyncadd (%p3391_p12), [#allocation6], 4294966016 }
  0x8c   : > { %2745 = dma.done.wait (%p3392_p3), [#allocation9], 2816   ;;  %p3393_p9 = pmov %p3392_p3 }
  0x8d   : > { %s3040_s16 = sand.u32 1, %s2762_s29   ;;  %p3394_p1 = scmp.ne.s32.totalorder %s3381_s8, 0 }
  0x8e   : > { %2747 = vsyncadd (%p3393_p9), [#allocation9], 4294964480  ;;  %s2472_s10 = smul.u32 48, %s3040_s16  ;;  %s237_s27 = scalar_lea.sflag [#allocation12], %s3040_s16 }
  0x90   : > { %s3044_s7 = scalar_lea.vmem [#allocation11], %s2472_s10 }
  0x91   : > { %2749 = dma.done.wait (%p3394_p1), %s237_s27, 768  }
  0x92   : > { %2751 = vsyncadd (%p3394_p1), %s237_s27, 4294966528  ;;  %s2091_s20 = sshll.u32 %s3040_s16, 7  ;;  %p3395_p11 = scmp.ne.s32.totalorder %s2847_s0, 0 }
  0x93   : > { %s3051_s22 = scalar_lea.vmem [#allocation13], %s2091_s20  ;;  %v298_v0 = vld [vmem:[#allocation8] sm:$0xff] (!%p3395_p11)  ;;  %v299_v1 = vld [vmem:[#allocation8 + $0x8] sm:$0xff] (!%p3395_p11)  ;;  %v300_v2 = vld [vmem:[#allocation8 + $0x10] sm:$0xff] (!%p3395_p11)  ;;  %vm306_vm0 = vcmask (!%p3395_p11), 261120   ;;  %v302_v22 = vlaneseq (!%p3395_p11)  ;;  %vm469_vm1 = vcmask (!%p3395_p11), 257024  }
  0x94   : > { %268 = sbr.rel (%p3395_p11) target bundleno = 1634 (0x662), region = 56  ;;  %v2408_v3 = vpack.c.bf16 (!%p3395_p11), %v299_v1, %v298_v0  ;;  %v301_v4 = vld [vmem:[#allocation8 + $0x18] sm:$0xff] (!%p3395_p11)  ;;  %v286_v5 = vld [vmem:[#allocation5] sm:$0xff] (!%p3395_p11)  ;;  %v288_v10 = vld [vmem:[#allocation5 + $0x10] sm:$0xff] (!%p3395_p11) }
  0x95   : > { %v2412_v6 = vpack.c.bf16 (!%p3395_p11), %v301_v4, %v300_v2  ;;  %2265 = vmatprep.mubr.msk.f32.mxu0 (!%p3395_p11), %vm306_vm0, %v286_v5  ;;  %v290_v7 = vld [vmem:[#allocation5 + $0x20] sm:$0xff] (!%p3395_p11)  ;;  %v287_v8 = vld [vmem:[#allocation5 + $0x8] sm:$0xff] (!%p3395_p11)  ;;  %v292_v11 = vld [vmem:[#allocation5 + $0x30] sm:$0xff] (!%p3395_p11)  ;;  %v3065_v23 = vshrl.u32 (!%p3395_p11), %v302_v22, 7 }
  0x96   : > { %2409 = vmatprep.subr.bf16.mxu0 (!%p3395_p11), %v2408_v3  ;;  %2460 = vmatprep.subr.bf16.mxu1 (!%p3395_p11), %v2408_v3  ;;  %v291_v9 = vld [vmem:[#allocation5 + $0x28] sm:$0xff] (!%p3395_p11)  ;;  %v289_v12 = vld [vmem:[#allocation5 + $0x18] sm:$0xff] (!%p3395_p11)  ;;  %v294_v14 = vld [vmem:[#allocation5 + $0x40] sm:$0xff] (!%p3395_p11) }
  0x97   : > { %2411 = vmatpush3.bf16.msra.mxu0 (!%p3395_p11), %v2408_v3  ;;  %2462 = vmatpush3.bf16.msra.mxu1 (!%p3395_p11), %v2408_v3  ;;  %v293_v13 = vld [vmem:[#allocation5 + $0x38] sm:$0xff] (!%p3395_p11)  ;;  %v295_v15 = vld [vmem:[#allocation5 + $0x48] sm:$0xf] (!%p3395_p11)  ;;  %v597_v16 = vld [vmem:[#allocation8 + $0x20] sm:$0xff] (!%p3395_p11)  ;;  %v304_v24 = vsub.s32 (!%p3395_p11), 0, %v3065_v23 }
  0x98   : > { %2413 = vmatprep.subr.bf16.mxu0 (!%p3395_p11), %v2412_v6  ;;  %2461 = vmatprep.subr.bf16.mxu1 (!%p3395_p11), %v2412_v6  ;;  %v598_v17 = vld [vmem:[#allocation8 + $0x28] sm:$0xff] (!%p3395_p11)  ;;  %v599_v19 = vld [vmem:[#allocation8 + $0x30] sm:$0xff] (!%p3395_p11)  ;;  %v600_v20 = vld [vmem:[#allocation8 + $0x38] sm:$0xff] (!%p3395_p11) }
  0x99   : > { %2271 = vmatprep.mubr.msk.f32.mxu1 (!%p3395_p11), %vm306_vm0, %v290_v7  ;;  %v2416_v18 = vpack.c.bf16 (!%p3395_p11), %v598_v17, %v597_v16  ;;  %v2420_v21 = vpack.c.bf16 (!%p3395_p11), %v600_v20, %v599_v19  ;;  %v3068_v25 = vld [vmem:[#allocation10] sm:$0xff] (!%p3395_p11) }
  0x9a   : > { %v305_v26 = vrot.slane (!%p3395_p11), %v3068_v25, %v304_v24 }
  0x9b   : > { %2415 = vmatpush3.bf16.msra.mxu0 %v2412_v6  ;;  %2463 = vmatpush3.bf16.msra.mxu1 %v2412_v6 }
  0x9c   : > { %2417 = vmatprep.subr.bf16.mxu1 %v2416_v18 }
  0x9e   : > { %2266 = vmatmul.mubr.msk.f32.vlgmr.msra.gmra.mrb[0].mxu0 %vm306_vm0, %v287_v8  ;;  %2272 = vmatmul.mubr.msk.f32.vlgmr.msra.gmra.mrb[0].mxu1 %vm306_vm0, %v291_v9 }
  0x9f   : > { %2268 = vmatprep.mubr.msk.f32.mxu0 %vm306_vm0, %v288_v10  ;;  %2274 = vmatprep.mubr.msk.f32.mxu1 %vm306_vm0, %v292_v11 }
  0xa0   : > { %2419 = vmatpush3.bf16.msra.mxu1 %v2416_v18 }
  0xa1   : > { %2421 = vmatprep.subr.bf16.mxu1 %v2420_v21 }
  0xa2   : > { %2269 = vmatmul.mubr.msk.f32.gmra.mrb[2].mxu0 %vm306_vm0, %v289_v12  ;;  %2275 = vmatmul.mubr.msk.f32.gmra.mrb[2].mxu1 %vm306_vm0, %v293_v13 }
  0xa3   : > { %2277 = vmatprep.mubr.msk.f32.mxu1 %vm306_vm0, %v294_v14 }
  0xa4   : > { %2423 = vmatpush3.bf16.msra.mxu1 %v2420_v21 }
  0xa6   : > { %2278 = vmatmul.mubr.msk.f32.gmra.mrb[4].mxu1 %vm306_vm0, %v295_v15 }
 0x171   : > { %v2267_v27 = vpop.f32.mrb[0].mxu0  ;;  %v2273_v28 = vpop.f32.mrb[0].mxu1 }
 0x172   : > { %v409_v29 = vadd.f32 %v2267_v27, %v305_v26  ;;  %v403_v30 = vpop.f32.mrb[1].mxu0  ;;  %v423_v31 = vpop.f32.mrb[1].mxu1  ;;  %v429_v48 = vadd.f32 %v2273_v28, %v305_v26 }
 0x173   : > { %v404_v32 = vadd.f32 %v403_v30, %v305_v26  ;;  %v424_v42 = vadd.f32 %v423_v31, %v305_v26 }
 0x174   : > { %v453_v33 = vsel %vm306_vm0, %v409_v29, 0.0  ;;  %v461_v53 = vsel %vm306_vm0, %v429_v48, 0.0 }
 0x175   : > { %v452_v34 = vsel %vm306_vm0, %v404_v32, 0.0  ;;  %v2270_v35 = vpop.f32.mrb[2].mxu0  ;;  %v2276_v36 = vpop.f32.mrb[2].mxu1  ;;  %v459_v49 = vsel %vm306_vm0, %v424_v42, 0.0 }
 0x176   : > { %v454_v37 = vadd.f32 %v453_v33, %v452_v34  ;;  %v413_v38 = vpop.f32.mrb[3].mxu0  ;;  %v433_v39 = vpop.f32.mrb[3].mxu1  ;;  %v419_v40 = vadd.f32 %v2270_v35, %v305_v26  ;;  %v439_v54 = vadd.f32 %v2276_v36, %v305_v26 }
 0x177   : > { %v414_v41 = vadd.f32 %v413_v38, %v305_v26  ;;  %v434_v50 = vadd.f32 %v433_v39, %v305_v26 }
 0x178   : > { %v457_v47 = vsel %vm306_vm0, %v419_v40, 0.0  ;;  %v465_v59 = vsel %vm306_vm0, %v439_v54, 0.0 }
 0x179   : > { %v455_v43 = vsel %vm306_vm0, %v414_v41, 0.0  ;;  %v2279_v44 = vpop.f32.mrb[4].mxu1  ;;  %v463_v55 = vsel %vm306_vm0, %v434_v50, 0.0 }
 0x17a   : > { %v456_v45 = vadd.f32 %v455_v43, %v454_v37  ;;  %v443_v46 = vpop.f32.mrb[5].mxu1  ;;  %v449_v60 = vadd.f32 %v2279_v44, %v305_v26 }
 0x17b   : > { %v444_v56 = vadd.f32 %v443_v46, %v305_v26 }
 0x17c   : > { %v458_v51 = vadd.f32 %v457_v47, %v456_v45  ;;  %v470_v0 = vsel %vm469_vm1, %v449_v60, 0.0 }
 0x17d   : > { %v467_v61 = vsel %vm306_vm0, %v444_v56, 0.0 }
 0x17e   : > { %v460_v52 = vadd.f32 %v459_v49, %v458_v51 }
 0x180   : > { %v462_v57 = vadd.f32 %v461_v53, %v460_v52 }
 0x182   : > { %v464_v58 = vadd.f32 %v463_v55, %v462_v57 }
 0x184   : > { %v466_v62 = vadd.f32 %v465_v59, %v464_v58  ;;  %v540_v59 = vsub.s32 5, %v3065_v23 }
 0x186   : > { %v468_v63 = vadd.f32 %v467_v61, %v466_v62  ;;  %v3103_v61 = vld [vmem:[#allocation10 + $0x8] sm:$0xff]  ;;  %v541_v62 = vrot.slane %v3068_v25, %v540_v59 }
 0x188   : > { %v471_v1 = vadd.f32 %v470_v0, %v468_v63 }
 0x18a   : > { %v472_v2 = vrot.slane %v471_v1, 4 }
 0x18c   : > { %v473_v3 = vadd.f32 %v472_v2, %v471_v1 }
 0x18e   : > { %v474_v4 = vrot.slane %v473_v3, 2 }
 0x190   : > { %v475_v5 = vadd.f32 %v474_v4, %v473_v3 }
 0x192   : > { %v476_v6 = vrot.slane %v475_v5, 1 }
 0x194   : > { %v477_v7 = vadd.f32 %v476_v6, %v475_v5 }
 0x196   : > { %v479_v8 = vmul.f32 0.013157895, %v477_v7 }
 0x198   : > { %v480_v9 = vsub.f32 %v404_v32, %v479_v8  ;;  %v481_v10 = vsub.f32 %v409_v29, %v479_v8  ;;  %v482_v11 = vsub.f32 %v414_v41, %v479_v8  ;;  %v483_v12 = vsub.f32 %v419_v40, %v479_v8 }
 0x199   : > { %v484_v13 = vsub.f32 %v424_v42, %v479_v8  ;;  %v485_v14 = vsub.f32 %v429_v48, %v479_v8  ;;  %v486_v15 = vsub.f32 %v434_v50, %v479_v8  ;;  %v3083_v16 = vsub.f32 %v439_v54, %v479_v8 }
 0x19a   : > { %v488_v17 = vsub.f32 %v444_v56, %v479_v8  ;;  %v3085_v18 = vsub.f32 %v449_v60, %v479_v8  ;;  %v490_v19 = vmul.f32 %v480_v9, %v480_v9  ;;  %v491_v20 = vmul.f32 %v481_v10, %v481_v10 }
 0x19b   : > { %v492_v21 = vmul.f32 %v482_v11, %v482_v11  ;;  %v493_v22 = vmul.f32 %v483_v12, %v483_v12  ;;  %v494_v29 = vmul.f32 %v484_v13, %v484_v13  ;;  %v495_v32 = vmul.f32 %v485_v14, %v485_v14 }
 0x19c   : > { %v500_v26 = vsel %vm306_vm0, %v490_v19, 0.0  ;;  %v501_v27 = vsel %vm306_vm0, %v491_v20, 0.0  ;;  %v496_v35 = vmul.f32 %v486_v15, %v486_v15  ;;  %v497_v38 = vmul.f32 %v3083_v16, %v3083_v16 }
 0x19d   : > { %v502_v28 = vadd.f32 %v501_v27, %v500_v26  ;;  %v503_v30 = vsel %vm306_vm0, %v492_v21, 0.0  ;;  %v505_v33 = vsel %vm306_vm0, %v493_v22, 0.0  ;;  %v507_v36 = vsel %vm306_vm0, %v494_v29, 0.0 }
 0x19e   : > { %v509_v39 = vsel %vm306_vm0, %v495_v32, 0.0  ;;  %v498_v41 = vmul.f32 %v488_v17, %v488_v17  ;;  %v511_v42 = vsel %vm306_vm0, %v496_v35, 0.0  ;;  %v499_v44 = vmul.f32 %v3085_v18, %v3085_v18 }
 0x19f   : > { %v504_v31 = vadd.f32 %v503_v30, %v502_v28  ;;  %v513_v45 = vsel %vm306_vm0, %v497_v38, 0.0  ;;  %v554_v60 = vsub.s32 1, %v3065_v23 }
 0x1a0   : > { %v515_v47 = vsel %vm306_vm0, %v498_v41, 0.0  ;;  %v517_v49 = vsel %vm469_vm1, %v499_v44, 0.0 }
 0x1a1   : > { %v506_v34 = vadd.f32 %v505_v33, %v504_v31  ;;  %v555_v0 = vrot.slane %v3103_v61, %v554_v60 }
 0x1a3   : > { %v508_v37 = vadd.f32 %v507_v36, %v506_v34 }
 0x1a5   : > { %v510_v40 = vadd.f32 %v509_v39, %v508_v37 }
 0x1a7   : > { %v512_v43 = vadd.f32 %v511_v42, %v510_v40 }
 0x1a9   : > { %v514_v46 = vadd.f32 %v513_v45, %v512_v43 }
 0x1ab   : > { %v516_v48 = vadd.f32 %v515_v47, %v514_v46 }
 0x1ad   : > { %v518_v50 = vadd.f32 %v517_v49, %v516_v48 }
 0x1af   : > { %v519_v51 = vrot.slane %v518_v50, 4 }
 0x1b1   : > { %v520_v52 = vadd.f32 %v519_v51, %v518_v50 }
 0x1b3   : > { %v521_v53 = vrot.slane %v520_v52, 2 }
 0x1b5   : > { %v522_v54 = vadd.f32 %v521_v53, %v520_v52 }
 0x1b7   : > { %v523_v55 = vrot.slane %v522_v54, 1 }
 0x1b9   : > { %v524_v56 = vadd.f32 %v523_v55, %v522_v54  ;;  %v893_v54 = vld [vmem:[#allocation8 + $0x40] sm:$0xff]  ;;  %v894_v55 = vld [vmem:[#allocation8 + $0x48] sm:$0xff] }
 0x1bb   : > { %v525_v57 = vmul.f32 0.013157895, %v524_v56  ;;  %v895_v56 = vld [vmem:[#allocation8 + $0x50] sm:$0xff] }
 0x1bd   : > { %v526_v58 = vadd.f32 1e-05, %v525_v57  ;;  %v2424_v57 = vpack.c.bf16 %v894_v55, %v893_v54 }
 0x1bf   : > { %2558 = vrsqrt.f32 %v526_v58  ;;  %v896_v58 = vld [vmem:[#allocation8 + $0x58] sm:$0xff]  ;;  %2425 = vmatprep.subr.bf16.mxu0 %v2424_v57 }
 0x1c0   : > { %v2428_v59 = vpack.c.bf16 %v896_v58, %v895_v56  ;;  %2427 = vmatpush3.bf16.msra.mxu0 %v2424_v57 }
 0x1c2   : > { %2429 = vmatprep.subr.bf16.mxu0 %v2428_v59 }
 0x1c4   : > { %2431 = vmatpush3.bf16.msra.mxu0 %v2428_v59 }
 0x1c9   : > { %v2559_v63 = vpop.eup %2558 }
 0x1ca   : > { %v536_v1 = vmul.f32 %v2559_v63, %v488_v17  ;;  %v528_v2 = vmul.f32 %v2559_v63, %v480_v9  ;;  %v529_v3 = vmul.f32 %v2559_v63, %v481_v10  ;;  %v530_v4 = vmul.f32 %v2559_v63, %v482_v11 }
 0x1cb   : > { %v531_v5 = vmul.f32 %v2559_v63, %v483_v12  ;;  %v532_v6 = vmul.f32 %v2559_v63, %v484_v13  ;;  %v533_v7 = vmul.f32 %v2559_v63, %v485_v14  ;;  %v534_v8 = vmul.f32 %v2559_v63, %v486_v15 }
 0x1cc   : > { %v542_v19 = vmul.f32 %v541_v62, %v528_v2  ;;  %v543_v20 = vmul.f32 %v541_v62, %v529_v3  ;;  %v544_v21 = vmul.f32 %v541_v62, %v530_v4  ;;  %v535_v30 = vmul.f32 %v2559_v63, %v3083_v16 }
 0x1cd   : > { %v545_v22 = vmul.f32 %v541_v62, %v531_v5  ;;  %v546_v26 = vmul.f32 %v541_v62, %v532_v6  ;;  %v547_v17 = vmul.f32 %v541_v62, %v533_v7  ;;  %v548_v9 = vmul.f32 %v541_v62, %v534_v8 }
 0x1ce   : > { %v556_v27 = vadd.f32 %v555_v0, %v542_v19  ;;  %v557_v28 = vadd.f32 %v555_v0, %v543_v20  ;;  %v558_v29 = vadd.f32 %v555_v0, %v544_v21  ;;  %v550_v15 = vmul.f32 %v541_v62, %v536_v1 }
 0x1cf   : > { %v559_v31 = vadd.f32 %v555_v0, %v545_v22  ;;  %v560_v32 = vadd.f32 %v555_v0, %v546_v26  ;;  %v561_v34 = vadd.f32 %v555_v0, %v547_v17  ;;  %v562_v35 = vadd.f32 %v555_v0, %v548_v9 }
 0x1d0   : > { %vm566_vm2 = vcmp.ge.f32.partialorder %v556_v27, 0.0  ;;  %v576_v10 = vmul.f32 0.01, %v556_v27  ;;  %vm567_vm3 = vcmp.ge.f32.partialorder %v557_v28, 0.0  ;;  %v577_v11 = vmul.f32 0.01, %v557_v28 }
 0x1d1   : > { %vm568_vm4 = vcmp.ge.f32.partialorder %v558_v29, 0.0  ;;  %v578_v12 = vmul.f32 0.01, %v558_v29  ;;  %v579_v33 = vmul.f32 0.01, %v559_v31  ;;  %vm569_vm5 = vcmp.ge.f32.partialorder %v559_v31, 0.0 }
 0x1d2   : > { %v586_v13 = vsel %vm566_vm2, %v556_v27, %v576_v10  ;;  %v587_v14 = vsel %vm567_vm3, %v557_v28, %v577_v11  ;;  %v580_v36 = vmul.f32 0.01, %v560_v32  ;;  %v549_v37 = vmul.f32 %v541_v62, %v535_v30 }
 0x1d3   : > { %2288 = vmatprep.mubr.msk.f32.mxu1 %vm306_vm0, %v586_v13  ;;  %v588_v16 = vsel %vm568_vm4, %v558_v29, %v578_v12  ;;  %vm570_vm6 = vcmp.ge.f32.partialorder %v560_v32, 0.0  ;;  %v537_v38 = vmul.f32 %v2559_v63, %v3085_v18  ;;  %v589_v39 = vsel %vm569_vm5, %v559_v31, %v579_v33 }
 0x1d4   : > { %2289 = vmatmul.mubr.msk.f32.vlgmr.msra.gmra.mrb[6].mxu1 %vm306_vm0, %v587_v14  ;;  %v581_v40 = vmul.f32 0.01, %v561_v34  ;;  %v563_v41 = vadd.f32 %v555_v0, %v549_v37  ;;  %v590_v43 = vsel %vm570_vm6, %v560_v32, %v580_v36  ;;  %vm571_vm7 = vcmp.ge.f32.partialorder %v561_v34, 0.0 }
 0x1d5   : > { %2291 = vmatprep.mubr.msk.f32.mxu1 %vm306_vm0, %v588_v16  ;;  %v551_v42 = vmul.f32 %v541_v62, %v537_v38  ;;  %v582_v44 = vmul.f32 0.01, %v562_v35  ;;  %v564_v45 = vadd.f32 %v555_v0, %v550_v15  ;;  %vm572_vm8 = vcmp.ge.f32.partialorder %v562_v35, 0.0 }
 0x1d6   : > { %v591_v46 = vsel %vm571_vm7, %v561_v34, %v581_v40  ;;  %v583_v47 = vmul.f32 0.01, %v563_v41  ;;  %vm573_vm9 = vcmp.ge.f32.partialorder %v563_v41, 0.0  ;;  %v604_v62 = vrot.slane %v3068_v25, %v554_v60 }
 0x1d7   : > { %v565_v48 = vadd.f32 %v555_v0, %v551_v42  ;;  %v592_v49 = vsel %vm572_vm8, %v562_v35, %v582_v44  ;;  %v584_v18 = vmul.f32 0.01, %v564_v45  ;;  %vm574_vm10 = vcmp.ge.f32.partialorder %v564_v45, 0.0 }
 0x1d8   : > { %2292 = vmatmul.mubr.msk.f32.gmra.mrb[8].mxu1 %vm306_vm0, %v589_v39  ;;  %v593_v50 = vsel %vm573_vm9, %v563_v41, %v583_v47 }
 0x1d9   : > { %2294 = vmatprep.mubr.msk.f32.mxu1 %vm306_vm0, %v590_v43  ;;  %v585_v51 = vmul.f32 0.01, %v565_v48  ;;  %v594_v52 = vsel %vm574_vm10, %v564_v45, %v584_v18  ;;  %vm575_vm11 = vcmp.ge.f32.partialorder %v565_v48, 0.0 }
 0x1db   : > { %v595_v53 = vsel %vm575_vm11, %v565_v48, %v585_v51 }
 0x1dc   : > { %2295 = vmatmul.mubr.msk.f32.gmra.mrb[10].mxu1 %vm306_vm0, %v591_v46 }
 0x1dd   : > { %2297 = vmatprep.mubr.msk.f32.mxu1 %vm306_vm0, %v592_v49 }
 0x1e0   : > { %2298 = vmatmul.mubr.msk.f32.gmra.mrb[12].mxu1 %vm306_vm0, %v593_v50 }
 0x1e1   : > { %2300 = vmatprep.mubr.msk.f32.mxu1 %vm306_vm0, %v594_v52 }
 0x1e4   : > { %2301 = vmatmul.mubr.msk.f32.gmra.mrb[14].mxu1 %vm306_vm0, %v595_v53 }
 0x2a7   : > { %v2290_v63 = vpop.f32.mrb[6].mxu1 }
 0x2a8   : > { %v707_v0 = vadd.f32 %v2290_v63, %v604_v62  ;;  %v701_v1 = vpop.f32.mrb[7].mxu1 }
 0x2a9   : > { %v702_v2 = vadd.f32 %v701_v1, %v604_v62 }
 0x2aa   : > { %v751_v3 = vsel %vm306_vm0, %v707_v0, 0.0 }
 0x2ab   : > { %v750_v4 = vsel %vm306_vm0, %v702_v2, 0.0  ;;  %v2293_v5 = vpop.f32.mrb[8].mxu1 }
 0x2ac   : > { %v752_v6 = vadd.f32 %v751_v3, %v750_v4  ;;  %v717_v7 = vadd.f32 %v2293_v5, %v604_v62  ;;  %v711_v8 = vpop.f32.mrb[9].mxu1 }
 0x2ad   : > { %v712_v19 = vadd.f32 %v711_v8, %v604_v62 }
 0x2ae   : > { %v755_v60 = vsel %vm306_vm0, %v717_v7, 0.0 }
 0x2af   : > { %v753_v20 = vsel %vm306_vm0, %v712_v19, 0.0  ;;  %v2296_v21 = vpop.f32.mrb[10].mxu1 }
 0x2b0   : > { %v754_v22 = vadd.f32 %v753_v20, %v752_v6  ;;  %v727_v26 = vadd.f32 %v2296_v21, %v604_v62  ;;  %v721_v27 = vpop.f32.mrb[11].mxu1 }
 0x2b1   : > { %v722_v28 = vadd.f32 %v721_v27, %v604_v62 }
 0x2b2   : > { %v756_v29 = vadd.f32 %v755_v60, %v754_v22  ;;  %v759_v10 = vsel %vm306_vm0, %v727_v26, 0.0 }
 0x2b3   : > { %v757_v30 = vsel %vm306_vm0, %v722_v28, 0.0  ;;  %v2299_v31 = vpop.f32.mrb[12].mxu1 }
 0x2b4   : > { %v758_v32 = vadd.f32 %v757_v30, %v756_v29  ;;  %v737_v17 = vadd.f32 %v2299_v31, %v604_v62  ;;  %v731_v9 = vpop.f32.mrb[13].mxu1 }
 0x2b5   : > { %v732_v11 = vadd.f32 %v731_v9, %v604_v62 }
 0x2b6   : > { %v760_v12 = vadd.f32 %v759_v10, %v758_v32  ;;  %v763_v35 = vsel %vm306_vm0, %v737_v17, 0.0 }
 0x2b7   : > { %v761_v13 = vsel %vm306_vm0, %v732_v11, 0.0  ;;  %v2302_v14 = vpop.f32.mrb[14].mxu1 }
 0x2b8   : > { %v762_v15 = vadd.f32 %v761_v13, %v760_v12  ;;  %v747_v33 = vadd.f32 %v2302_v14, %v604_v62  ;;  %v741_v34 = vpop.f32.mrb[15].mxu1 }
 0x2b9   : > { %v742_v16 = vadd.f32 %v741_v34, %v604_v62 }
 0x2ba   : > { %v764_v36 = vadd.f32 %v763_v35, %v762_v15  ;;  %v767_v39 = vsel %vm469_vm1, %v747_v33, 0.0 }
 0x2bb   : > { %v765_v37 = vsel %vm306_vm0, %v742_v16, 0.0 }
 0x2bc   : > { %v766_v38 = vadd.f32 %v765_v37, %v764_v36  ;;  %v850_v36 = vsub.s32 2, %v3065_v23 }
 0x2be   : > { %v768_v40 = vadd.f32 %v767_v39, %v766_v38  ;;  %v851_v39 = vrot.slane %v3103_v61, %v850_v36 }
 0x2c0   : > { %v769_v41 = vrot.slane %v768_v40, 4 }
 0x2c2   : > { %v770_v42 = vadd.f32 %v769_v41, %v768_v40 }
 0x2c4   : > { %v771_v43 = vrot.slane %v770_v42, 2 }
 0x2c6   : > { %v772_v44 = vadd.f32 %v771_v43, %v770_v42 }
 0x2c8   : > { %v773_v45 = vrot.slane %v772_v44, 1 }
 0x2ca   : > { %v774_v46 = vadd.f32 %v773_v45, %v772_v44 }
 0x2cc   : > { %v775_v47 = vmul.f32 0.013157895, %v774_v46 }
 0x2ce   : > { %v776_v48 = vsub.f32 %v702_v2, %v775_v47  ;;  %v777_v49 = vsub.f32 %v707_v0, %v775_v47  ;;  %v778_v18 = vsub.f32 %v712_v19, %v775_v47  ;;  %v779_v50 = vsub.f32 %v717_v7, %v775_v47 }
 0x2cf   : > { %v780_v51 = vsub.f32 %v722_v28, %v775_v47  ;;  %v781_v52 = vsub.f32 %v727_v26, %v775_v47  ;;  %v782_v53 = vsub.f32 %v732_v11, %v775_v47  ;;  %v783_v54 = vsub.f32 %v737_v17, %v775_v47 }
 0x2d0   : > { %v784_v55 = vsub.f32 %v742_v16, %v775_v47  ;;  %v3134_v56 = vsub.f32 %v747_v33, %v775_v47  ;;  %v786_v57 = vmul.f32 %v776_v48, %v776_v48  ;;  %v787_v58 = vmul.f32 %v777_v49, %v777_v49 }
 0x2d1   : > { %v788_v59 = vmul.f32 %v778_v18, %v778_v18  ;;  %v789_v62 = vmul.f32 %v779_v50, %v779_v50  ;;  %v790_v2 = vmul.f32 %v780_v51, %v780_v51  ;;  %v791_v5 = vmul.f32 %v781_v52, %v781_v52 }
 0x2d2   : > { %v796_v63 = vsel %vm306_vm0, %v786_v57, 0.0  ;;  %v797_v1 = vsel %vm306_vm0, %v787_v58, 0.0  ;;  %v792_v8 = vmul.f32 %v782_v53, %v782_v53  ;;  %v793_v21 = vmul.f32 %v783_v54, %v783_v54 }
 0x2d3   : > { %v798_v3 = vadd.f32 %v797_v1, %v796_v63  ;;  %v799_v0 = vsel %vm306_vm0, %v788_v59, 0.0  ;;  %v801_v6 = vsel %vm306_vm0, %v789_v62, 0.0  ;;  %v803_v19 = vsel %vm306_vm0, %v790_v2, 0.0 }
 0x2d4   : > { %v805_v22 = vsel %vm306_vm0, %v791_v5, 0.0  ;;  %v794_v27 = vmul.f32 %v784_v55, %v784_v55  ;;  %v807_v60 = vsel %vm306_vm0, %v792_v8, 0.0  ;;  %v795_v29 = vmul.f32 %v3134_v56, %v3134_v56 }
 0x2d5   : > { %v800_v4 = vadd.f32 %v799_v0, %v798_v3  ;;  %v809_v30 = vsel %vm306_vm0, %v793_v21, 0.0  ;;  %v836_v16 = vsub.s32 6, %v3065_v23 }
 0x2d6   : > { %v811_v32 = vsel %vm306_vm0, %v794_v27, 0.0  ;;  %v813_v9 = vsel %vm469_vm1, %v795_v29, 0.0 }
 0x2d7   : > { %v802_v7 = vadd.f32 %v801_v6, %v800_v4  ;;  %v837_v37 = vrot.slane %v3068_v25, %v836_v16 }
 0x2d9   : > { %v804_v20 = vadd.f32 %v803_v19, %v802_v7 }
 0x2db   : > { %v806_v26 = vadd.f32 %v805_v22, %v804_v20 }
 0x2dd   : > { %v808_v28 = vadd.f32 %v807_v60, %v806_v26 }
 0x2df   : > { %v810_v31 = vadd.f32 %v809_v30, %v808_v28 }
 0x2e1   : > { %v812_v17 = vadd.f32 %v811_v32, %v810_v31 }
 0x2e3   : > { %v814_v10 = vadd.f32 %v813_v9, %v812_v17 }
 0x2e5   : > { %v815_v11 = vrot.slane %v814_v10, 4 }
 0x2e7   : > { %v816_v12 = vadd.f32 %v815_v11, %v814_v10 }
 0x2e9   : > { %v817_v13 = vrot.slane %v816_v12, 2 }
 0x2eb   : > { %v818_v14 = vadd.f32 %v817_v13, %v816_v12 }
 0x2ed   : > { %v819_v15 = vrot.slane %v818_v14, 1 }
 0x2ef   : > { %v820_v33 = vadd.f32 %v819_v15, %v818_v14  ;;  %v1189_v14 = vld [vmem:[#allocation8 + $0x60] sm:$0xff]  ;;  %v1190_v15 = vld [vmem:[#allocation8 + $0x68] sm:$0xff] }
 0x2f1   : > { %v821_v34 = vmul.f32 0.013157895, %v820_v33  ;;  %v1191_v33 = vld [vmem:[#allocation8 + $0x70] sm:$0xff] }
 0x2f3   : > { %v822_v35 = vadd.f32 1e-05, %v821_v34  ;;  %v2432_v34 = vpack.c.bf16 %v1190_v15, %v1189_v14 }
 0x2f5   : > { %2560 = vrsqrt.f32 %v822_v35  ;;  %v1192_v35 = vld [vmem:[#allocation8 + $0x78] sm:$0xff]  ;;  %2433 = vmatprep.subr.bf16.mxu1 %v2432_v34 }
 0x2f6   : > { %v2436_v16 = vpack.c.bf16 %v1192_v35, %v1191_v33  ;;  %2435 = vmatpush3.bf16.msra.mxu1 %v2432_v34 }
 0x2f8   : > { %2437 = vmatprep.subr.bf16.mxu1 %v2436_v16 }
 0x2fa   : > { %2439 = vmatpush3.bf16.msra.mxu1 %v2436_v16 }
 0x2ff   : > { %v2561_v38 = vpop.eup %2560 }
 0x300   : > { %v832_v40 = vmul.f32 %v2561_v38, %v784_v55  ;;  %v824_v41 = vmul.f32 %v2561_v38, %v776_v48  ;;  %v825_v42 = vmul.f32 %v2561_v38, %v777_v49  ;;  %v826_v43 = vmul.f32 %v2561_v38, %v778_v18 }
 0x301   : > { %v827_v44 = vmul.f32 %v2561_v38, %v779_v50  ;;  %v828_v45 = vmul.f32 %v2561_v38, %v780_v51  ;;  %v829_v46 = vmul.f32 %v2561_v38, %v781_v52  ;;  %v830_v47 = vmul.f32 %v2561_v38, %v782_v53 }
 0x302   : > { %v838_v57 = vmul.f32 %v837_v37, %v824_v41  ;;  %v839_v58 = vmul.f32 %v837_v37, %v825_v42  ;;  %v840_v59 = vmul.f32 %v837_v37, %v826_v43  ;;  %v831_v0 = vmul.f32 %v2561_v38, %v783_v54 }
 0x303   : > { %v841_v62 = vmul.f32 %v837_v37, %v827_v44  ;;  %v842_v63 = vmul.f32 %v837_v37, %v828_v45  ;;  %v843_v6 = vmul.f32 %v837_v37, %v829_v46  ;;  %v844_v55 = vmul.f32 %v837_v37, %v830_v47 }
 0x304   : > { %v852_v1 = vadd.f32 %v851_v39, %v838_v57  ;;  %v853_v3 = vadd.f32 %v851_v39, %v839_v58  ;;  %v854_v2 = vadd.f32 %v851_v39, %v840_v59  ;;  %v846_v52 = vmul.f32 %v837_v37, %v832_v40 }
 0x305   : > { %v855_v4 = vadd.f32 %v851_v39, %v841_v62  ;;  %v856_v5 = vadd.f32 %v851_v39, %v842_v63  ;;  %v857_v7 = vadd.f32 %v851_v39, %v843_v6  ;;  %v858_v8 = vadd.f32 %v851_v39, %v844_v55 }
 0x306   : > { %vm862_vm12 = vcmp.ge.f32.partialorder %v852_v1, 0.0  ;;  %v872_v48 = vmul.f32 0.01, %v852_v1  ;;  %vm863_vm13 = vcmp.ge.f32.partialorder %v853_v3, 0.0  ;;  %v873_v49 = vmul.f32 0.01, %v853_v3 }
 0x307   : > { %vm864_vm14 = vcmp.ge.f32.partialorder %v854_v2, 0.0  ;;  %v874_v18 = vmul.f32 0.01, %v854_v2  ;;  %v875_v53 = vmul.f32 0.01, %v855_v4  ;;  %vm865_vm15 = vcmp.ge.f32.partialorder %v855_v4, 0.0 }
 0x308   : > { %v882_v50 = vsel %vm862_vm12, %v852_v1, %v872_v48  ;;  %v883_v51 = vsel %vm863_vm13, %v853_v3, %v873_v49  ;;  %v876_v19 = vmul.f32 0.01, %v856_v5  ;;  %v845_v20 = vmul.f32 %v837_v37, %v831_v0 }
 0x309   : > { %2311 = vmatprep.mubr.msk.f32.mxu0 %vm306_vm0, %v882_v50  ;;  %v884_v54 = vsel %vm864_vm14, %v854_v2, %v874_v18  ;;  %vm866_vm2 = vcmp.ge.f32.partialorder %v856_v5, 0.0  ;;  %v833_v21 = vmul.f32 %v2561_v38, %v3134_v56  ;;  %v885_v22 = vsel %vm865_vm15, %v855_v4, %v875_v53 }
 0x30a   : > { %2312 = vmatmul.mubr.msk.f32.vlgmr.msra.gmra.mrb[4].mxu0 %vm306_vm0, %v883_v51  ;;  %v877_v26 = vmul.f32 0.01, %v857_v7  ;;  %v859_v27 = vadd.f32 %v851_v39, %v845_v20  ;;  %v886_v28 = vsel %vm866_vm2, %v856_v5, %v876_v19  ;;  %vm867_vm3 = vcmp.ge.f32.partialorder %v857_v7, 0.0 }
 0x30b   : > { %2314 = vmatprep.mubr.msk.f32.mxu0 %vm306_vm0, %v884_v54  ;;  %v847_v60 = vmul.f32 %v837_v37, %v833_v21  ;;  %v878_v29 = vmul.f32 0.01, %v858_v8  ;;  %v860_v30 = vadd.f32 %v851_v39, %v846_v52  ;;  %vm868_vm4 = vcmp.ge.f32.partialorder %v858_v8, 0.0 }
 0x30c   : > { %v887_v31 = vsel %vm867_vm3, %v857_v7, %v877_v26  ;;  %v879_v32 = vmul.f32 0.01, %v859_v27  ;;  %vm869_vm5 = vcmp.ge.f32.partialorder %v859_v27, 0.0  ;;  %v900_v37 = vrot.slane %v3068_v25, %v850_v36 }
 0x30d   : > { %v861_v17 = vadd.f32 %v851_v39, %v847_v60  ;;  %v888_v9 = vsel %vm868_vm4, %v858_v8, %v878_v29  ;;  %v880_v56 = vmul.f32 0.01, %v860_v30  ;;  %vm870_vm6 = vcmp.ge.f32.partialorder %v860_v30, 0.0 }
 0x30e   : > { %2315 = vmatmul.mubr.msk.f32.gmra.mrb[6].mxu0 %vm306_vm0, %v885_v22  ;;  %v889_v10 = vsel %vm869_vm5, %v859_v27, %v879_v32  ;;  %vm269_vm4 = vcmask 7168  }
 0x30f   : > { %2317 = vmatprep.mubr.msk.f32.mxu0 %vm306_vm0, %v886_v28  ;;  %v881_v11 = vmul.f32 0.01, %v861_v17  ;;  %v890_v12 = vsel %vm870_vm6, %v860_v30, %v880_v56  ;;  %vm871_vm7 = vcmp.ge.f32.partialorder %v861_v17, 0.0 }
 0x311   : > { %v891_v13 = vsel %vm871_vm7, %v861_v17, %v881_v11 }
 0x312   : > { %2318 = vmatmul.mubr.msk.f32.gmra.mrb[8].mxu0 %vm306_vm0, %v887_v31 }
 0x313   : > { %2320 = vmatprep.mubr.msk.f32.mxu0 %vm306_vm0, %v888_v9 }
 0x316   : > { %2321 = vmatmul.mubr.msk.f32.gmra.mrb[10].mxu0 %vm306_vm0, %v889_v10 }
 0x317   : > { %2323 = vmatprep.mubr.msk.f32.mxu0 %vm306_vm0, %v890_v12 }
 0x31a   : > { %2324 = vmatmul.mubr.msk.f32.gmra.mrb[12].mxu0 %vm306_vm0, %v891_v13 }
 0x3dd   : > { %v2313_v38 = vpop.f32.mrb[4].mxu0 }
 0x3de   : > { %v1003_v39 = vadd.f32 %v2313_v38, %v900_v37  ;;  %v997_v40 = vpop.f32.mrb[5].mxu0 }
 0x3df   : > { %v998_v41 = vadd.f32 %v997_v40, %v900_v37 }
 0x3e0   : > { %v1047_v42 = vsel %vm306_vm0, %v1003_v39, 0.0 }
 0x3e1   : > { %v1046_v43 = vsel %vm306_vm0, %v998_v41, 0.0  ;;  %v2316_v44 = vpop.f32.mrb[6].mxu0 }
 0x3e2   : > { %v1048_v45 = vadd.f32 %v1047_v42, %v1046_v43  ;;  %v1013_v46 = vadd.f32 %v2316_v44, %v900_v37  ;;  %v1007_v47 = vpop.f32.mrb[7].mxu0 }
 0x3e3   : > { %v1008_v57 = vadd.f32 %v1007_v47, %v900_v37 }
 0x3e4   : > { %v1051_v36 = vsel %vm306_vm0, %v1013_v46, 0.0 }
 0x3e5   : > { %v1049_v58 = vsel %vm306_vm0, %v1008_v57, 0.0  ;;  %v2319_v59 = vpop.f32.mrb[8].mxu0 }
 0x3e6   : > { %v1050_v62 = vadd.f32 %v1049_v58, %v1048_v45  ;;  %v1023_v63 = vadd.f32 %v2319_v59, %v900_v37  ;;  %v1017_v1 = vpop.f32.mrb[9].mxu0 }
 0x3e7   : > { %v1018_v3 = vadd.f32 %v1017_v1, %v900_v37 }
 0x3e8   : > { %v1052_v2 = vadd.f32 %v1051_v36, %v1050_v62  ;;  %v1055_v48 = vsel %vm306_vm0, %v1023_v63, 0.0 }
 0x3e9   : > { %v1053_v0 = vsel %vm306_vm0, %v1018_v3, 0.0  ;;  %v2322_v4 = vpop.f32.mrb[10].mxu0 }
 0x3ea   : > { %v1054_v5 = vadd.f32 %v1053_v0, %v1052_v2  ;;  %v1033_v6 = vadd.f32 %v2322_v4, %v900_v37  ;;  %v1027_v55 = vpop.f32.mrb[11].mxu0 }
 0x3eb   : > { %v1028_v49 = vadd.f32 %v1027_v55, %v900_v37 }
 0x3ec   : > { %v1056_v18 = vadd.f32 %v1055_v48, %v1054_v5  ;;  %v1059_v8 = vsel %vm306_vm0, %v1033_v6, 0.0 }
 0x3ed   : > { %v1057_v50 = vsel %vm306_vm0, %v1028_v49, 0.0  ;;  %v2325_v51 = vpop.f32.mrb[12].mxu0 }
 0x3ee   : > { %v1058_v52 = vadd.f32 %v1057_v50, %v1056_v18  ;;  %v1043_v53 = vadd.f32 %v2325_v51, %v900_v37  ;;  %v1037_v7 = vpop.f32.mrb[13].mxu0 }
 0x3ef   : > { %v1038_v54 = vadd.f32 %v1037_v7, %v900_v37 }
 0x3f0   : > { %v1060_v19 = vadd.f32 %v1059_v8, %v1058_v52  ;;  %v1063_v22 = vsel %vm469_vm1, %v1043_v53, 0.0 }
 0x3f1   : > { %v1061_v20 = vsel %vm306_vm0, %v1038_v54, 0.0 }
 0x3f2   : > { %v1062_v21 = vadd.f32 %v1061_v20, %v1060_v19  ;;  %v1146_v19 = vsub.s32 3, %v3065_v23 }
 0x3f4   : > { %v1064_v26 = vadd.f32 %v1063_v22, %v1062_v21  ;;  %v1147_v22 = vrot.slane %v3103_v61, %v1146_v19 }
 0x3f6   : > { %v1065_v27 = vrot.slane %v1064_v26, 4 }
 0x3f8   : > { %v1066_v60 = vadd.f32 %v1065_v27, %v1064_v26 }
 0x3fa   : > { %v1067_v28 = vrot.slane %v1066_v60, 2 }
 0x3fc   : > { %v1068_v29 = vadd.f32 %v1067_v28, %v1066_v60 }
 0x3fe   : > { %v1069_v30 = vrot.slane %v1068_v29, 1 }
 0x400   : > { %v1070_v31 = vadd.f32 %v1069_v30, %v1068_v29 }
 0x402   : > { %v1071_v32 = vmul.f32 0.013157895, %v1070_v31 }
 0x404   : > { %v1072_v17 = vsub.f32 %v998_v41, %v1071_v32  ;;  %v1073_v9 = vsub.f32 %v1003_v39, %v1071_v32  ;;  %v1074_v56 = vsub.f32 %v1008_v57, %v1071_v32  ;;  %v1075_v10 = vsub.f32 %v1013_v46, %v1071_v32 }
 0x405   : > { %v1076_v11 = vsub.f32 %v1018_v3, %v1071_v32  ;;  %v1077_v12 = vsub.f32 %v1023_v63, %v1071_v32  ;;  %v1078_v13 = vsub.f32 %v1028_v49, %v1071_v32  ;;  %v1079_v14 = vsub.f32 %v1033_v6, %v1071_v32 }
 0x406   : > { %v1080_v15 = vsub.f32 %v1038_v54, %v1071_v32  ;;  %v3178_v33 = vsub.f32 %v1043_v53, %v1071_v32  ;;  %v1082_v34 = vmul.f32 %v1072_v17, %v1072_v17  ;;  %v1083_v35 = vmul.f32 %v1073_v9, %v1073_v9 }
 0x407   : > { %v1084_v16 = vmul.f32 %v1074_v56, %v1074_v56  ;;  %v1085_v37 = vmul.f32 %v1075_v10, %v1075_v10  ;;  %v1086_v41 = vmul.f32 %v1076_v11, %v1076_v11  ;;  %v1087_v44 = vmul.f32 %v1077_v12, %v1077_v12 }
 0x408   : > { %v1092_v38 = vsel %vm306_vm0, %v1082_v34, 0.0  ;;  %v1093_v40 = vsel %vm306_vm0, %v1083_v35, 0.0  ;;  %v1088_v47 = vmul.f32 %v1078_v13, %v1078_v13  ;;  %v1089_v59 = vmul.f32 %v1079_v14, %v1079_v14 }
 0x409   : > { %v1094_v42 = vadd.f32 %v1093_v40, %v1092_v38  ;;  %v1095_v39 = vsel %vm306_vm0, %v1084_v16, 0.0  ;;  %v1097_v45 = vsel %vm306_vm0, %v1085_v37, 0.0  ;;  %v1099_v57 = vsel %vm306_vm0, %v1086_v41, 0.0 }
 0x40a   : > { %v1101_v62 = vsel %vm306_vm0, %v1087_v44, 0.0  ;;  %v1090_v1 = vmul.f32 %v1080_v15, %v1080_v15  ;;  %v1103_v36 = vsel %vm306_vm0, %v1088_v47, 0.0  ;;  %v1091_v2 = vmul.f32 %v3178_v33, %v3178_v33 }
 0x40b   : > { %v1096_v43 = vadd.f32 %v1095_v39, %v1094_v42  ;;  %v1105_v0 = vsel %vm306_vm0, %v1089_v59, 0.0  ;;  %v1132_v54 = vsub.s32 7, %v3065_v23 }
 0x40c   : > { %v1107_v5 = vsel %vm306_vm0, %v1090_v1, 0.0  ;;  %v1109_v55 = vsel %vm469_vm1, %v1091_v2, 0.0 }
 0x40d   : > { %v1098_v46 = vadd.f32 %v1097_v45, %v1096_v43  ;;  %v1133_v20 = vrot.slane %v3068_v25, %v1132_v54  ;;  %v3225_v54 = vld [vmem:[#allocation10] sm:$0xff] }
 0x40f   : > { %v1100_v58 = vadd.f32 %v1099_v57, %v1098_v46 }
 0x411   : > { %v1102_v63 = vadd.f32 %v1101_v62, %v1100_v58 }
 0x413   : > { %v1104_v3 = vadd.f32 %v1103_v36, %v1102_v63 }
 0x415   : > { %v1106_v4 = vadd.f32 %v1105_v0, %v1104_v3 }
 0x417   : > { %v1108_v6 = vadd.f32 %v1107_v5, %v1106_v4 }
 0x419   : > { %v1110_v48 = vadd.f32 %v1109_v55, %v1108_v6 }
 0x41b   : > { %v1111_v49 = vrot.slane %v1110_v48, 4 }
 0x41d   : > { %v1112_v18 = vadd.f32 %v1111_v49, %v1110_v48 }
 0x41f   : > { %v1113_v50 = vrot.slane %v1112_v18, 2 }
 0x421   : > { %v1114_v51 = vadd.f32 %v1113_v50, %v1112_v18  ;;  %v1485_v18 = vld [vmem:[#allocation8 + $0x80] sm:$0xff]  ;;  %v1486_v50 = vld [vmem:[#allocation8 + $0x88] sm:$0xff] }
 0x423   : > { %v1115_v52 = vrot.slane %v1114_v51, 1 }
 0x425   : > { %v1116_v53 = vadd.f32 %v1115_v52, %v1114_v51  ;;  %v1487_v51 = vld [vmem:[#allocation8 + $0x90] sm:$0xff]  ;;  %v2440_v52 = vpack.c.bf16 %v1486_v50, %v1485_v18 }
 0x427   : > { %v1117_v7 = vmul.f32 0.013157895, %v1116_v53  ;;  %v1488_v53 = vld [vmem:[#allocation8 + $0x98] sm:$0xff]  ;;  %2441 = vmatprep.subr.bf16.mxu0 %v2440_v52 }
 0x428   : > { %2443 = vmatpush3.bf16.msra.mxu0 %v2440_v52 }
 0x429   : > { %v1118_v8 = vadd.f32 1e-05, %v1117_v7  ;;  %v2444_v7 = vpack.c.bf16 %v1488_v53, %v1487_v51 }
 0x42b   : > { %2562 = vrsqrt.f32 %v1118_v8  ;;  %2445 = vmatprep.subr.bf16.mxu0 %v2444_v7  ;;  %v2779_v8 = vmov 0.0  }
 0x42c   : > { %2447 = vmatpush3.bf16.msra.mxu0 %v2444_v7  ;;  %271 = vst.msk [vmem:[#allocation2 + $0x8] sm:$0xff] %vm269_vm4, %v2779_v8  ;;  %280 = vst.msk [vmem:[#allocation2 + $0x50] sm:$0xff] %vm269_vm4, %v2779_v8 }
 0x42d   : > { %281 = vst.msk [vmem:[#allocation2 + $0x58] sm:$0xff] %vm269_vm4, %v2779_v8  ;;  %282 = vst.msk [vmem:[#allocation2 + $0x60] sm:$0xff] %vm269_vm4, %v2779_v8 }
 0x42e   : > { %283 = vst.msk [vmem:[#allocation2 + $0x68] sm:$0xff] %vm269_vm4, %v2779_v8  ;;  %284 = vst.msk [vmem:[#allocation2 + $0x70] sm:$0xff] %vm269_vm4, %v2779_v8 }
 0x42f   : > { %285 = vst.msk [vmem:[#allocation2 + $0x78] sm:$0xff] %vm269_vm4, %v2779_v8  ;;  %270 = vst.msk [vmem:[#allocation2] sm:$0xff] %vm269_vm4, %v2779_v8 }
 0x430   : > { %272 = vst.msk [vmem:[#allocation2 + $0x10] sm:$0xff] %vm269_vm4, %v2779_v8  ;;  %273 = vst.msk [vmem:[#allocation2 + $0x18] sm:$0xff] %vm269_vm4, %v2779_v8 }
 0x431   : > { %274 = vst.msk [vmem:[#allocation2 + $0x20] sm:$0xff] %vm269_vm4, %v2779_v8  ;;  %275 = vst.msk [vmem:[#allocation2 + $0x28] sm:$0xff] %vm269_vm4, %v2779_v8 }
 0x432   : > { %276 = vst.msk [vmem:[#allocation2 + $0x30] sm:$0xff] %vm269_vm4, %v2779_v8  ;;  %277 = vst.msk [vmem:[#allocation2 + $0x38] sm:$0xff] %vm269_vm4, %v2779_v8 }
 0x433   : > { %278 = vst.msk [vmem:[#allocation2 + $0x40] sm:$0xff] %vm269_vm4, %v2779_v8  ;;  %279 = vst.msk [vmem:[#allocation2 + $0x48] sm:$0xff] %vm269_vm4, %v2779_v8 }
 0x435   : > { %v2563_v21 = vpop.eup %2562 }
 0x436   : > { %v1128_v26 = vmul.f32 %v2563_v21, %v1080_v15  ;;  %v1120_v27 = vmul.f32 %v2563_v21, %v1072_v17  ;;  %v1121_v60 = vmul.f32 %v2563_v21, %v1073_v9  ;;  %v1122_v28 = vmul.f32 %v2563_v21, %v1074_v56 }
 0x437   : > { %v1123_v29 = vmul.f32 %v2563_v21, %v1075_v10  ;;  %v1124_v30 = vmul.f32 %v2563_v21, %v1076_v11  ;;  %v1125_v31 = vmul.f32 %v2563_v21, %v1077_v12  ;;  %v1126_v32 = vmul.f32 %v2563_v21, %v1078_v13 }
 0x438   : > { %v1134_v34 = vmul.f32 %v1133_v20, %v1120_v27  ;;  %v1135_v35 = vmul.f32 %v1133_v20, %v1121_v60  ;;  %v1136_v16 = vmul.f32 %v1133_v20, %v1122_v28  ;;  %v1127_v41 = vmul.f32 %v2563_v21, %v1079_v14 }
 0x439   : > { %v1137_v37 = vmul.f32 %v1133_v20, %v1123_v29  ;;  %v1138_v38 = vmul.f32 %v1133_v20, %v1124_v30  ;;  %v1139_v61 = vmul.f32 %v1133_v20, %v1125_v31  ;;  %v1140_v15 = vmul.f32 %v1133_v20, %v1126_v32 }
 0x43a   : > { %v1148_v40 = vadd.f32 %v1147_v22, %v1134_v34  ;;  %v1149_v25 = vadd.f32 %v1147_v22, %v1135_v35  ;;  %v1150_v42 = vadd.f32 %v1147_v22, %v1136_v16  ;;  %v1142_v12 = vmul.f32 %v1133_v20, %v1128_v26 }
 0x43b   : > { %v1151_v39 = vadd.f32 %v1147_v22, %v1137_v37  ;;  %v1152_v43 = vadd.f32 %v1147_v22, %v1138_v38  ;;  %v1153_v44 = vadd.f32 %v1147_v22, %v1139_v61  ;;  %v1154_v45 = vadd.f32 %v1147_v22, %v1140_v15 }
 0x43c   : > { %vm1158_vm8 = vcmp.ge.f32.partialorder %v1148_v40, 0.0  ;;  %v1168_v17 = vmul.f32 0.01, %v1148_v40  ;;  %vm1159_vm9 = vcmp.ge.f32.partialorder %v1149_v25, 0.0  ;;  %v1169_v9 = vmul.f32 0.01, %v1149_v25 }
 0x43d   : > { %vm1160_vm10 = vcmp.ge.f32.partialorder %v1150_v42, 0.0  ;;  %v1170_v56 = vmul.f32 0.01, %v1150_v42  ;;  %v1171_v13 = vmul.f32 0.01, %v1151_v39  ;;  %vm1161_vm11 = vcmp.ge.f32.partialorder %v1151_v39, 0.0 }
 0x43e   : > { %v1178_v10 = vsel %vm1158_vm8, %v1148_v40, %v1168_v17  ;;  %v1179_v11 = vsel %vm1159_vm9, %v1149_v25, %v1169_v9  ;;  %v1172_v46 = vmul.f32 0.01, %v1152_v43  ;;  %v1141_v47 = vmul.f32 %v1133_v20, %v1127_v41 }
 0x43f   : > { %2334 = vmatprep.mubr.msk.f32.mxu1 %vm306_vm0, %v1178_v10  ;;  %v1180_v14 = vsel %vm1160_vm10, %v1150_v42, %v1170_v56  ;;  %vm1162_vm12 = vcmp.ge.f32.partialorder %v1152_v43, 0.0  ;;  %v1129_v57 = vmul.f32 %v2563_v21, %v3178_v33  ;;  %v1181_v58 = vsel %vm1161_vm11, %v1151_v39, %v1171_v13 }
 0x440   : > { %2335 = vmatmul.mubr.msk.f32.vlgmr.msra.gmra.mrb[16].mxu1 %vm306_vm0, %v1179_v11  ;;  %v1173_v59 = vmul.f32 0.01, %v1153_v44  ;;  %v1155_v62 = vadd.f32 %v1147_v22, %v1141_v47  ;;  %v1182_v1 = vsel %vm1162_vm12, %v1152_v43, %v1172_v46  ;;  %vm1163_vm13 = vcmp.ge.f32.partialorder %v1153_v44, 0.0 }
 0x441   : > { %2337 = vmatprep.mubr.msk.f32.mxu1 %vm306_vm0, %v1180_v14  ;;  %v1143_v63 = vmul.f32 %v1133_v20, %v1129_v57  ;;  %v1174_v36 = vmul.f32 0.01, %v1154_v45  ;;  %v1156_v3 = vadd.f32 %v1147_v22, %v1142_v12  ;;  %vm1164_vm14 = vcmp.ge.f32.partialorder %v1154_v45, 0.0 }
 0x442   : > { %v1183_v2 = vsel %vm1163_vm13, %v1153_v44, %v1173_v59  ;;  %v1175_v0 = vmul.f32 0.01, %v1155_v62  ;;  %vm1165_vm15 = vcmp.ge.f32.partialorder %v1155_v62, 0.0  ;;  %v1196_v20 = vrot.slane %v3225_v54, %v1146_v19 }
 0x443   : > { %v1157_v4 = vadd.f32 %v1147_v22, %v1143_v63  ;;  %v1184_v5 = vsel %vm1164_vm14, %v1154_v45, %v1174_v36  ;;  %v1176_v33 = vmul.f32 0.01, %v1156_v3  ;;  %vm1166_vm2 = vcmp.ge.f32.partialorder %v1156_v3, 0.0 }
 0x444   : > { %2338 = vmatmul.mubr.msk.f32.gmra.mrb[18].mxu1 %vm306_vm0, %v1181_v58  ;;  %v1185_v6 = vsel %vm1165_vm15, %v1155_v62, %v1175_v0 }
 0x445   : > { %2340 = vmatprep.mubr.msk.f32.mxu1 %vm306_vm0, %v1182_v1  ;;  %v1177_v55 = vmul.f32 0.01, %v1157_v4  ;;  %v1186_v48 = vsel %vm1166_vm2, %v1156_v3, %v1176_v33  ;;  %vm1167_vm3 = vcmp.ge.f32.partialorder %v1157_v4, 0.0 }
 0x447   : > { %v1187_v49 = vsel %vm1167_vm3, %v1157_v4, %v1177_v55 }
 0x448   : > { %2341 = vmatmul.mubr.msk.f32.gmra.mrb[20].mxu1 %vm306_vm0, %v1183_v2 }
 0x449   : > { %2343 = vmatprep.mubr.msk.f32.mxu1 %vm306_vm0, %v1184_v5 }
 0x44c   : > { %2344 = vmatmul.mubr.msk.f32.gmra.mrb[22].mxu1 %vm306_vm0, %v1185_v6 }
 0x44d   : > { %2346 = vmatprep.mubr.msk.f32.mxu1 %vm306_vm0, %v1186_v48 }
 0x450   : > { %2347 = vmatmul.mubr.msk.f32.gmra.mrb[24].mxu1 %vm306_vm0, %v1187_v49 }
 0x513   : > { %v2336_v21 = vpop.f32.mrb[16].mxu1 }
 0x514   : > { %v1299_v22 = vadd.f32 %v2336_v21, %v1196_v20  ;;  %v1293_v26 = vpop.f32.mrb[17].mxu1 }
 0x515   : > { %v1294_v27 = vadd.f32 %v1293_v26, %v1196_v20 }
 0x516   : > { %v1343_v60 = vsel %vm306_vm0, %v1299_v22, 0.0 }
 0x517   : > { %v1342_v28 = vsel %vm306_vm0, %v1294_v27, 0.0  ;;  %v2339_v29 = vpop.f32.mrb[18].mxu1 }
 0x518   : > { %v1344_v30 = vadd.f32 %v1343_v60, %v1342_v28  ;;  %v1309_v31 = vadd.f32 %v2339_v29, %v1196_v20  ;;  %v1303_v32 = vpop.f32.mrb[19].mxu1 }
 0x519   : > { %v1304_v34 = vadd.f32 %v1303_v32, %v1196_v20 }
 0x51a   : > { %v1347_v19 = vsel %vm306_vm0, %v1309_v31, 0.0 }
 0x51b   : > { %v1345_v35 = vsel %vm306_vm0, %v1304_v34, 0.0  ;;  %v2342_v16 = vpop.f32.mrb[20].mxu1 }
 0x51c   : > { %v1346_v37 = vadd.f32 %v1345_v35, %v1344_v30  ;;  %v1319_v38 = vadd.f32 %v2342_v16, %v1196_v20  ;;  %v1313_v40 = vpop.f32.mrb[21].mxu1 }
 0x51d   : > { %v1314_v25 = vadd.f32 %v1313_v40, %v1196_v20 }
 0x51e   : > { %v1348_v42 = vadd.f32 %v1347_v19, %v1346_v37  ;;  %v1351_v17 = vsel %vm306_vm0, %v1319_v38, 0.0 }
 0x51f   : > { %v1349_v41 = vsel %vm306_vm0, %v1314_v25, 0.0  ;;  %v2345_v39 = vpop.f32.mrb[22].mxu1 }
 0x520   : > { %v1350_v43 = vadd.f32 %v1349_v41, %v1348_v42  ;;  %v1329_v61 = vadd.f32 %v2345_v39, %v1196_v20  ;;  %v1323_v15 = vpop.f32.mrb[23].mxu1 }
 0x521   : > { %v1324_v9 = vadd.f32 %v1323_v15, %v1196_v20 }
 0x522   : > { %v1352_v56 = vadd.f32 %v1351_v17, %v1350_v43  ;;  %v1355_v45 = vsel %vm306_vm0, %v1329_v61, 0.0 }
 0x523   : > { %v1353_v10 = vsel %vm306_vm0, %v1324_v9, 0.0  ;;  %v2348_v11 = vpop.f32.mrb[24].mxu1 }
 0x524   : > { %v1354_v12 = vadd.f32 %v1353_v10, %v1352_v56  ;;  %v1339_v13 = vadd.f32 %v2348_v11, %v1196_v20  ;;  %v1333_v44 = vpop.f32.mrb[25].mxu1 }
 0x525   : > { %v1334_v14 = vadd.f32 %v1333_v44, %v1196_v20 }
 0x526   : > { %v1356_v46 = vadd.f32 %v1355_v45, %v1354_v12  ;;  %v1359_v58 = vsel %vm469_vm1, %v1339_v13, 0.0  ;;  %v1442_v45 = vsub.s32 4, %v3065_v23 }
 0x527   : > { %v1357_v47 = vsel %vm306_vm0, %v1334_v14, 0.0 }
 0x528   : > { %v1358_v57 = vadd.f32 %v1357_v47, %v1356_v46 }
 0x52a   : > { %v1360_v59 = vadd.f32 %v1359_v58, %v1358_v57 }
 0x52c   : > { %v1361_v62 = vrot.slane %v1360_v59, 4 }
 0x52e   : > { %v1362_v63 = vadd.f32 %v1361_v62, %v1360_v59 }
 0x530   : > { %v1363_v1 = vrot.slane %v1362_v63, 2 }
 0x532   : > { %v1364_v36 = vadd.f32 %v1363_v1, %v1362_v63 }
 0x534   : > { %v1365_v3 = vrot.slane %v1364_v36, 1 }
 0x536   : > { %v1366_v2 = vadd.f32 %v1365_v3, %v1364_v36 }
 0x538   : > { %v1367_v0 = vmul.f32 0.013157895, %v1366_v2 }
 0x53a   : > { %v1368_v4 = vsub.f32 %v1294_v27, %v1367_v0  ;;  %v1369_v5 = vsub.f32 %v1299_v22, %v1367_v0  ;;  %v1370_v33 = vsub.f32 %v1304_v34, %v1367_v0  ;;  %v1371_v6 = vsub.f32 %v1309_v31, %v1367_v0 }
 0x53b   : > { %v1372_v55 = vsub.f32 %v1314_v25, %v1367_v0  ;;  %v1373_v48 = vsub.f32 %v1319_v38, %v1367_v0  ;;  %v1374_v49 = vsub.f32 %v1324_v9, %v1367_v0  ;;  %v1375_v18 = vsub.f32 %v1329_v61, %v1367_v0 }
 0x53c   : > { %v1376_v50 = vsub.f32 %v1334_v14, %v1367_v0  ;;  %v3240_v51 = vsub.f32 %v1339_v13, %v1367_v0  ;;  %v1378_v52 = vmul.f32 %v1368_v4, %v1368_v4  ;;  %v1379_v53 = vmul.f32 %v1369_v5, %v1369_v5  ;;  %v2567_v14 = vld [vmem:[#allocation10 + $0x8] sm:$0xff] }
 0x53d   : > { %v1380_v7 = vmul.f32 %v1370_v33, %v1370_v33  ;;  %v1381_v8 = vmul.f32 %v1371_v6, %v1371_v6  ;;  %v1382_v27 = vmul.f32 %v1372_v55, %v1372_v55  ;;  %v1383_v28 = vmul.f32 %v1373_v48, %v1373_v48 }
 0x53e   : > { %v1388_v20 = vsel %vm306_vm0, %v1378_v52, 0.0  ;;  %v1389_v21 = vsel %vm306_vm0, %v1379_v53, 0.0  ;;  %v1384_v31 = vmul.f32 %v1374_v49, %v1374_v49  ;;  %v1385_v35 = vmul.f32 %v1375_v18, %v1375_v18 }
 0x53f   : > { %v1390_v26 = vadd.f32 %v1389_v21, %v1388_v20  ;;  %v1391_v22 = vsel %vm306_vm0, %v1380_v7, 0.0  ;;  %v1393_v29 = vsel %vm306_vm0, %v1381_v8, 0.0  ;;  %v1395_v32 = vsel %vm306_vm0, %v1382_v27, 0.0 }
 0x540   : > { %v1397_v16 = vsel %vm306_vm0, %v1383_v28, 0.0  ;;  %v1386_v38 = vmul.f32 %v1376_v50, %v1376_v50  ;;  %v1399_v40 = vsel %vm306_vm0, %v1384_v31, 0.0  ;;  %v1387_v25 = vmul.f32 %v3240_v51, %v3240_v51 }
 0x541   : > { %v1392_v60 = vadd.f32 %v1391_v22, %v1390_v26  ;;  %v1401_v42 = vsel %vm306_vm0, %v1385_v35, 0.0  ;;  %v1429_v46 = vrot.slane %v2567_v14, %v304_v24  ;;  %v1443_v57 = vrot.slane %v2567_v14, %v1442_v45 }
 0x542   : > { %v1403_v39 = vsel %vm306_vm0, %v1386_v38, 0.0  ;;  %v1405_v61 = vsel %vm469_vm1, %v1387_v25, 0.0 }
 0x543   : > { %v1394_v30 = vadd.f32 %v1393_v29, %v1392_v60 }
 0x545   : > { %v1396_v34 = vadd.f32 %v1395_v32, %v1394_v30 }
 0x547   : > { %v1398_v37 = vadd.f32 %v1397_v16, %v1396_v34 }
 0x549   : > { %v1400_v19 = vadd.f32 %v1399_v40, %v1398_v37 }
 0x54b   : > { %v1402_v41 = vadd.f32 %v1401_v42, %v1400_v19 }
 0x54d   : > { %v1404_v43 = vadd.f32 %v1403_v39, %v1402_v41 }
 0x54f   : > { %v1406_v15 = vadd.f32 %v1405_v61, %v1404_v43 }
 0x551   : > { %v1407_v17 = vrot.slane %v1406_v15, 4 }
 0x553   : > { %v1408_v9 = vadd.f32 %v1407_v17, %v1406_v15 }
 0x555   : > { %v1409_v56 = vrot.slane %v1408_v9, 2 }
 0x557   : > { %v1410_v10 = vadd.f32 %v1409_v56, %v1408_v9  ;;  %v1492_v9 = vrot.slane %v3225_v54, %v1442_v45 }
 0x559   : > { %v1411_v11 = vrot.slane %v1410_v10, 1 }
 0x55b   : > { %v1412_v12 = vadd.f32 %v1411_v11, %v1410_v10 }
 0x55d   : > { %v1413_v13 = vmul.f32 0.013157895, %v1412_v12 }
 0x55f   : > { %v1414_v44 = vadd.f32 1e-05, %v1413_v13 }
 0x561   : > { %2564 = vrsqrt.f32 %v1414_v44 }
 0x56b   : > { %v2565_v47 = vpop.eup %2564 }
 0x56c   : > { %v1424_v58 = vmul.f32 %v2565_v47, %v1376_v50  ;;  %v1416_v59 = vmul.f32 %v2565_v47, %v1368_v4  ;;  %v1417_v62 = vmul.f32 %v2565_v47, %v1369_v5  ;;  %v1418_v63 = vmul.f32 %v2565_v47, %v1370_v33 }
 0x56d   : > { %v1419_v1 = vmul.f32 %v2565_v47, %v1371_v6  ;;  %v1420_v36 = vmul.f32 %v2565_v47, %v1372_v55  ;;  %v1421_v3 = vmul.f32 %v2565_v47, %v1373_v48  ;;  %v1422_v2 = vmul.f32 %v2565_v47, %v1374_v49 }
 0x56e   : > { %v1430_v0 = vmul.f32 %v1429_v46, %v1416_v59  ;;  %v1431_v52 = vmul.f32 %v1429_v46, %v1417_v62  ;;  %v1432_v53 = vmul.f32 %v1429_v46, %v1418_v63  ;;  %v1423_v26 = vmul.f32 %v2565_v47, %v1375_v18 }
 0x56f   : > { %v1433_v7 = vmul.f32 %v1429_v46, %v1419_v1  ;;  %v1434_v8 = vmul.f32 %v1429_v46, %v1420_v36  ;;  %v1435_v60 = vmul.f32 %v1429_v46, %v1421_v3  ;;  %v1436_v50 = vmul.f32 %v1429_v46, %v1422_v2 }
 0x570   : > { %v1444_v20 = vadd.f32 %v1443_v57, %v1430_v0  ;;  %v1445_v21 = vadd.f32 %v1443_v57, %v1431_v52  ;;  %v1446_v24 = vadd.f32 %v1443_v57, %v1432_v53  ;;  %v1438_v48 = vmul.f32 %v1429_v46, %v1424_v58 }
 0x571   : > { %v1447_v27 = vadd.f32 %v1443_v57, %v1433_v7  ;;  %v1448_v22 = vadd.f32 %v1443_v57, %v1434_v8  ;;  %v1449_v28 = vadd.f32 %v1443_v57, %v1435_v60  ;;  %v1450_v29 = vadd.f32 %v1443_v57, %v1436_v50 }
 0x572   : > { %vm1454_vm1 = vcmp.ge.f32.partialorder %v1444_v20, 0.0  ;;  %v1464_v4 = vmul.f32 0.01, %v1444_v20  ;;  %vm1455_vm5 = vcmp.ge.f32.partialorder %v1445_v21, 0.0  ;;  %v1465_v5 = vmul.f32 0.01, %v1445_v21 }
 0x573   : > { %vm1456_vm6 = vcmp.ge.f32.partialorder %v1446_v24, 0.0  ;;  %v1466_v33 = vmul.f32 0.01, %v1446_v24  ;;  %v1467_v49 = vmul.f32 0.01, %v1447_v27  ;;  %vm1457_vm7 = vcmp.ge.f32.partialorder %v1447_v27, 0.0 }
 0x574   : > { %v1474_v6 = vsel %vm1454_vm1, %v1444_v20, %v1464_v4  ;;  %v1475_v55 = vsel %vm1455_vm5, %v1445_v21, %v1465_v5  ;;  %v1468_v30 = vmul.f32 0.01, %v1448_v22  ;;  %v1437_v31 = vmul.f32 %v1429_v46, %v1423_v26 }
 0x575   : > { %2357 = vmatprep.mubr.msk.f32.mxu0 %vm306_vm0, %v1474_v6  ;;  %v1476_v18 = vsel %vm1456_vm6, %v1446_v24, %v1466_v33  ;;  %vm1458_vm8 = vcmp.ge.f32.partialorder %v1448_v22, 0.0  ;;  %v1425_v32 = vmul.f32 %v2565_v47, %v3240_v51  ;;  %v1477_v34 = vsel %vm1457_vm7, %v1447_v27, %v1467_v49 }
 0x576   : > { %2358 = vmatmul.mubr.msk.f32.vlgmr.msra.gmra.mrb[14].mxu0 %vm306_vm0, %v1475_v55  ;;  %v1469_v35 = vmul.f32 0.01, %v1449_v28  ;;  %v1451_v16 = vadd.f32 %v1443_v57, %v1437_v31  ;;  %v1478_v38 = vsel %vm1458_vm8, %v1448_v22, %v1468_v30  ;;  %vm1459_vm9 = vcmp.ge.f32.partialorder %v1449_v28, 0.0 }
 0x577   : > { %2360 = vmatprep.mubr.msk.f32.mxu0 %vm306_vm0, %v1476_v18  ;;  %v1439_v37 = vmul.f32 %v1429_v46, %v1425_v32  ;;  %v1470_v40 = vmul.f32 0.01, %v1450_v29  ;;  %v1452_v19 = vadd.f32 %v1443_v57, %v1438_v48  ;;  %vm1460_vm10 = vcmp.ge.f32.partialorder %v1450_v29, 0.0 }
 0x578   : > { %v1479_v25 = vsel %vm1459_vm9, %v1449_v28, %v1469_v35  ;;  %v1471_v42 = vmul.f32 0.01, %v1451_v16  ;;  %vm1461_vm11 = vcmp.ge.f32.partialorder %v1451_v16, 0.0 }
 0x579   : > { %v1453_v41 = vadd.f32 %v1443_v57, %v1439_v37  ;;  %v1480_v39 = vsel %vm1460_vm10, %v1450_v29, %v1470_v40  ;;  %v1472_v51 = vmul.f32 0.01, %v1452_v19  ;;  %vm1462_vm12 = vcmp.ge.f32.partialorder %v1452_v19, 0.0 }
 0x57a   : > { %2361 = vmatmul.mubr.msk.f32.gmra.mrb[16].mxu0 %vm306_vm0, %v1477_v34  ;;  %v1481_v43 = vsel %vm1461_vm11, %v1451_v16, %v1471_v42 }
 0x57b   : > { %2363 = vmatprep.mubr.msk.f32.mxu0 %vm306_vm0, %v1478_v38  ;;  %v1473_v61 = vmul.f32 0.01, %v1453_v41  ;;  %v1482_v15 = vsel %vm1462_vm12, %v1452_v19, %v1472_v51  ;;  %vm1463_vm13 = vcmp.ge.f32.partialorder %v1453_v41, 0.0 }
 0x57d   : > { %v1483_v17 = vsel %vm1463_vm13, %v1453_v41, %v1473_v61 }
 0x57e   : > { %2364 = vmatmul.mubr.msk.f32.gmra.mrb[18].mxu0 %vm306_vm0, %v1479_v25 }
 0x57f   : > { %2366 = vmatprep.mubr.msk.f32.mxu0 %vm306_vm0, %v1480_v39 }
 0x582   : > { %2367 = vmatmul.mubr.msk.f32.gmra.mrb[20].mxu0 %vm306_vm0, %v1481_v43 }
 0x583   : > { %2369 = vmatprep.mubr.msk.f32.mxu0 %vm306_vm0, %v1482_v15 }
 0x586   : > { %2370 = vmatmul.mubr.msk.f32.gmra.mrb[22].mxu0 %vm306_vm0, %v1483_v17  ;;  %vm1667_vm0 = vcmask 3072  }
 0x649   : > { %v2359_v56 = vpop.f32.mrb[14].mxu0 }
 0x64a   : > { %v1595_v10 = vadd.f32 %v2359_v56, %v1492_v9  ;;  %v1589_v11 = vpop.f32.mrb[15].mxu0 }
 0x64b   : > { %v1590_v12 = vadd.f32 %v1589_v11, %v1492_v9 }
 0x64c   : > { %v1639_v13 = vmul.f32 %v1595_v10, %v1595_v10 }
 0x64d   : > { %v1638_v44 = vmul.f32 %v1590_v12, %v1590_v12  ;;  %v2362_v14 = vpop.f32.mrb[16].mxu0 }
 0x64e   : > { %v1649_v46 = vadd.f32 0.01, %v1639_v13  ;;  %v1605_v47 = vadd.f32 %v2362_v14, %v1492_v9  ;;  %v1599_v57 = vpop.f32.mrb[17].mxu0 }
 0x64f   : > { %v1648_v58 = vadd.f32 0.01, %v1638_v44  ;;  %v1600_v59 = vadd.f32 %v1599_v57, %v1492_v9 }
 0x650   : > { %1659 = vst.msk [vmem:[#allocation2 + $0x8] sm:$0xff] %vm269_vm4, %v1649_v46  ;;  %v1641_v62 = vmul.f32 %v1605_v47, %v1605_v47 }
 0x651   : > { %1658 = vst.msk [vmem:[#allocation2] sm:$0xff] %vm269_vm4, %v1648_v58  ;;  %v1640_v23 = vmul.f32 %v1600_v59, %v1600_v59  ;;  %v2365_v63 = vpop.f32.mrb[18].mxu0 }
 0x652   : > { %v1651_v54 = vadd.f32 0.01, %v1641_v62  ;;  %v1615_v45 = vadd.f32 %v2365_v63, %v1492_v9  ;;  %v1609_v1 = vpop.f32.mrb[19].mxu0 }
 0x653   : > { %v1650_v36 = vadd.f32 0.01, %v1640_v23  ;;  %v1610_v3 = vadd.f32 %v1609_v1, %v1492_v9 }
 0x654   : > { %1661 = vst.msk [vmem:[#allocation2 + $0x18] sm:$0xff] %vm269_vm4, %v1651_v54  ;;  %v1643_v2 = vmul.f32 %v1615_v45, %v1615_v45 }
 0x655   : > { %1660 = vst.msk [vmem:[#allocation2 + $0x10] sm:$0xff] %vm269_vm4, %v1650_v36  ;;  %v1642_v0 = vmul.f32 %v1610_v3, %v1610_v3  ;;  %v2368_v52 = vpop.f32.mrb[20].mxu0 }
 0x656   : > { %v1653_v53 = vadd.f32 0.01, %v1643_v2  ;;  %v1625_v7 = vadd.f32 %v2368_v52, %v1492_v9  ;;  %v1619_v8 = vpop.f32.mrb[21].mxu0 }
 0x657   : > { %v1652_v20 = vadd.f32 0.01, %v1642_v0  ;;  %v1620_v21 = vadd.f32 %v1619_v8, %v1492_v9 }
 0x658   : > { %1663 = vst.msk [vmem:[#allocation2 + $0x28] sm:$0xff] %vm269_vm4, %v1653_v53  ;;  %v1645_v24 = vmul.f32 %v1625_v7, %v1625_v7 }
 0x659   : > { %1662 = vst.msk [vmem:[#allocation2 + $0x20] sm:$0xff] %vm269_vm4, %v1652_v20  ;;  %v1644_v26 = vmul.f32 %v1620_v21, %v1620_v21  ;;  %v2371_v27 = vpop.f32.mrb[22].mxu0 }
 0x65a   : > { %v1655_v22 = vadd.f32 0.01, %v1645_v24  ;;  %v1635_v60 = vadd.f32 %v2371_v27, %v1492_v9  ;;  %v1629_v50 = vpop.f32.mrb[23].mxu0 }
 0x65b   : > { %v1654_v4 = vadd.f32 0.01, %v1644_v26  ;;  %v1630_v5 = vadd.f32 %v1629_v50, %v1492_v9 }
 0x65c   : > { %1665 = vst.msk [vmem:[#allocation2 + $0x38] sm:$0xff] %vm269_vm4, %v1655_v22  ;;  %v1647_v33 = vmul.f32 %v1635_v60, %v1635_v60 }
 0x65d   : > { %1664 = vst.msk [vmem:[#allocation2 + $0x30] sm:$0xff] %vm269_vm4, %v1654_v4  ;;  %v1646_v6 = vmul.f32 %v1630_v5, %v1630_v5 }
 0x65e   : > { %v1657_v55 = vadd.f32 0.01, %v1647_v33 }
 0x65f   : > { %v1656_v48 = vadd.f32 0.01, %v1646_v6 }
 0x660   : > { %1668 = vst.msk [vmem:[#allocation2 + $0x48] sm:$0xf] %vm1667_vm0, %v1657_v55 }
 0x661   : > { %1666 = vst.msk [vmem:[#allocation2 + $0x40] sm:$0xff] %vm269_vm4, %v1656_v48 }
 0x662 PF: > { %s1669_s8 = sld [smem:[#allocation4 + %s2847_s0]]  ;;  %v2780_v49 = vmov 0   ;;  %v1677_v34 = vld [vmem:[%s3044_s7] sm:$0xff]  ;;  %v1678_v35 = vld [vmem:[%s3044_s7 + $0x8] sm:$0xff]  ;;  %v1679_v16 = vld [vmem:[%s3044_s7 + $0x10] sm:$0xff]  ;;  %vm1751_vm14 = vcmask 392192  }
 0x663   : > { %2569 = vset.pattern.permute.xlu1 %v2780_v49  ;;  %2568 = vset.pattern.permute.xlu0 %v2780_v49  ;;  %v1680_v37 = vld [vmem:[%s3044_s7 + $0x18] sm:$0xff]  ;;  %v1681_v38 = vld [vmem:[%s3044_s7 + $0x20] sm:$0xff]  ;;  %v1682_v40 = vld [vmem:[%s3044_s7 + $0x28] sm:$0xff]  ;;  %s2164_s24 = sshll.u32 %s2847_s0, 11  ;;  %s1975_s12 = sshll.u32 %s3051_s22, 4  ;;  %s3326_s12 = int_to_ptr.vmem [resolvable:$true] %s1975_s12 }
 0x664   : > { %s3324_s19 = scalar_lea.hbm %s3377_s5, %s2164_s24  ;;  %s1962_s11 = scalar_lea.sflag [#allocation7], %s3040_s16 }
 0x665   : > { %s2694_s17 = scalar_lea.vmem %s3326_s12, 2048  ;;  %s2781_s0 = smov [#allocation13]  }
 0x666   : > { %p2695_p13 = scmp.ne.s32.totalorder %s3326_s12, %s2694_s17  ;;  %s2698_s21 = sshll.u32 %s2781_s0, 4  ;;  %s2699_s21 = int_to_ptr.vmem [resolvable:$false] %s2698_s21 }
 0x667   : > { %s2700_s13 = scalar_lea.vmem %s2699_s21, 4096  ;;  %p2701_p4 = scmp.lt.s32.totalorder %s3326_s12, %s2699_s21 }
 0x668   : > { %s1670_s15 = scalar_lea.vmem [#allocation2], %s1669_s8  ;;  %p2696_p10 = pnand %p2695_p13, %p2981_p8 }
 0x669   : > { %v1673_v28 = vld [vmem:[%s1670_s15 + $0x10] sm:$0xff]  ;;  %v1671_v29 = vld [vmem:[%s1670_s15] sm:$0xff]  ;;  %v1674_v18 = vld [vmem:[%s1670_s15 + $0x18] sm:$0xff]  ;;  %p2702_p5 = scmp.lt.s32.totalorder %s2700_s13, %s2694_s17 }
 0x66a   : > { %1695 = vperm.xlu1 %2569, %v1673_v28   ;;  %1685 = vperm.xlu0 %2568, %v1671_v29   ;;  %v1672_v30 = vld [vmem:[%s1670_s15 + $0x8] sm:$0xff]  ;;  %v1675_v32 = vld [vmem:[%s1670_s15 + $0x20] sm:$0xff]  ;;  %p2697_p2 = pneg %p2696_p10 }
 0x66b   : > { %v1676_v31 = vld [vmem:[%s1670_s15 + $0x28] sm:$0xff]  ;;  %p2703_p7 = por %p2702_p5, %p2701_p4 }
 0x66d   : > { %p2704_p0 = pnand %p2703_p7, %p2697_p2 }
 0x66e   : > { %1700 = vperm.xlu1 %2569, %v1674_v18   ;;  %1690 = vperm.xlu0 %2568, %v1672_v30  }
 0x672   : > { %1710 = vperm.xlu1 %2569, %v1676_v31   ;;  %1705 = vperm.xlu0 %2568, %v1675_v32  }
 0x690   : > { %1719 = vxpose.xlu0.b32.start [1/6] (short) %v1677_v34, 128 }
 0x694   : > { %1720 = vxpose.xlu0.b32.cont [2/6] (short) %v1678_v35, 128 }
 0x698   : > { %1721 = vxpose.xlu0.b32.cont [3/6] (short) %v1679_v16, 128 }
 0x69c   : > { %1722 = vxpose.xlu0.b32.cont [4/6] (short) %v1680_v37, 128 }
 0x6a0   : > { %1723 = vxpose.xlu0.b32.cont [5/6] (short) %v1681_v38, 128 }
 0x6a4   : > { %1724 = vxpose.xlu0.b32.end [6/6] (short) %v1682_v40, 128 }
 0x6e9   : > { %v1696_v19 = vpop.permute.xlu1 %1695  ;;  %v1686_v25 = vpop.permute.xlu0 %1685 }
 0x6ea   : > { %v1715_v42 = vmul.f32 %v1696_v19, %v1679_v16  ;;  %v1713_v51 = vmul.f32 %v1686_v25, %v1677_v34 }
 0x6ed   : > { %v1701_v41 = vpop.permute.xlu1 %1700  ;;  %v1691_v39 = vpop.permute.xlu0 %1690 }
 0x6ee   : > { %v1716_v43 = vmul.f32 %v1701_v41, %v1680_v37  ;;  %v1714_v61 = vmul.f32 %v1691_v39, %v1678_v35 }
 0x6f0   : > { %v2452_v15 = vpack.c.bf16 %v1716_v43, %v1715_v42  ;;  %v2448_v17 = vpack.c.bf16 %v1714_v61, %v1713_v51 }
 0x6f1   : > { %v1711_v9 = vpop.permute.xlu1 %1710  ;;  %v1706_v56 = vpop.permute.xlu0 %1705 }
 0x6f2   : > { %v1718_v10 = vmul.f32 %v1711_v9, %v1682_v40  ;;  %v1717_v11 = vmul.f32 %v1706_v56, %v1681_v38  ;;  %2449 = vmatprep.subr.bf16.mxu0 %v2448_v17  ;;  %2464 = vmatprep.subr.bf16.mxu1 %v2448_v17 }
 0x6f3   : > { %2451 = vmatpush3.bf16.msra.mxu0 %v2448_v17  ;;  %2467 = vmatpush3.bf16.msra.mxu1 %v2448_v17 }
 0x6f4   : > { %2453 = vmatprep.subr.bf16.mxu0 %v2452_v15  ;;  %2465 = vmatprep.subr.bf16.mxu1 %v2452_v15  ;;  %v2456_v12 = vpack.c.bf16 %v1718_v10, %v1717_v11 }
 0x6f7   : > { %2455 = vmatpush3.bf16.msra.mxu0 %v2452_v15  ;;  %2468 = vmatpush3.bf16.msra.mxu1 %v2452_v15 }
 0x6f8   : > { %2457 = vmatprep.subr.bf16.mxu0 %v2456_v12  ;;  %2466 = vmatprep.subr.bf16.mxu1 %v2456_v12 }
 0x6fb   : > { %2459 = vmatpush3.bf16.msra.mxu0 %v2456_v12  ;;  %2469 = vmatpush3.bf16.msra.mxu1 %v2456_v12 }
 0x710   : > { %v1735_v13 = vpop.trf.xlu0 }
 0x711   : > { %2384 = vmatprep.mubr.msk.f32.mxu0 %vm1751_vm14, %v1735_v13 }
 0x714   : > { %v1736_v44 = vpop.trf.xlu0 }
 0x715   : > { %2385 = vmatmul.mubr.msk.f32.vlgmr.msra.gmra.mrb[0].mxu0 %vm1751_vm14, %v1736_v44 }
 0x718   : > { %v1737_v14 = vpop.trf.xlu0 }
 0x719   : > { %2387 = vmatprep.mubr.msk.f32.mxu0 %vm1751_vm14, %v1737_v14 }
 0x71c   : > { %v1738_v46 = vpop.trf.xlu0 }
 0x71d   : > { %2388 = vmatmul.mubr.msk.f32.gmra.mrb[2].mxu0 %vm1751_vm14, %v1738_v46 }
 0x720   : > { %v1739_v47 = vpop.trf.xlu0 }
 0x721   : > { %2390 = vmatprep.mubr.msk.f32.mxu0 %vm1751_vm14, %v1739_v47 }
 0x724   : > { %v1740_v57 = vpop.trf.xlu0 }
 0x725   : > { %2391 = vmatmul.mubr.msk.f32.gmra.mrb[4].mxu0 %vm1751_vm14, %v1740_v57 }
 0x728   : > { %v1741_v58 = vpop.trf.xlu0 }
 0x729   : > { %2393 = vmatprep.mubr.msk.f32.mxu0 %vm1751_vm14, %v1741_v58 }
 0x72c   : > { %v1742_v59 = vpop.trf.xlu0 }
 0x72d   : > { %2394 = vmatmul.mubr.msk.f32.gmra.mrb[6].mxu0 %vm1751_vm14, %v1742_v59 }
 0x730   : > { %v1743_v62 = vpop.trf.xlu0 }
 0x731   : > { %2396 = vmatprep.mubr.msk.f32.mxu1 %vm1751_vm14, %v1743_v62 }
 0x734   : > { %v1744_v23 = vpop.trf.xlu0 }
 0x735   : > { %2397 = vmatmul.mubr.msk.f32.vlgmr.msra.gmra.mrb[0].mxu1 %vm1751_vm14, %v1744_v23 }
 0x738   : > { %v1745_v63 = vpop.trf.xlu0 }
 0x739   : > { %2399 = vmatprep.mubr.msk.f32.mxu1 %vm1751_vm14, %v1745_v63 }
 0x73c   : > { %v1746_v54 = vpop.trf.xlu0 }
 0x73d   : > { %2400 = vmatmul.mubr.msk.f32.gmra.mrb[2].mxu1 %vm1751_vm14, %v1746_v54 }
 0x740   : > { %v1747_v45 = vpop.trf.xlu0 }
 0x741   : > { %2402 = vmatprep.mubr.msk.f32.mxu1 %vm1751_vm14, %v1747_v45 }
 0x744   : > { %v1748_v1 = vpop.trf.xlu0 }
 0x745   : > { %2403 = vmatmul.mubr.msk.f32.gmra.mrb[4].mxu1 %vm1751_vm14, %v1748_v1 }
 0x748   : > { %v1749_v36 = vpop.trf.xlu0 }
 0x749   : > { %2405 = vmatprep.mubr.msk.f32.mxu1 %vm1751_vm14, %v1749_v36 }
 0x74c   : > { %v1750_v3 = vpop.trf.xlu0 }
 0x74d   : > { %2406 = vmatmul.mubr.msk.f32.gmra.mrb[6].mxu1 %vm1751_vm14, %v1750_v3 }
 0x7e8   : > { %v2386_v2 = vpop.f32.mrb[0].mxu0 }
 0x7e9   : > { %1946 = vst [vmem:[%s3051_s22 + $0x8] sm:$0xff] %v2386_v2  ;;  %v1866_v0 = vpop.f32.mrb[1].mxu0 }
 0x7ea   : > { %1945 = vst [vmem:[%s3051_s22] sm:$0xff] %v1866_v0 }
 0x7f0   : > { %v2389_v52 = vpop.f32.mrb[2].mxu0 }
 0x7f1   : > { %1948 = vst [vmem:[%s3051_s22 + $0x18] sm:$0xff] %v2389_v52  ;;  %v1876_v53 = vpop.f32.mrb[3].mxu0 }
 0x7f2   : > { %1947 = vst [vmem:[%s3051_s22 + $0x10] sm:$0xff] %v1876_v53 }
 0x7f8   : > { %v2392_v7 = vpop.f32.mrb[4].mxu0 }
 0x7f9   : > { %1950 = vst [vmem:[%s3051_s22 + $0x28] sm:$0xff] %v2392_v7  ;;  %v1886_v8 = vpop.f32.mrb[5].mxu0 }
 0x7fa   : > { %1949 = vst [vmem:[%s3051_s22 + $0x20] sm:$0xff] %v1886_v8 }
 0x800   : > { %v2395_v20 = vpop.f32.mrb[6].mxu0 }
 0x801   : > { %1952 = vst [vmem:[%s3051_s22 + $0x38] sm:$0xff] %v2395_v20  ;;  %v1896_v21 = vpop.f32.mrb[7].mxu0 }
 0x802   : > { %1951 = vst [vmem:[%s3051_s22 + $0x30] sm:$0xff] %v1896_v21 }
 0x808   : > { %v2398_v24 = vpop.f32.mrb[0].mxu1 }
 0x809   : > { %1954 = vst [vmem:[%s3051_s22 + $0x48] sm:$0xff] %v2398_v24  ;;  %v1906_v26 = vpop.f32.mrb[1].mxu1 }
 0x80a   : > { %1953 = vst [vmem:[%s3051_s22 + $0x40] sm:$0xff] %v1906_v26 }
 0x810   : > { %v2401_v27 = vpop.f32.mrb[2].mxu1 }
 0x811   : > { %1956 = vst [vmem:[%s3051_s22 + $0x58] sm:$0xff] %v2401_v27  ;;  %v1916_v22 = vpop.f32.mrb[3].mxu1 }
 0x812   : > { %1955 = vst [vmem:[%s3051_s22 + $0x50] sm:$0xff] %v1916_v22 }
 0x818   : > { %v2404_v60 = vpop.f32.mrb[4].mxu1 }
 0x819   : > { %1958 = vst [vmem:[%s3051_s22 + $0x68] sm:$0xff] %v2404_v60  ;;  %v1926_v50 = vpop.f32.mrb[5].mxu1 }
 0x81a   : > { %1957 = vst [vmem:[%s3051_s22 + $0x60] sm:$0xff] %v1926_v50 }
 0x820   : > { %v2407_v4 = vpop.f32.mrb[6].mxu1 }
 0x821   : > { %1960 = vst [vmem:[%s3051_s22 + $0x78] sm:$0xff] %v2407_v4  ;;  %v1936_v5 = vpop.f32.mrb[7].mxu1 }
 0x822   : > { %1959 = vst [vmem:[%s3051_s22 + $0x70] sm:$0xff] %v1936_v5 }
 0x823   : > { %2707 = shalt.err (!%p2704_p0)
}
 0x824   : > { %s2708_s10 = scalar_lea.hbm %s3324_s19, 2048  ;;  %s2712_s20 = scalar_lea.hbm %s3377_s5, 4096 }
 0x825   : > { %p2709_p6 = scmp.ne.s32.totalorder %s3324_s19, %s2708_s10  ;;  %p2713_p9 = scmp.lt.u32.totalorder %s3324_s19, %s3377_s5 }
 0x826   : > { %p2714_p1 = scmp.lt.u32.totalorder %s2712_s20, %s2708_s10  ;;  %p2716_p13 = scmp.lt.u32.totalorder %s2708_s10, %s3324_s19 }
 0x827   : > { %p2710_p12 = pnand %p2709_p6, %p2981_p8 }
 0x828   : > { %p2715_p11 = por %p2714_p1, %p2713_p9 }
 0x829   : > { %p2711_p3 = pneg %p2710_p12 }
 0x82a   : > { %p2717_p10 = por %p2716_p13, %p2715_p11 }
 0x82c   : > { %p2718_p2 = pnand %p2717_p10, %p2711_p3 }
 0x82e   : > { %2721 = shalt.err (!%p2718_p2)
}
 0x82f   : > { %s2782_s15 = smov 128   ;;  %s2783_s24 = smov 8  }
 0x830   : > { %2487 = dma.vmem_to_hbm [thread:$0]  (%p2981_p8), %s3326_s12, 2048, %s3324_s19, %s1962_s11, %s2782_s15, %s2782_s15, %s2783_s24  }
 0x831 PF: > { %s1990_s14 = sand.u32 1, %s2758_s28   ;;  %p3396_p4 = scmp.ne.s32.totalorder %s3382_s9, 0 }
 0x832   : > { %p3397_p5 = scmp.ge.s32.totalorder %s2770_s6, 2  ;;  %s1991_s18 = scalar_lea.sflag [#allocation7], %s1990_s14 }
 0x834   : > { %p2504_p7 = pnand %p3397_p5, %p3396_p4 }
 0x836   : > { %2753 = dma.done.wait (!%p2504_p7), %s1991_s18, 2048  }
 0x837   : > { %2755 = vsyncadd (!%p2504_p7), %s1991_s18, 4294965248  ;;  %p24_p0 = scmp.ge.s32.totalorder %s2967_s23, 4   ;;  %s3398_s28 = smov %s2762_s29 }
 0x838   : > { %s3399_s29 = smov %s2766_s30  ;;  %s3400_s30 = smov %s2977_s25 }
 0x839   : > { %s3401_s6 = smov %s2967_s23  ;;  %26 = sbr.rel (!%p24_p0) target bundleno = 19 (0x13), region = 103 }
 0x840   :  { %1996 = vsyncpa [#allocation6], 1 }
 0x841   :  { %1998 = vsyncpa [#allocation6 + $0x1], 1 }
 0x842   :  { %1999 = vsyncpa [#allocation9], 1 }
 0x843   :  { %2000 = vsyncpa [#allocation12], 1 }
 0x844   :  { %2002 = vsyncpa [#allocation12 + $0x1], 1 }
 0x845   :  { %2003 = vsyncpa [#allocation7], 1 }
 0x846   :  { %2005 = vsyncpa [#allocation7 + $0x1], 1 }

// kernel: forward.5
= control target key start
LH: loop header
LB: loop body
LE: loop exit
PB: predicated region body
PF: predicated region fallthrough
CT: control target
= control target key end

     0   :  { %9 = vsyncpa [#allocation4], 0  ;;  %s2207_s0 = inlined_call_operand.hbm [shape: f32[16,32], index: 0, kind: input, shape index: {}]   ;;  %s2208_s1 = inlined_call_operand.hbm [shape: f32[5,32,32], index: 1, kind: input, shape index: {}]   ;;  %s2209_s2 = inlined_call_operand.hbm [shape: f32[16,32], index: 2, kind: input, shape index: {}]   ;;  %s2210_s3 = inlined_call_operand.hbm [shape: f32[2,128,8], index: 3, kind: input, shape index: {}]   ;;  %s2211_s4 = inlined_call_operand.hbm [shape: f32[2,128,32], index: 4, kind: output, shape index: {}]  }
   0x1   :  { %10 = vsyncpa [#allocation7], 0 }
   0x2   :  { %11 = vsyncpa [#allocation10], 0 }
   0x3   :  { %13 = vsyncpa [#allocation10 + $0x1], 0 }
   0x4   :  { %14 = vsyncpa [#allocation5], 0 }
   0x5   :  { %16 = vsyncpa [#allocation5 + $0x1], 0  ;;  %s1804_s15 = smov 0   ;;  %s1806_s16 = smov 0  }
   0x6   :  { %s1808_s17 = smov 0   ;;  %s1810_s18 = smov 0  }
   0x7 LB: > { %s1825_s19 = sadd.s32 4294967295, %s1768_s18   ;;  %s1271_s20 = sadd.s32 4294967294, %s1768_s18   ;;  %s1768_s18 = sphi %s1810_s18, %s2235_s18   ;;  %s1764_s17 = sphi %s1808_s17, %s2234_s17   ;;  %s1760_s16 = sphi %s1806_s16, %s2233_s16   ;;  %s1756_s15 = sphi %s1804_s15, %s2232_s15  }
   0x8   : > { %p105_p0 = scmp.ne.s32.totalorder %s1760_s16, %s1756_s15  ;;  %p2212_p1 = scmp.eq.s32.totalorder %s1825_s19, 0 }
   0x9   : > { %p135_p3 = scmp.eq.s32.totalorder %s1271_s20, 1  ;;  %p1272_p5 = scmp.ge.s32.totalorder %s1768_s18, 1 }
   0xa   : > { %p1834_p4 = por %p2212_p1, %p105_p0  ;;  %p142_p7 = scmp.lt.s32.totalorder %s1768_s18, 3 }
   0xb   : > { %p1839_p6 = por %p135_p3, %p105_p0  ;;  %s1770_s24 = smov [#allocation6]  }
   0xc   : > { %s2215_s21 = scalar_select %p1834_p4, 1, 0 }
   0xd   : > { %s2216_s22 = scalar_select %p1839_p6, 1, 0 }
   0xe   : > { %p1845_p9 = pnand %p1272_p5, %p142_p7  ;;  %s167_s25 = sshll.u32 %s1770_s24, 4  ;;  %s1852_s25 = int_to_ptr.vmem [resolvable:$true] %s167_s25 }
   0xf   : > { %s1771_s27 = smov [#allocation3]   ;;  %s1772_s29 = smov [#allocation8]  }
  0x10   : > { %s2217_s23 = scalar_select %p1845_p9, 1, 0 }
  0x11   : > { %p1507_p11 = pneg %p1845_p9  ;;  %s154_s28 = sshll.u32 %s1771_s27, 4  ;;  %s1860_s28 = int_to_ptr.vmem [resolvable:$true] %s154_s28 }
  0x12   : > { %s1862_s30 = sshll.u32 %s1772_s29, 4  ;;  %s1580_s7 = scalar_lea.hbm %s2208_s1, 2560  ;;  %s181_s30 = int_to_ptr.vmem [resolvable:$true] %s1862_s30 }
  0x13   : > { %p1856_p12 = pnand %p1507_p11, %p2212_p1  ;;  %p1581_p13 = scmp.ne.s32.totalorder %s2208_s1, %s1580_s7 }
  0x14   : > { %p1587_p7 = scmp.lt.u32.totalorder %s1580_s7, %s2208_s1 }
  0x15   : > { %p1872_p0 = pneg %p1856_p12 }
  0x17   : > { %p1583_p3 = pnand %p1872_p0, %p1581_p13 }
  0x19   : > { %p1584_p5 = pneg %p1583_p3 }
  0x1b   : > { %p1589_p11 = pnand %p1587_p7, %p1584_p5 }
  0x1d   : > { %1592 = shalt.err (!%p1589_p11)
}
  0x1e   : > { %s1593_s13 = scalar_lea.vmem %s1852_s25, 2560  ;;  %p1601_p2 = scmp.lt.s32.totalorder %s1852_s25, %s1852_s25 }
  0x1f   : > { %p1594_p10 = scmp.ne.s32.totalorder %s1852_s25, %s1593_s13  ;;  %p1602_p6 = scmp.lt.s32.totalorder %s1593_s13, %s1593_s13 }
  0x21   : > { %p1596_p8 = pnand %p1594_p10, %p1872_p0  ;;  %p1603_p13 = por %p1602_p6, %p1601_p2 }
  0x23   : > { %p1597_p1 = pneg %p1596_p8 }
  0x25   : > { %p1604_p3 = pnand %p1603_p13, %p1597_p1 }
  0x27   : > { %1607 = shalt.err (!%p1604_p3)
}
  0x28   : > { %s1773_s14 = smov 128   ;;  %s1774_s20 = smov 8  }
  0x29   : > { %1513 = dma.hbm_to_vmem [thread:$0]  (!%p1856_p12), %s2208_s1, 2560, %s1852_s25, [#allocation7], %s1773_s14, %s1773_s14, %s1774_s20  }
  0x2a   : > { %s1608_s6 = scalar_lea.hbm %s2207_s0, 256 }
  0x2b   : > { %p1609_p1 = scmp.ne.s32.totalorder %s2207_s0, %s1608_s6  ;;  %p1615_p8 = scmp.lt.u32.totalorder %s1608_s6, %s2207_s0 }
  0x2d   : > { %p1611_p2 = pnand %p1609_p1, %p1872_p0 }
  0x2f   : > { %p1612_p6 = pneg %p1611_p2 }
  0x31   : > { %p1617_p10 = pnand %p1615_p8, %p1612_p6 }
  0x33   : > { %1620 = shalt.err (!%p1617_p10)
}
  0x34   : > { %s1621_s25 = scalar_lea.vmem %s1860_s28, 256  ;;  %p1629_p13 = scmp.lt.s32.totalorder %s1860_s28, %s1860_s28 }
  0x35   : > { %p1622_p5 = scmp.ne.s32.totalorder %s1860_s28, %s1621_s25  ;;  %p1630_p3 = scmp.lt.s32.totalorder %s1621_s25, %s1621_s25 }
  0x37   : > { %p1624_p7 = pnand %p1622_p5, %p1872_p0  ;;  %p1631_p1 = por %p1630_p3, %p1629_p13 }
  0x39   : > { %p1625_p11 = pneg %p1624_p7 }
  0x3b   : > { %p1632_p2 = pnand %p1631_p1, %p1625_p11 }
  0x3d   : > { %1635 = shalt.err (!%p1632_p2)
}
  0x3e   : > { %1510 = dma.hbm_to_vmem [thread:$0]  (!%p1856_p12), %s2207_s0, 256, %s1860_s28, [#allocation4], %s1773_s14, %s1773_s14, %s1774_s20  }
  0x3f   : > { %s1636_s29 = scalar_lea.hbm %s2209_s2, 256 }
  0x40   : > { %p1637_p6 = scmp.ne.s32.totalorder %s2209_s2, %s1636_s29  ;;  %p1643_p5 = scmp.lt.u32.totalorder %s1636_s29, %s2209_s2 }
  0x42   : > { %p1639_p8 = pnand %p1637_p6, %p1872_p0 }
  0x44   : > { %p1640_p10 = pneg %p1639_p8 }
  0x46   : > { %p1645_p7 = pnand %p1643_p5, %p1640_p10 }
  0x48   : > { %1648 = shalt.err (!%p1645_p7)
}
  0x49   : > { %s1649_s9 = scalar_lea.vmem %s181_s30, 256  ;;  %p1657_p1 = scmp.lt.s32.totalorder %s181_s30, %s181_s30 }
  0x4a   : > { %p1650_p11 = scmp.ne.s32.totalorder %s181_s30, %s1649_s9  ;;  %p1658_p2 = scmp.lt.s32.totalorder %s1649_s9, %s1649_s9 }
  0x4c   : > { %p1652_p13 = pnand %p1650_p11, %p1872_p0  ;;  %p1659_p4 = por %p1658_p2, %p1657_p1 }
  0x4e   : > { %p1653_p3 = pneg %p1652_p13 }
  0x50   : > { %p1660_p9 = pnand %p1659_p4, %p1653_p3 }
  0x52   : > { %1663 = shalt.err (!%p1660_p9)
}
  0x53   : > { %1516 = dma.hbm_to_vmem [thread:$0]  (!%p1856_p12), %s2209_s2, 256, %s181_s30, [#allocation7], %s1773_s14, %s1773_s14, %s1774_s20  }
  0x54   : > { %s1945_s10 = sadd.s32 1, %s1768_s18   ;;  %s92_s25 = sadd.s32 1, %s1764_s17 }
  0x55   : > { %s89_s26 = ssub.s32 %s1768_s18, %s1945_s10  ;;  %p99_p9 = scmp.ne.s32.totalorder %s1764_s17, %s1760_s16 }
  0x56   : > { %p90_p4 = scmp.eq.s32.totalorder %s89_s26, 0  ;;  %p100_p0 = scmp.eq.s32.totalorder %s1768_s18, 0 }
  0x57   : > { %p1528_p6 = scmp.lt.s32.totalorder %s1768_s18, 2  ;;  %p2220_p10 = scmp.eq.s32.totalorder %s1825_s19, 1 }
  0x58   : > { %s1955_s12 = scalar_select %p90_p4, %s1764_s17, %s92_s25  }
  0x59   : > { %p101_p8 = por %p100_p0, %p99_p9  ;;  %p1959_p5 = por %p2220_p10, %p99_p9 }
  0x5a   : > { %s194_s24 = sand.u32 1, %s1764_s17   ;;  %s1319_s27 = sshll.u32 %s1768_s18, 11 }
  0x5b   : > { %s1277_s30 = sshll.u32 %s194_s24, 7  ;;  %s1968_s6 = scalar_lea.hbm %s2210_s3, %s1319_s27 }
  0x5c   : > { %s198_s7 = scalar_lea.vmem [#allocation9], %s1277_s30  ;;  %p1970_p12 = pnand %p1528_p6, %p101_p8 }
  0x5d   : > { %s205_s8 = sshll.u32 %s198_s7, 4  ;;  %s1976_s28 = scalar_lea.sflag [#allocation10], %s194_s24  ;;  %s1974_s8 = int_to_ptr.vmem [resolvable:$true] %s205_s8 }
  0x5e   : > { %s1664_s11 = scalar_lea.hbm %s1968_s6, 2048  ;;  %p1666_p11 = pneg %p1970_p12 }
  0x5f   : > { %p1665_p7 = scmp.ne.s32.totalorder %s1968_s6, %s1664_s11  ;;  %s1669_s27 = scalar_lea.hbm %s2210_s3, 4096 }
  0x60   : > { %p1670_p1 = scmp.lt.u32.totalorder %s1968_s6, %s2210_s3  ;;  %p1671_p2 = scmp.lt.u32.totalorder %s1669_s27, %s1664_s11 }
  0x61   : > { %p1667_p13 = pnand %p1666_p11, %p1665_p7  ;;  %p1673_p9 = scmp.lt.u32.totalorder %s1664_s11, %s1968_s6 }
  0x62   : > { %p1672_p4 = por %p1671_p2, %p1670_p1 }
  0x63   : > { %p1668_p3 = pneg %p1667_p13 }
  0x64   : > { %p1674_p0 = por %p1673_p9, %p1672_p4 }
  0x66   : > { %p1675_p6 = pnand %p1674_p0, %p1668_p3 }
  0x68   : > { %1678 = shalt.err (!%p1675_p6)
}
  0x69   : > { %s1679_s24 = scalar_lea.vmem %s1974_s8, 2048  ;;  %s1775_s5 = smov [#allocation9]  }
  0x6a   : > { %p1680_p8 = scmp.ne.s32.totalorder %s1974_s8, %s1679_s24  ;;  %s1684_s7 = sshll.u32 %s1775_s5, 4  ;;  %s1685_s7 = int_to_ptr.vmem [resolvable:$false] %s1684_s7 }
  0x6b   : > { %s1686_s26 = scalar_lea.vmem %s1685_s7, 4096  ;;  %p1687_p13 = scmp.lt.s32.totalorder %s1974_s8, %s1685_s7 }
  0x6c   : > { %p1682_p10 = pnand %p1680_p8, %p1666_p11  ;;  %p1688_p1 = scmp.lt.s32.totalorder %s1686_s26, %s1679_s24 }
  0x6e   : > { %p1683_p7 = pneg %p1682_p10  ;;  %p1689_p2 = por %p1688_p1, %p1687_p13 }
  0x70   : > { %p1690_p4 = pnand %p1689_p2, %p1683_p7 }
  0x72   : > { %1693 = shalt.err (!%p1690_p4)
}
  0x73   : > { %1520 = dma.hbm_to_vmem [thread:$0]  (!%p1970_p12), %s1968_s6, 2048, %s1974_s8, %s1976_s28, %s1773_s14, %s1773_s14, %s1774_s20  }
  0x74   : > { %p2223_p11 = scmp.ne.s32.totalorder %s2217_s23, 0 }
  0x75   : > { %p2224_p3 = scmp.eq.s32.totalorder (!%p2223_p11), %s1825_s19, 0 }
  0x76   : > { %217 = sbr.rel (%p2223_p11) target bundleno = 1714 (0x6b2), region = 36 }
  0x7d   : > { %1739 = dma.done.wait (%p2224_p3), [#allocation4], 256   ;;  %p2225_p9 = pmov %p2224_p3 }
  0x7e   : > { %p2226_p0 = pmov %p2224_p3 }
  0x7f   : > { %1741 = vsyncadd (%p2225_p9), [#allocation4], 4294967040 }
  0x80   : > { %1743 = dma.done.wait (%p2226_p0), [#allocation7], 2816   ;;  %p2227_p6 = pmov %p2226_p0 }
  0x81   : > { %s2018_s9 = sand.u32 1, %s1760_s16   ;;  %p2228_p12 = scmp.ne.s32.totalorder %s2215_s21, 0 }
  0x82   : > { %1745 = vsyncadd (%p2227_p6), [#allocation7], 4294964480  ;;  %s1284_s23 = sshll.u32 %s2018_s9, 7  ;;  %s232_s14 = scalar_lea.sflag [#allocation10], %s2018_s9 }
  0x83   : > { %s2022_s20 = scalar_lea.vmem [#allocation9], %s1284_s23 }
  0x84   : > { %1747 = dma.done.wait (%p2228_p12), %s232_s14, 2048  }
  0x85   : > { %1749 = vsyncadd (%p2228_p12), %s232_s14, 4294965248  ;;  %s2028_s6 = scalar_lea.vmem [#allocation11], %s1284_s23  ;;  %p2229_p8 = scmp.ne.s32.totalorder %s1825_s19, 0 }
  0x86   : > { %v268_v0 = vld [vmem:[#allocation6] sm:$0xff] (!%p2229_p8)  ;;  %v269_v1 = vld [vmem:[#allocation6 + $0x8] sm:$0xff] (!%p2229_p8)  ;;  %v270_v2 = vld [vmem:[#allocation6 + $0x10] sm:$0xff] (!%p2229_p8)  ;;  %vm276_vm0 = vcmask (!%p2229_p8), 261120   ;;  %v272_v14 = vlaneseq (!%p2229_p8) }
  0x87   : > { %263 = sbr.rel (%p2229_p8) target bundleno = 1465 (0x5b9), region = 56  ;;  %v1449_v3 = vpack.c.bf16 (!%p2229_p8), %v269_v1, %v268_v0  ;;  %v271_v4 = vld [vmem:[#allocation6 + $0x18] sm:$0xff] (!%p2229_p8)  ;;  %v264_v5 = vld [vmem:[#allocation3] sm:$0xff] (!%p2229_p8)  ;;  %v406_v8 = vld [vmem:[#allocation6 + $0x20] sm:$0xff] (!%p2229_p8) }
  0x88   : > { %v1453_v6 = vpack.c.bf16 (!%p2229_p8), %v271_v4, %v270_v2  ;;  %1376 = vmatprep.mubr.msk.f32.mxu0 (!%p2229_p8), %vm276_vm0, %v264_v5  ;;  %v265_v7 = vld [vmem:[#allocation3 + $0x8] sm:$0xff] (!%p2229_p8)  ;;  %v407_v9 = vld [vmem:[#allocation6 + $0x28] sm:$0xff] (!%p2229_p8)  ;;  %v408_v11 = vld [vmem:[#allocation6 + $0x30] sm:$0xff] (!%p2229_p8)  ;;  %v2034_v15 = vshrl.u32 (!%p2229_p8), %v272_v14, 7 }
  0x89   : > { %1450 = vmatprep.subr.bf16.mxu0 (!%p2229_p8), %v1449_v3  ;;  %v1457_v10 = vpack.c.bf16 (!%p2229_p8), %v407_v9, %v406_v8  ;;  %v409_v12 = vld [vmem:[#allocation6 + $0x38] sm:$0xff] (!%p2229_p8)  ;;  %v2037_v17 = vld [vmem:[#allocation8] sm:$0xff] (!%p2229_p8)  ;;  %v2048_v50 = vld [vmem:[#allocation8 + $0x8] sm:$0xff] (!%p2229_p8) }
  0x8a   : > { %1452 = vmatpush3.bf16.msra.mxu0 (!%p2229_p8), %v1449_v3  ;;  %v1461_v13 = vpack.c.bf16 (!%p2229_p8), %v409_v12, %v408_v11  ;;  %v274_v16 = vsub.s32 (!%p2229_p8), 0, %v2034_v15  ;;  %v389_v48 = vsub.s32 (!%p2229_p8), 5, %v2034_v15  ;;  %v395_v49 = vsub.s32 (!%p2229_p8), 1, %v2034_v15  ;;  %v542_v0 = vld [vmem:[#allocation6 + $0x40] sm:$0xff] (!%p2229_p8)  ;;  %v543_v1 = vld [vmem:[#allocation6 + $0x48] sm:$0xff] (!%p2229_p8)  ;;  %v544_v3 = vld [vmem:[#allocation6 + $0x50] sm:$0xff] (!%p2229_p8) }
  0x8b   : > { %1454 = vmatprep.subr.bf16.mxu0 (!%p2229_p8), %v1453_v6  ;;  %1458 = vmatprep.subr.bf16.mxu1 (!%p2229_p8), %v1457_v10  ;;  %v1465_v2 = vpack.c.bf16 (!%p2229_p8), %v543_v1, %v542_v0  ;;  %v545_v4 = vld [vmem:[#allocation6 + $0x58] sm:$0xff] (!%p2229_p8) }
  0x8c   : > { %1460 = vmatpush3.bf16.msra.mxu1 (!%p2229_p8), %v1457_v10  ;;  %v275_v18 = vrot.slane (!%p2229_p8), %v2037_v17, %v274_v16  ;;  %v390_v51 = vrot.slane (!%p2229_p8), %v2037_v17, %v389_v48  ;;  %v396_v55 = vrot.slane (!%p2229_p8), %v2048_v50, %v395_v49  ;;  %v1469_v5 = vpack.c.bf16 (!%p2229_p8), %v545_v4, %v544_v3 }
  0x8d   : > { %1462 = vmatprep.subr.bf16.mxu1 (!%p2229_p8), %v1461_v13 }
  0x8e   : > { %1456 = vmatpush3.bf16.msra.mxu0 %v1453_v6  ;;  %v413_v6 = vrot.slane %v2037_v17, %v395_v49 }
  0x8f   : > { %1466 = vmatprep.subr.bf16.mxu0 %v1465_v2 }
  0x90   : > { %1464 = vmatpush3.bf16.msra.mxu1 %v1461_v13 }
  0x91   : > { %1377 = vmatmul.mubr.msk.f32.vlgmr.msra.gmra.mrb[0].mxu0 %vm276_vm0, %v265_v7 }
  0x92   : > { %1468 = vmatpush3.bf16.msra.mxu0 %v1465_v2 }
  0x93   : > { %1470 = vmatprep.subr.bf16.mxu0 %v1469_v5 }
  0x96   : > { %1472 = vmatpush3.bf16.msra.mxu0 %v1469_v5 }
 0x164   : > { %v1378_v19 = vpop.f32.mrb[0].mxu0 }
 0x165   : > { %v355_v20 = vadd.f32 %v1378_v19, %v275_v18  ;;  %v349_v21 = vpop.f32.mrb[1].mxu0 }
 0x166   : > { %v350_v22 = vadd.f32 %v349_v21, %v275_v18 }
 0x167   : > { %v359_v23 = vsel %vm276_vm0, %v355_v20, 0.0 }
 0x168   : > { %v358_v24 = vsel %vm276_vm0, %v350_v22, 0.0 }
 0x169   : > { %v360_v25 = vadd.f32 %v359_v23, %v358_v24 }
 0x16b   : > { %v361_v26 = vrot.slane %v360_v25, 4 }
 0x16d   : > { %v362_v27 = vadd.f32 %v361_v26, %v360_v25 }
 0x16f   : > { %v363_v28 = vrot.slane %v362_v27, 2 }
 0x171   : > { %v364_v29 = vadd.f32 %v363_v28, %v362_v27 }
 0x173   : > { %v365_v30 = vrot.slane %v364_v29, 1 }
 0x175   : > { %v366_v31 = vadd.f32 %v365_v30, %v364_v29 }
 0x177   : > { %v368_v32 = vmul.f32 0.0625, %v366_v31 }
 0x179   : > { %v369_v33 = vsub.f32 %v350_v22, %v368_v32  ;;  %v370_v34 = vsub.f32 %v355_v20, %v368_v32 }
 0x17b   : > { %v371_v35 = vmul.f32 %v369_v33, %v369_v33  ;;  %v372_v36 = vmul.f32 %v370_v34, %v370_v34 }
 0x17d   : > { %v373_v37 = vsel %vm276_vm0, %v371_v35, 0.0  ;;  %v374_v38 = vsel %vm276_vm0, %v372_v36, 0.0 }
 0x17e   : > { %v375_v39 = vadd.f32 %v374_v38, %v373_v37 }
 0x180   : > { %v376_v40 = vrot.slane %v375_v39, 4 }
 0x182   : > { %v377_v41 = vadd.f32 %v376_v40, %v375_v39  ;;  %v525_v39 = vsub.s32 6, %v2034_v15  ;;  %v531_v40 = vsub.s32 2, %v2034_v15 }
 0x184   : > { %v378_v42 = vrot.slane %v377_v41, 2 }
 0x186   : > { %v379_v43 = vadd.f32 %v378_v42, %v377_v41  ;;  %v526_v41 = vrot.slane %v2037_v17, %v525_v39 }
 0x188   : > { %v380_v44 = vrot.slane %v379_v43, 1 }
 0x18a   : > { %v381_v45 = vadd.f32 %v380_v44, %v379_v43 }
 0x18c   : > { %v382_v46 = vmul.f32 0.0625, %v381_v45  ;;  %v532_v45 = vrot.slane %v2048_v50, %v531_v40 }
 0x18e   : > { %v383_v47 = vadd.f32 1e-05, %v382_v46 }
 0x190   : > { %1572 = vrsqrt.f32 %v383_v47 }
 0x19a   : > { %v1573_v52 = vpop.eup %1572 }
 0x19b   : > { %v385_v53 = vmul.f32 %v1573_v52, %v369_v33  ;;  %v386_v54 = vmul.f32 %v1573_v52, %v370_v34 }
 0x19d   : > { %v391_v56 = vmul.f32 %v390_v51, %v385_v53  ;;  %v392_v57 = vmul.f32 %v390_v51, %v386_v54 }
 0x19f   : > { %v397_v58 = vadd.f32 %v396_v55, %v391_v56  ;;  %v398_v59 = vadd.f32 %v396_v55, %v392_v57  ;;  %v678_v55 = vld [vmem:[#allocation6 + $0x60] sm:$0xff]  ;;  %v679_v56 = vld [vmem:[#allocation6 + $0x68] sm:$0xff] }
 0x1a0   : > { %v1473_v57 = vpack.c.bf16 %v679_v56, %v678_v55 }
 0x1a1   : > { %vm399_vm1 = vcmp.ge.f32.partialorder %v397_v58, 0.0  ;;  %v401_v60 = vmul.f32 0.01, %v397_v58  ;;  %vm400_vm2 = vcmp.ge.f32.partialorder %v398_v59, 0.0  ;;  %v402_v61 = vmul.f32 0.01, %v398_v59 }
 0x1a2   : > { %1474 = vmatprep.subr.bf16.mxu1 %v1473_v57 }
 0x1a3   : > { %v403_v62 = vsel %vm399_vm1, %v397_v58, %v401_v60  ;;  %v404_v63 = vsel %vm400_vm2, %v398_v59, %v402_v61  ;;  %v680_v58 = vld [vmem:[#allocation6 + $0x70] sm:$0xff]  ;;  %v681_v59 = vld [vmem:[#allocation6 + $0x78] sm:$0xff]  ;;  %v549_v61 = vrot.slane %v2037_v17, %v531_v40 }
 0x1a4   : > { %1387 = vmatprep.mubr.msk.f32.mxu1 %vm276_vm0, %v403_v62  ;;  %v1477_v60 = vpack.c.bf16 %v681_v59, %v680_v58 }
 0x1a5   : > { %1388 = vmatmul.mubr.msk.f32.vlgmr.msra.gmra.mrb[0].mxu1 %vm276_vm0, %v404_v63 }
 0x1a6   : > { %1476 = vmatpush3.bf16.msra.mxu1 %v1473_v57 }
 0x1a7   : > { %1478 = vmatprep.subr.bf16.mxu1 %v1477_v60 }
 0x1aa   : > { %1480 = vmatpush3.bf16.msra.mxu1 %v1477_v60 }
 0x278   : > { %v1389_v7 = vpop.f32.mrb[0].mxu1 }
 0x279   : > { %v492_v8 = vadd.f32 %v1389_v7, %v413_v6  ;;  %v486_v9 = vpop.f32.mrb[1].mxu1 }
 0x27a   : > { %v487_v10 = vadd.f32 %v486_v9, %v413_v6 }
 0x27b   : > { %v496_v11 = vsel %vm276_vm0, %v492_v8, 0.0 }
 0x27c   : > { %v495_v12 = vsel %vm276_vm0, %v487_v10, 0.0 }
 0x27d   : > { %v497_v13 = vadd.f32 %v496_v11, %v495_v12 }
 0x27f   : > { %v498_v14 = vrot.slane %v497_v13, 4 }
 0x281   : > { %v499_v18 = vadd.f32 %v498_v14, %v497_v13 }
 0x283   : > { %v500_v19 = vrot.slane %v499_v18, 2 }
 0x285   : > { %v501_v20 = vadd.f32 %v500_v19, %v499_v18 }
 0x287   : > { %v502_v21 = vrot.slane %v501_v20, 1 }
 0x289   : > { %v503_v22 = vadd.f32 %v502_v21, %v501_v20 }
 0x28b   : > { %v504_v23 = vmul.f32 0.0625, %v503_v22 }
 0x28d   : > { %v505_v24 = vsub.f32 %v487_v10, %v504_v23  ;;  %v506_v25 = vsub.f32 %v492_v8, %v504_v23 }
 0x28f   : > { %v507_v26 = vmul.f32 %v505_v24, %v505_v24  ;;  %v508_v27 = vmul.f32 %v506_v25, %v506_v25 }
 0x291   : > { %v509_v28 = vsel %vm276_vm0, %v507_v26, 0.0  ;;  %v510_v29 = vsel %vm276_vm0, %v508_v27, 0.0 }
 0x292   : > { %v511_v30 = vadd.f32 %v510_v29, %v509_v28 }
 0x294   : > { %v512_v31 = vrot.slane %v511_v30, 4 }
 0x296   : > { %v513_v32 = vadd.f32 %v512_v31, %v511_v30  ;;  %v661_v30 = vsub.s32 7, %v2034_v15  ;;  %v667_v31 = vsub.s32 3, %v2034_v15 }
 0x298   : > { %v514_v33 = vrot.slane %v513_v32, 2 }
 0x29a   : > { %v515_v34 = vadd.f32 %v514_v33, %v513_v32  ;;  %v662_v32 = vrot.slane %v2037_v17, %v661_v30 }
 0x29c   : > { %v516_v35 = vrot.slane %v515_v34, 1 }
 0x29e   : > { %v517_v36 = vadd.f32 %v516_v35, %v515_v34 }
 0x2a0   : > { %v518_v37 = vmul.f32 0.0625, %v517_v36  ;;  %v668_v36 = vrot.slane %v2048_v50, %v667_v31 }
 0x2a2   : > { %v519_v38 = vadd.f32 1e-05, %v518_v37 }
 0x2a4   : > { %1574 = vrsqrt.f32 %v519_v38 }
 0x2ae   : > { %v1575_v42 = vpop.eup %1574 }
 0x2af   : > { %v521_v43 = vmul.f32 %v1575_v42, %v505_v24  ;;  %v522_v44 = vmul.f32 %v1575_v42, %v506_v25 }
 0x2b1   : > { %v527_v46 = vmul.f32 %v526_v41, %v521_v43  ;;  %v528_v47 = vmul.f32 %v526_v41, %v522_v44 }
 0x2b3   : > { %v533_v48 = vadd.f32 %v532_v45, %v527_v46  ;;  %v534_v49 = vadd.f32 %v532_v45, %v528_v47  ;;  %v814_v45 = vld [vmem:[#allocation6 + $0x80] sm:$0xff]  ;;  %v815_v46 = vld [vmem:[#allocation6 + $0x88] sm:$0xff] }
 0x2b4   : > { %v1481_v47 = vpack.c.bf16 %v815_v46, %v814_v45 }
 0x2b5   : > { %vm535_vm3 = vcmp.ge.f32.partialorder %v533_v48, 0.0  ;;  %v537_v51 = vmul.f32 0.01, %v533_v48  ;;  %vm536_vm4 = vcmp.ge.f32.partialorder %v534_v49, 0.0  ;;  %v538_v52 = vmul.f32 0.01, %v534_v49 }
 0x2b6   : > { %1482 = vmatprep.subr.bf16.mxu0 %v1481_v47 }
 0x2b7   : > { %v539_v53 = vsel %vm535_vm3, %v533_v48, %v537_v51  ;;  %v540_v54 = vsel %vm536_vm4, %v534_v49, %v538_v52  ;;  %v816_v48 = vld [vmem:[#allocation6 + $0x90] sm:$0xff]  ;;  %v817_v49 = vld [vmem:[#allocation6 + $0x98] sm:$0xff]  ;;  %v685_v52 = vrot.slane %v2037_v17, %v667_v31 }
 0x2b8   : > { %1398 = vmatprep.mubr.msk.f32.mxu0 %vm276_vm0, %v539_v53  ;;  %v1485_v51 = vpack.c.bf16 %v817_v49, %v816_v48 }
 0x2b9   : > { %1399 = vmatmul.mubr.msk.f32.vlgmr.msra.gmra.mrb[2].mxu0 %vm276_vm0, %v540_v54 }
 0x2ba   : > { %1484 = vmatpush3.bf16.msra.mxu0 %v1481_v47 }
 0x2bb   : > { %1486 = vmatprep.subr.bf16.mxu0 %v1485_v51 }
 0x2be   : > { %1488 = vmatpush3.bf16.msra.mxu0 %v1485_v51 }
 0x38c   : > { %v1400_v62 = vpop.f32.mrb[2].mxu0 }
 0x38d   : > { %v628_v63 = vadd.f32 %v1400_v62, %v549_v61  ;;  %v622_v0 = vpop.f32.mrb[3].mxu0 }
 0x38e   : > { %v623_v1 = vadd.f32 %v622_v0, %v549_v61 }
 0x38f   : > { %v632_v2 = vsel %vm276_vm0, %v628_v63, 0.0 }
 0x390   : > { %v631_v3 = vsel %vm276_vm0, %v623_v1, 0.0 }
 0x391   : > { %v633_v4 = vadd.f32 %v632_v2, %v631_v3 }
 0x393   : > { %v634_v5 = vrot.slane %v633_v4, 4 }
 0x395   : > { %v635_v6 = vadd.f32 %v634_v5, %v633_v4 }
 0x397   : > { %v636_v7 = vrot.slane %v635_v6, 2 }
 0x399   : > { %v637_v8 = vadd.f32 %v636_v7, %v635_v6 }
 0x39b   : > { %v638_v9 = vrot.slane %v637_v8, 1 }
 0x39d   : > { %v639_v10 = vadd.f32 %v638_v9, %v637_v8 }
 0x39f   : > { %v640_v11 = vmul.f32 0.0625, %v639_v10 }
 0x3a1   : > { %v641_v12 = vsub.f32 %v623_v1, %v640_v11  ;;  %v642_v13 = vsub.f32 %v628_v63, %v640_v11 }
 0x3a3   : > { %v643_v14 = vmul.f32 %v641_v12, %v641_v12  ;;  %v644_v18 = vmul.f32 %v642_v13, %v642_v13 }
 0x3a5   : > { %v645_v19 = vsel %vm276_vm0, %v643_v14, 0.0  ;;  %v646_v20 = vsel %vm276_vm0, %v644_v18, 0.0 }
 0x3a6   : > { %v647_v21 = vadd.f32 %v646_v20, %v645_v19 }
 0x3a8   : > { %v648_v22 = vrot.slane %v647_v21, 4 }
 0x3aa   : > { %v649_v23 = vadd.f32 %v648_v22, %v647_v21  ;;  %v803_v21 = vsub.s32 4, %v2034_v15  ;;  %v798_v22 = vrot.slane %v2048_v50, %v274_v16 }
 0x3ac   : > { %v650_v24 = vrot.slane %v649_v23, 2  ;;  %v821_v15 = vrot.slane %v2037_v17, %v803_v21 }
 0x3ae   : > { %v651_v25 = vadd.f32 %v650_v24, %v649_v23 }
 0x3b0   : > { %v652_v26 = vrot.slane %v651_v25, 1 }
 0x3b2   : > { %v653_v27 = vadd.f32 %v652_v26, %v651_v25  ;;  %v804_v26 = vrot.slane %v2048_v50, %v803_v21 }
 0x3b4   : > { %v654_v28 = vmul.f32 0.0625, %v653_v27 }
 0x3b6   : > { %v655_v29 = vadd.f32 1e-05, %v654_v28 }
 0x3b8   : > { %1576 = vrsqrt.f32 %v655_v29 }
 0x3c2   : > { %v1577_v33 = vpop.eup %1576 }
 0x3c3   : > { %v657_v34 = vmul.f32 %v1577_v33, %v641_v12  ;;  %v658_v35 = vmul.f32 %v1577_v33, %v642_v13 }
 0x3c5   : > { %v663_v37 = vmul.f32 %v662_v32, %v657_v34  ;;  %v664_v38 = vmul.f32 %v662_v32, %v658_v35 }
 0x3c7   : > { %v669_v39 = vadd.f32 %v668_v36, %v663_v37  ;;  %v670_v40 = vadd.f32 %v668_v36, %v664_v38 }
 0x3c9   : > { %vm671_vm5 = vcmp.ge.f32.partialorder %v669_v39, 0.0  ;;  %v673_v41 = vmul.f32 0.01, %v669_v39  ;;  %vm672_vm6 = vcmp.ge.f32.partialorder %v670_v40, 0.0  ;;  %v674_v42 = vmul.f32 0.01, %v670_v40 }
 0x3cb   : > { %v675_v43 = vsel %vm671_vm5, %v669_v39, %v673_v41  ;;  %v676_v44 = vsel %vm672_vm6, %v670_v40, %v674_v42 }
 0x3cc   : > { %1409 = vmatprep.mubr.msk.f32.mxu1 %vm276_vm0, %v675_v43 }
 0x3cd   : > { %1410 = vmatmul.mubr.msk.f32.vlgmr.msra.gmra.mrb[2].mxu1 %vm276_vm0, %v676_v44 }
 0x4a0   : > { %v1411_v53 = vpop.f32.mrb[2].mxu1 }
 0x4a1   : > { %v764_v54 = vadd.f32 %v1411_v53, %v685_v52  ;;  %v758_v55 = vpop.f32.mrb[3].mxu1 }
 0x4a2   : > { %v759_v56 = vadd.f32 %v758_v55, %v685_v52 }
 0x4a3   : > { %v768_v57 = vsel %vm276_vm0, %v764_v54, 0.0 }
 0x4a4   : > { %v767_v58 = vsel %vm276_vm0, %v759_v56, 0.0 }
 0x4a5   : > { %v769_v59 = vadd.f32 %v768_v57, %v767_v58 }
 0x4a7   : > { %v770_v60 = vrot.slane %v769_v59, 4 }
 0x4a9   : > { %v771_v61 = vadd.f32 %v770_v60, %v769_v59 }
 0x4ab   : > { %v772_v62 = vrot.slane %v771_v61, 2 }
 0x4ad   : > { %v773_v63 = vadd.f32 %v772_v62, %v771_v61 }
 0x4af   : > { %v774_v0 = vrot.slane %v773_v63, 1 }
 0x4b1   : > { %v775_v1 = vadd.f32 %v774_v0, %v773_v63 }
 0x4b3   : > { %v776_v2 = vmul.f32 0.0625, %v775_v1 }
 0x4b5   : > { %v777_v3 = vsub.f32 %v759_v56, %v776_v2  ;;  %v778_v4 = vsub.f32 %v764_v54, %v776_v2 }
 0x4b7   : > { %v779_v5 = vmul.f32 %v777_v3, %v777_v3  ;;  %v780_v6 = vmul.f32 %v778_v4, %v778_v4 }
 0x4b9   : > { %v781_v7 = vsel %vm276_vm0, %v779_v5, 0.0  ;;  %v782_v8 = vsel %vm276_vm0, %v780_v6, 0.0 }
 0x4ba   : > { %v783_v9 = vadd.f32 %v782_v8, %v781_v7 }
 0x4bc   : > { %v784_v10 = vrot.slane %v783_v9, 4 }
 0x4be   : > { %v785_v11 = vadd.f32 %v784_v10, %v783_v9 }
 0x4c0   : > { %v786_v12 = vrot.slane %v785_v11, 2 }
 0x4c2   : > { %v787_v13 = vadd.f32 %v786_v12, %v785_v11 }
 0x4c4   : > { %v788_v14 = vrot.slane %v787_v13, 1 }
 0x4c6   : > { %v789_v18 = vadd.f32 %v788_v14, %v787_v13 }
 0x4c8   : > { %v790_v19 = vmul.f32 0.0625, %v789_v18 }
 0x4ca   : > { %v791_v20 = vadd.f32 1e-05, %v790_v19 }
 0x4cc   : > { %1578 = vrsqrt.f32 %v791_v20 }
 0x4d6   : > { %v1579_v23 = vpop.eup %1578 }
 0x4d7   : > { %v793_v24 = vmul.f32 %v1579_v23, %v777_v3  ;;  %v794_v25 = vmul.f32 %v1579_v23, %v778_v4 }
 0x4d9   : > { %v799_v27 = vmul.f32 %v798_v22, %v793_v24  ;;  %v800_v28 = vmul.f32 %v798_v22, %v794_v25 }
 0x4db   : > { %v805_v29 = vadd.f32 %v804_v26, %v799_v27  ;;  %v806_v30 = vadd.f32 %v804_v26, %v800_v28 }
 0x4dd   : > { %vm807_vm7 = vcmp.ge.f32.partialorder %v805_v29, 0.0  ;;  %v809_v31 = vmul.f32 0.01, %v805_v29  ;;  %vm808_vm8 = vcmp.ge.f32.partialorder %v806_v30, 0.0  ;;  %v810_v32 = vmul.f32 0.01, %v806_v30 }
 0x4df   : > { %v811_v33 = vsel %vm807_vm7, %v805_v29, %v809_v31  ;;  %v812_v34 = vsel %vm808_vm8, %v806_v30, %v810_v32 }
 0x4e0   : > { %1420 = vmatprep.mubr.msk.f32.mxu0 %vm276_vm0, %v811_v33 }
 0x4e1   : > { %1421 = vmatmul.mubr.msk.f32.vlgmr.msra.gmra.mrb[4].mxu0 %vm276_vm0, %v812_v34 }
 0x5b4   : > { %v1422_v16 = vpop.f32.mrb[4].mxu0 }
 0x5b5   : > { %v900_v35 = vadd.f32 %v1422_v16, %v821_v15  ;;  %v894_v36 = vpop.f32.mrb[5].mxu0 }
 0x5b6   : > { %v895_v50 = vadd.f32 %v894_v36, %v821_v15 }
 0x5b7   : > { %904 = vst.msk [vmem:[#allocation2 + $0x8] sm:$0xff] %vm276_vm0, %v900_v35 }
 0x5b8   : > { %903 = vst.msk [vmem:[#allocation2] sm:$0xff] %vm276_vm0, %v895_v50 }
 0x5b9 PF: > { %s1297_s21 = sshll.u32 %s1825_s19, 3  ;;  %v908_v37 = vld [vmem:[%s2022_s20] sm:$0xff]  ;;  %v909_v17 = vld [vmem:[%s2022_s20 + $0x8] sm:$0xff]  ;;  %v910_v42 = vld [vmem:[%s2022_s20 + $0x10] sm:$0xff]  ;;  %vm940_vm9 = vcmask 64512   ;;  %vm1134_vm10 = vcmask 261120  }
 0x5ba   : > { %v916_v38 = vld [vmem:[%s2022_s20 + $0x40] sm:$0xff]  ;;  %v924_v39 = vmul.f32 %v908_v37, %v908_v37  ;;  %v917_v41 = vld [vmem:[%s2022_s20 + $0x48] sm:$0xff]  ;;  %v918_v43 = vld [vmem:[%s2022_s20 + $0x50] sm:$0xff]  ;;  %s906_s8 = scalar_lea.vmem [#allocation2], %s1297_s21  ;;  %v925_v45 = vmul.f32 %v909_v17, %v909_v17  ;;  %v926_v47 = vmul.f32 %v910_v42, %v910_v42  ;;  %s1320_s28 = sshll.u32 %s1825_s19, 11 }
 0x5bb   : > { %v932_v40 = vmul.f32 %v916_v38, %v916_v38  ;;  %v933_v46 = vmul.f32 %v917_v41, %v917_v41  ;;  %v934_v48 = vmul.f32 %v918_v43, %v918_v43  ;;  %v911_v49 = vld [vmem:[%s2022_s20 + $0x18] sm:$0xff]  ;;  %v912_v52 = vld [vmem:[%s2022_s20 + $0x20] sm:$0xff]  ;;  %v913_v58 = vld [vmem:[%s2022_s20 + $0x28] sm:$0xff]  ;;  %s1165_s11 = sshll.u32 %s2028_s6, 4  ;;  %s2153_s30 = scalar_lea.hbm %s2211_s4, %s1320_s28  ;;  %s2155_s11 = int_to_ptr.vmem [resolvable:$true] %s1165_s11 }
 0x5bc   : > { %v919_v51 = vld [vmem:[%s2022_s20 + $0x58] sm:$0xff]  ;;  %v920_v53 = vld [vmem:[%s2022_s20 + $0x60] sm:$0xff]  ;;  %1425 = vmatprep.mubr.msk.f32.mxu0 %vm940_vm9, %v924_v39  ;;  %v927_v54 = vmul.f32 %v911_v49, %v911_v49  ;;  %v928_v56 = vmul.f32 %v912_v52, %v912_v52  ;;  %v921_v59 = vld [vmem:[%s2022_s20 + $0x68] sm:$0xff]  ;;  %v929_v62 = vmul.f32 %v913_v58, %v913_v58  ;;  %s1152_s19 = scalar_lea.sflag [#allocation5], %s2018_s9  ;;  %s1694_s29 = scalar_lea.vmem %s2155_s11, 2048 }
 0x5bd   : > { %1437 = vmatprep.mubr.msk.f32.mxu1 %vm940_vm9, %v932_v40  ;;  %v935_v55 = vmul.f32 %v919_v51, %v919_v51  ;;  %v936_v57 = vmul.f32 %v920_v53, %v920_v53  ;;  %v914_v60 = vld [vmem:[%s2022_s20 + $0x30] sm:$0xff]  ;;  %v937_v63 = vmul.f32 %v921_v59, %v921_v59  ;;  %v915_v2 = vld [vmem:[%s2022_s20 + $0x38] sm:$0xff]  ;;  %p1695_p10 = scmp.ne.s32.totalorder %s2155_s11, %s1694_s29  ;;  %s1776_s24 = smov [#allocation11]  }
 0x5be   : > { %v922_v61 = vld [vmem:[%s2022_s20 + $0x70] sm:$0xff]  ;;  %v930_v0 = vmul.f32 %v914_v60, %v914_v60  ;;  %v923_v3 = vld [vmem:[%s2022_s20 + $0x78] sm:$0xff]  ;;  %v931_v4 = vmul.f32 %v915_v2, %v915_v2  ;;  %s1698_s5 = sshll.u32 %s1776_s24, 4  ;;  %s1699_s5 = int_to_ptr.vmem [resolvable:$false] %s1698_s5 }
 0x5bf   : > { %v907_v44 = vld [vmem:[%s906_s8] sm:$0xff]  ;;  %v938_v1 = vmul.f32 %v922_v61, %v922_v61  ;;  %v939_v5 = vmul.f32 %v923_v3, %v923_v3  ;;  %p1696_p7 = pnand %p1695_p10, %p1959_p5  ;;  %s1700_s7 = scalar_lea.vmem %s1699_s5, 4096 }
 0x5c0   : > { %1423 = vmatprep.subr.mxu0 %v907_v44  ;;  %1489 = vmatprep.subr.mxu1 %v907_v44  ;;  %p1701_p1 = scmp.lt.s32.totalorder %s2155_s11, %s1699_s5  ;;  %p1702_p2 = scmp.lt.s32.totalorder %s1700_s7, %s1694_s29 }
 0x5c1   : > { %1424 = vmatpush3.msra.mxu0 %v907_v44  ;;  %1490 = vmatpush3.msra.mxu1 %v907_v44  ;;  %p1697_p13 = pneg %p1696_p7 }
 0x5c2   : > { %1426 = vmatmul.mubr.msk.f32.vlgmr.msra.gmra.mrb[0].mxu0 %vm940_vm9, %v925_v45  ;;  %1438 = vmatmul.mubr.msk.f32.vlgmr.msra.gmra.mrb[0].mxu1 %vm940_vm9, %v933_v46  ;;  %p1703_p4 = por %p1702_p2, %p1701_p1 }
 0x5c3   : > { %1428 = vmatprep.mubr.msk.f32.mxu0 %vm940_vm9, %v926_v47  ;;  %1440 = vmatprep.mubr.msk.f32.mxu1 %vm940_vm9, %v934_v48 }
 0x5c4   : > { %p1704_p11 = pnand %p1703_p4, %p1697_p13 }
 0x5c6   : > { %1429 = vmatmul.mubr.msk.f32.gmra.mrb[2].mxu0 %vm940_vm9, %v927_v54  ;;  %1441 = vmatmul.mubr.msk.f32.gmra.mrb[2].mxu1 %vm940_vm9, %v935_v55 }
 0x5c7   : > { %1431 = vmatprep.mubr.msk.f32.mxu0 %vm940_vm9, %v928_v56  ;;  %1443 = vmatprep.mubr.msk.f32.mxu1 %vm940_vm9, %v936_v57 }
 0x5ca   : > { %1432 = vmatmul.mubr.msk.f32.gmra.mrb[4].mxu0 %vm940_vm9, %v929_v62  ;;  %1444 = vmatmul.mubr.msk.f32.gmra.mrb[4].mxu1 %vm940_vm9, %v937_v63 }
 0x5cb   : > { %1434 = vmatprep.mubr.msk.f32.mxu0 %vm940_vm9, %v930_v0  ;;  %1446 = vmatprep.mubr.msk.f32.mxu1 %vm940_vm9, %v938_v1 }
 0x5ce   : > { %1435 = vmatmul.mubr.msk.f32.gmra.mrb[6].mxu0 %vm940_vm9, %v931_v4  ;;  %1447 = vmatmul.mubr.msk.f32.gmra.mrb[6].mxu1 %vm940_vm9, %v939_v5 }
 0x695   : > { %v1427_v6 = vpop.f32.mrb[0].mxu0  ;;  %v1439_v7 = vpop.f32.mrb[0].mxu1 }
 0x696   : > { %1136 = vst.msk [vmem:[%s2028_s6 + $0x8] sm:$0xff] %vm1134_vm10, %v1427_v6  ;;  %1144 = vst.msk [vmem:[%s2028_s6 + $0x48] sm:$0xff] %vm1134_vm10, %v1439_v7  ;;  %v1055_v8 = vpop.f32.mrb[1].mxu0  ;;  %v1095_v9 = vpop.f32.mrb[1].mxu1 }
 0x697   : > { %1135 = vst.msk [vmem:[%s2028_s6] sm:$0xff] %vm1134_vm10, %v1055_v8  ;;  %1143 = vst.msk [vmem:[%s2028_s6 + $0x40] sm:$0xff] %vm1134_vm10, %v1095_v9 }
 0x699   : > { %v1430_v10 = vpop.f32.mrb[2].mxu0  ;;  %v1442_v11 = vpop.f32.mrb[2].mxu1 }
 0x69a   : > { %1138 = vst.msk [vmem:[%s2028_s6 + $0x18] sm:$0xff] %vm1134_vm10, %v1430_v10  ;;  %1146 = vst.msk [vmem:[%s2028_s6 + $0x58] sm:$0xff] %vm1134_vm10, %v1442_v11  ;;  %v1065_v12 = vpop.f32.mrb[3].mxu0  ;;  %v1105_v13 = vpop.f32.mrb[3].mxu1 }
 0x69b   : > { %1137 = vst.msk [vmem:[%s2028_s6 + $0x10] sm:$0xff] %vm1134_vm10, %v1065_v12  ;;  %1145 = vst.msk [vmem:[%s2028_s6 + $0x50] sm:$0xff] %vm1134_vm10, %v1105_v13 }
 0x69d   : > { %v1433_v14 = vpop.f32.mrb[4].mxu0  ;;  %v1445_v18 = vpop.f32.mrb[4].mxu1 }
 0x69e   : > { %1140 = vst.msk [vmem:[%s2028_s6 + $0x28] sm:$0xff] %vm1134_vm10, %v1433_v14  ;;  %1148 = vst.msk [vmem:[%s2028_s6 + $0x68] sm:$0xff] %vm1134_vm10, %v1445_v18  ;;  %v1075_v19 = vpop.f32.mrb[5].mxu0  ;;  %v1115_v20 = vpop.f32.mrb[5].mxu1 }
 0x69f   : > { %1139 = vst.msk [vmem:[%s2028_s6 + $0x20] sm:$0xff] %vm1134_vm10, %v1075_v19  ;;  %1147 = vst.msk [vmem:[%s2028_s6 + $0x60] sm:$0xff] %vm1134_vm10, %v1115_v20 }
 0x6a1   : > { %v1436_v21 = vpop.f32.mrb[6].mxu0  ;;  %v1448_v22 = vpop.f32.mrb[6].mxu1 }
 0x6a2   : > { %1142 = vst.msk [vmem:[%s2028_s6 + $0x38] sm:$0xff] %vm1134_vm10, %v1436_v21  ;;  %1150 = vst.msk [vmem:[%s2028_s6 + $0x78] sm:$0xff] %vm1134_vm10, %v1448_v22  ;;  %v1085_v23 = vpop.f32.mrb[7].mxu0  ;;  %v1125_v24 = vpop.f32.mrb[7].mxu1 }
 0x6a3   : > { %1141 = vst.msk [vmem:[%s2028_s6 + $0x30] sm:$0xff] %vm1134_vm10, %v1085_v23  ;;  %1149 = vst.msk [vmem:[%s2028_s6 + $0x70] sm:$0xff] %vm1134_vm10, %v1125_v24 }
 0x6a4   : > { %1707 = shalt.err (!%p1704_p11)
}
 0x6a5   : > { %s1708_s26 = scalar_lea.hbm %s2153_s30, 2048  ;;  %s1712_s20 = scalar_lea.hbm %s2211_s4, 4096 }
 0x6a6   : > { %p1709_p3 = scmp.ne.s32.totalorder %s2153_s30, %s1708_s26  ;;  %p1713_p6 = scmp.lt.u32.totalorder %s2153_s30, %s2211_s4 }
 0x6a7   : > { %p1714_p12 = scmp.lt.u32.totalorder %s1712_s20, %s1708_s26  ;;  %p1716_p10 = scmp.lt.u32.totalorder %s1708_s26, %s2153_s30 }
 0x6a8   : > { %p1710_p9 = pnand %p1709_p3, %p1959_p5 }
 0x6a9   : > { %p1715_p8 = por %p1714_p12, %p1713_p6 }
 0x6aa   : > { %p1711_p0 = pneg %p1710_p9 }
 0x6ab   : > { %p1717_p7 = por %p1716_p10, %p1715_p8 }
 0x6ad   : > { %p1718_p13 = pnand %p1717_p7, %p1711_p0 }
 0x6af   : > { %1721 = shalt.err (!%p1718_p13)
}
 0x6b0   : > { %s1777_s8 = smov 128   ;;  %s1778_s28 = smov 8  }
 0x6b1   : > { %1505 = dma.vmem_to_hbm [thread:$0]  (%p1959_p5), %s2155_s11, 2048, %s2153_s30, %s1152_s19, %s1777_s8, %s1777_s8, %s1778_s28  }
 0x6b2 PF: > { %s1180_s25 = sand.u32 1, %s1756_s15   ;;  %p2230_p1 = scmp.ne.s32.totalorder %s2216_s22, 0 }
 0x6b3   : > { %p2231_p2 = scmp.ge.s32.totalorder %s1768_s18, 2  ;;  %s1181_s27 = scalar_lea.sflag [#allocation5], %s1180_s25 }
 0x6b5   : > { %p1522_p4 = pnand %p2231_p2, %p2230_p1 }
 0x6b7   : > { %1751 = dma.done.wait (!%p1522_p4), %s1181_s27, 2048  }
 0x6b8   : > { %1753 = vsyncadd (!%p1522_p4), %s1181_s27, 4294965248  ;;  %p19_p11 = scmp.ge.s32.totalorder %s1945_s10, 4   ;;  %s2232_s15 = smov %s1760_s16 }
 0x6b9   : > { %s2233_s16 = smov %s1764_s17  ;;  %s2234_s17 = smov %s1955_s12 }
 0x6ba   : > { %s2235_s18 = smov %s1945_s10  ;;  %21 = sbr.rel (!%p19_p11) target bundleno = 7 (0x7), region = 103 }
 0x6c1   :  { %1186 = vsyncpa [#allocation4], 1 }
 0x6c2   :  { %1188 = vsyncpa [#allocation4 + $0x1], 1 }
 0x6c3   :  { %1189 = vsyncpa [#allocation7], 1 }
 0x6c4   :  { %1190 = vsyncpa [#allocation10], 1 }
 0x6c5   :  { %1192 = vsyncpa [#allocation10 + $0x1], 1 }
 0x6c6   :  { %1193 = vsyncpa [#allocation5], 1 }
 0x6c7   :  { %1195 = vsyncpa [#allocation5 + $0x1], 1 }

</bundles_post_ra>
